<compile_context>
chip_gen: v7x
topology: tpu7x:2x2x1
jax: 0.10.0
libtpu: 0.0.40
codegen_flags: <defaults>
</compile_context>

<pallas_src>
import functools

import jax
import jax.numpy as jnp
from jax import lax
from jax.experimental import pallas as pl
from jax.experimental.pallas import tpu as pltpu


# ----------------------------------------------------------------------------
# Fused MLP kernel: all layers in one body, activations live in vregs.
# refs = (x_ref, w0_ref, b0_ref, w1_ref, b1_ref, ..., o_ref)
# ----------------------------------------------------------------------------
def _fused_mlp_kernel(*refs, num_layers, compute_dtype):
    x_ref = refs[0]
    o_ref = refs[1 + 2 * num_layers]
    is_f32_compute = compute_dtype == jnp.dtype(jnp.float32)

    h = x_ref[...]
    for layer in range(num_layers):
        w_ref = refs[1 + 2 * layer]
        b_ref = refs[2 + 2 * layer]

        lhs = h if h.dtype == compute_dtype else h.astype(compute_dtype)
        rhs = w_ref[...]  # already stored in compute_dtype by the wrapper

        if is_f32_compute:
            # Explicit highest precision so the f32 self-check is tight.
            acc = jnp.dot(lhs, rhs, preferred_element_type=jnp.float32,
                          precision=lax.Precision.HIGHEST)
        else:
            # bf16 MXU inputs, f32 accumulation.
            acc = jnp.dot(lhs, rhs, preferred_element_type=jnp.float32)

        acc = acc + b_ref[...]  # bias (1, N) broadcasts over rows, f32
        if layer != num_layers - 1:
            acc = jnp.maximum(acc, 0.0)  # ReLU on hidden layers
            # Dropout (eval mode) == identity.
            # Store inter-layer activation in compute dtype: halves resident
            # vreg/VMEM bytes and makes the next layer's cast a no-op.
            h = acc.astype(compute_dtype)
        else:
            h = acc

    o_ref[...] = h.astype(o_ref.dtype)


# ----------------------------------------------------------------------------
# Tiling policy
# ----------------------------------------------------------------------------
def _num_tensorcores():
    """Best-effort TensorCores-per-chip: v7x has 2, v5e/v6e have 1."""
    try:
        kind = jax.devices()[0].device_kind.lower()
    except Exception:  # pragma: no cover - defensive
        return 1
    return 2 if "v7" in kind else 1


def _pick_tm(batch, num_tc):
    """Batch tile: as large as possible (cap 512 rows) to approach HBM
    roofline; single block for small batches (grid is a serial loop on 1-TC
    chips); on 2-TC chips split only when each per-core block is >=128 rows."""
    if batch % 8 != 0:
        return batch  # full-array dim is always legal
    cap = 512
    if num_tc >= 2 and batch >= 256:
        cap = min(cap, batch // num_tc)  # >=2 blocks, each >=128 rows
    tm = min(cap, batch)
    tm -= tm % 8
    while tm >= 8 and batch % tm != 0:
        tm -= 8
    if tm < 8:
        return batch
    return tm


# ----------------------------------------------------------------------------
# Wrapper
# ----------------------------------------------------------------------------
def fused_mlp_forward(params, x, *, compute_dtype=jnp.bfloat16, tm=None):
    """params: list of (W [K,N] f32, b [N] f32); x: [M, D_in] f32 -> [M, D_out]."""
    M, d_in = x.shape
    num_layers = len(params)
    assert params[0][0].shape[0] == d_in
    d_out = params[-1][0].shape[1]
    compute_dtype = jnp.dtype(compute_dtype)

    num_tc = _num_tensorcores()
    if tm is None:
        tm = _pick_tm(M, num_tc)
    assert M % tm == 0, (M, tm)

    # Flat inputs: x, then (W, b) per layer.  Weights are cast ONCE here
    # (halves HBM + VMEM bytes when compute_dtype=bf16); biases stay f32.
    flat_inputs = [x]
    for (w, b) in params:
        k_l, n_l = w.shape
        assert b.shape == (n_l,)
        flat_inputs.append(w.astype(compute_dtype))
        flat_inputs.append(b.reshape(1, n_l).astype(jnp.float32))

    param_bytes_1buf = sum(
        int(a.size) * a.dtype.itemsize for a in flat_inputs[1:]
    )
    # Guard: fully-resident weights must fit comfortably in VMEM even on v7x
    # (64 MiB physical).  Beyond this, a K/N-tiled path is required.
    if param_bytes_1buf > (40 << 20):
        # TODO(synk): K/N-tiled fallback (accumulator scratch + "arbitrary"
        # reduction axis) for large hidden_dim/depth.
        raise NotImplementedError(
            "MLP weights too large for VMEM-resident fused kernel "
            f"({param_bytes_1buf} bytes); tiled fallback not implemented."
        )

    max_width = max([d_in, d_out] + [w.shape[1] for w, _ in params])

    # Advisory cost estimate for XLA's scheduler.
    flops = 2 * M * sum(w.shape[0] * w.shape[1] for w, _ in params)
    bytes_accessed = (
        int(x.size) * x.dtype.itemsize
        + param_bytes_1buf
        + M * d_out * x.dtype.itemsize
    )
    cost = pl.CostEstimate(
        flops=flops, transcendentals=0, bytes_accessed=bytes_accessed
    )

    kernel = functools.partial(
        _fused_mlp_kernel, num_layers=num_layers, compute_dtype=compute_dtype
    )

    def _call(single_buffer_weights):
        in_specs = [pl.BlockSpec((tm, d_in), lambda i: (i, 0))]
        for (w, _b) in params:
            k_l, n_l = w.shape
            if single_buffer_weights:
                # Constant index_map -> no re-DMA across grid steps; single
                # buffer halves resident weight VMEM.
                in_specs.append(
                    pl.BlockSpec((k_l, n_l), lambda i: (0, 0),
                                 pipeline_mode=pl.Buffered(1)))
                in_specs.append(
                    pl.BlockSpec((1, n_l), lambda i: (0, 0),
                                 pipeline_mode=pl.Buffered(1)))
            else:
                in_specs.append(pl.BlockSpec((k_l, n_l), lambda i: (0, 0)))
                in_specs.append(pl.BlockSpec((1, n_l), lambda i: (0, 0)))

        # VMEM budget from per-tile bytes, not full arrays:
        #   weights/biases x buffer count
        #   + double-buffered x/out tiles
        #   + f32 activation / accumulator working set
        #   + headroom.
        w_bufs = 1 if single_buffer_weights else 2
        vmem_limit = (
            param_bytes_1buf * w_bufs
            + 2 * tm * (d_in + d_out) * x.dtype.itemsize
            + 2 * tm * max_width * 4
            + (4 << 20)
        )
        vmem_limit = int(min(max(vmem_limit, 8 << 20), 48 << 20))

        return pl.pallas_call(
            kernel,
            out_shape=jax.ShapeDtypeStruct((M, d_out), x.dtype),
            grid_spec=pltpu.PrefetchScalarGridSpec(
                num_scalar_prefetch=0,
                grid=(M // tm,),
                in_specs=in_specs,
                out_specs=pl.BlockSpec((tm, d_out), lambda i: (i, 0)),
            ),
            compiler_params=pltpu.CompilerParams(
                dimension_semantics=("parallel",),
                vmem_limit_bytes=vmem_limit,
            ),
            cost_estimate=cost,
        )(*flat_inputs)

    try:
        return _call(single_buffer_weights=True)
    except Exception:
        # Older jax without pipeline_mode / Buffered(1) support: fall back to
        # default double-buffered constant specs (correctness identical).
        return _call(single_buffer_weights=False)


# ----------------------------------------------------------------------------
# Parameter construction (mimics PyTorch nn.Linear default init) + reference.
# ----------------------------------------------------------------------------
def init_mlp_params(key, input_dim, hidden_dim, num_hidden_layers, output_dim):
    """U(-1/sqrt(fan_in), 1/sqrt(fan_in)) like torch.nn.Linear."""
    dims = (
        [(input_dim, hidden_dim)]
        + [(hidden_dim, hidden_dim)] * (num_hidden_layers - 1)
        + [(hidden_dim, output_dim)]
    )
    params = []
    for (fan_in, fan_out) in dims:
        key, kw, kb = jax.random.split(key, 3)
        bound = 1.0 / jnp.sqrt(float(fan_in))
        w = jax.random.uniform(
            kw, (fan_in, fan_out), jnp.float32, minval=-bound, maxval=bound
        )
        b = jax.random.uniform(
            kb, (fan_out,), jnp.float32, minval=-bound, maxval=bound
        )
        params.append((w, b))
    return params


def mlp_reference(params, x):
    h = x
    n_layers = len(params)
    for idx, (w, b) in enumerate(params):
        h = h @ w + b
        if idx != n_layers - 1:
            h = jnp.maximum(h, 0.0)  # dropout (eval) == identity
    return h


if __name__ == "__main__":
    # Small, TPU-tile-friendly shapes consistent with the module's forward:
    batch = 16
    input_dim = 128
    hidden_dim = 256
    num_hidden_layers = 2      # depth - 2, as in the reference module
    output_dim = 128

    key = jax.random.PRNGKey(0)
    key, kx = jax.random.split(key)
    x = jax.random.normal(kx, (batch, input_dim), jnp.float32)

    params = init_mlp_params(
        key, input_dim, hidden_dim, num_hidden_layers, output_dim
    )

    ref = mlp_reference(params, x)

    # 1) f32 compute path: tight check against the pure-JAX reference.
    out_f32 = jax.block_until_ready(
        fused_mlp_forward(params, x, compute_dtype=jnp.float32)
    )
    assert out_f32.shape == (batch, output_dim)
    assert jnp.allclose(out_f32, ref, atol=1e-4, rtol=1e-4)

    # 2) Default bf16-MXU path (f32 accumulation): looser tolerance since the
    #    reference is pure f32.
    out_bf16 = jax.block_until_ready(fused_mlp_forward(params, x))
    assert out_bf16.shape == (batch, output_dim)
    assert jnp.allclose(out_bf16, ref, atol=5e-2, rtol=5e-2)

    print("KERNEL_OK")
</pallas_src>

<mosaic_0001>
module attributes {stable_mosaic.version = 11 : i64} {
  func.func @_fused_mlp_kernel(%arg0: i32, %arg1: memref<16x128xf32, #tpu.memory_space<vmem>>, %arg2: memref<128x256xf32, #tpu.memory_space<vmem>>, %arg3: memref<1x256xf32, #tpu.memory_space<vmem>>, %arg4: memref<256x256xf32, #tpu.memory_space<vmem>>, %arg5: memref<1x256xf32, #tpu.memory_space<vmem>>, %arg6: memref<256x128xf32, #tpu.memory_space<vmem>>, %arg7: memref<1x128xf32, #tpu.memory_space<vmem>>, %arg8: memref<16x128xf32, #tpu.memory_space<vmem>>) attributes {dimension_semantics = [#tpu.dimension_semantics<parallel>], iteration_bounds = array<i64: 1>, scalar_prefetch = 0 : i64, scratch_operands = 0 : i64, tpu.core_type = #tpu.core_type<tc>, window_params = [{transform_indices = @transform_0, window_bounds = array<i64: 16, 128>}, {pipeline_mode = #tpu.pipeline_mode<synchronous>, transform_indices = @transform_1, window_bounds = array<i64: 128, 256>}, {pipeline_mode = #tpu.pipeline_mode<synchronous>, transform_indices = @transform_2, window_bounds = array<i64: 1, 256>}, {pipeline_mode = #tpu.pipeline_mode<synchronous>, transform_indices = @transform_3, window_bounds = array<i64: 256, 256>}, {pipeline_mode = #tpu.pipeline_mode<synchronous>, transform_indices = @transform_4, window_bounds = array<i64: 1, 256>}, {pipeline_mode = #tpu.pipeline_mode<synchronous>, transform_indices = @transform_5, window_bounds = array<i64: 256, 128>}, {pipeline_mode = #tpu.pipeline_mode<synchronous>, transform_indices = @transform_6, window_bounds = array<i64: 1, 128>}, {transform_indices = @transform_7, window_bounds = array<i64: 16, 128>}]} {
    %c0 = arith.constant 0 : index
    %c0_0 = arith.constant 0 : index
    %0 = vector.load %arg1[%c0, %c0_0] : memref<16x128xf32, #tpu.memory_space<vmem>>, vector<16x128xf32>
    %c0_1 = arith.constant 0 : index
    %c0_2 = arith.constant 0 : index
    %1 = vector.load %arg2[%c0_1, %c0_2] : memref<128x256xf32, #tpu.memory_space<vmem>>, vector<128x256xf32>
    %cst = arith.constant dense<0.000000e+00> : vector<16x256xf32>
    %2 = tpu.matmul %0, %1, %cst {dimension_numbers = #tpu.dot_dimension_numbers<[1], [0], [0], [1], [0, 0, 1, 1], [], []>, precision = #tpu.contract_precision<fp32>} : vector<16x128xf32>, vector<128x256xf32>, vector<16x256xf32> -> vector<16x256xf32>
    %c0_3 = arith.constant 0 : index
    %c0_4 = arith.constant 0 : index
    %3 = vector.load %arg3[%c0_3, %c0_4] : memref<1x256xf32, #tpu.memory_space<vmem>>, vector<1x256xf32>
    %4 = vector.broadcast %3 : vector<1x256xf32> to vector<16x256xf32>
    %5 = arith.addf %2, %4 : vector<16x256xf32>
    %cst_5 = arith.constant 0.000000e+00 : f32
    %6 = vector.broadcast %cst_5 : f32 to vector<16x256xf32>
    %7 = arith.maximumf %5, %6 : vector<16x256xf32>
    %c0_6 = arith.constant 0 : index
    %c0_7 = arith.constant 0 : index
    %8 = vector.load %arg4[%c0_6, %c0_7] : memref<256x256xf32, #tpu.memory_space<vmem>>, vector<256x256xf32>
    %cst_8 = arith.constant dense<0.000000e+00> : vector<16x256xf32>
    %9 = tpu.matmul %7, %8, %cst_8 {dimension_numbers = #tpu.dot_dimension_numbers<[1], [0], [0], [1], [0, 0, 1, 1], [], []>, precision = #tpu.contract_precision<fp32>} : vector<16x256xf32>, vector<256x256xf32>, vector<16x256xf32> -> vector<16x256xf32>
    %c0_9 = arith.constant 0 : index
    %c0_10 = arith.constant 0 : index
    %10 = vector.load %arg5[%c0_9, %c0_10] : memref<1x256xf32, #tpu.memory_space<vmem>>, vector<1x256xf32>
    %11 = vector.broadcast %10 : vector<1x256xf32> to vector<16x256xf32>
    %12 = arith.addf %9, %11 : vector<16x256xf32>
    %cst_11 = arith.constant 0.000000e+00 : f32
    %13 = vector.broadcast %cst_11 : f32 to vector<16x256xf32>
    %14 = arith.maximumf %12, %13 : vector<16x256xf32>
    %c0_12 = arith.constant 0 : index
    %c0_13 = arith.constant 0 : index
    %15 = vector.load %arg6[%c0_12, %c0_13] : memref<256x128xf32, #tpu.memory_space<vmem>>, vector<256x128xf32>
    %cst_14 = arith.constant dense<0.000000e+00> : vector<16x128xf32>
    %16 = tpu.matmul %14, %15, %cst_14 {dimension_numbers = #tpu.dot_dimension_numbers<[1], [0], [0], [1], [0, 0, 1, 1], [], []>, precision = #tpu.contract_precision<fp32>} : vector<16x256xf32>, vector<256x128xf32>, vector<16x128xf32> -> vector<16x128xf32>
    %c0_15 = arith.constant 0 : index
    %c0_16 = arith.constant 0 : index
    %17 = vector.load %arg7[%c0_15, %c0_16] : memref<1x128xf32, #tpu.memory_space<vmem>>, vector<1x128xf32>
    %18 = vector.broadcast %17 : vector<1x128xf32> to vector<16x128xf32>
    %19 = arith.addf %16, %18 : vector<16x128xf32>
    %c0_17 = arith.constant 0 : index
    %c0_18 = arith.constant 0 : index
    %20 = vector.load %arg8[%c0_17, %c0_18] : memref<16x128xf32, #tpu.memory_space<vmem>>, vector<16x128xf32>
    tpu.vector_store %arg8[%c0_17, %c0_18], %19 {strides = array<i32>} : memref<16x128xf32, #tpu.memory_space<vmem>>, vector<16x128xf32>,
    return
  }
  func.func @transform_0(%arg0: i32) -> (i32, i32) {
    %c0_i32 = arith.constant 0 : i32
    %c0_i32_0 = arith.constant 0 : i32
    return %arg0, %c0_i32 : i32, i32
  }
  func.func @transform_1(%arg0: i32) -> (i32, i32) {
    %c0_i32 = arith.constant 0 : i32
    %c0_i32_0 = arith.constant 0 : i32
    %c0_i32_1 = arith.constant 0 : i32
    return %c0_i32, %c0_i32_0 : i32, i32
  }
  func.func @transform_2(%arg0: i32) -> (i32, i32) {
    %c0_i32 = arith.constant 0 : i32
    %c0_i32_0 = arith.constant 0 : i32
    %c0_i32_1 = arith.constant 0 : i32
    return %c0_i32, %c0_i32_0 : i32, i32
  }
  func.func @transform_3(%arg0: i32) -> (i32, i32) {
    %c0_i32 = arith.constant 0 : i32
    %c0_i32_0 = arith.constant 0 : i32
    %c0_i32_1 = arith.constant 0 : i32
    return %c0_i32, %c0_i32_0 : i32, i32
  }
  func.func @transform_4(%arg0: i32) -> (i32, i32) {
    %c0_i32 = arith.constant 0 : i32
    %c0_i32_0 = arith.constant 0 : i32
    %c0_i32_1 = arith.constant 0 : i32
    return %c0_i32, %c0_i32_0 : i32, i32
  }
  func.func @transform_5(%arg0: i32) -> (i32, i32) {
    %c0_i32 = arith.constant 0 : i32
    %c0_i32_0 = arith.constant 0 : i32
    %c0_i32_1 = arith.constant 0 : i32
    return %c0_i32, %c0_i32_0 : i32, i32
  }
  func.func @transform_6(%arg0: i32) -> (i32, i32) {
    %c0_i32 = arith.constant 0 : i32
    %c0_i32_0 = arith.constant 0 : i32
    %c0_i32_1 = arith.constant 0 : i32
    return %c0_i32, %c0_i32_0 : i32, i32
  }
  func.func @transform_7(%arg0: i32) -> (i32, i32) {
    %c0_i32 = arith.constant 0 : i32
    %c0_i32_0 = arith.constant 0 : i32
    return %arg0, %c0_i32 : i32, i32
  }
}

module attributes {stable_mosaic.version = 11 : i64} {
  func.func @_fused_mlp_kernel(%arg0: i32, %arg1: memref<16x128xf32, #tpu.memory_space<vmem>>, %arg2: memref<128x256xf32, #tpu.memory_space<vmem>>, %arg3: memref<1x256xf32, #tpu.memory_space<vmem>>, %arg4: memref<256x256xf32, #tpu.memory_space<vmem>>, %arg5: memref<1x256xf32, #tpu.memory_space<vmem>>, %arg6: memref<256x128xf32, #tpu.memory_space<vmem>>, %arg7: memref<1x128xf32, #tpu.memory_space<vmem>>, %arg8: memref<16x128xf32, #tpu.memory_space<vmem>>) attributes {dimension_semantics = [#tpu.dimension_semantics<parallel>], iteration_bounds = array<i64: 1>, scalar_prefetch = 0 : i64, scratch_operands = 0 : i64, tpu.core_type = #tpu.core_type<tc>, window_params = [{transform_indices = @transform_0, window_bounds = array<i64: 16, 128>}, {pipeline_mode = #tpu.pipeline_mode<synchronous>, transform_indices = @transform_1, window_bounds = array<i64: 128, 256>}, {pipeline_mode = #tpu.pipeline_mode<synchronous>, transform_indices = @transform_2, window_bounds = array<i64: 1, 256>}, {pipeline_mode = #tpu.pipeline_mode<synchronous>, transform_indices = @transform_3, window_bounds = array<i64: 256, 256>}, {pipeline_mode = #tpu.pipeline_mode<synchronous>, transform_indices = @transform_4, window_bounds = array<i64: 1, 256>}, {pipeline_mode = #tpu.pipeline_mode<synchronous>, transform_indices = @transform_5, window_bounds = array<i64: 256, 128>}, {pipeline_mode = #tpu.pipeline_mode<synchronous>, transform_indices = @transform_6, window_bounds = array<i64: 1, 128>}, {transform_indices = @transform_7, window_bounds = array<i64: 16, 128>}]} {
    %c0 = arith.constant 0 : index
    %c0_0 = arith.constant 0 : index
    %0 = vector.load %arg1[%c0, %c0_0] : memref<16x128xf32, #tpu.memory_space<vmem>>, vector<16x128xf32>
    %c0_1 = arith.constant 0 : index
    %c0_2 = arith.constant 0 : index
    %1 = vector.load %arg2[%c0_1, %c0_2] : memref<128x256xf32, #tpu.memory_space<vmem>>, vector<128x256xf32>
    %cst = arith.constant dense<0.000000e+00> : vector<16x256xf32>
    %2 = tpu.matmul %0, %1, %cst {dimension_numbers = #tpu.dot_dimension_numbers<[1], [0], [0], [1], [0, 0, 1, 1], [], []>, precision = #tpu.contract_precision<fp32>} : vector<16x128xf32>, vector<128x256xf32>, vector<16x256xf32> -> vector<16x256xf32>
    %c0_3 = arith.constant 0 : index
    %c0_4 = arith.constant 0 : index
    %3 = vector.load %arg3[%c0_3, %c0_4] : memref<1x256xf32, #tpu.memory_space<vmem>>, vector<1x256xf32>
    %4 = vector.broadcast %3 : vector<1x256xf32> to vector<16x256xf32>
    %5 = arith.addf %2, %4 : vector<16x256xf32>
    %cst_5 = arith.constant 0.000000e+00 : f32
    %6 = vector.broadcast %cst_5 : f32 to vector<16x256xf32>
    %7 = arith.maximumf %5, %6 : vector<16x256xf32>
    %c0_6 = arith.constant 0 : index
    %c0_7 = arith.constant 0 : index
    %8 = vector.load %arg4[%c0_6, %c0_7] : memref<256x256xf32, #tpu.memory_space<vmem>>, vector<256x256xf32>
    %cst_8 = arith.constant dense<0.000000e+00> : vector<16x256xf32>
    %9 = tpu.matmul %7, %8, %cst_8 {dimension_numbers = #tpu.dot_dimension_numbers<[1], [0], [0], [1], [0, 0, 1, 1], [], []>, precision = #tpu.contract_precision<fp32>} : vector<16x256xf32>, vector<256x256xf32>, vector<16x256xf32> -> vector<16x256xf32>
    %c0_9 = arith.constant 0 : index
    %c0_10 = arith.constant 0 : index
    %10 = vector.load %arg5[%c0_9, %c0_10] : memref<1x256xf32, #tpu.memory_space<vmem>>, vector<1x256xf32>
    %11 = vector.broadcast %10 : vector<1x256xf32> to vector<16x256xf32>
    %12 = arith.addf %9, %11 : vector<16x256xf32>
    %cst_11 = arith.constant 0.000000e+00 : f32
    %13 = vector.broadcast %cst_11 : f32 to vector<16x256xf32>
    %14 = arith.maximumf %12, %13 : vector<16x256xf32>
    %c0_12 = arith.constant 0 : index
    %c0_13 = arith.constant 0 : index
    %15 = vector.load %arg6[%c0_12, %c0_13] : memref<256x128xf32, #tpu.memory_space<vmem>>, vector<256x128xf32>
    %cst_14 = arith.constant dense<0.000000e+00> : vector<16x128xf32>
    %16 = tpu.matmul %14, %15, %cst_14 {dimension_numbers = #tpu.dot_dimension_numbers<[1], [0], [0], [1], [0, 0, 1, 1], [], []>, precision = #tpu.contract_precision<fp32>} : vector<16x256xf32>, vector<256x128xf32>, vector<16x128xf32> -> vector<16x128xf32>
    %c0_15 = arith.constant 0 : index
    %c0_16 = arith.constant 0 : index
    %17 = vector.load %arg7[%c0_15, %c0_16] : memref<1x128xf32, #tpu.memory_space<vmem>>, vector<1x128xf32>
    %18 = vector.broadcast %17 : vector<1x128xf32> to vector<16x128xf32>
    %19 = arith.addf %16, %18 : vector<16x128xf32>
    %c0_17 = arith.constant 0 : index
    %c0_18 = arith.constant 0 : index
    %20 = vector.load %arg8[%c0_17, %c0_18] : memref<16x128xf32, #tpu.memory_space<vmem>>, vector<16x128xf32>
    tpu.vector_store %arg8[%c0_17, %c0_18], %19 {strides = array<i32>} : memref<16x128xf32, #tpu.memory_space<vmem>>, vector<16x128xf32>,
    return
  }
  func.func @transform_0(%arg0: i32) -> (i32, i32) {
    %c0_i32 = arith.constant 0 : i32
    %c0_i32_0 = arith.constant 0 : i32
    return %arg0, %c0_i32 : i32, i32
  }
  func.func @transform_1(%arg0: i32) -> (i32, i32) {
    %c0_i32 = arith.constant 0 : i32
    %c0_i32_0 = arith.constant 0 : i32
    %c0_i32_1 = arith.constant 0 : i32
    return %c0_i32, %c0_i32_0 : i32, i32
  }
  func.func @transform_2(%arg0: i32) -> (i32, i32) {
    %c0_i32 = arith.constant 0 : i32
    %c0_i32_0 = arith.constant 0 : i32
    %c0_i32_1 = arith.constant 0 : i32
    return %c0_i32, %c0_i32_0 : i32, i32
  }
  func.func @transform_3(%arg0: i32) -> (i32, i32) {
    %c0_i32 = arith.constant 0 : i32
    %c0_i32_0 = arith.constant 0 : i32
    %c0_i32_1 = arith.constant 0 : i32
    return %c0_i32, %c0_i32_0 : i32, i32
  }
  func.func @transform_4(%arg0: i32) -> (i32, i32) {
    %c0_i32 = arith.constant 0 : i32
    %c0_i32_0 = arith.constant 0 : i32
    %c0_i32_1 = arith.constant 0 : i32
    return %c0_i32, %c0_i32_0 : i32, i32
  }
  func.func @transform_5(%arg0: i32) -> (i32, i32) {
    %c0_i32 = arith.constant 0 : i32
    %c0_i32_0 = arith.constant 0 : i32
    %c0_i32_1 = arith.constant 0 : i32
    return %c0_i32, %c0_i32_0 : i32, i32
  }
  func.func @transform_6(%arg0: i32) -> (i32, i32) {
    %c0_i32 = arith.constant 0 : i32
    %c0_i32_0 = arith.constant 0 : i32
    %c0_i32_1 = arith.constant 0 : i32
    return %c0_i32, %c0_i32_0 : i32, i32
  }
  func.func @transform_7(%arg0: i32) -> (i32, i32) {
    %c0_i32 = arith.constant 0 : i32
    %c0_i32_0 = arith.constant 0 : i32
    return %arg0, %c0_i32 : i32, i32
  }
}

</mosaic_0001>

<bundles_post_ra>
// kernel: tpu_custom_call.1
= control target key start
LH: loop header
LB: loop body
LE: loop exit
PB: predicated region body
PF: predicated region fallthrough
CT: control target
= control target key end

     0   :  { %12 = vsyncpa [#allocation3], 0  ;;  %s6635_s0 = inlined_call_operand.hbm [shape: f32[16,128], index: 0, kind: input, shape index: {}]   ;;  %s6636_s1 = inlined_call_operand.hbm [shape: f32[128,256], index: 1, kind: input, shape index: {}]   ;;  %s6637_s2 = inlined_call_operand.vmem [shape: f32[1,256], index: 2, kind: input, shape index: {}]   ;;  %s6638_s3 = inlined_call_operand.hbm [shape: f32[256,256], index: 3, kind: input, shape index: {}]   ;;  %s6639_s4 = inlined_call_operand.vmem [shape: f32[1,256], index: 4, kind: input, shape index: {}]   ;;  %s6640_s5 = inlined_call_operand.hbm [shape: f32[256,128], index: 5, kind: input, shape index: {}]   ;;  %s6641_s6 = inlined_call_operand.vmem [shape: f32[1,128], index: 6, kind: input, shape index: {}]   ;;  %s6642_s7 = inlined_call_operand.hbm [shape: f32[16,128], index: 7, kind: output, shape index: {}]  }
   0x1   :  { %13 = vsyncpa [#allocation6], 0 }
   0x2   :  { %14 = vsyncpa [#allocation9], 0 }
   0x3   :  { %15 = vsyncpa [#allocation4], 0  ;;  %s4613_s24 = smov [#allocation5]   ;;  %s4495_s28 = scalar_lea.hbm %s6636_s1, 4096 }
   0x4   :  { %s33_s25 = sshll.u32 %s4613_s24, 4  ;;  %p4496_p0 = scmp.ne.s32.totalorder %s6636_s1, %s4495_s28  ;;  %s34_s25 = int_to_ptr.vmem [resolvable:$true] %s33_s25 }
   0x5   :  { %p4499_p1 = scmp.lt.u32.totalorder %s4495_s28, %s6636_s1 }
   0x7   :  { %p4501_p2 = pnand %p4499_p1, %p4496_p0 }
   0x9   :  { %4504 = shalt.err (!%p4501_p2)
}
   0xa   :  { %s4505_s10 = scalar_lea.vmem %s34_s25, 4096  ;;  %p4510_p4 = scmp.lt.s32.totalorder %s34_s25, %s34_s25 }
   0xb   :  { %p4506_p3 = scmp.ne.s32.totalorder %s34_s25, %s4505_s10  ;;  %p4511_p5 = scmp.lt.s32.totalorder %s4505_s10, %s4505_s10 }
   0xd   :  { %p4512_p6 = por %p4511_p5, %p4510_p4 }
   0xf   :  { %p4513_p7 = pnand %p4512_p6, %p4506_p3 }
  0x11   :  { %4516 = shalt.err (!%p4513_p7)
}
  0x12   :  { %s4614_s11 = smov 256   ;;  %s4615_s12 = smov 16  }
  0x13   :  { %39 = dma.hbm_to_vmem [thread:$0]  %s6636_s1, 4096, %s34_s25, [#allocation6], %s4614_s11, %s4614_s11, %s4615_s12  }
  0x14   :  { %s4616_s15 = smov [#allocation2]   ;;  %s4517_s19 = scalar_lea.hbm %s6635_s0, 256 }
  0x15   :  { %s21_s16 = sshll.u32 %s4616_s15, 4  ;;  %p4518_p8 = scmp.ne.s32.totalorder %s6635_s0, %s4517_s19  ;;  %s22_s16 = int_to_ptr.vmem [resolvable:$true] %s21_s16 }
  0x16   :  { %p4521_p9 = scmp.lt.u32.totalorder %s4517_s19, %s6635_s0 }
  0x18   :  { %p4523_p10 = pnand %p4521_p9, %p4518_p8 }
  0x1a   :  { %4526 = shalt.err (!%p4523_p10)
}
  0x1b   :  { %s4527_s24 = scalar_lea.vmem %s22_s16, 256  ;;  %p4532_p12 = scmp.lt.s32.totalorder %s22_s16, %s22_s16 }
  0x1c   :  { %p4528_p11 = scmp.ne.s32.totalorder %s22_s16, %s4527_s24  ;;  %p4533_p13 = scmp.lt.s32.totalorder %s4527_s24, %s4527_s24 }
  0x1e   :  { %p4534_p0 = por %p4533_p13, %p4532_p12 }
  0x20   :  { %p4535_p1 = pnand %p4534_p0, %p4528_p11 }
  0x22   :  { %4538 = shalt.err (!%p4535_p1)
}
  0x23   :  { %s4617_s1 = smov 128   ;;  %s4618_s25 = smov 8  }
  0x24   :  { %27 = dma.hbm_to_vmem [thread:$0]  %s6635_s0, 256, %s22_s16, [#allocation3], %s4617_s1, %s4617_s1, %s4618_s25  }
  0x25   :  { %s4619_s28 = smov [#allocation7]   ;;  %s4620_s30 = smov [#allocation8]  }
  0x26   :  { %s47_s29 = sshll.u32 %s4619_s28, 4  ;;  %s61_s8 = sshll.u32 %s4620_s30, 4  ;;  %s48_s29 = int_to_ptr.vmem [resolvable:$true] %s47_s29  ;;  %s4693_s8 = int_to_ptr.vmem [resolvable:$true] %s61_s8 }
  0x27   :  { %s4539_s13 = scalar_lea.hbm %s6638_s3, 8192 }
  0x28   :  { %p4540_p2 = scmp.ne.s32.totalorder %s6638_s3, %s4539_s13  ;;  %p4543_p3 = scmp.lt.u32.totalorder %s4539_s13, %s6638_s3 }
  0x2a   :  { %p4545_p4 = pnand %p4543_p3, %p4540_p2 }
  0x2c   :  { %4548 = shalt.err (!%p4545_p4)
}
  0x2d   :  { %s4549_s0 = scalar_lea.vmem %s48_s29, 8192  ;;  %p4554_p6 = scmp.lt.s32.totalorder %s48_s29, %s48_s29 }
  0x2e   :  { %p4550_p5 = scmp.ne.s32.totalorder %s48_s29, %s4549_s0  ;;  %p4555_p7 = scmp.lt.s32.totalorder %s4549_s0, %s4549_s0 }
  0x30   :  { %p4556_p8 = por %p4555_p7, %p4554_p6 }
  0x32   :  { %p4557_p9 = pnand %p4556_p8, %p4550_p5 }
  0x34   :  { %4560 = shalt.err (!%p4557_p9)
}
  0x35   :  { %53 = dma.hbm_to_vmem [thread:$0]  %s6638_s3, 8192, %s48_s29, [#allocation6], %s4614_s11, %s4614_s11, %s4615_s12  }
  0x36   :  { %s4561_s22 = scalar_lea.hbm %s6640_s5, 4096 }
  0x37   :  { %p4562_p10 = scmp.ne.s32.totalorder %s6640_s5, %s4561_s22  ;;  %p4565_p11 = scmp.lt.u32.totalorder %s4561_s22, %s6640_s5 }
  0x39   :  { %p4567_p12 = pnand %p4565_p11, %p4562_p10 }
  0x3b   :  { %4570 = shalt.err (!%p4567_p12)
}
  0x3c   :  { %s4571_s28 = scalar_lea.vmem %s4693_s8, 4096  ;;  %p4576_p0 = scmp.lt.s32.totalorder %s4693_s8, %s4693_s8 }
  0x3d   :  { %p4572_p13 = scmp.ne.s32.totalorder %s4693_s8, %s4571_s28  ;;  %p4577_p1 = scmp.lt.s32.totalorder %s4571_s28, %s4571_s28 }
  0x3f   :  { %p4578_p2 = por %p4577_p1, %p4576_p0 }
  0x41   :  { %p4579_p3 = pnand %p4578_p2, %p4572_p13 }
  0x43   :  { %4582 = shalt.err (!%p4579_p3)
}
  0x44   :  { %67 = dma.hbm_to_vmem [thread:$0]  %s6640_s5, 4096, %s4693_s8, [#allocation9], %s4617_s1, %s4617_s1, %s4618_s25  }
  0x45   :  { %4605 = dma.done.wait [#allocation3], 256  }
  0x46   :  { %4606 = vsyncadd [#allocation3], 4294967040 }
  0x47   :  { %4607 = dma.done.wait [#allocation6], 12288  }
  0x48   :  { %4608 = vsyncadd [#allocation6], 4294955008 }
  0x49   :  { %4609 = dma.done.wait [#allocation9], 4096  }
  0x4a   :  { %4610 = vsyncadd [#allocation9], 4294963200  ;;  %v6645_v0 = vmov 0.0   ;;  %v85_v1 = vld [vmem:[#allocation5 + $0x8] sm:$0xff]  ;;  %v87_v2 = vld [vmem:[#allocation5 + $0x18] sm:$0xff] }
  0x4b   :  { %224 = vmatprep.mubr.f32.mxu0 %v6645_v0  ;;  %v84_v3 = vld [vmem:[#allocation5] sm:$0xff]  ;;  %v128_v4 = vand.u32 4294901760, %v85_v1  ;;  %v132_v5 = vand.u32 4294901760, %v87_v2  ;;  %v86_v6 = vld [vmem:[#allocation5 + $0x10] sm:$0xff]  ;;  %v89_v8 = vld [vmem:[#allocation5 + $0x28] sm:$0xff] }
  0x4c   :  { %v130_v7 = vand.u32 4294901760, %v84_v3  ;;  %v91_v9 = vld [vmem:[#allocation5 + $0x38] sm:$0xff]  ;;  %v134_v10 = vand.u32 4294901760, %v86_v6  ;;  %v136_v11 = vand.u32 4294901760, %v89_v8  ;;  %v88_v13 = vld [vmem:[#allocation5 + $0x20] sm:$0xff]  ;;  %v90_v14 = vld [vmem:[#allocation5 + $0x30] sm:$0xff] }
  0x4d   :  { %v140_v12 = vand.u32 4294901760, %v91_v9  ;;  %v93_v15 = vld [vmem:[#allocation5 + $0x48] sm:$0xff]  ;;  %v4731_v16 = vpack.c.bf16 %v132_v5, %v128_v4  ;;  %v95_v17 = vld [vmem:[#allocation5 + $0x58] sm:$0xff]  ;;  %v92_v18 = vld [vmem:[#allocation5 + $0x40] sm:$0xff]  ;;  %v138_v23 = vand.u32 4294901760, %v88_v13  ;;  %v142_v24 = vand.u32 4294901760, %v90_v14 }
  0x4e   :  { %v94_v19 = vld [vmem:[#allocation5 + $0x50] sm:$0xff]  ;;  %v4733_v20 = vpack.c.bf16 %v134_v10, %v130_v7  ;;  %v97_v22 = vld [vmem:[#allocation5 + $0x68] sm:$0xff]  ;;  %v144_v25 = vand.u32 4294901760, %v93_v15  ;;  %v148_v26 = vand.u32 4294901760, %v95_v17  ;;  %v146_v27 = vand.u32 4294901760, %v92_v18  ;;  %v99_v29 = vld [vmem:[#allocation5 + $0x78] sm:$0xff] }
  0x4f   :  { %6986 = vst [vmem:[#allocation15_spill] sm:$0xff] %v4731_v16  ;;  %v4735_v21 = vpack.c.bf16 %v140_v12, %v136_v11  ;;  %3670 = vmatprep.subr.bf16.mxu0 %v4731_v16  ;;  %v150_v28 = vand.u32 4294901760, %v94_v19  ;;  %v96_v30 = vld [vmem:[#allocation5 + $0x60] sm:$0xff]  ;;  %v4739_v31 = vsub.f32 %v85_v1, %v128_v4  ;;  %v4742_v32 = vpack.c.bf16 %v142_v24, %v138_v23  ;;  %v98_v34 = vld [vmem:[#allocation5 + $0x70] sm:$0xff]  ;;  %v101_v39 = vld [vmem:[#allocation5 + $0x88] sm:$0xff] }
  0x50   :  { %6987 = vst [vmem:[#allocation16_spill] sm:$0xff] %v4733_v20  ;;  %3672 = vmatpush1.bf16.msra.mxu0 %v4733_v20  ;;  %v152_v33 = vand.u32 4294901760, %v97_v22  ;;  %v4744_v35 = vsub.f32 %v87_v2, %v132_v5  ;;  %v4746_v36 = vsub.f32 %v84_v3, %v130_v7  ;;  %v4748_v37 = vsub.f32 %v86_v6, %v134_v10  ;;  %v103_v40 = vld [vmem:[#allocation5 + $0x98] sm:$0xff]  ;;  %v100_v45 = vld [vmem:[#allocation5 + $0x80] sm:$0xff]  ;;  %v102_v46 = vld [vmem:[#allocation5 + $0x90] sm:$0xff] }
  0x51   :  { %6988 = vst [vmem:[#allocation17_spill] sm:$0xff] %v4735_v21  ;;  %3674 = vmatprep.subr.bf16.mxu0 %v4735_v21  ;;  %6989 = vst [vmem:[#allocation18_spill] sm:$0xff] %v4742_v32  ;;  %v4750_v38 = vpack.c.bf16 %v148_v26, %v144_v25  ;;  %v4752_v41 = vsub.f32 %v89_v8, %v136_v11  ;;  %v4754_v42 = vsub.f32 %v91_v9, %v140_v12  ;;  %v105_v51 = vld [vmem:[#allocation5 + $0xa8] sm:$0xff]  ;;  %v107_v56 = vld [vmem:[#allocation5 + $0xb8] sm:$0xff] }
  0x52   :  { %v156_v43 = vand.u32 4294901760, %v99_v29  ;;  %v154_v44 = vand.u32 4294901760, %v96_v30  ;;  %v4757_v47 = vsub.f32 %v88_v13, %v138_v23  ;;  %v4759_v48 = vsub.f32 %v90_v14, %v142_v24  ;;  %v104_v57 = vld [vmem:[#allocation5 + $0xa0] sm:$0xff]  ;;  %v106_v58 = vld [vmem:[#allocation5 + $0xb0] sm:$0xff]  ;;  %v109_v63 = vld [vmem:[#allocation5 + $0xc8] sm:$0xff] }
  0x53   :  { %6990 = vst [vmem:[#allocation19_spill] sm:$0xff] %v4750_v38  ;;  %v4761_v49 = vpack.c.bf16 %v150_v28, %v146_v27  ;;  %v158_v50 = vand.u32 4294901760, %v98_v34  ;;  %v4764_v52 = vsub.f32 %v93_v15, %v144_v25  ;;  %v160_v54 = vand.u32 4294901760, %v101_v39  ;;  %v111_v1 = vld [vmem:[#allocation5 + $0xd8] sm:$0xff]  ;;  %v108_v10 = vld [vmem:[#allocation5 + $0xc0] sm:$0xff]  ;;  %v110_v11 = vld [vmem:[#allocation5 + $0xd0] sm:$0xff] }
  0x54   :  { %3676 = vmatpush1.bf16.msra.mxu0 %v4742_v32  ;;  %v4766_v53 = vpack.c.bf16 %v156_v43, %v152_v33  ;;  %v164_v55 = vand.u32 4294901760, %v103_v40  ;;  %v4768_v59 = vsub.f32 %v95_v17, %v148_v26  ;;  %v4770_v60 = vsub.f32 %v92_v18, %v146_v27  ;;  %v82_v27 = vld [vmem:[#allocation2] sm:$0xff]  ;;  %v83_v20 = vld [vmem:[#allocation2 + $0x8] sm:$0xff] }
  0x55   :  { %6991 = vst [vmem:[#allocation20_spill] sm:$0xff] %v4761_v49  ;;  %3678 = vmatprep.subr.bf16.mxu0 %v4750_v38  ;;  %v162_v61 = vand.u32 4294901760, %v100_v45  ;;  %v166_v62 = vand.u32 4294901760, %v102_v46  ;;  %v4772_v2 = vsub.f32 %v94_v19, %v150_v28  ;;  %v4774_v3 = vsub.f32 %v97_v22, %v152_v33 }
  0x56   :  { %6992 = vst [vmem:[#allocation21_spill] sm:$0xff] %v4766_v53  ;;  %v4776_v4 = vsub.f32 %v99_v29, %v156_v43  ;;  %v4778_v5 = vpack.c.bf16 %v158_v50, %v154_v44  ;;  %v168_v6 = vand.u32 4294901760, %v105_v51  ;;  %v172_v7 = vand.u32 4294901760, %v107_v56 }
  0x57   :  { %v170_v8 = vand.u32 4294901760, %v104_v57  ;;  %v174_v9 = vand.u32 4294901760, %v106_v58  ;;  %v4782_v12 = vsub.f32 %v96_v30, %v154_v44  ;;  %v4784_v13 = vpack.c.bf16 %v164_v55, %v160_v54  ;;  %v113_v44 = vld [vmem:[#allocation5 + $0xe8] sm:$0xff] }
  0x58   :  { %6993 = vst [vmem:[#allocation22_spill] sm:$0xff] %v4778_v5  ;;  %3680 = vmatpush1.bf16.msra.mxu0 %v4761_v49  ;;  %v176_v14 = vand.u32 4294901760, %v109_v63  ;;  %v180_v15 = vand.u32 4294901760, %v111_v1  ;;  %v4786_v17 = vsub.f32 %v98_v34, %v158_v50  ;;  %v4788_v18 = vsub.f32 %v101_v39, %v160_v54 }
  0x59   :  { %3682 = vmatprep.subr.bf16.mxu0 %v4766_v53  ;;  %6994 = vst [vmem:[#allocation23_spill] sm:$0xff] %v4784_v13  ;;  %v4790_v19 = vsub.f32 %v103_v40, %v164_v55  ;;  %v4792_v22 = vpack.c.bf16 %v166_v62, %v162_v61  ;;  %v4794_v23 = vsub.f32 %v100_v45, %v162_v61  ;;  %v178_v25 = vand.u32 4294901760, %v108_v10  ;;  %v115_v45 = vld [vmem:[#allocation5 + $0xf8] sm:$0xff] }
  0x5a   :  { %v4796_v24 = vsub.f32 %v102_v46, %v166_v62  ;;  %v182_v26 = vand.u32 4294901760, %v110_v11  ;;  %v4799_v28 = vpack.c.bf16 %v172_v7, %v168_v6  ;;  %v4801_v29 = vsub.f32 %v105_v51, %v168_v6  ;;  %v4816_v46 = vld [vmem:[#allocation5 + $0xe0] sm:$0xff]  ;;  %v4831_v62 = vld [vmem:[#allocation5 + $0xf0] sm:$0xff] }
  0x5b   :  { %6995 = vst [vmem:[#allocation24_spill] sm:$0xff] %v4792_v22  ;;  %v4803_v30 = vsub.f32 %v107_v56, %v172_v7  ;;  %v4805_v33 = vpack.c.bf16 %v174_v9, %v170_v8  ;;  %v4808_v34 = vsub.f32 %v104_v57, %v170_v8  ;;  %v4810_v39 = vsub.f32 %v106_v58, %v174_v9 }
  0x5c   :  { %3684 = vmatpush1.bf16.msra.mxu0 %v4778_v5  ;;  %6996 = vst [vmem:[#allocation25_spill] sm:$0xff] %v4799_v28  ;;  %v4812_v40 = vpack.c.bf16 %v180_v15, %v176_v14  ;;  %v4814_v43 = vsub.f32 %v109_v63, %v176_v14  ;;  %v6644_v50 = vand.u32 4294901760, %v4739_v31  ;;  %v6643_v51 = vand.u32 4294901760, %v4744_v35 }
  0x5d   :  { %6997 = vst [vmem:[#allocation26_spill] sm:$0xff] %v4805_v33  ;;  %3686 = vmatprep.subr.bf16.mxu0 %v4784_v13  ;;  %v4820_v54 = vand.u32 4294901760, %v82_v27  ;;  %v6647_v55 = vand.u32 4294901760, %v4746_v36  ;;  %v4823_v56 = vsub.f32 %v111_v1, %v180_v15  ;;  %v4825_v57 = vpack.c.bf16 %v182_v26, %v178_v25 }
  0x5e   :  { %6998 = vst [vmem:[#allocation27_spill] sm:$0xff] %v4812_v40  ;;  %v4827_v58 = vsub.f32 %v108_v10, %v178_v25  ;;  %v4829_v61 = vsub.f32 %v110_v11, %v182_v26  ;;  %v184_v63 = vand.u32 4294901760, %v113_v44  ;;  %v188_v6 = vand.u32 4294901760, %v115_v45 }
  0x5f   :  { %6999 = vst [vmem:[#allocation28_spill] sm:$0xff] %v4825_v57  ;;  %v250_v7 = vsub.f32 %v4739_v31, %v6644_v50  ;;  %v262_v1 = vsub.f32 %v4744_v35, %v6643_v51  ;;  %v4843_v9 = vsub.f32 %v82_v27, %v4820_v54  ;;  %v6648_v10 = vand.u32 4294901760, %v4748_v37 }
  0x60   :  { %7000 = vst [vmem:[#allocation29_spill] sm:$0xff] %v4829_v61  ;;  %3688 = vmatpush1.bf16.msra.mxu0 %v4792_v22  ;;  %v6649_v11 = vand.u32 4294901760, %v4752_v41  ;;  %v256_v15 = vsub.f32 %v4746_v36, %v6647_v55  ;;  %v6652_v25 = vand.u32 4294901760, %v4754_v42  ;;  %v6657_v26 = vand.u32 4294901760, %v4757_v47 }
  0x61   :  { %3690 = vmatprep.subr.bf16.mxu0 %v4799_v28  ;;  %7001 = vst [vmem:[#allocation30_spill] sm:$0xff] %v4843_v9  ;;  %v251_v51 = vand.u32 4294901760, %v250_v7  ;;  %v263_v50 = vand.u32 4294901760, %v262_v1  ;;  %v268_v27 = vsub.f32 %v4748_v37, %v6648_v10  ;;  %v6662_v1 = vand.u32 4294901760, %v4759_v48 }
  0x62   :  { %v274_v14 = vsub.f32 %v4752_v41, %v6649_v11  ;;  %v286_v55 = vsub.f32 %v4754_v42, %v6652_v25  ;;  %v280_v7 = vsub.f32 %v4757_v47, %v6657_v26  ;;  %v4869_v0 = vpack.c.bf16 %v188_v6, %v184_v63 }
  0x63   :  { %v4871_v10 = vsub.f32 %v113_v44, %v184_v63  ;;  %v4873_v8 = vsub.f32 %v115_v45, %v188_v6  ;;  %v7006_v25 = vand.u32 4294901760, %v4831_v62  ;;  %v257_v22 = vand.u32 4294901760, %v256_v15 }
  0x64   :  { %3692 = vmatpush1.bf16.msra.mxu0 %v4805_v33  ;;  %7002 = vst [vmem:[#allocation31_spill] sm:$0xff] %v4869_v0  ;;  %v7005_v33 = vand.u32 4294901760, %v4816_v46  ;;  %v292_v26 = vsub.f32 %v4759_v48, %v6662_v1  ;;  %v3701_v13 = vpack.c.bf16 %v263_v50, %v251_v51  ;;  %v7008_v44 = vand.u32 4294901760, %v4843_v9 }
  0x65   :  { %3694 = vmatprep.subr.bf16.mxu0 %v4812_v40  ;;  %7003 = vst [vmem:[#allocation32_spill] sm:$0xff] %v4871_v10  ;;  %7004 = vst [vmem:[#allocation33_spill] sm:$0xff] %v4873_v8  ;;  %v6665_v40 = vand.u32 4294901760, %v4768_v59  ;;  %v269_v63 = vand.u32 4294901760, %v268_v27  ;;  %v275_v11 = vand.u32 4294901760, %v274_v14  ;;  %v6670_v15 = vand.u32 4294901760, %v4772_v2 }
  0x66   :  { %v4880_v28 = vpack.c.bf16 %v7006_v25, %v7005_v33  ;;  %v228_v45 = vsub.f32 %v4843_v9, %v7008_v44  ;;  %v287_v33 = vand.u32 4294901760, %v286_v55  ;;  %v281_v25 = vand.u32 4294901760, %v280_v7 }
  0x67   :  { %v7009_v1 = vand.u32 4294901760, %v4764_v52  ;;  %v310_v51 = vsub.f32 %v4768_v59, %v6665_v40  ;;  %v6675_v27 = vand.u32 4294901760, %v4774_v3  ;;  %v6676_v44 = vand.u32 4294901760, %v4776_v4 }
  0x68   :  { %7007 = vst [vmem:[#allocation34_spill] sm:$0xff] %v4880_v28  ;;  %3696 = vmatpush1.bf16.msra.mxu0 %v4825_v57  ;;  %v293_v6 = vand.u32 4294901760, %v292_v26  ;;  %v7010_v55 = vand.u32 4294901760, %v4770_v60  ;;  %v316_v7 = vsub.f32 %v4772_v2, %v6670_v15  ;;  %v6690_v26 = vand.u32 4294901760, %v4786_v17 }
  0x69   :  { %3698 = vmatprep.subr.bf16.mxu0 %v4869_v0  ;;  %v298_v50 = vsub.f32 %v4764_v52, %v7009_v1  ;;  %v6683_v0 = vand.u32 4294901760, %v4782_v12  ;;  %v229_v1 = vand.u32 4294901760, %v228_v45  ;;  %v322_v40 = vsub.f32 %v4774_v3, %v6675_v27 }
  0x6a   :  { %v304_v14 = vsub.f32 %v4770_v60, %v7010_v55  ;;  %v334_v57 = vsub.f32 %v4776_v4, %v6676_v44  ;;  %v3703_v55 = vpack.c.bf16 %v269_v63, %v257_v22  ;;  %v3705_v5 = vpack.c.bf16 %v287_v33, %v275_v11 }
  0x6b   :  { %v328_v15 = vsub.f32 %v4782_v12, %v6683_v0  ;;  %v6688_v45 = vand.u32 4294901760, %v4788_v18  ;;  %v299_v53 = vand.u32 4294901760, %v298_v50  ;;  %v311_v49 = vand.u32 4294901760, %v310_v51 }
  0x6c   :  { %3700 = vmatpush1.bf16.msra.mxu0 %v4880_v28  ;;  %v340_v27 = vsub.f32 %v4786_v17, %v6690_v26  ;;  %v6686_v44 = vand.u32 4294901760, %v4790_v19  ;;  %v3707_v38 = vpack.c.bf16 %v293_v6, %v281_v25  ;;  %v305_v32 = vand.u32 4294901760, %v304_v14 }
  0x6d   :  { %3702 = vmatprep.subr.bf16.mxu0 %v3701_v13  ;;  %v317_v28 = vand.u32 4294901760, %v316_v7  ;;  %v6685_v22 = vand.u32 4294901760, %v4794_v23  ;;  %v323_v11 = vand.u32 4294901760, %v322_v40  ;;  %v335_v63 = vand.u32 4294901760, %v334_v57 }
  0x6e   :  { %v329_v33 = vand.u32 4294901760, %v328_v15  ;;  %v6684_v0 = vand.u32 4294901760, %v4796_v24  ;;  %v341_v13 = vand.u32 4294901760, %v340_v27  ;;  %v346_v50 = vsub.f32 %v4788_v18, %v6688_v45 }
  0x6f   :  { %230 = vmatmul.mubr.f32.vlgmr.msra.gmra.mrb[0].mxu0 %v229_v1  ;;  %v6687_v51 = vand.u32 4294901760, %v4801_v29  ;;  %v6689_v6 = vand.u32 4294901760, %v4803_v30  ;;  %v7011_v25 = vmov 0.0   ;;  %v3709_v14 = vpack.c.bf16 %v311_v49, %v299_v53 }
  0x70   :  { %3704 = vmatpush1.bf16.msra.mxu0 %v3703_v55  ;;  %235 = vmatprep.mubr.f32.mxu0 %v7011_v25  ;;  %v358_v40 = vsub.f32 %v4790_v19, %v6686_v44  ;;  %v352_v57 = vsub.f32 %v4794_v23, %v6685_v22  ;;  %v364_v15 = vsub.f32 %v4796_v24, %v6684_v0  ;;  %v7012_v27 = vand.u32 4294901760, %v4816_v46 }
  0x71   :  { %3706 = vmatprep.subr.bf16.mxu0 %v3705_v5  ;;  %v370_v49 = vsub.f32 %v4801_v29, %v6687_v51  ;;  %v382_v53 = vsub.f32 %v4803_v30, %v6689_v6  ;;  %v7013_v1 = vand.u32 4294901760, %v4831_v62  ;;  %v3711_v0 = vpack.c.bf16 %v317_v28, %v305_v32 }
  0x72   :  { %v4944_v7 = vsub.f32 %v4816_v46, %v7012_v27  ;;  %v6697_v22 = vand.u32 4294901760, %v4810_v39  ;;  %v6695_v46 = vand.u32 4294901760, %v4814_v43  ;;  %v3713_v27 = vpack.c.bf16 %v335_v63, %v323_v11 }
  0x73   :  { %v4956_v55 = vsub.f32 %v4831_v62, %v7013_v1  ;;  %v3715_v44 = vpack.c.bf16 %v341_v13, %v329_v33  ;;  %v347_v51 = vand.u32 4294901760, %v346_v50  ;;  %v6696_v45 = vand.u32 4294901760, %v4823_v56 }
  0x74   :  { %3708 = vmatpush1.bf16.msra.mxu0 %v3707_v38  ;;  %v359_v6 = vand.u32 4294901760, %v358_v40  ;;  %v353_v26 = vand.u32 4294901760, %v352_v57  ;;  %v365_v5 = vand.u32 4294901760, %v364_v15  ;;  %v6698_v21 = vand.u32 4294901760, %v4827_v58 }
  0x75   :  { %3710 = vmatprep.subr.bf16.mxu0 %v3709_v14  ;;  %v371_v62 = vand.u32 4294901760, %v370_v49  ;;  %v383_v1 = vand.u32 4294901760, %v382_v53  ;;  %v7014_v32 = vand.u32 4294901760, %v4808_v34  ;;  %v411_v38 = vand.u32 4294901760, %v4829_v61 }
  0x76   :  { %v388_v11 = vsub.f32 %v4810_v39, %v6697_v22  ;;  %v394_v63 = vsub.f32 %v4814_v43, %v6695_v46  ;;  %v417_v33 = vand.u32 4294901760, %v4871_v10  ;;  %v429_v13 = vand.u32 4294901760, %v4873_v8 }
  0x77   :  { %v376_v28 = vsub.f32 %v4808_v34, %v7014_v32  ;;  %v406_v50 = vsub.f32 %v4823_v56, %v6696_v45  ;;  %v400_v14 = vsub.f32 %v4827_v58, %v6698_v21  ;;  %v412_v40 = vsub.f32 %v4829_v61, %v411_v38 }
  0x78   :  { %3712 = vmatpush1.bf16.msra.mxu0 %v3711_v0  ;;  %v4981_v57 = vand.u32 4294901760, %v83_v20  ;;  %v3717_v15 = vpack.c.bf16 %v359_v6, %v347_v51  ;;  %v418_v49 = vsub.f32 %v4871_v10, %v417_v33  ;;  %v430_v53 = vsub.f32 %v4873_v8, %v429_v13 }
  0x79   :  { %3714 = vmatprep.subr.bf16.mxu0 %v3713_v27  ;;  %v423_v0 = vand.u32 4294901760, %v4944_v7  ;;  %v3719_v32 = vpack.c.bf16 %v365_v5, %v353_v26  ;;  %v435_v45 = vand.u32 4294901760, %v4956_v55  ;;  %v3721_v22 = vpack.c.bf16 %v383_v1, %v371_v62 }
  0x7a   :  { %v4987_v46 = vsub.f32 %v83_v20, %v4981_v57  ;;  %v377_v21 = vand.u32 4294901760, %v376_v28  ;;  %v389_v9 = vand.u32 4294901760, %v388_v11  ;;  %v395_v16 = vand.u32 4294901760, %v394_v63 }
  0x7b   :  { %v407_v61 = vand.u32 4294901760, %v406_v50  ;;  %v401_v27 = vand.u32 4294901760, %v400_v14  ;;  %v413_v51 = vand.u32 4294901760, %v412_v40  ;;  %v419_v8 = vand.u32 4294901760, %v418_v49 }
  0x7c   :  { %3716 = vmatpush1.bf16.msra.mxu0 %v3715_v44  ;;  %v6706_v6 = vand.u32 4294901760, %v4987_v46  ;;  %v431_v10 = vand.u32 4294901760, %v430_v53  ;;  %v424_v26 = vsub.f32 %v4944_v7, %v423_v0  ;;  %v436_v20 = vsub.f32 %v4956_v55, %v435_v45 }
  0x7d   :  { %3718 = vmatprep.subr.bf16.mxu0 %v3717_v15  ;;  %v3723_v62 = vpack.c.bf16 %v389_v9, %v377_v21  ;;  %v3725_v1 = vpack.c.bf16 %v407_v61, %v395_v16  ;;  %v3727_v28 = vpack.c.bf16 %v413_v51, %v401_v27  ;;  %v7015_v14 = vand.u32 4294901760, %v4739_v31 }
  0x7e   :  { %v239_v5 = vsub.f32 %v4987_v46, %v6706_v6  ;;  %v3729_v11 = vpack.c.bf16 %v431_v10, %v419_v8  ;;  %v425_v63 = vand.u32 4294901760, %v424_v26  ;;  %v437_v50 = vand.u32 4294901760, %v436_v20 }
  0x7f   :  { %v7016_v40 = vand.u32 4294901760, %v4744_v35  ;;  %v7017_v49 = vand.u32 4294901760, %v4746_v36  ;;  %v7018_v53 = vand.u32 4294901760, %v4748_v37  ;;  %v7019_v16 = vand.u32 4294901760, %v4752_v41 }
  0x80   :  { %3720 = vmatpush1.bf16.msra.mxu0 %v3719_v32  ;;  %v240_v44 = vand.u32 4294901760, %v239_v5  ;;  %v7020_v21 = vand.u32 4294901760, %v4754_v42  ;;  %v7021_v8 = vand.u32 4294901760, %v4757_v47  ;;  %v7022_v9 = vand.u32 4294901760, %v4759_v48 }
  0x81   :  { %3722 = vmatprep.subr.bf16.mxu0 %v3721_v22  ;;  %v5000_v15 = vpack.c.bf16 %v7016_v40, %v7015_v14  ;;  %v5006_v32 = vpack.c.bf16 %v7018_v53, %v7017_v49  ;;  %v7023_v22 = vand.u32 4294901760, %v4764_v52  ;;  %v7024_v27 = vand.u32 4294901760, %v4768_v59 }
  0x82   :  { %241 = vmatmul.mubr.f32.gmra.mrb[2].mxu0 %v240_v44  ;;  %v5012_v61 = vpack.c.bf16 %v7020_v21, %v7019_v16  ;;  %v5018_v10 = vpack.c.bf16 %v7022_v9, %v7021_v8  ;;  %v7025_v26 = vand.u32 4294901760, %v4770_v60  ;;  %v7026_v20 = vand.u32 4294901760, %v4772_v2 }
  0x83   :  { %471 = vmatprep.mubr.f32.mxu0 %v7011_v25  ;;  %v5025_v51 = vpack.c.bf16 %v7024_v27, %v7023_v22  ;;  %v7027_v44 = vand.u32 4294901760, %v4774_v3  ;;  %v7028_v14 = vand.u32 4294901760, %v4776_v4  ;;  %v7029_v49 = vand.u32 4294901760, %v4782_v12 }
  0x84   :  { %v5031_v5 = vpack.c.bf16 %v7026_v20, %v7025_v26  ;;  %v7030_v53 = vand.u32 4294901760, %v4786_v17  ;;  %3724 = vmatpush1.bf16.msra.mxu0 %v3723_v62  ;;  %v7031_v21 = vand.u32 4294901760, %v4788_v18  ;;  %v7032_v8 = vand.u32 4294901760, %v4790_v19 }
  0x85   :  { %v5037_v40 = vpack.c.bf16 %v7028_v14, %v7027_v44  ;;  %v7033_v22 = vand.u32 4294901760, %v4794_v23  ;;  %v7034_v27 = vand.u32 4294901760, %v4796_v24  ;;  %v7036_v20 = vand.u32 4294901760, %v4801_v29  ;;  %3726 = vmatprep.subr.bf16.mxu0 %v3725_v1 }
  0x86   :  { %v5043_v16 = vpack.c.bf16 %v7030_v53, %v7029_v49  ;;  %v5049_v9 = vpack.c.bf16 %v7032_v8, %v7031_v21  ;;  %v7037_v44 = vand.u32 4294901760, %v4803_v30  ;;  %v7038_v62 = vand.u32 4294901760, %v4808_v34 }
  0x87   :  { %v5055_v26 = vpack.c.bf16 %v7034_v27, %v7033_v22  ;;  %v7039_v49 = vand.u32 4294901760, %v4810_v39  ;;  %v7040_v21 = vand.u32 4294901760, %v4814_v43  ;;  %v7041_v8 = vand.u32 4294901760, %v4823_v56 }
  0x88   :  { %v5061_v14 = vpack.c.bf16 %v7037_v44, %v7036_v20  ;;  %v7042_v22 = vand.u32 4294901760, %v4827_v58  ;;  %v5081_v20 = vpack.c.bf16 %v435_v45, %v423_v0  ;;  %3728 = vmatpush1.bf16.msra.mxu0 %v3727_v28  ;;  %v3731_v44 = vpack.c.bf16 %v437_v50, %v425_v63  ;;  %v1040_v63 = vld [vmem:[#allocation7 + $0x20] sm:$0xff]  ;;  %v1042_v50 = vld [vmem:[#allocation7 + $0x30] sm:$0xff] }
  0x89   :  { %7035 = vst [vmem:[#allocation35_spill] sm:$0xff] %v5055_v26  ;;  %v5067_v53 = vpack.c.bf16 %v7039_v49, %v7038_v62  ;;  %v5073_v6 = vpack.c.bf16 %v7041_v8, %v7040_v21  ;;  %v5079_v26 = vpack.c.bf16 %v429_v13, %v417_v33  ;;  %3730 = vmatprep.subr.bf16.mxu0 %v3729_v11  ;;  %v1043_v33 = vld [vmem:[#allocation7 + $0x38] sm:$0xff]  ;;  %v1045_v21 = vld [vmem:[#allocation7 + $0x48] sm:$0xff] }
  0x8a   :  { %v5077_v27 = vpack.c.bf16 %v411_v38, %v7042_v22  ;;  %v3733_v1 = vpack.c.bf16 %v4744_v35, %v4739_v31  ;;  %v3735_v62 = vpack.c.bf16 %v4748_v37, %v4746_v36  ;;  %v3737_v49 = vpack.c.bf16 %v4754_v42, %v4752_v41  ;;  %v1041_v38 = vld [vmem:[#allocation7 + $0x28] sm:$0xff] }
  0x8b   :  { %v3739_v45 = vpack.c.bf16 %v4759_v48, %v4757_v47  ;;  %v3741_v31 = vpack.c.bf16 %v4768_v59, %v4764_v52  ;;  %v3743_v35 = vpack.c.bf16 %v4772_v2, %v4770_v60  ;;  %v3745_v36 = vpack.c.bf16 %v4776_v4, %v4774_v3  ;;  %v1037_v47 = vld [vmem:[#allocation7 + $0x8] sm:$0xff]  ;;  %v1039_v48 = vld [vmem:[#allocation7 + $0x18] sm:$0xff]  ;;  %v1036_v52 = vld [vmem:[#allocation7] sm:$0xff] }
  0x8c   :  { %3732 = vmatpush1.bf16.msra.mxu0 %v3731_v44  ;;  %v1112_v60 = vand.u32 4294901760, %v1037_v47  ;;  %v1116_v2 = vand.u32 4294901760, %v1039_v48  ;;  %v1038_v3 = vld [vmem:[#allocation7 + $0x10] sm:$0xff]  ;;  %v1114_v4 = vand.u32 4294901760, %v1036_v52  ;;  %v1120_v28 = vand.u32 4294901760, %v1041_v38  ;;  %v1049_v41 = vld [vmem:[#allocation7 + $0x68] sm:$0xff] }
  0x8d   :  { %3734 = vmatprep.subr.bf16.mxu0 %v3733_v1  ;;  %v1118_v0 = vand.u32 4294901760, %v1038_v3  ;;  %v1124_v11 = vand.u32 4294901760, %v1043_v33  ;;  %v1136_v37 = vand.u32 4294901760, %v1049_v41 }
  0x8e   :  { %v5111_v8 = vpack.c.bf16 %v1116_v2, %v1112_v60  ;;  %v5113_v22 = vsub.f32 %v1037_v47, %v1112_v60  ;;  %v5115_v44 = vsub.f32 %v1039_v48, %v1116_v2  ;;  %v5117_v1 = vsub.f32 %v1036_v52, %v1114_v4  ;;  %v1051_v2 = vld [vmem:[#allocation7 + $0x78] sm:$0xff] }
  0x8f   :  { %473 = vmatmul.mubr.f32.vlgmr.msra.gmra.mrb[0].mxu0 %v4820_v54  ;;  %v5121_v13 = vsub.f32 %v1038_v3, %v1118_v0  ;;  %v5123_v59 = vpack.c.bf16 %v1124_v11, %v1120_v28  ;;  %v5125_v42 = vsub.f32 %v1041_v38, %v1120_v28  ;;  %v5128_v47 = vsub.f32 %v1043_v33, %v1124_v11  ;;  %v1050_v38 = vld [vmem:[#allocation7 + $0x70] sm:$0xff] }
  0x90   :  { %3736 = vmatpush1.bf16.msra.mxu0 %v3735_v62  ;;  %478 = vmatprep.mubr.f32.mxu0 %v7011_v25  ;;  %7043 = vst [vmem:[#allocation36_spill] sm:$0xff] %v5111_v8  ;;  %7044 = vst [vmem:[#allocation37_spill] sm:$0xff] %v5115_v44  ;;  %v1047_v62 = vld [vmem:[#allocation7 + $0x58] sm:$0xff]  ;;  %v1122_v48 = vand.u32 4294901760, %v1040_v63  ;;  %v1126_v52 = vand.u32 4294901760, %v1042_v50  ;;  %v1128_v60 = vand.u32 4294901760, %v1045_v21 }
  0x91   :  { %3738 = vmatprep.subr.bf16.mxu0 %v3737_v49  ;;  %7045 = vst [vmem:[#allocation38_spill] sm:$0xff] %v5117_v1  ;;  %v1044_v49 = vld [vmem:[#allocation7 + $0x40] sm:$0xff]  ;;  %7047 = vst [vmem:[#allocation40_spill] sm:$0xff] %v5121_v13  ;;  %3862 = vmatprep.subr.bf16.mxu1 %v5111_v8  ;;  %v1053_v8 = vld [vmem:[#allocation7 + $0x88] sm:$0xff] }
  0x92   :  { %7048 = vst [vmem:[#allocation41_spill] sm:$0xff] %v5123_v59  ;;  %7049 = vst [vmem:[#allocation42_spill] sm:$0xff] %v5125_v42  ;;  %v1130_v3 = vand.u32 4294901760, %v1044_v49  ;;  %v1048_v13 = vld [vmem:[#allocation7 + $0x60] sm:$0xff]  ;;  %v5134_v28 = vsub.f32 %v1040_v63, %v1122_v48  ;;  %v5136_v33 = vsub.f32 %v1042_v50, %v1126_v52  ;;  %v5138_v11 = vsub.f32 %v1045_v21, %v1128_v60 }
  0x93   :  { %480 = vmatmul.mubr.f32.gmra.mrb[2].mxu0 %v4981_v57  ;;  %7050 = vst [vmem:[#allocation43_spill] sm:$0xff] %v5128_v47  ;;  %v5140_v47 = vld [vmem:[#allocation7 + $0x80] sm:$0xff]  ;;  %v7057_v63 = vpack.c.bf16 %v4786_v17, %v4782_v12  ;;  %v1140_v21 = vand.u32 4294901760, %v1051_v2 }
  0x94   :  { %3740 = vmatpush1.bf16.msra.mxu0 %v3739_v45  ;;  %614 = vmatprep.mubr.f32.mxu0 %v7011_v25  ;;  %v1046_v45 = vld [vmem:[#allocation7 + $0x50] sm:$0xff]  ;;  %7052 = vst [vmem:[#allocation45_spill] sm:$0xff] %v5138_v11  ;;  %v5148_v44 = vsub.f32 %v1044_v49, %v1130_v3  ;;  %v1144_v49 = vand.u32 4294901760, %v1053_v8 }
  0x95   :  { %3742 = vmatprep.subr.bf16.mxu0 %v3741_v31  ;;  %v5119_v31 = vpack.c.bf16 %v1118_v0, %v1114_v4  ;;  %v1132_v4 = vand.u32 4294901760, %v1047_v62  ;;  %v1134_v0 = vand.u32 4294901760, %v1046_v45  ;;  %v5163_v12 = vpack.c.bf16 %v1140_v21, %v1136_v37 }
  0x96   :  { %7056 = vst [vmem:[#allocation49_spill] sm:$0xff] %v5148_v44  ;;  %v5165_v17 = vsub.f32 %v1051_v2, %v1140_v21  ;;  %v7068_v2 = vld [vmem:[#allocation32_spill] sm:$0xff]  ;;  %v7069_v21 = vld [vmem:[#allocation33_spill] sm:$0xff] }
  0x97   :  { %7046 = vst [vmem:[#allocation39_spill] sm:$0xff] %v5119_v31  ;;  %3864 = vmatpush1.bf16.msra.mxu1 %v5119_v31  ;;  %v5142_v31 = vpack.c.bf16 %v1132_v4, %v1128_v60  ;;  %v5144_v42 = vsub.f32 %v1047_v62, %v1132_v4  ;;  %v5146_v1 = vpack.c.bf16 %v1134_v0, %v1130_v3  ;;  %v1142_v62 = vand.u32 4294901760, %v1050_v38 }
  0x98   :  { %3744 = vmatpush1.bf16.msra.mxu0 %v3743_v35  ;;  %3866 = vmatprep.subr.bf16.mxu1 %v5123_v59  ;;  %v5132_v35 = vpack.c.bf16 %v1126_v52, %v1122_v48  ;;  %v1054_v59 = vld [vmem:[#allocation7 + $0x90] sm:$0xff]  ;;  %v5153_v50 = vsub.f32 %v1046_v45, %v1134_v0  ;;  %v5155_v48 = vsub.f32 %v1049_v41, %v1136_v37  ;;  %v1138_v52 = vand.u32 4294901760, %v1048_v13  ;;  %v1057_v0 = vld [vmem:[#allocation7 + $0xa8] sm:$0xff] }
  0x99   :  { %3746 = vmatprep.subr.bf16.mxu0 %v3745_v36  ;;  %v1055_v36 = vld [vmem:[#allocation7 + $0x98] sm:$0xff]  ;;  %7053 = vst [vmem:[#allocation46_spill] sm:$0xff] %v5142_v31  ;;  %7054 = vst [vmem:[#allocation47_spill] sm:$0xff] %v5144_v42  ;;  %v7060_v60 = vpack.c.bf16 %v4790_v19, %v4788_v18  ;;  %v1146_v3 = vand.u32 4294901760, %v5140_v47  ;;  %v1150_v45 = vand.u32 4294901760, %v1054_v59  ;;  %v3757_v18 = vpack.c.bf16 %v4823_v56, %v4814_v43  ;;  %v7064_v19 = vld [vmem:[#allocation29_spill] sm:$0xff] }
  0x9a   :  { %7051 = vst [vmem:[#allocation44_spill] sm:$0xff] %v5132_v35  ;;  %7055 = vst [vmem:[#allocation48_spill] sm:$0xff] %v5146_v1  ;;  %v1148_v4 = vand.u32 4294901760, %v1055_v36  ;;  %v5167_v41 = vsub.f32 %v1048_v13, %v1138_v52  ;;  %v1058_v37 = vld [vmem:[#allocation7 + $0xb0] sm:$0xff]  ;;  %v7067_v13 = vpack.c.bf16 %v4796_v24, %v4794_v23  ;;  %v5199_v24 = vpack.c.bf16 %v1142_v62, %v1138_v52  ;;  %v5214_v23 = vld [vmem:[#allocation7 + $0xf8] sm:$0xff] }
  0x9b   :  { %7058 = vst [vmem:[#allocation50_spill] sm:$0xff] %v5153_v50  ;;  %7059 = vst [vmem:[#allocation51_spill] sm:$0xff] %v5155_v48  ;;  %3868 = vmatpush1.bf16.msra.mxu1 %v5132_v35  ;;  %v5173_v35 = vsub.f32 %v1050_v38, %v1142_v62  ;;  %v5175_v48 = vsub.f32 %v1053_v8, %v1144_v49  ;;  %v5177_v50 = vld [vmem:[#allocation7 + $0xc8] sm:$0xff]  ;;  %v5187_v43 = vsub.f32 %v5140_v47, %v1146_v3  ;;  %v5191_v8 = vld [vmem:[#allocation7 + $0xc0] sm:$0xff] }
  0x9c   :  { %3748 = vmatpush1.bf16.msra.mxu0 %v7057_v63  ;;  %3870 = vmatprep.subr.bf16.mxu1 %v5142_v31  ;;  %7061 = vst [vmem:[#allocation52_spill] sm:$0xff] %v5163_v12  ;;  %7062 = vst [vmem:[#allocation53_spill] sm:$0xff] %v5165_v17  ;;  %v1059_v63 = vld [vmem:[#allocation7 + $0xb8] sm:$0xff]  ;;  %v1056_v31 = vld [vmem:[#allocation7 + $0xa0] sm:$0xff]  ;;  %v5184_v17 = vsub.f32 %v1055_v36, %v1148_v4  ;;  %v5189_v56 = vsub.f32 %v1054_v59, %v1150_v45  ;;  %v1152_v36 = vand.u32 4294901760, %v1057_v0 }
  0x9d   :  { %3750 = vmatprep.subr.bf16.mxu0 %v7060_v60  ;;  %7063 = vst [vmem:[#allocation54_spill] sm:$0xff] %v5167_v41  ;;  %v3759_v60 = vpack.c.bf16 %v7064_v19, %v4827_v58  ;;  %7065 = vst [vmem:[#allocation29_spill] sm:$0xff] %v5173_v35  ;;  %v3761_v41 = vpack.c.bf16 %v7069_v21, %v7068_v2  ;;  %v1063_v58 = vld [vmem:[#allocation7 + $0xd8] sm:$0xff]  ;;  %v7073_v38 = vpack.c.bf16 %v4803_v30, %v4801_v29  ;;  %v5201_v47 = vld [vmem:[#allocation7 + $0xd0] sm:$0xff] }
  0x9e   :  { %7066 = vst [vmem:[#allocation55_spill] sm:$0xff] %v5175_v48  ;;  %7070 = vst [vmem:[#allocation32_spill] sm:$0xff] %v5184_v17  ;;  %v1156_v19 = vand.u32 4294901760, %v1059_v63  ;;  %v5204_v59 = vpack.c.bf16 %v1148_v4, %v1144_v49  ;;  %v1158_v2 = vand.u32 4294901760, %v1058_v37  ;;  %v1160_v29 = vand.u32 4294901760, %v5177_v50  ;;  %v5207_v30 = vld [vmem:[#allocation7 + $0xe8] sm:$0xff] }
  0x9f   :  { %7071 = vst [vmem:[#allocation33_spill] sm:$0xff] %v5187_v43  ;;  %7072 = vst [vmem:[#allocation56_spill] sm:$0xff] %v5189_v56  ;;  %3872 = vmatpush1.bf16.msra.mxu1 %v5146_v1  ;;  %v5209_v21 = vsub.f32 %v1057_v0, %v1152_v36  ;;  %v1164_v52 = vand.u32 4294901760, %v1063_v58  ;;  %v5216_v1 = vld [vmem:[#allocation7 + $0xe0] sm:$0xff]  ;;  %v7078_v49 = vpack.c.bf16 %v4810_v39, %v4808_v34  ;;  %v5231_v62 = vld [vmem:[#allocation7 + $0x108] sm:$0xff]  ;;  %v7084_v39 = vand.u32 4294901760, %v5191_v8 }
  0xa0   :  { %3752 = vmatpush1.bf16.msra.mxu0 %v7067_v13  ;;  %7074 = vst [vmem:[#allocation57_spill] sm:$0xff] %v5199_v24  ;;  %3874 = vmatprep.subr.bf16.mxu1 %v5163_v12  ;;  %7075 = vst [vmem:[#allocation58_spill] sm:$0xff] %v5204_v59  ;;  %v1154_v13 = vand.u32 4294901760, %v1056_v31  ;;  %v5223_v12 = vsub.f32 %v1058_v37, %v1158_v2  ;;  %v5226_v0 = vsub.f32 %v5177_v50, %v1160_v29  ;;  %v5244_v37 = vld [vmem:[#allocation7 + $0x118] sm:$0xff] }
  0xa1   :  { %3754 = vmatprep.subr.bf16.mxu0 %v7073_v38  ;;  %7076 = vst [vmem:[#allocation59_spill] sm:$0xff] %v5209_v21  ;;  %v5211_v38 = vsub.f32 %v1059_v63, %v1156_v19  ;;  %v1166_v63 = vand.u32 4294901760, %v5201_v47  ;;  %v5234_v21 = vpack.c.bf16 %v1150_v45, %v1146_v3  ;;  %v5236_v34 = vsub.f32 %v1063_v58, %v1164_v52 }
  0xa2   :  { %v5221_v4 = vsub.f32 %v1056_v31, %v1154_v13  ;;  %7080 = vst [vmem:[#allocation62_spill] sm:$0xff] %v5223_v12  ;;  %7081 = vst [vmem:[#allocation63_spill] sm:$0xff] %v5226_v0  ;;  %v5241_v31 = vsub.f32 %v5191_v8, %v7084_v39  ;;  %v1168_v50 = vand.u32 4294901760, %v5207_v30  ;;  %v1172_v45 = vand.u32 4294901760, %v5214_v23  ;;  %v7103_v12 = vld [vmem:[#allocation15_spill] sm:$0xff] }
  0xa3   :  { %7077 = vst [vmem:[#allocation60_spill] sm:$0xff] %v5211_v38  ;;  %v5229_v38 = vld [vmem:[#allocation7 + $0xf0] sm:$0xff]  ;;  %3876 = vmatpush1.bf16.msra.mxu1 %v5199_v24  ;;  %7082 = vst [vmem:[#allocation64_spill] sm:$0xff] %v5234_v21  ;;  %v5252_v3 = vsub.f32 %v5201_v47, %v1166_v63  ;;  %v6740_v58 = vand.u32 4294901760, %v5216_v1  ;;  %v5258_v39 = vpack.c.bf16 %v1158_v2, %v1154_v13  ;;  %v1180_v2 = vand.u32 4294901760, %v5244_v37 }
  0xa4   :  { %3756 = vmatpush1.bf16.msra.mxu0 %v7078_v49  ;;  %7079 = vst [vmem:[#allocation61_spill] sm:$0xff] %v5221_v4  ;;  %7083 = vst [vmem:[#allocation65_spill] sm:$0xff] %v5236_v34  ;;  %v5246_v49 = vld [vmem:[#allocation7 + $0x100] sm:$0xff]  ;;  %3878 = vmatprep.subr.bf16.mxu1 %v5204_v59  ;;  %v5256_v24 = vld [vmem:[#allocation7 + $0x110] sm:$0xff]  ;;  %v1174_v34 = vand.u32 4294901760, %v5229_v38  ;;  %v5270_v47 = vsub.f32 %v5214_v23, %v1172_v45  ;;  %v7104_v4 = vand.u32 4294901760, %v5191_v8 }
  0xa5   :  { %3758 = vmatprep.subr.bf16.mxu0 %v3757_v18  ;;  %7085 = vst [vmem:[#allocation66_spill] sm:$0xff] %v5241_v31  ;;  %v5249_v18 = vpack.c.bf16 %v1156_v19, %v1152_v36  ;;  %7087 = vst [vmem:[#allocation68_spill] sm:$0xff] %v5252_v3  ;;  %v5261_v31 = vsub.f32 %v5207_v30, %v1168_v50  ;;  %v5265_v36 = vld [vmem:[#allocation7 + $0x128] sm:$0xff]  ;;  %v5267_v19 = vld [vmem:[#allocation7 + $0x138] sm:$0xff]  ;;  %v5275_v13 = vsub.f32 %v5216_v1, %v6740_v58 }
  0xa6   :  { %7088 = vst [vmem:[#allocation69_spill] sm:$0xff] %v5258_v39  ;;  %7090 = vst [vmem:[#allocation71_spill] sm:$0xff] %v5270_v47  ;;  %v5281_v59 = vld [vmem:[#allocation7 + $0x130] sm:$0xff]  ;;  %v5287_v23 = vsub.f32 %v5229_v38, %v1174_v34  ;;  %v7094_v47 = vand.u32 4294901760, %v5231_v62  ;;  %v5295_v30 = vld [vmem:[#allocation7 + $0x148] sm:$0xff]  ;;  %v1184_v38 = vand.u32 4294901760, %v5265_v36  ;;  %v5327_v56 = vpack.c.bf16 %v1166_v63, %v7104_v4 }
  0xa7   :  { %7086 = vst [vmem:[#allocation67_spill] sm:$0xff] %v5249_v18  ;;  %7089 = vst [vmem:[#allocation70_spill] sm:$0xff] %v5261_v31  ;;  %v5279_v31 = vld [vmem:[#allocation7 + $0x120] sm:$0xff]  ;;  %3880 = vmatpush1.bf16.msra.mxu1 %v5234_v21  ;;  %v1188_v21 = vand.u32 4294901760, %v5267_v19  ;;  %v1192_v0 = vand.u32 4294901760, %v5295_v30  ;;  %v7110_v4 = vld [vmem:[#allocation30_spill] sm:$0xff] }
  0xa8   :  { %3760 = vmatpush1.bf16.msra.mxu0 %v3759_v60  ;;  %7091 = vst [vmem:[#allocation72_spill] sm:$0xff] %v5275_v13  ;;  %v5284_v60 = vpack.c.bf16 %v1164_v52, %v1160_v29  ;;  %7093 = vst [vmem:[#allocation74_spill] sm:$0xff] %v5287_v23  ;;  %v5292_v58 = vsub.f32 %v5231_v62, %v7094_v47  ;;  %v1182_v13 = vand.u32 4294901760, %v5256_v24  ;;  %3882 = vmatprep.subr.bf16.mxu1 %v5249_v18  ;;  %v1079_v47 = vld [vmem:[#allocation7 + $0x158] sm:$0xff]  ;;  %v1076_v3 = vld [vmem:[#allocation7 + $0x140] sm:$0xff] }
  0xa9   :  { %3762 = vmatprep.subr.bf16.mxu0 %v3761_v41  ;;  %v5299_v41 = vsub.f32 %v5244_v37, %v1180_v2  ;;  %v7097_v29 = vand.u32 4294901760, %v5246_v49  ;;  %v1186_v23 = vand.u32 4294901760, %v5279_v31  ;;  %v1190_v18 = vand.u32 4294901760, %v5281_v59  ;;  %v1078_v37 = vld [vmem:[#allocation7 + $0x150] sm:$0xff]  ;;  %7105 = vst [vmem:[#allocation15_spill] sm:$0xff] %v5327_v56 }
  0xaa   :  { %7092 = vst [vmem:[#allocation73_spill] sm:$0xff] %v5284_v60  ;;  %7095 = vst [vmem:[#allocation75_spill] sm:$0xff] %v5292_v58  ;;  %v5309_v58 = vsub.f32 %v5256_v24, %v1182_v13  ;;  %v1081_v24 = vld [vmem:[#allocation7 + $0x168] sm:$0xff]  ;;  %v1198_v8 = vand.u32 4294901760, %v1078_v37 }
  0xab   :  { %7096 = vst [vmem:[#allocation76_spill] sm:$0xff] %v5299_v41  ;;  %v5304_v52 = vsub.f32 %v5246_v49, %v7097_v29  ;;  %v7100_v41 = vpack.c.bf16 %v4956_v55, %v4944_v7  ;;  %v5317_v29 = vsub.f32 %v5265_v36, %v1184_v38  ;;  %3884 = vmatpush1.bf16.msra.mxu1 %v5258_v39  ;;  %v1196_v36 = vand.u32 4294901760, %v1079_v47 }
  0xac   :  { %7099 = vst [vmem:[#allocation78_spill] sm:$0xff] %v5309_v58  ;;  %v1083_v58 = vld [vmem:[#allocation7 + $0x178] sm:$0xff]  ;;  %v5330_v7 = vsub.f32 %v5279_v31, %v1186_v23  ;;  %v5333_v55 = vsub.f32 %v5281_v59, %v1190_v18  ;;  %3886 = vmatprep.subr.bf16.mxu1 %v5284_v60  ;;  %v1194_v39 = vand.u32 4294901760, %v1076_v3  ;;  %v1200_v31 = vand.u32 4294901760, %v1081_v24 }
  0xad   :  { %7098 = vst [vmem:[#allocation77_spill] sm:$0xff] %v5304_v52  ;;  %3764 = vmatpush1.bf16.msra.mxu0 %v7100_v41  ;;  %7101 = vst [vmem:[#allocation79_spill] sm:$0xff] %v5317_v29  ;;  %v5320_v52 = vsub.f32 %v5267_v19, %v1188_v21  ;;  %v1080_v19 = vld [vmem:[#allocation7 + $0x160] sm:$0xff]  ;;  %v1082_v41 = vld [vmem:[#allocation7 + $0x170] sm:$0xff]  ;;  %v5339_v29 = vsub.f32 %v5295_v30, %v1192_v0  ;;  %v5342_v63 = vsub.f32 %v1079_v47, %v1196_v36 }
  0xae   :  { %3766 = vmatprep.subr.bf16.mxu0 %v7103_v12  ;;  %7106 = vst [vmem:[#allocation81_spill] sm:$0xff] %v5330_v7  ;;  %7107 = vst [vmem:[#allocation82_spill] sm:$0xff] %v5333_v55  ;;  %v1204_v7 = vand.u32 4294901760, %v1083_v58  ;;  %v7112_v59 = vld [vmem:[#allocation16_spill] sm:$0xff]  ;;  %v5346_v55 = vsub.f32 %v1076_v3, %v1194_v39  ;;  %v5348_v60 = vsub.f32 %v1078_v37, %v1198_v8  ;;  %v7115_v30 = vld [vmem:[#allocation17_spill] sm:$0xff]  ;;  %v7118_v3 = vand.u32 4294901760, %v5231_v62 }
  0xaf   :  { %7102 = vst [vmem:[#allocation80_spill] sm:$0xff] %v5320_v52  ;;  %v5336_v52 = vpack.c.bf16 %v1172_v45, %v1168_v50  ;;  %7109 = vst [vmem:[#allocation84_spill] sm:$0xff] %v5339_v29  ;;  %v1202_v50 = vand.u32 4294901760, %v1080_v19  ;;  %v1206_v45 = vand.u32 4294901760, %v1082_v41  ;;  %3888 = vmatpush1.bf16.msra.mxu1 %v5327_v56  ;;  %v7116_v29 = vand.u32 4294901760, %v5216_v1  ;;  %v7120_v56 = vld [vmem:[#allocation18_spill] sm:$0xff] }
  0xb0   :  { %617 = vmatmul.mubr.f32.vlgmr.msra.gmra.mrb[0].mxu0 %v7110_v4  ;;  %7111 = vst [vmem:[#allocation30_spill] sm:$0xff] %v5342_v63  ;;  %7113 = vst [vmem:[#allocation16_spill] sm:$0xff] %v5346_v55  ;;  %v5356_v63 = vsub.f32 %v1081_v24, %v1200_v31  ;;  %v5358_v43 = vsub.f32 %v1083_v58, %v1204_v7  ;;  %v5363_v37 = vpack.c.bf16 %v1180_v2, %v7118_v3  ;;  %v7121_v1 = vld [vmem:[#allocation19_spill] sm:$0xff]  ;;  %v7125_v2 = vld [vmem:[#allocation20_spill] sm:$0xff] }
  0xb1   :  { %7108 = vst [vmem:[#allocation83_spill] sm:$0xff] %v5336_v52  ;;  %3768 = vmatpush1.bf16.msra.mxu0 %v7112_v59  ;;  %622 = vmatprep.mubr.f32.mxu0 %v7011_v25  ;;  %7114 = vst [vmem:[#allocation85_spill] sm:$0xff] %v5348_v60  ;;  %v5354_v47 = vpack.c.bf16 %v1174_v34, %v7116_v29  ;;  %v5365_v60 = vsub.f32 %v1080_v19, %v1202_v50  ;;  %v7122_v34 = vand.u32 4294901760, %v5246_v49  ;;  %v7126_v29 = vld [vmem:[#allocation21_spill] sm:$0xff]  ;;  %v7130_v49 = vld [vmem:[#allocation23_spill] sm:$0xff] }
  0xb2   :  { %3770 = vmatprep.subr.bf16.mxu0 %v7115_v30  ;;  %3890 = vmatprep.subr.bf16.mxu1 %v5336_v52  ;;  %7119 = vst [vmem:[#allocation86_spill] sm:$0xff] %v5363_v37  ;;  %v5367_v55 = vsub.f32 %v1082_v41, %v1206_v45  ;;  %v5379_v62 = vpack.c.bf16 %v1188_v21, %v1184_v38  ;;  %v7129_v41 = vld [vmem:[#allocation22_spill] sm:$0xff]  ;;  %v7133_v38 = vld [vmem:[#allocation24_spill] sm:$0xff]  ;;  %v1092_v3 = vld [vmem:[#allocation7 + $0x1c0] sm:$0xff] }
  0xb3   :  { %7117 = vst [vmem:[#allocation17_spill] sm:$0xff] %v5354_v47  ;;  %3892 = vmatpush1.bf16.msra.mxu1 %v5354_v47  ;;  %v5376_v58 = vpack.c.bf16 %v1182_v13, %v7122_v34  ;;  %v5384_v24 = vpack.c.bf16 %v1190_v18, %v1186_v23  ;;  %v5387_v19 = vpack.c.bf16 %v1196_v36, %v1192_v0  ;;  %v7134_v18 = vld [vmem:[#allocation25_spill] sm:$0xff]  ;;  %v7136_v23 = vld [vmem:[#allocation26_spill] sm:$0xff]  ;;  %v7137_v36 = vld [vmem:[#allocation27_spill] sm:$0xff]  ;;  %v1226_v34 = vand.u32 4294901760, %v1092_v3 }
  0xb4   :  { %625 = vmatmul.mubr.f32.gmra.mrb[2].mxu0 %v4987_v46  ;;  %3894 = vmatprep.subr.bf16.mxu1 %v5363_v37  ;;  %7124 = vst [vmem:[#allocation19_spill] sm:$0xff] %v5379_v62  ;;  %v5392_v21 = vpack.c.bf16 %v1198_v8, %v1194_v39  ;;  %v5395_v13 = vpack.c.bf16 %v1204_v7, %v1200_v31  ;;  %v7138_v39 = vld [vmem:[#allocation28_spill] sm:$0xff]  ;;  %v7139_v7 = vld [vmem:[#allocation31_spill] sm:$0xff]  ;;  %v7140_v8 = vld [vmem:[#allocation34_spill] sm:$0xff]  ;;  %v7141_v31 = vand.u32 4294901760, %v7110_v4 }
  0xb5   :  { %3772 = vmatpush1.bf16.msra.mxu0 %v7120_v56  ;;  %727 = vmatprep.mubr.f32.mxu0 %v7011_v25  ;;  %7123 = vst [vmem:[#allocation18_spill] sm:$0xff] %v5376_v58  ;;  %7127 = vst [vmem:[#allocation20_spill] sm:$0xff] %v5384_v24  ;;  %v5400_v0 = vpack.c.bf16 %v1206_v45, %v1202_v50  ;;  %v7142_v50 = vand.u32 4294901760, %v4987_v46  ;;  %v1085_v46 = vld [vmem:[#allocation7 + $0x188] sm:$0xff]  ;;  %v7183_v37 = vld [vmem:[#allocation33_spill] sm:$0xff] }
  0xb6   :  { %3774 = vmatprep.subr.bf16.mxu0 %v7121_v1  ;;  %7128 = vst [vmem:[#allocation21_spill] sm:$0xff] %v5387_v19  ;;  %7131 = vst [vmem:[#allocation22_spill] sm:$0xff] %v5392_v21  ;;  %v1093_v4 = vld [vmem:[#allocation7 + $0x1c8] sm:$0xff] }
  0xb7   :  { %3896 = vmatpush1.bf16.msra.mxu1 %v5376_v58  ;;  %7132 = vst [vmem:[#allocation23_spill] sm:$0xff] %v5395_v13  ;;  %7135 = vst [vmem:[#allocation24_spill] sm:$0xff] %v5400_v0  ;;  %v1224_v45 = vand.u32 4294901760, %v1093_v4  ;;  %v7181_v52 = vld [vmem:[#allocation54_spill] sm:$0xff] }
  0xb8   :  { %3898 = vmatprep.subr.bf16.mxu1 %v5379_v62 }
  0xb9   :  { %3776 = vmatpush1.bf16.msra.mxu0 %v7125_v2 }
  0xba   :  { %3778 = vmatprep.subr.bf16.mxu0 %v7126_v29 }
  0xbb   :  { %3900 = vmatpush1.bf16.msra.mxu1 %v5384_v24 }
  0xbc   :  { %3902 = vmatprep.subr.bf16.mxu1 %v5387_v19 }
  0xbd   :  { %3780 = vmatpush1.bf16.msra.mxu0 %v7129_v41 }
  0xbe   :  { %3782 = vmatprep.subr.bf16.mxu0 %v7130_v49 }
  0xbf   :  { %3904 = vmatpush1.bf16.msra.mxu1 %v5392_v21 }
  0xc0   :  { %3906 = vmatprep.subr.bf16.mxu1 %v5395_v13 }
  0xc1   :  { %3784 = vmatpush1.bf16.msra.mxu0 %v7133_v38 }
  0xc2   :  { %3786 = vmatprep.subr.bf16.mxu0 %v7134_v18 }
  0xc3   :  { %3908 = vmatpush1.bf16.msra.mxu1 %v5400_v0 }
  0xc5   :  { %3788 = vmatpush1.bf16.msra.mxu0 %v7136_v23 }
  0xc6   :  { %3790 = vmatprep.subr.bf16.mxu0 %v7137_v36 }
  0xc9   :  { %3792 = vmatpush1.bf16.msra.mxu0 %v7138_v39 }
  0xca   :  { %3794 = vmatprep.subr.bf16.mxu0 %v7139_v7 }
  0xcd   :  { %3796 = vmatpush1.bf16.msra.mxu0 %v7140_v8 }
  0xce   :  { %3798 = vmatprep.subr.bf16.mxu0 %v5000_v15  ;;  %v7143_v15 = vld [vmem:[#allocation35_spill] sm:$0xff] }
  0xd0   :  { %731 = vmatmul.mubr.f32.vlgmr.msra.gmra.mrb[0].mxu0 %v7141_v31  ;;  %v1096_v31 = vld [vmem:[#allocation7 + $0x1e0] sm:$0xff] }
  0xd1   :  { %3800 = vmatpush1.bf16.msra.mxu0 %v5006_v32  ;;  %736 = vmatprep.mubr.f32.mxu0 %v7011_v25  ;;  %v1208_v32 = vand.u32 4294901760, %v1085_v46 }
  0xd2   :  { %3802 = vmatprep.subr.bf16.mxu0 %v5012_v61 }
  0xd4   :  { %740 = vmatmul.mubr.f32.gmra.mrb[2].mxu0 %v7142_v50  ;;  %v1098_v50 = vld [vmem:[#allocation7 + $0x1f0] sm:$0xff] }
  0xd5   :  { %3804 = vmatpush1.bf16.msra.mxu0 %v5018_v10  ;;  %906 = vmatprep.mubr.f32.mxu0 %v7011_v25  ;;  %v1084_v10 = vld [vmem:[#allocation7 + $0x180] sm:$0xff] }
  0xd6   :  { %3806 = vmatprep.subr.bf16.mxu0 %v5025_v51  ;;  %v1086_v51 = vld [vmem:[#allocation7 + $0x190] sm:$0xff] }
  0xd9   :  { %3808 = vmatpush1.bf16.msra.mxu0 %v5031_v5  ;;  %v1210_v5 = vand.u32 4294901760, %v1084_v10 }
  0xda   :  { %3810 = vmatprep.subr.bf16.mxu0 %v5037_v40  ;;  %v1214_v40 = vand.u32 4294901760, %v1086_v51 }
  0xdd   :  { %3812 = vmatpush1.bf16.msra.mxu0 %v5043_v16 }
  0xde   :  { %3814 = vmatprep.subr.bf16.mxu0 %v5049_v9  ;;  %v5456_v9 = vpack.c.bf16 %v1214_v40, %v1210_v5 }
  0xe0   :  { %7145 = vst [vmem:[#allocation26_spill] sm:$0xff] %v5456_v9 }
  0xe1   :  { %3816 = vmatpush1.bf16.msra.mxu0 %v7143_v15  ;;  %v1234_v15 = vand.u32 4294901760, %v1096_v31 }
  0xe2   :  { %3818 = vmatprep.subr.bf16.mxu0 %v5061_v14  ;;  %v1091_v14 = vld [vmem:[#allocation7 + $0x1b8] sm:$0xff] }
  0xe5   :  { %3820 = vmatpush1.bf16.msra.mxu0 %v5067_v53  ;;  %v1088_v53 = vld [vmem:[#allocation7 + $0x1a0] sm:$0xff] }
  0xe6   :  { %3822 = vmatprep.subr.bf16.mxu0 %v5073_v6  ;;  %v1087_v6 = vld [vmem:[#allocation7 + $0x198] sm:$0xff] }
  0xe7   :  { %v1212_v61 = vand.u32 4294901760, %v1087_v6 }
  0xe9   :  { %3824 = vmatpush1.bf16.msra.mxu0 %v5077_v27  ;;  %v5454_v16 = vpack.c.bf16 %v1212_v61, %v1208_v32  ;;  %v1218_v27 = vand.u32 4294901760, %v1088_v53 }
  0xea   :  { %3826 = vmatprep.subr.bf16.mxu0 %v5079_v26  ;;  %v1089_v26 = vld [vmem:[#allocation7 + $0x1a8] sm:$0xff] }
  0xeb   :  { %7144 = vst [vmem:[#allocation25_spill] sm:$0xff] %v5454_v16  ;;  %3910 = vmatprep.subr.bf16.mxu1 %v5454_v16 }
  0xec   :  { %3912 = vmatpush1.bf16.msra.mxu1 %v5456_v9 }
  0xed   :  { %3828 = vmatpush1.bf16.msra.mxu0 %v5081_v20 }
  0xee   :  { %3830 = vmatprep.subr.bf16.mxu0 %v7103_v12 }
  0xf0   :  { %908 = vmatmul.mubr.f32.vlgmr.msra.gmra.mrb[0].mxu0 %v4820_v54 }
  0xf1   :  { %3832 = vmatpush1.bf16.msra.mxu0 %v7112_v59  ;;  %913 = vmatprep.mubr.f32.mxu0 %v7011_v25  ;;  %v1095_v59 = vld [vmem:[#allocation7 + $0x1d8] sm:$0xff] }
  0xf2   :  { %3834 = vmatprep.subr.bf16.mxu0 %v7115_v30  ;;  %v1228_v30 = vand.u32 4294901760, %v1095_v59 }
  0xf4   :  { %915 = vmatmul.mubr.f32.gmra.mrb[2].mxu0 %v4981_v57  ;;  %v5499_v9 = vsub.f32 %v1095_v59, %v1228_v30 }
  0xf5   :  { %3836 = vmatpush1.bf16.msra.mxu0 %v7120_v56  ;;  %1017 = vmatprep.mubr.f32.mxu0 %v7011_v25 }
  0xf6   :  { %3838 = vmatprep.subr.bf16.mxu0 %v7121_v1  ;;  %v1094_v1 = vld [vmem:[#allocation7 + $0x1d0] sm:$0xff]  ;;  %7154 = vst [vmem:[#allocation88_spill] sm:$0xff] %v5499_v9 }
  0xf9   :  { %3840 = vmatpush1.bf16.msra.mxu0 %v7125_v2  ;;  %v1230_v2 = vand.u32 4294901760, %v1094_v1 }
  0xfa   :  { %3842 = vmatprep.subr.bf16.mxu0 %v7126_v29  ;;  %v5466_v29 = vpack.c.bf16 %v1228_v30, %v1224_v45 }
  0xfc   :  { %7148 = vst [vmem:[#allocation31_spill] sm:$0xff] %v5466_v29 }
  0xfd   :  { %3844 = vmatpush1.bf16.msra.mxu0 %v7129_v41  ;;  %v5468_v41 = vsub.f32 %v1085_v46, %v1208_v32  ;;  %v1238_v46 = vand.u32 4294901760, %v1098_v50 }
  0xfe   :  { %3846 = vmatprep.subr.bf16.mxu0 %v7130_v49  ;;  %v5470_v49 = vsub.f32 %v1087_v6, %v1212_v61  ;;  %v6783_v6 = vand.u32 4294901760, %v5113_v22  ;;  %v7151_v61 = vld [vmem:[#allocation37_spill] sm:$0xff] }
 0x101   :  { %3848 = vmatpush1.bf16.msra.mxu0 %v7133_v38  ;;  %v5472_v38 = vpack.c.bf16 %v1230_v2, %v1226_v34 }
 0x102   :  { %3850 = vmatprep.subr.bf16.mxu0 %v7134_v18  ;;  %v1097_v18 = vld [vmem:[#allocation7 + $0x1e8] sm:$0xff] }
 0x103   :  { %7149 = vst [vmem:[#allocation34_spill] sm:$0xff] %v5472_v38 }
 0x105   :  { %3852 = vmatpush1.bf16.msra.mxu0 %v7136_v23  ;;  %v1099_v23 = vld [vmem:[#allocation7 + $0x1f8] sm:$0xff] }
 0x106   :  { %3854 = vmatprep.subr.bf16.mxu0 %v7137_v36  ;;  %v5474_v36 = vsub.f32 %v1084_v10, %v1210_v5  ;;  %v5488_v5 = vpack.c.bf16 %v1238_v46, %v1234_v15 }
 0x108   :  { %7152 = vst [vmem:[#allocation37_spill] sm:$0xff] %v5488_v5 }
 0x109   :  { %3856 = vmatpush1.bf16.msra.mxu0 %v7138_v39  ;;  %v5476_v39 = vsub.f32 %v1086_v51, %v1214_v40  ;;  %v1276_v40 = vsub.f32 %v5113_v22, %v6783_v6 }
 0x10a   :  { %3858 = vmatprep.subr.bf16.mxu0 %v7139_v7  ;;  %v1232_v7 = vand.u32 4294901760, %v1097_v18 }
 0x10d   :  { %3860 = vmatpush1.bf16.msra.mxu0 %v7140_v8  ;;  %v1236_v8 = vand.u32 4294901760, %v1099_v23 }
 0x10f   :  { %v5481_v32 = vpack.c.bf16 %v1236_v8, %v1232_v7 }
 0x110   :  { %1019 = vmatmul.mubr.f32.vlgmr.msra.gmra.mrb[0].mxu0 %v4820_v54  ;;  %v1216_v54 = vand.u32 4294901760, %v1089_v26 }
 0x111   :  { %1024 = vmatprep.mubr.f32.mxu0 %v7011_v25  ;;  %v1220_v25 = vand.u32 4294901760, %v1091_v14  ;;  %7150 = vst [vmem:[#allocation35_spill] sm:$0xff] %v5481_v32 }
 0x112   :  { %v5484_v10 = vsub.f32 %v1089_v26, %v1216_v54  ;;  %v5502_v26 = vsub.f32 %v1092_v3, %v1226_v34 }
 0x113   :  { %v5460_v12 = vpack.c.bf16 %v1220_v25, %v1216_v54  ;;  %v5486_v51 = vsub.f32 %v1091_v14, %v1220_v25  ;;  %v5504_v14 = vsub.f32 %v1094_v1, %v1230_v2  ;;  %v5506_v54 = vsub.f32 %v1097_v18, %v1232_v7  ;;  %v7160_v1 = vld [vmem:[#allocation38_spill] sm:$0xff]  ;;  %v7161_v2 = vld [vmem:[#allocation40_spill] sm:$0xff] }
 0x114   :  { %1026 = vmatmul.mubr.f32.gmra.mrb[2].mxu0 %v4981_v57  ;;  %v1090_v57 = vld [vmem:[#allocation7 + $0x1b0] sm:$0xff]  ;;  %v5508_v25 = vsub.f32 %v1099_v23, %v1236_v8  ;;  %v6784_v34 = vand.u32 4294901760, %v7160_v1  ;;  %v6785_v18 = vand.u32 4294901760, %v7161_v2 }
 0x115   :  { %v1222_v20 = vand.u32 4294901760, %v1090_v57  ;;  %7146 = vst [vmem:[#allocation27_spill] sm:$0xff] %v5460_v12  ;;  %3914 = vmatprep.subr.bf16.mxu1 %v5460_v12  ;;  %v5497_v12 = vsub.f32 %v1093_v4, %v1224_v45  ;;  %7155 = vst [vmem:[#allocation89_spill] sm:$0xff] %v5504_v14  ;;  %v118_v45 = vlaneseq  ;;  %v116_v23 = vld [vmem:[%s6637_s2] sm:$0x3] }
 0x116   :  { %7156 = vst [vmem:[#allocation90_spill] sm:$0xff] %v5508_v25 }
 0x117   :  { %v5462_v56 = vpack.c.bf16 %v1222_v20, %v1218_v27  ;;  %v5518_v30 = vshrl.u32 %v118_v45, 7 }
 0x119   :  { %7147 = vst [vmem:[#allocation28_spill] sm:$0xff] %v5462_v56  ;;  %3916 = vmatpush1.bf16.msra.mxu1 %v5462_v56  ;;  %v6782_v56 = vand.u32 4294901760, %v7151_v61  ;;  %7159 = vst [vmem:[#allocation93_spill] sm:$0xff] %v5518_v30  ;;  %v6781_v3 = vsub.s32 0, %v5518_v30  ;;  %v6788_v7 = vsub.s32 1, %v5518_v30 }
 0x11a   :  { %3918 = vmatprep.subr.bf16.mxu1 %v5466_v29  ;;  %v5493_v29 = vsub.f32 %v1088_v53, %v1218_v27  ;;  %v5511_v53 = vsub.f32 %v1096_v31, %v1234_v15  ;;  %v1277_v27 = vand.u32 4294901760, %v1276_v40  ;;  %v1282_v31 = vsub.f32 %v7160_v1, %v6784_v34  ;;  %v7162_v15 = vld [vmem:[#allocation42_spill] sm:$0xff] }
 0x11b   :  { %v121_v8 = vrot.slane %v116_v23, %v6781_v3  ;;  %v125_v40 = vrot.slane %v116_v23, %v6788_v7 }
 0x11c   :  { %7157 = vst [vmem:[#allocation91_spill] sm:$0xff] %v5511_v53  ;;  %v1283_v6 = vand.u32 4294901760, %v1282_v31  ;;  %v7164_v31 = vand.u32 4294901760, %v5136_v33 }
 0x11d   :  { %3920 = vmatpush1.bf16.msra.mxu1 %v5472_v38  ;;  %v5495_v38 = vsub.f32 %v1090_v57, %v1222_v20  ;;  %v5513_v57 = vsub.f32 %v1098_v50, %v1238_v46  ;;  %v1288_v20 = vsub.f32 %v7151_v61, %v6782_v56  ;;  %v1294_v50 = vsub.f32 %v7161_v2, %v6785_v18 }
 0x11e   :  { %3922 = vmatprep.subr.bf16.mxu1 %v5481_v32  ;;  %v6793_v46 = vand.u32 4294901760, %v7162_v15 }
 0x11f   :  { %7153 = vst [vmem:[#allocation87_spill] sm:$0xff] %v5495_v38  ;;  %7158 = vst [vmem:[#allocation92_spill] sm:$0xff] %v5513_v57  ;;  %v1289_v4 = vand.u32 4294901760, %v1288_v20  ;;  %v1295_v34 = vand.u32 4294901760, %v1294_v50  ;;  %v1318_v50 = vsub.f32 %v5136_v33, %v7164_v31 }
 0x120   :  { %v1300_v18 = vsub.f32 %v7162_v15, %v6793_v46 }
 0x121   :  { %3924 = vmatpush1.bf16.msra.mxu1 %v5488_v5  ;;  %v3925_v59 = vpack.c.bf16 %v1289_v4, %v1277_v27  ;;  %v7163_v27 = vld [vmem:[#allocation43_spill] sm:$0xff]  ;;  %v6803_v4 = vand.u32 4294901760, %v5134_v28 }
 0x122   :  { %v6798_v20 = vand.u32 4294901760, %v7163_v27  ;;  %v1301_v13 = vand.u32 4294901760, %v1300_v18  ;;  %v7171_v18 = vld [vmem:[#allocation50_spill] sm:$0xff] }
 0x123   :  { %3926 = vmatprep.subr.bf16.mxu1 %v3925_v59  ;;  %v1306_v45 = vsub.f32 %v5134_v28, %v6803_v4  ;;  %v7167_v4 = vand.u32 4294901760, %v5138_v11 }
 0x124   :  { %v1312_v23 = vsub.f32 %v7163_v27, %v6798_v20  ;;  %v3927_v20 = vpack.c.bf16 %v1295_v34, %v1283_v6  ;;  %v7170_v34 = vand.u32 4294901760, %v5144_v42 }
 0x125   :  { %v1307_v24 = vand.u32 4294901760, %v1306_v45 }
 0x126   :  { %v1313_v21 = vand.u32 4294901760, %v1312_v23  ;;  %v7173_v23 = vld [vmem:[#allocation51_spill] sm:$0xff] }
 0x127   :  { %v7180_v47 = vand.u32 4294901760, %v7173_v23 }
 0x1e3   :  { %v1020_v59 = vpop.f32.mrb[0].mxu0 }
 0x1e4   :  { %v4437_v3 = vadd.f32 %v1020_v59, %v121_v8  ;;  %v1022_v56 = vpop.f32.mrb[1].mxu0 }
 0x1e5   :  { %v4438_v5 = vadd.f32 %v1022_v56, %v125_v40 }
 0x1e6   :  { %v1032_v30 = vmax.f32 %v4437_v3, 0.0 }
 0x1e7   :  { %v1033_v59 = vmax.f32 %v4438_v5, 0.0  ;;  %v1027_v32 = vpop.f32.mrb[2].mxu0  ;;  %v1324_v5 = vsub.f32 %v5138_v11, %v7167_v4  ;;  %v7187_v11 = vld [vmem:[#allocation60_spill] sm:$0xff] }
 0x1e8   :  { %v5555_v56 = vand.u32 4294901760, %v1032_v30  ;;  %v4439_v16 = vadd.f32 %v1027_v32, %v121_v8  ;;  %v1029_v0 = vpop.f32.mrb[3].mxu0  ;;  %v7176_v8 = vand.u32 4294901760, %v5148_v44 }
 0x1e9   :  { %v5557_v7 = vand.u32 4294901760, %v1033_v59  ;;  %v4440_v3 = vadd.f32 %v1029_v0, %v125_v40  ;;  %v1336_v0 = vsub.f32 %v5144_v42, %v7170_v34  ;;  %v1325_v62 = vand.u32 4294901760, %v1324_v5 }
 0x1ea   :  { %7165 = vst [vmem:[#allocation38_spill] sm:$0xff] %v5555_v56  ;;  %v5563_v19 = vsub.f32 %v1032_v30, %v5555_v56  ;;  %v1034_v31 = vmax.f32 %v4439_v16, 0.0  ;;  %v1319_v30 = vand.u32 4294901760, %v1318_v50  ;;  %v1330_v58 = vsub.f32 %v5148_v44, %v7176_v8  ;;  %v7177_v50 = vld [vmem:[#allocation53_spill] sm:$0xff] }
 0x1eb   :  { %7166 = vst [vmem:[#allocation40_spill] sm:$0xff] %v5557_v7  ;;  %v5567_v32 = vsub.f32 %v1033_v59, %v5557_v7  ;;  %v1035_v6 = vmax.f32 %v4440_v3, 0.0  ;;  %v3929_v59 = vpack.c.bf16 %v1313_v21, %v1301_v13  ;;  %v1337_v13 = vand.u32 4294901760, %v1336_v0 }
 0x1ec   :  { %7168 = vst [vmem:[#allocation42_spill] sm:$0xff] %v5563_v19  ;;  %v5573_v40 = vand.u32 4294901760, %v1034_v31  ;;  %v6814_v4 = vand.u32 4294901760, %v5563_v19  ;;  %v7179_v5 = vand.u32 4294901760, %v7171_v18  ;;  %v1348_v8 = vsub.f32 %v7173_v23, %v7180_v47  ;;  %v7184_v23 = vld [vmem:[#allocation56_spill] sm:$0xff] }
 0x1ed   :  { %7169 = vst [vmem:[#allocation43_spill] sm:$0xff] %v5567_v32  ;;  %v5577_v45 = vand.u32 4294901760, %v1035_v6  ;;  %v6823_v46 = vand.u32 4294901760, %v5567_v32  ;;  %v7185_v42 = vand.u32 4294901760, %v7181_v52 }
 0x1ee   :  { %7172 = vst [vmem:[#allocation94_spill] sm:$0xff] %v5573_v40  ;;  %v5581_v3 = vsub.f32 %v1034_v31, %v5573_v40  ;;  %v1249_v34 = vsub.f32 %v5563_v19, %v6814_v4  ;;  %v1342_v31 = vsub.f32 %v7171_v18, %v7179_v5  ;;  %v1331_v18 = vand.u32 4294901760, %v1330_v58 }
 0x1ef   :  { %7174 = vst [vmem:[#allocation95_spill] sm:$0xff] %v5577_v45  ;;  %v5591_v16 = vsub.f32 %v1035_v6, %v5577_v45  ;;  %v1243_v21 = vsub.f32 %v5567_v32, %v6823_v46  ;;  %v7182_v40 = vand.u32 4294901760, %v7177_v50  ;;  %v1354_v58 = vsub.f32 %v7181_v52, %v7185_v42 }
 0x1f0   :  { %7175 = vst [vmem:[#allocation96_spill] sm:$0xff] %v5581_v3  ;;  %v6832_v4 = vand.u32 4294901760, %v5581_v3  ;;  %v1250_v32 = vand.u32 4294901760, %v1249_v34  ;;  %v1343_v6 = vand.u32 4294901760, %v1342_v31  ;;  %v3931_v34 = vpack.c.bf16 %v1319_v30, %v1307_v24 }
 0x1f1   :  { %7178 = vst [vmem:[#allocation97_spill] sm:$0xff] %v5591_v16  ;;  %v1244_v19 = vand.u32 4294901760, %v1243_v21  ;;  %v6838_v44 = vand.u32 4294901760, %v5591_v16  ;;  %v1360_v47 = vsub.f32 %v7177_v50, %v7182_v40  ;;  %v7188_v50 = vand.u32 4294901760, %v5173_v35 }
 0x1f2   :  { %v1265_v5 = vsub.f32 %v5581_v3, %v6832_v4  ;;  %v7186_v4 = vld [vmem:[#allocation59_spill] sm:$0xff]  ;;  %v7190_v24 = vand.u32 4294901760, %v5184_v17  ;;  %v3933_v30 = vpack.c.bf16 %v1337_v13, %v1325_v62  ;;  %v1349_v3 = vand.u32 4294901760, %v1348_v8  ;;  %v7195_v13 = vld [vmem:[#allocation61_spill] sm:$0xff]  ;;  %v7200_v8 = vld [vmem:[#allocation68_spill] sm:$0xff] }
 0x1f3   :  { %1245 = vmatprep.mubr.f32.mxu1 %v1244_v19  ;;  %v1259_v21 = vsub.f32 %v5591_v16, %v6838_v44  ;;  %v1366_v31 = vsub.f32 %v5173_v35, %v7188_v50  ;;  %v7189_v44 = vand.u32 4294901760, %v5175_v48  ;;  %v1361_v46 = vand.u32 4294901760, %v1360_v47 }
 0x1f4   :  { %1251 = vmatmul.mubr.f32.vlgmr.msra.gmra.mrb[0].mxu1 %v1250_v32  ;;  %v1384_v32 = vsub.f32 %v5184_v17, %v7190_v24  ;;  %v1266_v42 = vand.u32 4294901760, %v1265_v5  ;;  %v7192_v50 = vand.u32 4294901760, %v7184_v23  ;;  %v1355_v5 = vand.u32 4294901760, %v1354_v58 }
 0x1f5   :  { %3928 = vmatpush1.bf16.msra.mxu1 %v3927_v20  ;;  %v1260_v19 = vand.u32 4294901760, %v1259_v21  ;;  %v1372_v0 = vsub.f32 %v5175_v48, %v7189_v44  ;;  %v3935_v20 = vpack.c.bf16 %v1343_v6, %v1331_v18  ;;  %v7191_v21 = vand.u32 4294901760, %v7183_v37  ;;  %v7196_v18 = vld [vmem:[#allocation62_spill] sm:$0xff] }
 0x1f6   :  { %3930 = vmatprep.subr.bf16.mxu1 %v3929_v59  ;;  %v1390_v16 = vsub.f32 %v7184_v23, %v7192_v50  ;;  %v7193_v44 = vand.u32 4294901760, %v7186_v4  ;;  %v7194_v59 = vand.u32 4294901760, %v7187_v11  ;;  %v1367_v47 = vand.u32 4294901760, %v1366_v31  ;;  %v7197_v50 = vld [vmem:[#allocation63_spill] sm:$0xff] }
 0x1f7   :  { %1261 = vmatprep.mubr.f32.mxu1 %v1260_v19  ;;  %v1378_v40 = vsub.f32 %v7183_v37, %v7191_v21  ;;  %v1373_v19 = vand.u32 4294901760, %v1372_v0  ;;  %v1385_v21 = vand.u32 4294901760, %v1384_v32  ;;  %v6852_v23 = vand.u32 4294901760, %v7197_v50  ;;  %v7203_v32 = vld [vmem:[#allocation70_spill] sm:$0xff] }
 0x1f8   :  { %1267 = vmatmul.mubr.f32.gmra.mrb[2].mxu1 %v1266_v42  ;;  %v1396_v24 = vsub.f32 %v7186_v4, %v7193_v44  ;;  %v1408_v62 = vsub.f32 %v7187_v11, %v7194_v59  ;;  %v3937_v42 = vpack.c.bf16 %v1361_v46, %v1349_v3  ;;  %v7198_v44 = vld [vmem:[#allocation65_spill] sm:$0xff]  ;;  %v1391_v17 = vand.u32 4294901760, %v1390_v16  ;;  %v7199_v59 = vld [vmem:[#allocation66_spill] sm:$0xff] }
 0x1f9   :  { %3932 = vmatpush1.bf16.msra.mxu1 %v3931_v34  ;;  %1658 = vmatprep.mubr.f32.mxu1 %v5557_v7  ;;  %v6851_v4 = vand.u32 4294901760, %v7198_v44  ;;  %v1379_v37 = vand.u32 4294901760, %v1378_v40  ;;  %v6856_v11 = vand.u32 4294901760, %v7199_v59  ;;  %v6858_v48 = vand.u32 4294901760, %v7200_v8 }
 0x1fa   :  { %3934 = vmatprep.subr.bf16.mxu1 %v3933_v30  ;;  %v1397_v6 = vand.u32 4294901760, %v1396_v24  ;;  %v1409_v34 = vand.u32 4294901760, %v1408_v62  ;;  %v7201_v7 = vand.u32 4294901760, %v7195_v13  ;;  %v7202_v0 = vand.u32 4294901760, %v7196_v18  ;;  %v7204_v24 = vld [vmem:[#allocation71_spill] sm:$0xff] }
 0x1fb   :  { %v3939_v3 = vpack.c.bf16 %v1367_v47, %v1355_v5  ;;  %v3941_v31 = vpack.c.bf16 %v1385_v21, %v1373_v19  ;;  %v1420_v16 = vsub.f32 %v7197_v50, %v6852_v23  ;;  %v1432_v40 = vsub.f32 %v7198_v44, %v6851_v4  ;;  %v7206_v4 = vld [vmem:[#allocation74_spill] sm:$0xff]  ;;  %v7207_v30 = vld [vmem:[#allocation75_spill] sm:$0xff] }
 0x1fc   :  { %v1402_v58 = vsub.f32 %v7195_v13, %v7201_v7  ;;  %v1414_v46 = vsub.f32 %v7196_v18, %v7202_v0  ;;  %v1426_v62 = vsub.f32 %v7199_v59, %v6856_v11  ;;  %v3943_v5 = vpack.c.bf16 %v1391_v17, %v1379_v37  ;;  %v7208_v7 = vld [vmem:[#allocation76_spill] sm:$0xff]  ;;  %v7213_v0 = vld [vmem:[#allocation79_spill] sm:$0xff] }
 0x1fd   :  { %3936 = vmatpush1.bf16.msra.mxu1 %v3935_v20  ;;  %v1438_v20 = vsub.f32 %v7200_v8, %v6858_v48  ;;  %v3945_v47 = vpack.c.bf16 %v1409_v34, %v1397_v6  ;;  %v1421_v18 = vand.u32 4294901760, %v1420_v16  ;;  %v1433_v11 = vand.u32 4294901760, %v1432_v40  ;;  %v7226_v8 = vld [vmem:[#allocation16_spill] sm:$0xff] }
 0x1fe   :  { %3938 = vmatprep.subr.bf16.mxu1 %v3937_v42  ;;  %v1403_v19 = vand.u32 4294901760, %v1402_v58  ;;  %v1415_v21 = vand.u32 4294901760, %v1414_v46  ;;  %v7205_v42 = vld [vmem:[#allocation72_spill] sm:$0xff]  ;;  %v7209_v59 = vand.u32 4294901760, %v7203_v32  ;;  %v7210_v17 = vand.u32 4294901760, %v7204_v24  ;;  %v7211_v58 = vld [vmem:[#allocation77_spill] sm:$0xff] }
 0x1ff   :  { %v1427_v6 = vand.u32 4294901760, %v1426_v62  ;;  %v1439_v34 = vand.u32 4294901760, %v1438_v20  ;;  %v6863_v46 = vand.u32 4294901760, %v7211_v58  ;;  %v7215_v40 = vand.u32 4294901760, %v7205_v42 }
 0x200   :  { %v1444_v48 = vsub.f32 %v7203_v32, %v7209_v59  ;;  %v1456_v37 = vsub.f32 %v7204_v24, %v7210_v17  ;;  %v3947_v44 = vpack.c.bf16 %v1415_v21, %v1403_v19  ;;  %v7216_v32 = vand.u32 4294901760, %v7206_v4 }
 0x201   :  { %3940 = vmatpush1.bf16.msra.mxu1 %v3939_v3  ;;  %v7212_v3 = vld [vmem:[#allocation78_spill] sm:$0xff]  ;;  %v1450_v59 = vsub.f32 %v7205_v42, %v7215_v40  ;;  %v7217_v62 = vand.u32 4294901760, %v7207_v30  ;;  %v7218_v23 = vand.u32 4294901760, %v7208_v7  ;;  %v3949_v21 = vpack.c.bf16 %v1433_v11, %v1421_v18  ;;  %v7222_v11 = vld [vmem:[#allocation81_spill] sm:$0xff] }
 0x202   :  { %3942 = vmatprep.subr.bf16.mxu1 %v3941_v31  ;;  %v7214_v31 = vld [vmem:[#allocation80_spill] sm:$0xff]  ;;  %v1462_v17 = vsub.f32 %v7206_v4, %v7216_v32  ;;  %v1445_v16 = vand.u32 4294901760, %v1444_v48  ;;  %v3951_v50 = vpack.c.bf16 %v1439_v34, %v1427_v6  ;;  %v1474_v40 = vsub.f32 %v7211_v58, %v6863_v46  ;;  %v7223_v18 = vld [vmem:[#allocation82_spill] sm:$0xff] }
 0x203   :  { %v1468_v20 = vsub.f32 %v7207_v30, %v7217_v62  ;;  %v1480_v19 = vsub.f32 %v7208_v7, %v7218_v23  ;;  %v7219_v42 = vand.u32 4294901760, %v7212_v3  ;;  %v7220_v4 = vand.u32 4294901760, %v7213_v0  ;;  %v7225_v7 = vld [vmem:[#allocation30_spill] sm:$0xff] }
 0x204   :  { %v7221_v30 = vand.u32 4294901760, %v7214_v31  ;;  %v1463_v6 = vand.u32 4294901760, %v1462_v17  ;;  %v6874_v24 = vand.u32 4294901760, %v7225_v7  ;;  %v6875_v13 = vand.u32 4294901760, %v7226_v8 }
 0x205   :  { %3944 = vmatpush1.bf16.msra.mxu1 %v3943_v5  ;;  %v1457_v5 = vand.u32 4294901760, %v1456_v37  ;;  %v1486_v32 = vsub.f32 %v7212_v3, %v7219_v42  ;;  %v1492_v62 = vsub.f32 %v7213_v0, %v7220_v4  ;;  %v1451_v37 = vand.u32 4294901760, %v1450_v59  ;;  %v7224_v42 = vld [vmem:[#allocation84_spill] sm:$0xff] }
 0x206   :  { %3946 = vmatprep.subr.bf16.mxu1 %v3945_v47  ;;  %v1504_v23 = vsub.f32 %v7214_v31, %v7221_v30  ;;  %v6887_v47 = vand.u32 4294901760, %v7223_v18  ;;  %v1469_v34 = vand.u32 4294901760, %v1468_v20  ;;  %v1481_v46 = vand.u32 4294901760, %v1480_v19  ;;  %v7227_v30 = vld [vmem:[#allocation85_spill] sm:$0xff] }
 0x207   :  { %v3953_v58 = vpack.c.bf16 %v1457_v5, %v1445_v16  ;;  %v6886_v3 = vand.u32 4294901760, %v7224_v42  ;;  %v1475_v4 = vand.u32 4294901760, %v1474_v40  ;;  %v1487_v0 = vand.u32 4294901760, %v1486_v32 }
 0x208   :  { %v6876_v31 = vand.u32 4294901760, %v7227_v30  ;;  %v1493_v48 = vand.u32 4294901760, %v1492_v62  ;;  %v1505_v35 = vand.u32 4294901760, %v1504_v23  ;;  %v1510_v16 = vsub.f32 %v7223_v18, %v6887_v47 }
 0x209   :  { %3948 = vmatpush1.bf16.msra.mxu1 %v3947_v44  ;;  %v7228_v44 = vand.u32 4294901760, %v7222_v11  ;;  %v3955_v17 = vpack.c.bf16 %v1463_v6, %v1451_v37  ;;  %v3957_v20 = vpack.c.bf16 %v1481_v46, %v1469_v34  ;;  %v1516_v19 = vsub.f32 %v7224_v42, %v6886_v3 }
 0x20a   :  { %3950 = vmatprep.subr.bf16.mxu1 %v3949_v21  ;;  %v1528_v21 = vsub.f32 %v7225_v7, %v6874_v24  ;;  %v6885_v5 = vand.u32 4294901760, %v5356_v63  ;;  %v6877_v40 = vand.u32 4294901760, %v5358_v43  ;;  %v1522_v32 = vsub.f32 %v7226_v8, %v6875_v13 }
 0x20b   :  { %v1498_v59 = vsub.f32 %v7222_v11, %v7228_v44  ;;  %v3961_v46 = vpack.c.bf16 %v1505_v35, %v1493_v48  ;;  %v1511_v23 = vand.u32 4294901760, %v1510_v16  ;;  %v6878_v37 = vand.u32 4294901760, %v5365_v60 }
 0x20c   :  { %v6879_v6 = vand.u32 4294901760, %v5367_v55  ;;  %v6880_v34 = vand.u32 4294901760, %v5468_v41  ;;  %v6883_v44 = vand.u32 4294901760, %v5470_v49  ;;  %v1517_v24 = vand.u32 4294901760, %v1516_v19 }
 0x20d   :  { %3952 = vmatpush1.bf16.msra.mxu1 %v3951_v50  ;;  %v1534_v50 = vsub.f32 %v7227_v30, %v6876_v31  ;;  %v1499_v62 = vand.u32 4294901760, %v1498_v59  ;;  %v1529_v13 = vand.u32 4294901760, %v1528_v21  ;;  %v1540_v31 = vsub.f32 %v5356_v63, %v6885_v5 }
 0x20e   :  { %3954 = vmatprep.subr.bf16.mxu1 %v3953_v58  ;;  %v3959_v58 = vpack.c.bf16 %v1487_v0, %v1475_v4  ;;  %v1552_v35 = vsub.f32 %v5358_v43, %v6877_v40  ;;  %v1523_v0 = vand.u32 4294901760, %v1522_v32  ;;  %v6881_v4 = vand.u32 4294901760, %v5474_v36 }
 0x20f   :  { %v1535_v48 = vand.u32 4294901760, %v1534_v50  ;;  %v6882_v59 = vand.u32 4294901760, %v5476_v39  ;;  %v3963_v16 = vpack.c.bf16 %v1511_v23, %v1499_v62  ;;  %v1546_v19 = vsub.f32 %v5365_v60, %v6878_v37 }
 0x210   :  { %v1558_v21 = vsub.f32 %v5367_v55, %v6879_v6  ;;  %v1564_v32 = vsub.f32 %v5468_v41, %v6880_v34  ;;  %v1576_v50 = vsub.f32 %v5470_v49, %v6883_v44  ;;  %v3965_v62 = vpack.c.bf16 %v1529_v13, %v1517_v24 }
 0x211   :  { %3956 = vmatpush1.bf16.msra.mxu1 %v3955_v17  ;;  %v6884_v17 = vand.u32 4294901760, %v5484_v10  ;;  %v1541_v23 = vand.u32 4294901760, %v1540_v31  ;;  %v3967_v40 = vpack.c.bf16 %v1535_v48, %v1523_v0  ;;  %v1570_v37 = vsub.f32 %v5474_v36, %v6881_v4 }
 0x212   :  { %3958 = vmatprep.subr.bf16.mxu1 %v3957_v20  ;;  %v6888_v20 = vand.u32 4294901760, %v5486_v51  ;;  %v1582_v6 = vsub.f32 %v5476_v39, %v6882_v59  ;;  %v6898_v13 = vand.u32 4294901760, %v5493_v29  ;;  %v6897_v24 = vand.u32 4294901760, %v5495_v38 }
 0x213   :  { %v1588_v34 = vsub.f32 %v5484_v10, %v6884_v17  ;;  %v1547_v31 = vand.u32 4294901760, %v1546_v19  ;;  %v1565_v0 = vand.u32 4294901760, %v1564_v32  ;;  %v1577_v48 = vand.u32 4294901760, %v1576_v50 }
 0x214   :  { %v6896_v59 = vand.u32 4294901760, %v5497_v12  ;;  %v6889_v44 = vand.u32 4294901760, %v5499_v9  ;;  %v1571_v17 = vand.u32 4294901760, %v1570_v37  ;;  %v1583_v5 = vand.u32 4294901760, %v1582_v6 }
 0x215   :  { %3960 = vmatpush1.bf16.msra.mxu1 %v3959_v58  ;;  %v1553_v58 = vand.u32 4294901760, %v1552_v35  ;;  %v1559_v35 = vand.u32 4294901760, %v1558_v21  ;;  %v1589_v3 = vand.u32 4294901760, %v1588_v34  ;;  %v3973_v21 = vpack.c.bf16 %v1577_v48, %v1565_v0 }
 0x216   :  { %3962 = vmatprep.subr.bf16.mxu1 %v3961_v46  ;;  %v1600_v46 = vsub.f32 %v5486_v51, %v6888_v20  ;;  %v1594_v20 = vsub.f32 %v5493_v29, %v6898_v13  ;;  %v6895_v32 = vand.u32 4294901760, %v5502_v26  ;;  %v6891_v50 = vand.u32 4294901760, %v5504_v14  ;;  %v7249_v13 = vld [vmem:[#allocation68_spill] sm:$0xff] }
 0x217   :  { %v3969_v4 = vpack.c.bf16 %v1553_v58, %v1541_v23  ;;  %v3971_v19 = vpack.c.bf16 %v1559_v35, %v1547_v31  ;;  %v1612_v37 = vsub.f32 %v5497_v12, %v6896_v59  ;;  %v1624_v6 = vsub.f32 %v5499_v9, %v6889_v44  ;;  %v7247_v59 = vld [vmem:[#allocation65_spill] sm:$0xff] }
 0x218   :  { %v1601_v47 = vand.u32 4294901760, %v1600_v46  ;;  %v6890_v34 = vand.u32 4294901760, %v5506_v54  ;;  %v1595_v58 = vand.u32 4294901760, %v1594_v20  ;;  %v1630_v31 = vsub.f32 %v5504_v14, %v6891_v50 }
 0x219   :  { %3964 = vmatpush1.bf16.msra.mxu1 %v3963_v16  ;;  %v1606_v16 = vsub.f32 %v5495_v38, %v6897_v24  ;;  %v6894_v35 = vand.u32 4294901760, %v5511_v53  ;;  %v6893_v0 = vand.u32 4294901760, %v5513_v57  ;;  %v1613_v48 = vand.u32 4294901760, %v1612_v37 }
 0x21a   :  { %3966 = vmatprep.subr.bf16.mxu1 %v3965_v62  ;;  %v6892_v62 = vand.u32 4294901760, %v5508_v25  ;;  %v3977_v23 = vpack.c.bf16 %v1601_v47, %v1589_v3  ;;  %v1625_v44 = vand.u32 4294901760, %v1624_v6  ;;  %v1636_v3 = vsub.f32 %v5506_v54, %v6890_v34 }
 0x21b   :  { %v1607_v46 = vand.u32 4294901760, %v1606_v16  ;;  %v1631_v20 = vand.u32 4294901760, %v1630_v31  ;;  %v1642_v16 = vsub.f32 %v5511_v53, %v6894_v35  ;;  %v7231_v31 = vld [vmem:[#allocation94_spill] sm:$0xff] }
 0x21c   :  { %v1648_v47 = vsub.f32 %v5508_v25, %v6892_v62  ;;  %v1637_v37 = vand.u32 4294901760, %v1636_v3  ;;  %v7233_v3 = vld [vmem:[#allocation49_spill] sm:$0xff]  ;;  %v7245_v35 = vld [vmem:[#allocation62_spill] sm:$0xff] }
 0x21d   :  { %3968 = vmatpush1.bf16.msra.mxu1 %v3967_v40  ;;  %v3975_v40 = vpack.c.bf16 %v1583_v5, %v1571_v17  ;;  %v3979_v5 = vpack.c.bf16 %v1607_v46, %v1595_v58  ;;  %v1643_v50 = vand.u32 4294901760, %v1642_v16  ;;  %v3989_v46 = vpack.c.bf16 %v7151_v61, %v5113_v22 }
 0x21e   :  { %3970 = vmatprep.subr.bf16.mxu1 %v3969_v4  ;;  %v1618_v4 = vsub.f32 %v5502_v26, %v6895_v32  ;;  %v1649_v6 = vand.u32 4294901760, %v1648_v47  ;;  %v7234_v47 = vld [vmem:[#allocation50_spill] sm:$0xff] }
 0x220   :  { %v1619_v17 = vand.u32 4294901760, %v1618_v4  ;;  %v3991_v4 = vpack.c.bf16 %v7161_v2, %v7160_v1 }
 0x221   :  { %3972 = vmatpush1.bf16.msra.mxu1 %v3971_v19  ;;  %v1654_v19 = vsub.f32 %v5513_v57, %v6893_v0 }
 0x222   :  { %3974 = vmatprep.subr.bf16.mxu1 %v3973_v21  ;;  %v3981_v21 = vpack.c.bf16 %v1625_v44, %v1613_v48  ;;  %v3983_v34 = vpack.c.bf16 %v1631_v20, %v1619_v17  ;;  %v3993_v44 = vpack.c.bf16 %v7163_v27, %v7162_v15  ;;  %v7232_v48 = vld [vmem:[#allocation43_spill] sm:$0xff]  ;;  %v7236_v20 = vld [vmem:[#allocation53_spill] sm:$0xff] }
 0x223   :  { %v1655_v62 = vand.u32 4294901760, %v1654_v19  ;;  %v7235_v17 = vld [vmem:[#allocation51_spill] sm:$0xff]  ;;  %v7237_v19 = vld [vmem:[#allocation29_spill] sm:$0xff] }
 0x224   :  { %v4001_v16 = vpack.c.bf16 %v7236_v20, %v7235_v17 }
 0x225   :  { %3976 = vmatpush1.bf16.msra.mxu1 %v3975_v40  ;;  %v3985_v40 = vpack.c.bf16 %v1649_v6, %v1637_v37  ;;  %v3987_v58 = vpack.c.bf16 %v1655_v62, %v1643_v50  ;;  %v3995_v50 = vpack.c.bf16 %v5136_v33, %v5134_v28  ;;  %v7230_v62 = vld [vmem:[#allocation47_spill] sm:$0xff]  ;;  %v7239_v6 = vld [vmem:[#allocation32_spill] sm:$0xff] }
 0x226   :  { %3978 = vmatprep.subr.bf16.mxu1 %v3977_v23  ;;  %v7238_v37 = vld [vmem:[#allocation55_spill] sm:$0xff] }
 0x229   :  { %3980 = vmatpush1.bf16.msra.mxu1 %v3979_v5  ;;  %v3999_v5 = vpack.c.bf16 %v7234_v47, %v7233_v3 }
 0x22a   :  { %3982 = vmatprep.subr.bf16.mxu1 %v3981_v21  ;;  %v4003_v21 = vpack.c.bf16 %v7237_v19, %v7181_v52 }
 0x22d   :  { %3984 = vmatpush1.bf16.msra.mxu1 %v3983_v34  ;;  %v7229_v34 = vld [vmem:[#allocation45_spill] sm:$0xff] }
 0x22e   :  { %3986 = vmatprep.subr.bf16.mxu1 %v3985_v40  ;;  %v3997_v23 = vpack.c.bf16 %v7230_v62, %v7229_v34  ;;  %v4005_v40 = vpack.c.bf16 %v7239_v6, %v7238_v37 }
 0x231   :  { %3988 = vmatpush1.bf16.msra.mxu1 %v3987_v58  ;;  %v7240_v58 = vld [vmem:[#allocation33_spill] sm:$0xff] }
 0x232   :  { %3990 = vmatprep.subr.bf16.mxu1 %v3989_v46  ;;  %v7241_v46 = vld [vmem:[#allocation56_spill] sm:$0xff] }
 0x234   :  { %1660 = vmatmul.mubr.f32.vlgmr.msra.gmra.mrb[0].mxu1 %v5555_v56 }
 0x235   :  { %1666 = vmatprep.mubr.f32.mxu1 %v5577_v45  ;;  %3992 = vmatpush1.bf16.msra.mxu1 %v3991_v4  ;;  %v4007_v4 = vpack.c.bf16 %v7241_v46, %v7240_v58  ;;  %v7251_v45 = vld [vmem:[#allocation71_spill] sm:$0xff]  ;;  %v7253_v46 = vld [vmem:[#allocation74_spill] sm:$0xff] }
 0x236   :  { %3994 = vmatprep.subr.bf16.mxu1 %v3993_v44  ;;  %v7242_v44 = vld [vmem:[#allocation59_spill] sm:$0xff] }
 0x238   :  { %1668 = vmatmul.mubr.f32.gmra.mrb[2].mxu1 %v7231_v31 }
 0x239   :  { %3996 = vmatpush1.bf16.msra.mxu1 %v3995_v50  ;;  %1868 = vmatprep.mubr.f32.mxu1 %v7232_v48  ;;  %v7243_v50 = vld [vmem:[#allocation60_spill] sm:$0xff] }
 0x23a   :  { %3998 = vmatprep.subr.bf16.mxu1 %v3997_v23  ;;  %v4009_v0 = vpack.c.bf16 %v7243_v50, %v7242_v44  ;;  %v7244_v23 = vld [vmem:[#allocation61_spill] sm:$0xff]  ;;  %v7255_v44 = vld [vmem:[#allocation76_spill] sm:$0xff] }
 0x23b   :  { %v4011_v32 = vpack.c.bf16 %v7245_v35, %v7244_v23  ;;  %v7257_v23 = vld [vmem:[#allocation78_spill] sm:$0xff] }
 0x23d   :  { %4000 = vmatpush1.bf16.msra.mxu1 %v3999_v5  ;;  %v7246_v5 = vld [vmem:[#allocation63_spill] sm:$0xff] }
 0x23e   :  { %4002 = vmatprep.subr.bf16.mxu1 %v4001_v16  ;;  %v4013_v24 = vpack.c.bf16 %v7247_v59, %v7246_v5  ;;  %v7248_v16 = vld [vmem:[#allocation66_spill] sm:$0xff]  ;;  %v7259_v5 = vld [vmem:[#allocation80_spill] sm:$0xff] }
 0x23f   :  { %v4015_v31 = vpack.c.bf16 %v7249_v13, %v7248_v16 }
 0x241   :  { %4004 = vmatpush1.bf16.msra.mxu1 %v4003_v21  ;;  %v7250_v21 = vld [vmem:[#allocation70_spill] sm:$0xff] }
 0x242   :  { %4006 = vmatprep.subr.bf16.mxu1 %v4005_v40  ;;  %v4017_v56 = vpack.c.bf16 %v7251_v45, %v7250_v21  ;;  %v7252_v40 = vld [vmem:[#allocation72_spill] sm:$0xff] }
 0x243   :  { %v4019_v50 = vpack.c.bf16 %v7253_v46, %v7252_v40 }
 0x245   :  { %4008 = vmatpush1.bf16.msra.mxu1 %v4007_v4  ;;  %v7254_v4 = vld [vmem:[#allocation75_spill] sm:$0xff] }
 0x246   :  { %4010 = vmatprep.subr.bf16.mxu1 %v4009_v0  ;;  %v4021_v35 = vpack.c.bf16 %v7255_v44, %v7254_v4  ;;  %v7256_v0 = vld [vmem:[#allocation77_spill] sm:$0xff] }
 0x247   :  { %v4023_v59 = vpack.c.bf16 %v7257_v23, %v7256_v0 }
 0x249   :  { %4012 = vmatpush1.bf16.msra.mxu1 %v4011_v32  ;;  %v7258_v32 = vld [vmem:[#allocation79_spill] sm:$0xff] }
 0x24a   :  { %4014 = vmatprep.subr.bf16.mxu1 %v4013_v24  ;;  %v4025_v13 = vpack.c.bf16 %v7259_v5, %v7258_v32  ;;  %v4027_v24 = vpack.c.bf16 %v7223_v18, %v7222_v11 }
 0x24d   :  { %4016 = vmatpush1.bf16.msra.mxu1 %v4015_v31  ;;  %v4029_v31 = vpack.c.bf16 %v7225_v7, %v7224_v42 }
 0x24e   :  { %4018 = vmatprep.subr.bf16.mxu1 %v4017_v56  ;;  %v4031_v56 = vpack.c.bf16 %v7227_v30, %v7226_v8 }
 0x251   :  { %4020 = vmatpush1.bf16.msra.mxu1 %v4019_v50  ;;  %v4033_v50 = vpack.c.bf16 %v5358_v43, %v5356_v63 }
 0x252   :  { %4022 = vmatprep.subr.bf16.mxu1 %v4021_v35  ;;  %v4035_v35 = vpack.c.bf16 %v5367_v55, %v5365_v60 }
 0x255   :  { %4024 = vmatpush1.bf16.msra.mxu1 %v4023_v59  ;;  %v4037_v59 = vpack.c.bf16 %v5470_v49, %v5468_v41 }
 0x256   :  { %4026 = vmatprep.subr.bf16.mxu1 %v4025_v13  ;;  %v4039_v13 = vpack.c.bf16 %v5476_v39, %v5474_v36 }
 0x259   :  { %4028 = vmatpush1.bf16.msra.mxu1 %v4027_v24  ;;  %v4041_v24 = vpack.c.bf16 %v5486_v51, %v5484_v10 }
 0x25a   :  { %4030 = vmatprep.subr.bf16.mxu1 %v4029_v31  ;;  %v4043_v31 = vpack.c.bf16 %v5495_v38, %v5493_v29  ;;  %v7262_v38 = vld [vmem:[#allocation97_spill] sm:$0xff] }
 0x25d   :  { %4032 = vmatpush1.bf16.msra.mxu1 %v4031_v56  ;;  %v4045_v56 = vpack.c.bf16 %v5499_v9, %v5497_v12  ;;  %v7264_v9 = vld [vmem:[#allocation41_spill] sm:$0xff] }
 0x25e   :  { %4034 = vmatprep.subr.bf16.mxu1 %v4033_v50  ;;  %v4047_v50 = vpack.c.bf16 %v5504_v14, %v5502_v26  ;;  %v7266_v14 = vld [vmem:[#allocation44_spill] sm:$0xff] }
 0x261   :  { %4036 = vmatpush1.bf16.msra.mxu1 %v4035_v35  ;;  %v4049_v35 = vpack.c.bf16 %v5508_v25, %v5506_v54  ;;  %v7275_v25 = vld [vmem:[#allocation69_spill] sm:$0xff] }
 0x262   :  { %4038 = vmatprep.subr.bf16.mxu1 %v4037_v59  ;;  %v4051_v59 = vpack.c.bf16 %v5513_v57, %v5511_v53  ;;  %v7268_v57 = vld [vmem:[#allocation46_spill] sm:$0xff] }
 0x263   :  { %v7272_v53 = vld [vmem:[#allocation58_spill] sm:$0xff] }
 0x265   :  { %4040 = vmatpush1.bf16.msra.mxu1 %v4039_v13  ;;  %v7260_v13 = vld [vmem:[#allocation36_spill] sm:$0xff] }
 0x266   :  { %4042 = vmatprep.subr.bf16.mxu1 %v4041_v24  ;;  %v7261_v24 = vld [vmem:[#allocation42_spill] sm:$0xff] }
 0x269   :  { %4044 = vmatpush1.bf16.msra.mxu1 %v4043_v31  ;;  %v7263_v31 = vld [vmem:[#allocation39_spill] sm:$0xff] }
 0x26a   :  { %4046 = vmatprep.subr.bf16.mxu1 %v4045_v56  ;;  %v7265_v56 = vld [vmem:[#allocation96_spill] sm:$0xff] }
 0x26d   :  { %4048 = vmatpush1.bf16.msra.mxu1 %v4047_v50  ;;  %v7267_v50 = vand.u32 4294901760, %v7232_v48  ;;  %v7277_v48 = vld [vmem:[#allocation15_spill] sm:$0xff] }
 0x26e   :  { %4050 = vmatprep.subr.bf16.mxu1 %v4049_v35  ;;  %v7269_v35 = vld [vmem:[#allocation48_spill] sm:$0xff] }
 0x271   :  { %4052 = vmatpush1.bf16.msra.mxu1 %v4051_v59  ;;  %v7270_v59 = vld [vmem:[#allocation52_spill] sm:$0xff] }
 0x272   :  { %4054 = vmatprep.subr.bf16.mxu1 %v7260_v13  ;;  %v7271_v13 = vld [vmem:[#allocation57_spill] sm:$0xff] }
 0x274   :  { %1871 = vmatmul.mubr.f32.vlgmr.msra.gmra.mrb[0].mxu1 %v7261_v24 }
 0x275   :  { %1878 = vmatprep.mubr.f32.mxu1 %v7262_v38  ;;  %4056 = vmatpush1.bf16.msra.mxu1 %v7263_v31  ;;  %v7273_v31 = vld [vmem:[#allocation64_spill] sm:$0xff] }
 0x276   :  { %4058 = vmatprep.subr.bf16.mxu1 %v7264_v9  ;;  %v7274_v9 = vld [vmem:[#allocation67_spill] sm:$0xff] }
 0x278   :  { %1881 = vmatmul.mubr.f32.gmra.mrb[2].mxu1 %v7265_v56 }
 0x279   :  { %4060 = vmatpush1.bf16.msra.mxu1 %v7266_v14  ;;  %2018 = vmatprep.mubr.f32.mxu1 %v7267_v50  ;;  %v7276_v14 = vld [vmem:[#allocation73_spill] sm:$0xff]  ;;  %v7278_v50 = vld [vmem:[#allocation83_spill] sm:$0xff] }
 0x27a   :  { %4062 = vmatprep.subr.bf16.mxu1 %v7268_v57  ;;  %v7279_v57 = vld [vmem:[#allocation17_spill] sm:$0xff] }
 0x27d   :  { %4064 = vmatpush1.bf16.msra.mxu1 %v7269_v35  ;;  %v7280_v35 = vld [vmem:[#allocation86_spill] sm:$0xff] }
 0x27e   :  { %4066 = vmatprep.subr.bf16.mxu1 %v7270_v59  ;;  %v7281_v59 = vld [vmem:[#allocation18_spill] sm:$0xff] }
 0x281   :  { %4068 = vmatpush1.bf16.msra.mxu1 %v7271_v13  ;;  %v7282_v13 = vld [vmem:[#allocation19_spill] sm:$0xff] }
 0x282   :  { %4070 = vmatprep.subr.bf16.mxu1 %v7272_v53  ;;  %v7283_v53 = vld [vmem:[#allocation20_spill] sm:$0xff] }
 0x285   :  { %4072 = vmatpush1.bf16.msra.mxu1 %v7273_v31  ;;  %v7284_v31 = vld [vmem:[#allocation21_spill] sm:$0xff] }
 0x286   :  { %4074 = vmatprep.subr.bf16.mxu1 %v7274_v9  ;;  %v7285_v9 = vld [vmem:[#allocation22_spill] sm:$0xff] }
 0x289   :  { %4076 = vmatpush1.bf16.msra.mxu1 %v7275_v25  ;;  %v7286_v25 = vld [vmem:[#allocation23_spill] sm:$0xff] }
 0x28a   :  { %4078 = vmatprep.subr.bf16.mxu1 %v7276_v14  ;;  %v7287_v14 = vld [vmem:[#allocation24_spill] sm:$0xff] }
 0x28d   :  { %4080 = vmatpush1.bf16.msra.mxu1 %v7277_v48  ;;  %v7288_v48 = vld [vmem:[#allocation25_spill] sm:$0xff] }
 0x28e   :  { %4082 = vmatprep.subr.bf16.mxu1 %v7278_v50  ;;  %v7289_v50 = vld [vmem:[#allocation26_spill] sm:$0xff] }
 0x291   :  { %4084 = vmatpush1.bf16.msra.mxu1 %v7279_v57  ;;  %v7290_v57 = vld [vmem:[#allocation27_spill] sm:$0xff] }
 0x292   :  { %4086 = vmatprep.subr.bf16.mxu1 %v7280_v35  ;;  %v7291_v35 = vld [vmem:[#allocation28_spill] sm:$0xff] }
 0x295   :  { %4088 = vmatpush1.bf16.msra.mxu1 %v7281_v59  ;;  %v7292_v59 = vld [vmem:[#allocation31_spill] sm:$0xff] }
 0x296   :  { %4090 = vmatprep.subr.bf16.mxu1 %v7282_v13  ;;  %v7293_v13 = vld [vmem:[#allocation34_spill] sm:$0xff] }
 0x299   :  { %4092 = vmatpush1.bf16.msra.mxu1 %v7283_v53  ;;  %v7294_v53 = vld [vmem:[#allocation35_spill] sm:$0xff] }
 0x29a   :  { %4094 = vmatprep.subr.bf16.mxu1 %v7284_v31 }
 0x29d   :  { %4096 = vmatpush1.bf16.msra.mxu1 %v7285_v9  ;;  %v7295_v9 = vand.u32 4294901760, %v5113_v22  ;;  %v7303_v22 = vand.u32 4294901760, %v7262_v38  ;;  %v7310_v38 = vand.u32 4294901760, %v7234_v47  ;;  %v2463_v47 = vld [vmem:[#allocation8 + $0x8] sm:$0xff] }
 0x29e   :  { %4098 = vmatprep.subr.bf16.mxu1 %v7286_v25  ;;  %v7296_v25 = vand.u32 4294901760, %v7151_v61  ;;  %v7305_v61 = vand.u32 4294901760, %v5136_v33 }
 0x2a0   :  { %v4117_v31 = vpack.c.bf16 %v7296_v25, %v7295_v9  ;;  %v7304_v9 = vand.u32 4294901760, %v5134_v28  ;;  %v7312_v28 = vand.u32 4294901760, %v7236_v20  ;;  %v7316_v20 = vand.u32 4294901760, %v7238_v37  ;;  %v2467_v37 = vld [vmem:[#allocation8 + $0x28] sm:$0xff] }
 0x2a1   :  { %4100 = vmatpush1.bf16.msra.mxu1 %v7287_v14  ;;  %v7297_v14 = vld [vmem:[#allocation37_spill] sm:$0xff] }
 0x2a2   :  { %4102 = vmatprep.subr.bf16.mxu1 %v7288_v48  ;;  %v7298_v48 = vand.u32 4294901760, %v7160_v1  ;;  %v4123_v25 = vpack.c.bf16 %v7305_v61, %v7304_v9  ;;  %v7306_v1 = vand.u32 4294901760, %v7229_v34  ;;  %v7313_v34 = vld [vmem:[#allocation40_spill] sm:$0xff]  ;;  %v7317_v9 = vand.u32 4294901760, %v7239_v6 }
 0x2a4   :  { %v4133_v61 = vpack.c.bf16 %v7317_v9, %v7316_v20 }
 0x2a5   :  { %4104 = vmatpush1.bf16.msra.mxu1 %v7289_v50  ;;  %v7299_v50 = vand.u32 4294901760, %v7161_v2  ;;  %v7307_v2 = vand.u32 4294901760, %v7230_v62  ;;  %v7314_v62 = vand.u32 4294901760, %v7181_v52  ;;  %v2465_v52 = vld [vmem:[#allocation8 + $0x18] sm:$0xff] }
 0x2a6   :  { %4106 = vmatprep.subr.bf16.mxu1 %v7290_v57 }
 0x2a7   :  { %v4119_v57 = vpack.c.bf16 %v7299_v50, %v7298_v48 }
 0x2a9   :  { %4108 = vmatpush1.bf16.msra.mxu1 %v7291_v35  ;;  %v7300_v35 = vand.u32 4294901760, %v7162_v15  ;;  %v4125_v15 = vpack.c.bf16 %v7307_v2, %v7306_v1 }
 0x2aa   :  { %4110 = vmatprep.subr.bf16.mxu1 %v7292_v59  ;;  %v7301_v59 = vand.u32 4294901760, %v7163_v27  ;;  %v7308_v27 = vand.u32 4294901760, %v7265_v56  ;;  %v7315_v56 = vand.u32 4294901760, %v7237_v19 }
 0x2ad   :  { %4112 = vmatpush1.bf16.msra.mxu1 %v7293_v13  ;;  %v4121_v13 = vpack.c.bf16 %v7301_v59, %v7300_v35  ;;  %v2462_v35 = vld [vmem:[#allocation8] sm:$0xff]  ;;  %v4131_v59 = vpack.c.bf16 %v7315_v56, %v7314_v62 }
 0x2ae   :  { %4114 = vmatprep.subr.bf16.mxu1 %v7294_v53  ;;  %v7302_v53 = vand.u32 4294901760, %v7261_v24  ;;  %v2502_v50 = vand.u32 4294901760, %v2462_v35  ;;  %v2466_v62 = vld [vmem:[#allocation8 + $0x20] sm:$0xff] }
 0x2b1   :  { %4116 = vmatpush1.bf16.msra.mxu1 %v7297_v14  ;;  %v2484_v14 = vld [vmem:[#allocation8 + $0xb0] sm:$0xff] }
 0x2b2   :  { %4118 = vmatprep.subr.bf16.mxu1 %v4117_v31  ;;  %v2478_v31 = vld [vmem:[#allocation8 + $0x80] sm:$0xff] }
 0x2b4   :  { %2022 = vmatmul.mubr.f32.vlgmr.msra.gmra.mrb[0].mxu1 %v7302_v53  ;;  %v7309_v53 = vand.u32 4294901760, %v7233_v3  ;;  %v2550_v3 = vand.u32 4294901760, %v2478_v31 }
 0x2b5   :  { %2030 = vmatprep.mubr.f32.mxu1 %v7303_v22  ;;  %4120 = vmatpush1.bf16.msra.mxu1 %v4119_v57  ;;  %v7311_v57 = vand.u32 4294901760, %v7235_v17  ;;  %v2480_v22 = vld [vmem:[#allocation8 + $0x90] sm:$0xff]  ;;  %v2481_v17 = vld [vmem:[#allocation8 + $0x98] sm:$0xff] }
 0x2b6   :  { %4122 = vmatprep.subr.bf16.mxu1 %v4121_v13  ;;  %v4127_v24 = vpack.c.bf16 %v7310_v38, %v7309_v53  ;;  %v2479_v13 = vld [vmem:[#allocation8 + $0x88] sm:$0xff]  ;;  %v2556_v1 = vand.u32 4294901760, %v2480_v22  ;;  %v2559_v2 = vand.u32 4294901760, %v2481_v17  ;;  %v2482_v53 = vld [vmem:[#allocation8 + $0xa0] sm:$0xff]  ;;  %v5964_v38 = vsub.f32 %v2478_v31, %v2550_v3 }
 0x2b7   :  { %v4129_v33 = vpack.c.bf16 %v7312_v28, %v7311_v57  ;;  %v2553_v48 = vand.u32 4294901760, %v2479_v13  ;;  %v5968_v28 = vsub.f32 %v2462_v35, %v2502_v50  ;;  %v2511_v35 = vand.u32 4294901760, %v2465_v52 }
 0x2b8   :  { %2034 = vmatmul.mubr.f32.gmra.mrb[2].mxu1 %v7308_v27  ;;  %v2464_v27 = vld [vmem:[#allocation8 + $0x10] sm:$0xff]  ;;  %7319 = vst [vmem:[#allocation81_spill] sm:$0xff] %v5964_v38  ;;  %v5974_v20 = vpack.c.bf16 %v2559_v2, %v2556_v1  ;;  %v5976_v9 = vsub.f32 %v2480_v22, %v2556_v1  ;;  %v5979_v31 = vsub.f32 %v2481_v17, %v2559_v2  ;;  %v2469_v2 = vld [vmem:[#allocation8 + $0x38] sm:$0xff] }
 0x2b9   :  { %4124 = vmatpush1.bf16.msra.mxu1 %v4123_v25  ;;  %2297 = vmatprep.mubr.f32.mxu1 %v7313_v34  ;;  %v2505_v25 = vand.u32 4294901760, %v2463_v47  ;;  %v5962_v19 = vpack.c.bf16 %v2553_v48, %v2550_v3  ;;  %v5966_v57 = vsub.f32 %v2479_v13, %v2553_v48  ;;  %7321 = vst [vmem:[#allocation84_spill] sm:$0xff] %v5968_v28  ;;  %v2508_v13 = vand.u32 4294901760, %v2464_v27  ;;  %v2468_v28 = vld [vmem:[#allocation8 + $0x30] sm:$0xff] }
 0x2ba   :  { %4126 = vmatprep.subr.bf16.mxu1 %v4125_v15  ;;  %v2483_v15 = vld [vmem:[#allocation8 + $0xa8] sm:$0xff]  ;;  %7324 = vst [vmem:[#allocation85_spill] sm:$0xff] %v5974_v20  ;;  %7325 = vst [vmem:[#allocation45_spill] sm:$0xff] %v5976_v9  ;;  %v2562_v3 = vand.u32 4294901760, %v2482_v53  ;;  %v5987_v17 = vsub.f32 %v2465_v52, %v2511_v35 }
 0x2bb   :  { %7318 = vst [vmem:[#allocation54_spill] sm:$0xff] %v5962_v19  ;;  %7320 = vst [vmem:[#allocation82_spill] sm:$0xff] %v5966_v57  ;;  %v5970_v56 = vpack.c.bf16 %v2505_v25, %v2502_v50  ;;  %v5972_v6 = vsub.f32 %v2463_v47, %v2505_v25  ;;  %4246 = vmatprep.subr.bf16.mxu0 %v5962_v19  ;;  %v2565_v48 = vand.u32 4294901760, %v2483_v15  ;;  %v2514_v50 = vand.u32 4294901760, %v2466_v62  ;;  %v2485_v25 = vld [vmem:[#allocation8 + $0xb8] sm:$0xff] }
 0x2bc   :  { %7326 = vst [vmem:[#allocation47_spill] sm:$0xff] %v5979_v31  ;;  %v2517_v47 = vand.u32 4294901760, %v2467_v37  ;;  %v5983_v22 = vpack.c.bf16 %v2511_v35, %v2508_v13  ;;  %v5989_v1 = vsub.f32 %v2482_v53, %v2562_v3  ;;  %v2520_v53 = vand.u32 4294901760, %v2468_v28 }
 0x2bd   :  { %7322 = vst [vmem:[#allocation30_spill] sm:$0xff] %v5970_v56  ;;  %7323 = vst [vmem:[#allocation16_spill] sm:$0xff] %v5972_v6  ;;  %4128 = vmatpush1.bf16.msra.mxu1 %v4127_v24  ;;  %4248 = vmatpush3.bf16.msra.mxu0 %v5970_v56  ;;  %v2568_v6 = vand.u32 4294901760, %v2484_v14  ;;  %v5985_v24 = vsub.f32 %v2464_v27, %v2508_v13  ;;  %v7330_v56 = vld [vmem:[#allocation56_spill] sm:$0xff]  ;;  %v5995_v9 = vpack.c.bf16 %v2565_v48, %v2562_v3  ;;  %v7333_v13 = vld [vmem:[#allocation59_spill] sm:$0xff] }
 0x2be   :  { %4130 = vmatprep.subr.bf16.mxu1 %v4129_v33  ;;  %4250 = vmatprep.subr.bf16.mxu0 %v5974_v20  ;;  %7327 = vst [vmem:[#allocation43_spill] sm:$0xff] %v5983_v22  ;;  %7328 = vst [vmem:[#allocation49_spill] sm:$0xff] %v5989_v1  ;;  %v7329_v33 = vand.u32 4294901760, %v7240_v58  ;;  %v7331_v19 = vand.u32 4294901760, %v7330_v56  ;;  %v5997_v57 = vsub.f32 %v2483_v15, %v2565_v48  ;;  %v2571_v27 = vand.u32 4294901760, %v2485_v25  ;;  %v7335_v58 = vld [vmem:[#allocation60_spill] sm:$0xff] }
 0x2bf   :  { %7332 = vst [vmem:[#allocation50_spill] sm:$0xff] %v5995_v9  ;;  %v5999_v38 = vsub.f32 %v2466_v62, %v2514_v50  ;;  %v6001_v20 = vsub.f32 %v2467_v37, %v2517_v47  ;;  %v6003_v52 = vsub.f32 %v2484_v14, %v2568_v6  ;;  %v7334_v35 = vand.u32 4294901760, %v7333_v13  ;;  %v7341_v48 = vld [vmem:[#allocation62_spill] sm:$0xff]  ;;  %v7345_v13 = vld [vmem:[#allocation65_spill] sm:$0xff] }
 0x2c0   :  { %v4135_v31 = vpack.c.bf16 %v7331_v19, %v7329_v33  ;;  %v7336_v1 = vand.u32 4294901760, %v7335_v58  ;;  %v6010_v19 = vpack.c.bf16 %v2517_v47, %v2514_v50  ;;  %v2523_v15 = vand.u32 4294901760, %v2469_v2  ;;  %v7343_v50 = vld [vmem:[#allocation63_spill] sm:$0xff] }
 0x2c1   :  { %4132 = vmatpush1.bf16.msra.mxu1 %v4131_v59  ;;  %4252 = vmatpush3.bf16.msra.mxu0 %v5983_v22  ;;  %v6013_v59 = vpack.c.bf16 %v2571_v27, %v2568_v6  ;;  %v6015_v62 = vsub.f32 %v2485_v25, %v2571_v27  ;;  %v6017_v14 = vsub.f32 %v2468_v28, %v2520_v53  ;;  %v7344_v47 = vand.u32 4294901760, %v7343_v50 }
 0x2c2   :  { %4134 = vmatprep.subr.bf16.mxu1 %v4133_v61  ;;  %v4137_v56 = vpack.c.bf16 %v7336_v1, %v7334_v35  ;;  %7337 = vst [vmem:[#allocation51_spill] sm:$0xff] %v6010_v19  ;;  %4254 = vmatprep.subr.bf16.mxu0 %v5995_v9  ;;  %v6019_v37 = vsub.f32 %v2469_v2, %v2523_v15  ;;  %v7339_v61 = vld [vmem:[#allocation61_spill] sm:$0xff]  ;;  %v7342_v1 = vand.u32 4294901760, %v7341_v48  ;;  %v7346_v35 = vand.u32 4294901760, %v7345_v13 }
 0x2c3   :  { %7338 = vst [vmem:[#allocation53_spill] sm:$0xff] %v6013_v59  ;;  %v7340_v3 = vand.u32 4294901760, %v7339_v61  ;;  %v6030_v6 = vpack.c.bf16 %v2523_v15, %v2520_v53  ;;  %v7348_v28 = vand.u32 4294901760, %v7248_v16  ;;  %v7351_v27 = vand.u32 4294901760, %v7250_v21 }
 0x2c4   :  { %v4141_v58 = vpack.c.bf16 %v7346_v35, %v7344_v47  ;;  %v7353_v53 = vand.u32 4294901760, %v7252_v40  ;;  %v7354_v15 = vand.u32 4294901760, %v7253_v46  ;;  %v7355_v16 = vand.u32 4294901760, %v7254_v4 }
 0x2c5   :  { %4136 = vmatpush1.bf16.msra.mxu1 %v4135_v31  ;;  %v4139_v33 = vpack.c.bf16 %v7342_v1, %v7340_v3  ;;  %4256 = vmatpush3.bf16.msra.mxu0 %v6010_v19  ;;  %7347 = vst [vmem:[#allocation29_spill] sm:$0xff] %v6030_v6  ;;  %v7349_v31 = vld [vmem:[#allocation68_spill] sm:$0xff]  ;;  %v7356_v48 = vand.u32 4294901760, %v7255_v44  ;;  %v7357_v21 = vand.u32 4294901760, %v7256_v0  ;;  %v7359_v50 = vand.u32 4294901760, %v7258_v32 }
 0x2c6   :  { %4138 = vmatprep.subr.bf16.mxu1 %v4137_v56  ;;  %4258 = vmatprep.subr.bf16.mxu0 %v6013_v59  ;;  %v7350_v25 = vand.u32 4294901760, %v7349_v31  ;;  %v7352_v56 = vand.u32 4294901760, %v7251_v45  ;;  %v4147_v3 = vpack.c.bf16 %v7354_v15, %v7353_v53  ;;  %v7358_v45 = vand.u32 4294901760, %v7257_v23  ;;  %v7381_v53 = vld [vmem:[#allocation88_spill] sm:$0xff] }
 0x2c7   :  { %v4149_v1 = vpack.c.bf16 %v7356_v48, %v7355_v16  ;;  %v7360_v40 = vand.u32 4294901760, %v7259_v5  ;;  %v7361_v46 = vand.u32 4294901760, %v7222_v11  ;;  %v7362_v4 = vand.u32 4294901760, %v7223_v18  ;;  %v7387_v48 = vld [vmem:[#allocation90_spill] sm:$0xff] }
 0x2c8   :  { %v4143_v2 = vpack.c.bf16 %v7350_v25, %v7348_v28  ;;  %v4145_v61 = vpack.c.bf16 %v7352_v56, %v7351_v27  ;;  %v7363_v44 = vand.u32 4294901760, %v7224_v42  ;;  %v7364_v0 = vand.u32 4294901760, %v7225_v7  ;;  %v7378_v56 = vld [vmem:[#allocation87_spill] sm:$0xff] }
 0x2c9   :  { %4140 = vmatpush1.bf16.msra.mxu1 %v4139_v33  ;;  %4260 = vmatpush3.bf16.msra.mxu0 %v6030_v6  ;;  %v4151_v33 = vpack.c.bf16 %v7358_v45, %v7357_v21  ;;  %v4153_v47 = vpack.c.bf16 %v7360_v40, %v7359_v50  ;;  %v4155_v13 = vpack.c.bf16 %v7362_v4, %v7361_v46  ;;  %v7365_v23 = vand.u32 4294901760, %v7226_v8  ;;  %v7389_v21 = vld [vmem:[#allocation91_spill] sm:$0xff]  ;;  %v7393_v40 = vld [vmem:[#allocation36_spill] sm:$0xff]  ;;  %v7398_v4 = vld [vmem:[#allocation94_spill] sm:$0xff] }
 0x2ca   :  { %4142 = vmatprep.subr.bf16.mxu1 %v4141_v58  ;;  %v4157_v35 = vpack.c.bf16 %v7364_v0, %v7363_v44  ;;  %v7366_v32 = vand.u32 4294901760, %v7227_v30  ;;  %v7367_v5 = vand.u32 4294901760, %v5356_v63  ;;  %v7368_v11 = vand.u32 4294901760, %v5358_v43  ;;  %v7396_v46 = vld [vmem:[#allocation39_spill] sm:$0xff]  ;;  %v7400_v44 = vld [vmem:[#allocation46_spill] sm:$0xff]  ;;  %v7401_v0 = vld [vmem:[#allocation48_spill] sm:$0xff] }
 0x2cb   :  { %v7369_v18 = vand.u32 4294901760, %v5365_v60  ;;  %v7370_v42 = vand.u32 4294901760, %v5367_v55  ;;  %v7371_v7 = vand.u32 4294901760, %v5468_v41  ;;  %v7372_v8 = vand.u32 4294901760, %v5470_v49 }
 0x2cc   :  { %v4159_v58 = vpack.c.bf16 %v7366_v32, %v7365_v23  ;;  %v4161_v28 = vpack.c.bf16 %v7368_v11, %v7367_v5  ;;  %v7373_v30 = vand.u32 4294901760, %v5474_v36  ;;  %v7374_v63 = vand.u32 4294901760, %v5476_v39  ;;  %v7403_v23 = vld [vmem:[#allocation57_spill] sm:$0xff]  ;;  %v7404_v32 = vld [vmem:[#allocation58_spill] sm:$0xff]  ;;  %v7406_v5 = vld [vmem:[#allocation67_spill] sm:$0xff] }
 0x2cd   :  { %4144 = vmatpush1.bf16.msra.mxu1 %v4143_v2  ;;  %v4163_v31 = vpack.c.bf16 %v7370_v42, %v7369_v18  ;;  %v4165_v25 = vpack.c.bf16 %v7372_v8, %v7371_v7  ;;  %v7375_v43 = vand.u32 4294901760, %v5484_v10  ;;  %v7376_v60 = vand.u32 4294901760, %v5486_v51  ;;  %v7407_v11 = vld [vmem:[#allocation69_spill] sm:$0xff]  ;;  %v7409_v18 = vld [vmem:[#allocation15_spill] sm:$0xff]  ;;  %v7413_v7 = vld [vmem:[#allocation18_spill] sm:$0xff] }
 0x2ce   :  { %4146 = vmatprep.subr.bf16.mxu1 %v4145_v61  ;;  %v4167_v2 = vpack.c.bf16 %v7374_v63, %v7373_v30  ;;  %v7377_v55 = vand.u32 4294901760, %v5493_v29  ;;  %v7379_v41 = vand.u32 4294901760, %v7378_v56  ;;  %v7380_v49 = vand.u32 4294901760, %v5497_v12  ;;  %v7411_v42 = vld [vmem:[#allocation17_spill] sm:$0xff]  ;;  %v7414_v8 = vld [vmem:[#allocation19_spill] sm:$0xff]  ;;  %v7417_v63 = vld [vmem:[#allocation22_spill] sm:$0xff] }
 0x2cf   :  { %v4169_v27 = vpack.c.bf16 %v7376_v60, %v7375_v43  ;;  %v7382_v36 = vand.u32 4294901760, %v7381_v53  ;;  %v7383_v39 = vand.u32 4294901760, %v5502_v26  ;;  %v7386_v51 = vand.u32 4294901760, %v5506_v54  ;;  %v7394_v26 = vld [vmem:[#allocation38_spill] sm:$0xff]  ;;  %v7397_v54 = vld [vmem:[#allocation41_spill] sm:$0xff]  ;;  %v7419_v43 = vld [vmem:[#allocation24_spill] sm:$0xff] }
 0x2d0   :  { %v4171_v61 = vpack.c.bf16 %v7379_v41, %v7377_v55  ;;  %v7388_v29 = vand.u32 4294901760, %v7387_v48  ;;  %v7390_v45 = vand.u32 4294901760, %v7389_v21  ;;  %v7416_v30 = vld [vmem:[#allocation21_spill] sm:$0xff]  ;;  %v7422_v55 = vld [vmem:[#allocation27_spill] sm:$0xff]  ;;  %v7423_v56 = vld [vmem:[#allocation28_spill] sm:$0xff] }
 0x2d1   :  { %4148 = vmatpush1.bf16.msra.mxu1 %v4147_v3  ;;  %v4173_v15 = vpack.c.bf16 %v7382_v36, %v7380_v49  ;;  %v7384_v3 = vld [vmem:[#allocation89_spill] sm:$0xff]  ;;  %v7424_v41 = vld [vmem:[#allocation31_spill] sm:$0xff] }
 0x2d2   :  { %4150 = vmatprep.subr.bf16.mxu1 %v4149_v1  ;;  %v7385_v10 = vand.u32 4294901760, %v7384_v3  ;;  %v4177_v1 = vpack.c.bf16 %v7388_v29, %v7386_v51  ;;  %v7420_v60 = vld [vmem:[#allocation25_spill] sm:$0xff]  ;;  %v7426_v49 = vld [vmem:[#allocation35_spill] sm:$0xff] }
 0x2d3   :  { %v7427_v53 = vld [vmem:[#allocation37_spill] sm:$0xff]  ;;  %v2488_v21 = vld [vmem:[#allocation8 + $0xd0] sm:$0xff] }
 0x2d4   :  { %v4175_v16 = vpack.c.bf16 %v7385_v10, %v7383_v39  ;;  %v2486_v36 = vld [vmem:[#allocation8 + $0xc0] sm:$0xff] }
 0x2d5   :  { %4152 = vmatpush1.bf16.msra.mxu1 %v4151_v33  ;;  %v7391_v33 = vld [vmem:[#allocation92_spill] sm:$0xff]  ;;  %v2574_v39 = vand.u32 4294901760, %v2486_v36  ;;  %v2470_v10 = vld [vmem:[#allocation8 + $0x40] sm:$0xff] }
 0x2d6   :  { %4154 = vmatprep.subr.bf16.mxu1 %v4153_v47  ;;  %v7392_v12 = vand.u32 4294901760, %v7391_v33  ;;  %v7395_v47 = vld [vmem:[#allocation95_spill] sm:$0xff]  ;;  %v2526_v51 = vand.u32 4294901760, %v2470_v10  ;;  %v2580_v33 = vand.u32 4294901760, %v2488_v21 }
 0x2d8   :  { %v4179_v50 = vpack.c.bf16 %v7392_v12, %v7390_v45  ;;  %v2489_v45 = vld [vmem:[#allocation8 + $0xd8] sm:$0xff] }
 0x2d9   :  { %4156 = vmatpush1.bf16.msra.mxu1 %v4155_v13  ;;  %v7399_v13 = vld [vmem:[#allocation44_spill] sm:$0xff]  ;;  %v2583_v12 = vand.u32 4294901760, %v2489_v45 }
 0x2da   :  { %4158 = vmatprep.subr.bf16.mxu1 %v4157_v35  ;;  %v7402_v35 = vld [vmem:[#allocation52_spill] sm:$0xff] }
 0x2dd   :  { %4160 = vmatpush1.bf16.msra.mxu1 %v4159_v58  ;;  %v7405_v58 = vld [vmem:[#allocation64_spill] sm:$0xff] }
 0x2de   :  { %4162 = vmatprep.subr.bf16.mxu1 %v4161_v28  ;;  %v7408_v28 = vld [vmem:[#allocation73_spill] sm:$0xff] }
 0x2e1   :  { %4164 = vmatpush1.bf16.msra.mxu1 %v4163_v31  ;;  %v7412_v31 = vld [vmem:[#allocation86_spill] sm:$0xff] }
 0x2e2   :  { %4166 = vmatprep.subr.bf16.mxu1 %v4165_v25  ;;  %v7415_v25 = vld [vmem:[#allocation20_spill] sm:$0xff] }
 0x2e5   :  { %4168 = vmatpush1.bf16.msra.mxu1 %v4167_v2  ;;  %v7418_v2 = vld [vmem:[#allocation23_spill] sm:$0xff] }
 0x2e6   :  { %4170 = vmatprep.subr.bf16.mxu1 %v4169_v27  ;;  %v7421_v27 = vld [vmem:[#allocation26_spill] sm:$0xff] }
 0x2e9   :  { %4172 = vmatpush1.bf16.msra.mxu1 %v4171_v61  ;;  %v7425_v61 = vld [vmem:[#allocation34_spill] sm:$0xff] }
 0x2ea   :  { %4174 = vmatprep.subr.bf16.mxu1 %v4173_v15  ;;  %v2487_v15 = vld [vmem:[#allocation8 + $0xc8] sm:$0xff] }
 0x2eb   :  { %v2577_v3 = vand.u32 4294901760, %v2487_v15 }
 0x2ed   :  { %4176 = vmatpush1.bf16.msra.mxu1 %v4175_v16  ;;  %v2471_v16 = vld [vmem:[#allocation8 + $0x48] sm:$0xff]  ;;  %v6149_v29 = vpack.c.bf16 %v2577_v3, %v2574_v39 }
 0x2ee   :  { %4178 = vmatprep.subr.bf16.mxu1 %v4177_v1  ;;  %v2529_v48 = vand.u32 4294901760, %v2471_v16 }
 0x2ef   :  { %7428 = vst [vmem:[#allocation55_spill] sm:$0xff] %v6149_v29  ;;  %4262 = vmatprep.subr.bf16.mxu0 %v6149_v29  ;;  %v6192_v29 = vsub.f32 %v2470_v10, %v2526_v51 }
 0x2f0   :  { %v6151_v1 = vpack.c.bf16 %v2529_v48, %v2526_v51 }
 0x2f1   :  { %4180 = vmatpush1.bf16.msra.mxu1 %v4179_v50  ;;  %v2472_v50 = vld [vmem:[#allocation8 + $0x50] sm:$0xff] }
 0x2f2   :  { %4182 = vmatprep.subr.bf16.mxu1 %v7393_v40  ;;  %7429 = vst [vmem:[#allocation32_spill] sm:$0xff] %v6151_v1  ;;  %v2473_v40 = vld [vmem:[#allocation8 + $0x58] sm:$0xff]  ;;  %4264 = vmatpush3.bf16.msra.mxu0 %v6151_v1  ;;  %v6188_v1 = vsub.f32 %v2486_v36, %v2574_v39 }
 0x2f4   :  { %2299 = vmatmul.mubr.f32.vlgmr.msra.gmra.mrb[0].mxu1 %v7394_v26 }
 0x2f5   :  { %2305 = vmatprep.mubr.f32.mxu1 %v7395_v47  ;;  %4184 = vmatpush1.bf16.msra.mxu1 %v7396_v46  ;;  %v6155_v46 = vpack.c.bf16 %v2583_v12, %v2580_v33 }
 0x2f6   :  { %4186 = vmatprep.subr.bf16.mxu1 %v7397_v54 }
 0x2f7   :  { %7430 = vst [vmem:[#allocation33_spill] sm:$0xff] %v6155_v46  ;;  %4266 = vmatprep.subr.bf16.mxu0 %v6155_v46 }
 0x2f8   :  { %2307 = vmatmul.mubr.f32.gmra.mrb[2].mxu1 %v7398_v4 }
 0x2f9   :  { %4188 = vmatpush1.bf16.msra.mxu1 %v7399_v13  ;;  %2442 = vmatprep.mubr.f32.mxu1 %v7313_v34  ;;  %v7410_v34 = vld [vmem:[#allocation83_spill] sm:$0xff]  ;;  %v2491_v13 = vld [vmem:[#allocation8 + $0xe8] sm:$0xff] }
 0x2fa   :  { %4190 = vmatprep.subr.bf16.mxu1 %v7400_v44 }
 0x2fd   :  { %4192 = vmatpush1.bf16.msra.mxu1 %v7401_v0  ;;  %v2589_v0 = vand.u32 4294901760, %v2491_v13 }
 0x2fe   :  { %4194 = vmatprep.subr.bf16.mxu1 %v7402_v35  ;;  %v2474_v35 = vld [vmem:[#allocation8 + $0x60] sm:$0xff] }
 0x2ff   :  { %v6207_v36 = vsub.f32 %v2491_v13, %v2589_v0 }
 0x301   :  { %4196 = vmatpush1.bf16.msra.mxu1 %v7403_v23  ;;  %v2475_v23 = vld [vmem:[#allocation8 + $0x68] sm:$0xff] }
 0x302   :  { %4198 = vmatprep.subr.bf16.mxu1 %v7404_v32  ;;  %v2538_v32 = vand.u32 4294901760, %v2474_v35 }
 0x305   :  { %4200 = vmatpush1.bf16.msra.mxu1 %v7405_v58  ;;  %v2541_v58 = vand.u32 4294901760, %v2475_v23 }
 0x306   :  { %4202 = vmatprep.subr.bf16.mxu1 %v7406_v5 }
 0x307   :  { %v6211_v39 = vsub.f32 %v2475_v23, %v2541_v58 }
 0x309   :  { %4204 = vmatpush1.bf16.msra.mxu1 %v7407_v11  ;;  %v6163_v11 = vpack.c.bf16 %v2541_v58, %v2538_v32 }
 0x30a   :  { %4206 = vmatprep.subr.bf16.mxu1 %v7408_v28  ;;  %v2492_v28 = vld [vmem:[#allocation8 + $0xf0] sm:$0xff] }
 0x30b   :  { %7433 = vst [vmem:[#allocation71_spill] sm:$0xff] %v6163_v11 }
 0x30d   :  { %4208 = vmatpush1.bf16.msra.mxu1 %v7409_v18  ;;  %v2493_v18 = vld [vmem:[#allocation8 + $0xf8] sm:$0xff] }
 0x30e   :  { %4210 = vmatprep.subr.bf16.mxu1 %v7410_v34  ;;  %v2592_v34 = vand.u32 4294901760, %v2492_v28 }
 0x311   :  { %4212 = vmatpush1.bf16.msra.mxu1 %v7411_v42  ;;  %v2595_v42 = vand.u32 4294901760, %v2493_v18 }
 0x312   :  { %4214 = vmatprep.subr.bf16.mxu1 %v7412_v31  ;;  %v2476_v31 = vld [vmem:[#allocation8 + $0x70] sm:$0xff] }
 0x313   :  { %v6215_v10 = vsub.f32 %v2493_v18, %v2595_v42  ;;  %v6945_v18 = vand.u32 4294901760, %v6001_v20 }
 0x315   :  { %4216 = vmatpush1.bf16.msra.mxu1 %v7413_v7  ;;  %v2477_v7 = vld [vmem:[#allocation8 + $0x78] sm:$0xff] }
 0x316   :  { %4218 = vmatprep.subr.bf16.mxu1 %v7414_v8  ;;  %v7434_v8 = vld [vmem:[#allocation81_spill] sm:$0xff] }
 0x319   :  { %4220 = vmatpush1.bf16.msra.mxu1 %v7415_v25  ;;  %v6932_v25 = vand.u32 4294901760, %v7434_v8 }
 0x31a   :  { %4222 = vmatprep.subr.bf16.mxu1 %v7416_v30  ;;  %v7435_v30 = vld [vmem:[#allocation82_spill] sm:$0xff] }
 0x31d   :  { %4224 = vmatpush1.bf16.msra.mxu1 %v7417_v63  ;;  %v6935_v63 = vand.u32 4294901760, %v7435_v30 }
 0x31e   :  { %4226 = vmatprep.subr.bf16.mxu1 %v7418_v2  ;;  %v2544_v2 = vand.u32 4294901760, %v2476_v31 }
 0x321   :  { %4228 = vmatpush1.bf16.msra.mxu1 %v7419_v43  ;;  %v2547_v43 = vand.u32 4294901760, %v2477_v7 }
 0x322   :  { %4230 = vmatprep.subr.bf16.mxu1 %v7420_v60  ;;  %v7436_v60 = vld [vmem:[#allocation84_spill] sm:$0xff] }
 0x323   :  { %v6219_v51 = vsub.f32 %v2477_v7, %v2547_v43 }
 0x325   :  { %4232 = vmatpush1.bf16.msra.mxu1 %v7421_v27  ;;  %v6938_v27 = vand.u32 4294901760, %v7436_v60  ;;  %7442 = vst [vmem:[#allocation76_spill] sm:$0xff] %v6219_v51 }
 0x326   :  { %4234 = vmatprep.subr.bf16.mxu1 %v7422_v55  ;;  %v7437_v55 = vld [vmem:[#allocation16_spill] sm:$0xff] }
 0x329   :  { %4236 = vmatpush1.bf16.msra.mxu1 %v7423_v56  ;;  %v2632_v56 = vsub.f32 %v7436_v60, %v6938_v27 }
 0x32a   :  { %4238 = vmatprep.subr.bf16.mxu1 %v7424_v41  ;;  %v6171_v41 = vpack.c.bf16 %v2595_v42, %v2592_v34 }
 0x32c   :  { %7438 = vst [vmem:[#allocation72_spill] sm:$0xff] %v6171_v41 }
 0x32d   :  { %4240 = vmatpush1.bf16.msra.mxu1 %v7425_v61  ;;  %v2744_v61 = vsub.f32 %v7434_v8, %v6932_v25  ;;  %v6190_v25 = vsub.f32 %v2487_v15, %v2577_v3  ;;  %v6209_v15 = vsub.f32 %v2474_v35, %v2538_v32  ;;  %v6213_v3 = vsub.f32 %v2492_v28, %v2592_v34 }
 0x32e   :  { %4242 = vmatprep.subr.bf16.mxu1 %v7426_v49  ;;  %v2751_v49 = vsub.f32 %v7435_v30, %v6935_v63  ;;  %v6194_v63 = vsub.f32 %v2471_v16, %v2529_v48  ;;  %v6217_v16 = vsub.f32 %v2476_v31, %v2544_v2 }
 0x330   :  { %7441 = vst [vmem:[#allocation75_spill] sm:$0xff] %v6217_v16 }
 0x331   :  { %4244 = vmatpush1.bf16.msra.mxu1 %v7427_v53  ;;  %v6179_v53 = vpack.c.bf16 %v2547_v43, %v2544_v2 }
 0x333   :  { %7439 = vst [vmem:[#allocation74_spill] sm:$0xff] %v6179_v53 }
 0x334   :  { %2444 = vmatmul.mubr.f32.vlgmr.msra.gmra.mrb[0].mxu1 %v7394_v26  ;;  %v2532_v26 = vand.u32 4294901760, %v2472_v50 }
 0x335   :  { %2450 = vmatprep.mubr.f32.mxu1 %v7395_v47  ;;  %v2535_v47 = vand.u32 4294901760, %v2473_v40 }
 0x337   :  { %v6157_v54 = vpack.c.bf16 %v2535_v47, %v2532_v26  ;;  %v6203_v27 = vsub.f32 %v2473_v40, %v2535_v47  ;;  %v6955_v47 = vand.u32 4294901760, %v5987_v17 }
 0x338   :  { %2452 = vmatmul.mubr.f32.gmra.mrb[2].mxu1 %v7398_v4  ;;  %v2490_v4 = vld [vmem:[#allocation8 + $0xe0] sm:$0xff] }
 0x339   :  { %7431 = vst [vmem:[#allocation66_spill] sm:$0xff] %v6157_v54  ;;  %v2586_v44 = vand.u32 4294901760, %v2490_v4  ;;  %4268 = vmatpush3.bf16.msra.mxu0 %v6157_v54  ;;  %v7440_v54 = vand.u32 4294901760, %v7437_v55  ;;  %v2653_v32 = vsub.f32 %v5987_v17, %v6955_v47 }
 0x33b   :  { %v6161_v5 = vpack.c.bf16 %v2589_v0, %v2586_v44  ;;  %v2639_v46 = vsub.f32 %v7437_v55, %v7440_v54  ;;  %v6205_v6 = vsub.f32 %v2490_v4, %v2586_v44  ;;  %v7445_v54 = vld [vmem:[#allocation49_spill] sm:$0xff]  ;;  %v6947_v0 = vand.u32 4294901760, %v5997_v57 }
 0x33c   :  { %v6949_v4 = vand.u32 4294901760, %v7445_v54  ;;  %v2654_v31 = vand.u32 4294901760, %v2653_v32 }
 0x33d   :  { %7432 = vst [vmem:[#allocation70_spill] sm:$0xff] %v6161_v5  ;;  %4270 = vmatprep.subr.bf16.mxu0 %v6161_v5  ;;  %v2752_v5 = vand.u32 4294901760, %v2751_v49  ;;  %v6199_v49 = vsub.f32 %v2489_v45, %v2583_v12  ;;  %v2640_v45 = vand.u32 4294901760, %v2639_v46  ;;  %v6941_v46 = vand.u32 4294901760, %v5999_v38 }
 0x33e   :  { %4272 = vmatpush3.bf16.msra.mxu0 %v6163_v11  ;;  %v2745_v11 = vand.u32 4294901760, %v2744_v61  ;;  %v6197_v61 = vsub.f32 %v2488_v21, %v2580_v33  ;;  %v2633_v21 = vand.u32 4294901760, %v2632_v56  ;;  %v7443_v33 = vld [vmem:[#allocation45_spill] sm:$0xff]  ;;  %v2772_v58 = vsub.f32 %v7445_v54, %v6949_v4 }
 0x33f   :  { %4274 = vmatprep.subr.bf16.mxu0 %v6171_v41  ;;  %v6201_v41 = vsub.f32 %v2472_v50, %v2532_v26  ;;  %v6961_v12 = vand.u32 4294901760, %v7443_v33  ;;  %v7444_v50 = vld [vmem:[#allocation47_spill] sm:$0xff]  ;;  %v6957_v26 = vand.u32 4294901760, %v5985_v24  ;;  %v2660_v28 = vsub.f32 %v5999_v38, %v6941_v46 }
 0x340   :  { %v4277_v48 = vpack.c.bf16 %v2752_v5, %v2745_v11  ;;  %v6960_v40 = vand.u32 4294901760, %v7444_v50  ;;  %v6226_v13 = vpack.c.bf16 %v2640_v45, %v2633_v21  ;;  %v2779_v11 = vsub.f32 %v5997_v57, %v6947_v0 }
 0x341   :  { %v2758_v44 = vsub.f32 %v7443_v33, %v6961_v12  ;;  %v2646_v23 = vsub.f32 %v5985_v24, %v6957_v26  ;;  %v2773_v7 = vand.u32 4294901760, %v2772_v58  ;;  %v2661_v43 = vand.u32 4294901760, %v2660_v28 }
 0x342   :  { %4276 = vmatpush3.bf16.msra.mxu0 %v6179_v53  ;;  %v2765_v35 = vsub.f32 %v7444_v50, %v6960_v40  ;;  %v2780_v2 = vand.u32 4294901760, %v2779_v11  ;;  %v2667_v56 = vsub.f32 %v6001_v20, %v6945_v18  ;;  %v6944_v46 = vand.u32 4294901760, %v6017_v14 }
 0x343   :  { %4278 = vmatprep.subr.bf16.mxu0 %v4277_v48  ;;  %v2759_v5 = vand.u32 4294901760, %v2758_v44  ;;  %v2647_v42 = vand.u32 4294901760, %v2646_v23  ;;  %v6942_v48 = vand.u32 4294901760, %v6003_v52  ;;  %v6943_v44 = vand.u32 4294901760, %v6015_v62 }
 0x344   :  { %v2766_v34 = vand.u32 4294901760, %v2765_v35  ;;  %v6262_v35 = vpack.c.bf16 %v2780_v2, %v2773_v7  ;;  %v2668_v23 = vand.u32 4294901760, %v2667_v56  ;;  %v6946_v58 = vand.u32 4294901760, %v6019_v37 }
 0x345   :  { %v6258_v45 = vpack.c.bf16 %v2654_v31, %v2647_v42  ;;  %v2786_v32 = vsub.f32 %v6003_v52, %v6942_v48  ;;  %v2674_v11 = vsub.f32 %v6017_v14, %v6944_v46  ;;  %v6948_v28 = vand.u32 4294901760, %v6188_v1 }
 0x346   :  { %v6256_v21 = vpack.c.bf16 %v2766_v34, %v2759_v5  ;;  %v2793_v5 = vsub.f32 %v6015_v62, %v6943_v44  ;;  %v6951_v34 = vand.u32 4294901760, %v6190_v25  ;;  %v6276_v42 = vpack.c.bf16 %v2668_v23, %v2661_v43 }
 0x347   :  { %v2787_v31 = vand.u32 4294901760, %v2786_v32  ;;  %v2681_v7 = vsub.f32 %v6019_v37, %v6946_v58  ;;  %v6950_v2 = vand.u32 4294901760, %v6192_v29  ;;  %v2675_v48 = vand.u32 4294901760, %v2674_v11 }
 0x348   :  { %v2794_v56 = vand.u32 4294901760, %v2793_v5  ;;  %v2800_v44 = vsub.f32 %v6188_v1, %v6948_v28  ;;  %v2807_v46 = vsub.f32 %v6190_v25, %v6951_v34  ;;  %v6952_v23 = vand.u32 4294901760, %v6194_v63 }
 0x349   :  { %v2682_v18 = vand.u32 4294901760, %v2681_v7  ;;  %v2688_v43 = vsub.f32 %v6192_v29, %v6950_v2  ;;  %v6954_v32 = vand.u32 4294901760, %v6197_v61  ;;  %v6953_v0 = vand.u32 4294901760, %v6199_v49 }
 0x34a   :  { %v6293_v58 = vpack.c.bf16 %v2794_v56, %v2787_v31  ;;  %v2801_v5 = vand.u32 4294901760, %v2800_v44  ;;  %v2808_v11 = vand.u32 4294901760, %v2807_v46  ;;  %v2695_v7 = vsub.f32 %v6194_v63, %v6952_v23 }
 0x34b   :  { %v6296_v28 = vpack.c.bf16 %v2682_v18, %v2675_v48  ;;  %v2689_v4 = vand.u32 4294901760, %v2688_v43  ;;  %v2814_v2 = vsub.f32 %v6197_v61, %v6954_v32  ;;  %v2821_v44 = vsub.f32 %v6199_v49, %v6953_v0 }
 0x34c   :  { %v6304_v34 = vpack.c.bf16 %v2808_v11, %v2801_v5  ;;  %v6956_v46 = vand.u32 4294901760, %v6201_v41  ;;  %v6958_v18 = vand.u32 4294901760, %v6203_v27  ;;  %v2696_v48 = vand.u32 4294901760, %v2695_v7 }
 0x34d   :  { %v2815_v31 = vand.u32 4294901760, %v2814_v2  ;;  %v6959_v56 = vand.u32 4294901760, %v6205_v6  ;;  %v6962_v43 = vand.u32 4294901760, %v6207_v36  ;;  %v2822_v23 = vand.u32 4294901760, %v2821_v44 }
 0x34e   :  { %v2702_v5 = vsub.f32 %v6201_v41, %v6956_v46  ;;  %v2709_v11 = vsub.f32 %v6203_v27, %v6958_v18  ;;  %v6965_v0 = vand.u32 4294901760, %v6209_v15  ;;  %v6320_v32 = vpack.c.bf16 %v2696_v48, %v2689_v4 }
 0x34f   :  { %v2828_v2 = vsub.f32 %v6205_v6, %v6959_v56  ;;  %v2835_v7 = vsub.f32 %v6207_v36, %v6962_v43  ;;  %v6963_v44 = vand.u32 4294901760, %v6211_v39  ;;  %v6329_v47 = vpack.c.bf16 %v2822_v23, %v2815_v31 }
 0x350   :  { %v2703_v46 = vand.u32 4294901760, %v2702_v5  ;;  %v2710_v26 = vand.u32 4294901760, %v2709_v11  ;;  %v2716_v18 = vsub.f32 %v6209_v15, %v6965_v0  ;;  %v6964_v40 = vand.u32 4294901760, %v6213_v3 }
 0x351   :  { %v2829_v4 = vand.u32 4294901760, %v2828_v2  ;;  %v2836_v48 = vand.u32 4294901760, %v2835_v7  ;;  %v2723_v56 = vsub.f32 %v6211_v39, %v6963_v44  ;;  %v6968_v23 = vand.u32 4294901760, %v6215_v10 }
 0x352   :  { %v6338_v12 = vpack.c.bf16 %v2710_v26, %v2703_v46  ;;  %v2717_v43 = vand.u32 4294901760, %v2716_v18  ;;  %v6969_v31 = vand.u32 4294901760, %v6217_v16  ;;  %v2842_v2 = vsub.f32 %v6213_v3, %v6964_v40 }
 0x353   :  { %v6342_v5 = vpack.c.bf16 %v2836_v48, %v2829_v4  ;;  %v2724_v11 = vand.u32 4294901760, %v2723_v56  ;;  %v6970_v7 = vand.u32 4294901760, %v6219_v51  ;;  %v2849_v44 = vsub.f32 %v6215_v10, %v6968_v23 }
 0x354   :  { %v2730_v26 = vsub.f32 %v6217_v16, %v6969_v31  ;;  %v2843_v18 = vand.u32 4294901760, %v2842_v2 }
 0x355   :  { %v6354_v46 = vpack.c.bf16 %v2724_v11, %v2717_v43  ;;  %v2737_v56 = vsub.f32 %v6219_v51, %v6970_v7  ;;  %v2850_v4 = vand.u32 4294901760, %v2849_v44 }
 0x356   :  { %v2731_v48 = vand.u32 4294901760, %v2730_v26 }
 0x357   :  { %v2738_v40 = vand.u32 4294901760, %v2737_v56  ;;  %v6359_v0 = vpack.c.bf16 %v2850_v4, %v2843_v18  ;;  %v1100_v56 = vld [vmem:[%s6639_s4] sm:$0x3]  ;;  %v7446_v4 = vld [vmem:[#allocation93_spill] sm:$0xff] }
 0x358   :  { %v7447_v2 = vsub.s32 0, %v7446_v4 }
 0x359   :  { %v6361_v53 = vpack.c.bf16 %v2738_v40, %v2731_v48  ;;  %v7448_v48 = vsub.s32 1, %v7446_v4 }
 0x35a   :  { %v1105_v44 = vrot.slane %v1100_v56, %v7447_v2 }
 0x35b   :  { %v1109_v11 = vrot.slane %v1100_v56, %v7448_v48 }
 0x407   :  { %v2445_v7 = vpop.f32.mrb[0].mxu1 }
 0x408   :  { %v4441_v43 = vadd.f32 %v2445_v7, %v1105_v44  ;;  %v2447_v31 = vpop.f32.mrb[1].mxu1 }
 0x409   :  { %v4442_v40 = vadd.f32 %v2447_v31, %v1109_v11 }
 0x40a   :  { %v2458_v23 = vmax.f32 %v4441_v43, 0.0 }
 0x40b   :  { %v2459_v59 = vmax.f32 %v4442_v40, 0.0  ;;  %v2453_v26 = vpop.f32.mrb[2].mxu1 }
 0x40c   :  { %v6402_v19 = vand.u32 4294901760, %v2458_v23  ;;  %v4443_v18 = vadd.f32 %v2453_v26, %v1105_v44  ;;  %v2455_v9 = vpop.f32.mrb[3].mxu1 }
 0x40d   :  { %v6404_v22 = vand.u32 4294901760, %v2459_v59  ;;  %v4444_v16 = vadd.f32 %v2455_v9, %v1109_v11 }
 0x40e   :  { %v6407_v51 = vsub.f32 %v2458_v23, %v6402_v19  ;;  %v2460_v2 = vmax.f32 %v4443_v18, 0.0 }
 0x40f   :  { %v6410_v56 = vsub.f32 %v2459_v59, %v6404_v22  ;;  %v2461_v7 = vmax.f32 %v4444_v16, 0.0 }
 0x410   :  { %v6983_v31 = vand.u32 4294901760, %v6407_v51  ;;  %v6413_v43 = vand.u32 4294901760, %v2460_v2 }
 0x411   :  { %v6415_v40 = vand.u32 4294901760, %v2461_v7  ;;  %v2599_v44 = vand.u32 4294901760, %v6410_v56 }
 0x412   :  { %v2606_v9 = vsub.f32 %v6407_v51, %v6983_v31  ;;  %v6422_v23 = vsub.f32 %v2460_v2, %v6413_v43 }
 0x413   :  { %v6425_v11 = vsub.f32 %v2461_v7, %v6415_v40  ;;  %v2600_v59 = vsub.f32 %v6410_v56, %v2599_v44 }
 0x414   :  { %v6984_v16 = vand.u32 4294901760, %v6422_v23  ;;  %v2607_v4 = vand.u32 4294901760, %v2606_v9 }
 0x415   :  { %v2601_v26 = vand.u32 4294901760, %v2600_v59  ;;  %v6985_v18 = vand.u32 4294901760, %v6425_v11  ;;  %v7467_v59 = vld [vmem:[#allocation54_spill] sm:$0xff] }
 0x416   :  { %v2621_v48 = vsub.f32 %v6422_v23, %v6984_v16  ;;  %v7488_v16 = vand.u32 4294901760, %v7444_v50 }
 0x417   :  { %2602 = vmatprep.mubr.f32.mxu0 %v2601_v26  ;;  %v2615_v2 = vsub.f32 %v6425_v11, %v6985_v18  ;;  %v7468_v26 = vld [vmem:[#allocation30_spill] sm:$0xff] }
 0x418   :  { %2608 = vmatmul.mubr.f32.vlgmr.msra.gmra.mrb[4].mxu0 %v2607_v4  ;;  %v2622_v31 = vand.u32 4294901760, %v2621_v48  ;;  %v7469_v4 = vld [vmem:[#allocation85_spill] sm:$0xff]  ;;  %v7470_v48 = vld [vmem:[#allocation43_spill] sm:$0xff] }
 0x419   :  { %4280 = vmatpush3.bf16.msra.mxu0 %v6226_v13  ;;  %v2616_v7 = vand.u32 4294901760, %v2615_v2  ;;  %v7449_v13 = vpack.c.bf16 %v7435_v30, %v7434_v8  ;;  %v7471_v2 = vld [vmem:[#allocation50_spill] sm:$0xff] }
 0x41a   :  { %4282 = vmatprep.subr.bf16.mxu0 %v6256_v21  ;;  %v7454_v21 = vpack.c.bf16 %v6001_v20, %v5999_v38 }
 0x41b   :  { %2617 = vmatprep.mubr.f32.mxu0 %v2616_v7  ;;  %v7472_v7 = vld [vmem:[#allocation51_spill] sm:$0xff] }
 0x41c   :  { %2623 = vmatmul.mubr.f32.gmra.mrb[6].mxu0 %v2622_v31  ;;  %v7465_v31 = vld [vmem:[#allocation75_spill] sm:$0xff] }
 0x41d   :  { %4284 = vmatpush3.bf16.msra.mxu0 %v6258_v45  ;;  %2853 = vmatprep.mubr.f32.mxu0 %v6404_v22  ;;  %v7455_v45 = vpack.c.bf16 %v6015_v62, %v6003_v52 }
 0x41e   :  { %4286 = vmatprep.subr.bf16.mxu0 %v6262_v35  ;;  %v7456_v35 = vpack.c.bf16 %v6019_v37, %v6017_v14 }
 0x421   :  { %4288 = vmatpush3.bf16.msra.mxu0 %v6276_v42  ;;  %v7460_v42 = vpack.c.bf16 %v6203_v27, %v6201_v41 }
 0x422   :  { %4290 = vmatprep.subr.bf16.mxu0 %v6293_v58  ;;  %v7457_v58 = vpack.c.bf16 %v6190_v25, %v6188_v1 }
 0x425   :  { %4292 = vmatpush3.bf16.msra.mxu0 %v6296_v28  ;;  %v7458_v28 = vpack.c.bf16 %v6194_v63, %v6192_v29 }
 0x426   :  { %4294 = vmatprep.subr.bf16.mxu0 %v6304_v34  ;;  %v7459_v34 = vpack.c.bf16 %v6199_v49, %v6197_v61 }
 0x429   :  { %4296 = vmatpush3.bf16.msra.mxu0 %v6320_v32  ;;  %v7461_v32 = vpack.c.bf16 %v6207_v36, %v6205_v6 }
 0x42a   :  { %4298 = vmatprep.subr.bf16.mxu0 %v6329_v47  ;;  %v7450_v47 = vpack.c.bf16 %v7437_v55, %v7436_v60 }
 0x42d   :  { %4300 = vmatpush3.bf16.msra.mxu0 %v6338_v12  ;;  %v7451_v12 = vpack.c.bf16 %v7444_v50, %v7443_v33  ;;  %v7495_v50 = vand.u32 4294901760, %v6422_v23 }
 0x42e   :  { %4302 = vmatprep.subr.bf16.mxu0 %v6342_v5  ;;  %v7462_v5 = vpack.c.bf16 %v6211_v39, %v6209_v15 }
 0x431   :  { %4304 = vmatpush3.bf16.msra.mxu0 %v6354_v46  ;;  %v7463_v46 = vpack.c.bf16 %v6215_v10, %v6213_v3 }
 0x432   :  { %4306 = vmatprep.subr.bf16.mxu0 %v6359_v0  ;;  %v7453_v0 = vpack.c.bf16 %v5997_v57, %v7445_v54 }
 0x435   :  { %4308 = vmatpush3.bf16.msra.mxu0 %v6361_v53  ;;  %v7452_v53 = vpack.c.bf16 %v5987_v17, %v5985_v24 }
 0x436   :  { %4310 = vmatprep.subr.bf16.mxu0 %v7449_v13  ;;  %v7473_v13 = vld [vmem:[#allocation53_spill] sm:$0xff] }
 0x438   :  { %2855 = vmatmul.mubr.f32.vlgmr.msra.gmra.mrb[8].mxu0 %v6402_v19 }
 0x439   :  { %2860 = vmatprep.mubr.f32.mxu0 %v6415_v40  ;;  %4312 = vmatpush3.bf16.msra.mxu0 %v7450_v47  ;;  %v7474_v47 = vld [vmem:[#allocation29_spill] sm:$0xff] }
 0x43a   :  { %4314 = vmatprep.subr.bf16.mxu0 %v7451_v12  ;;  %v7475_v12 = vld [vmem:[#allocation55_spill] sm:$0xff] }
 0x43c   :  { %2862 = vmatmul.mubr.f32.gmra.mrb[10].mxu0 %v6413_v43 }
 0x43d   :  { %4316 = vmatpush3.bf16.msra.mxu0 %v7452_v53  ;;  %2997 = vmatprep.mubr.f32.mxu0 %v6410_v56  ;;  %v7464_v56 = vld [vmem:[#allocation76_spill] sm:$0xff] }
 0x43e   :  { %4318 = vmatprep.subr.bf16.mxu0 %v7453_v0  ;;  %v7466_v9 = vpack.c.bf16 %v7464_v56, %v7465_v31  ;;  %v7476_v53 = vld [vmem:[#allocation32_spill] sm:$0xff]  ;;  %v7477_v0 = vld [vmem:[#allocation33_spill] sm:$0xff] }
 0x441   :  { %4320 = vmatpush3.bf16.msra.mxu0 %v7454_v21  ;;  %v7478_v21 = vld [vmem:[#allocation66_spill] sm:$0xff] }
 0x442   :  { %4322 = vmatprep.subr.bf16.mxu0 %v7455_v45  ;;  %v7479_v45 = vld [vmem:[#allocation70_spill] sm:$0xff] }
 0x445   :  { %4324 = vmatpush3.bf16.msra.mxu0 %v7456_v35  ;;  %v7480_v35 = vld [vmem:[#allocation71_spill] sm:$0xff] }
 0x446   :  { %4326 = vmatprep.subr.bf16.mxu0 %v7457_v58  ;;  %v7482_v58 = vand.u32 4294901760, %v7434_v8  ;;  %v7490_v8 = vand.u32 4294901760, %v6425_v11 }
 0x449   :  { %4328 = vmatpush3.bf16.msra.mxu0 %v7458_v28  ;;  %v7483_v28 = vand.u32 4294901760, %v7435_v30  ;;  %v7491_v30 = vand.u32 4294901760, %v5985_v24 }
 0x44a   :  { %4330 = vmatprep.subr.bf16.mxu0 %v7459_v34 }
 0x44b   :  { %v4373_v34 = vpack.c.bf16 %v7483_v28, %v7482_v58 }
 0x44d   :  { %4332 = vmatpush3.bf16.msra.mxu0 %v7460_v42  ;;  %v7484_v42 = vld [vmem:[#allocation74_spill] sm:$0xff] }
 0x44e   :  { %4334 = vmatprep.subr.bf16.mxu0 %v7461_v32  ;;  %v7485_v32 = vand.u32 4294901760, %v7436_v60  ;;  %v7492_v60 = vand.u32 4294901760, %v5987_v17  ;;  %v7498_v17 = vand.u32 4294901760, %v6003_v52  ;;  %v7505_v52 = vand.u32 4294901760, %v6194_v63 }
 0x44f   :  { %v7512_v63 = vand.u32 4294901760, %v6209_v15 }
 0x450   :  { %v4379_v58 = vpack.c.bf16 %v7492_v60, %v7491_v30 }
 0x451   :  { %4336 = vmatpush3.bf16.msra.mxu0 %v7462_v5  ;;  %v7486_v5 = vand.u32 4294901760, %v7437_v55  ;;  %v7493_v55 = vand.u32 4294901760, %v7445_v54 }
 0x452   :  { %4338 = vmatprep.subr.bf16.mxu0 %v7463_v46 }
 0x453   :  { %v4375_v46 = vpack.c.bf16 %v7486_v5, %v7485_v32 }
 0x455   :  { %4340 = vmatpush3.bf16.msra.mxu0 %v7466_v9  ;;  %v7487_v9 = vand.u32 4294901760, %v7443_v33  ;;  %v7494_v33 = vand.u32 4294901760, %v5997_v57  ;;  %v7500_v57 = vand.u32 4294901760, %v6017_v14  ;;  %v7507_v14 = vand.u32 4294901760, %v6199_v49 }
 0x456   :  { %4342 = vmatprep.subr.bf16.mxu0 %v7467_v59  ;;  %v7514_v49 = vand.u32 4294901760, %v6213_v3 }
 0x457   :  { %v4377_v18 = vpack.c.bf16 %v7488_v16, %v7487_v9  ;;  %v4381_v28 = vpack.c.bf16 %v7494_v33, %v7493_v55  ;;  %v7499_v16 = vand.u32 4294901760, %v6015_v62  ;;  %v7506_v62 = vand.u32 4294901760, %v6197_v61 }
 0x458   :  { %3000 = vmatmul.mubr.f32.vlgmr.msra.gmra.mrb[12].mxu0 %v6407_v51  ;;  %v7513_v61 = vand.u32 4294901760, %v6211_v39 }
 0x459   :  { %3006 = vmatprep.mubr.f32.mxu0 %v6425_v11  ;;  %4344 = vmatpush3.bf16.msra.mxu0 %v7468_v26  ;;  %v7497_v11 = vand.u32 4294901760, %v6001_v20  ;;  %v4385_v54 = vpack.c.bf16 %v7499_v16, %v7498_v17  ;;  %v7504_v20 = vand.u32 4294901760, %v6192_v29  ;;  %v4393_v5 = vpack.c.bf16 %v7507_v14, %v7506_v62 }
 0x45a   :  { %4346 = vmatprep.subr.bf16.mxu0 %v7469_v4  ;;  %v7511_v29 = vand.u32 4294901760, %v6207_v36 }
 0x45b   :  { %v4391_v32 = vpack.c.bf16 %v7505_v52, %v7504_v20 }
 0x45c   :  { %3009 = vmatmul.mubr.f32.gmra.mrb[14].mxu0 %v6422_v23  ;;  %v7501_v23 = vand.u32 4294901760, %v6019_v37  ;;  %v7508_v37 = vand.u32 4294901760, %v6201_v41  ;;  %v7515_v41 = vand.u32 4294901760, %v6215_v10 }
 0x45d   :  { %4348 = vmatpush3.bf16.msra.mxu0 %v7470_v48  ;;  %3113 = vmatprep.mubr.f32.mxu0 %v2599_v44  ;;  %v7481_v44 = vld [vmem:[#allocation72_spill] sm:$0xff] }
 0x45e   :  { %4350 = vmatprep.subr.bf16.mxu0 %v7471_v2  ;;  %v4401_v30 = vpack.c.bf16 %v7515_v41, %v7514_v49 }
 0x461   :  { %4352 = vmatpush3.bf16.msra.mxu0 %v7472_v7 }
 0x462   :  { %4354 = vmatprep.subr.bf16.mxu0 %v7473_v13 }
 0x465   :  { %4356 = vmatpush3.bf16.msra.mxu0 %v7474_v47 }
 0x466   :  { %4358 = vmatprep.subr.bf16.mxu0 %v7475_v12 }
 0x469   :  { %4360 = vmatpush3.bf16.msra.mxu0 %v7476_v53 }
 0x46a   :  { %4362 = vmatprep.subr.bf16.mxu0 %v7477_v0 }
 0x46d   :  { %4364 = vmatpush3.bf16.msra.mxu0 %v7478_v21 }
 0x46e   :  { %4366 = vmatprep.subr.bf16.mxu0 %v7479_v45 }
 0x471   :  { %4368 = vmatpush3.bf16.msra.mxu0 %v7480_v35 }
 0x472   :  { %4370 = vmatprep.subr.bf16.mxu0 %v7481_v44  ;;  %v7489_v44 = vand.u32 4294901760, %v6407_v51  ;;  %v7496_v51 = vand.u32 4294901760, %v5999_v38  ;;  %v7503_v38 = vand.u32 4294901760, %v6190_v25  ;;  %v7510_v25 = vand.u32 4294901760, %v6205_v6 }
 0x473   :  { %v7517_v6 = vand.u32 4294901760, %v7464_v56 }
 0x474   :  { %v4383_v24 = vpack.c.bf16 %v7497_v11, %v7496_v51  ;;  %v4397_v9 = vpack.c.bf16 %v7511_v29, %v7510_v25 }
 0x475   :  { %4372 = vmatpush3.bf16.msra.mxu0 %v7484_v42 }
 0x476   :  { %4374 = vmatprep.subr.bf16.mxu0 %v4373_v34 }
 0x478   :  { %3117 = vmatmul.mubr.f32.vlgmr.msra.gmra.mrb[16].mxu0 %v7489_v44  ;;  %v7502_v44 = vand.u32 4294901760, %v6188_v1  ;;  %v7509_v1 = vand.u32 4294901760, %v6203_v27  ;;  %v7516_v27 = vand.u32 4294901760, %v7465_v31  ;;  %v3440_v31 = vld [vmem:[%s6641_s6] ss:$0 sm:$0xff]  ;;  %s4622_s6 = smov [#allocation10]  }
 0x479   :  { %3124 = vmatprep.mubr.f32.mxu0 %v7490_v8  ;;  %4376 = vmatpush3.bf16.msra.mxu0 %v4375_v46  ;;  %v4399_v8 = vpack.c.bf16 %v7513_v61, %v7512_v63  ;;  %s3426_s8 = sshll.u32 %s4622_s6, 4  ;;  %s3427_s8 = int_to_ptr.vmem [resolvable:$true] %s3426_s8 }
 0x47a   :  { %4378 = vmatprep.subr.bf16.mxu0 %v4377_v18  ;;  %v4387_v18 = vpack.c.bf16 %v7501_v23, %v7500_v57  ;;  %v4389_v34 = vpack.c.bf16 %v7503_v38, %v7502_v44  ;;  %v4395_v46 = vpack.c.bf16 %v7509_v1, %v7508_v37  ;;  %v4403_v60 = vpack.c.bf16 %v7517_v6, %v7516_v27  ;;  %s4583_s9 = scalar_lea.vmem %s3427_s8, 256  ;;  %p4588_p5 = scmp.lt.s32.totalorder %s3427_s8, %s3427_s8 }
 0x47b   :  { %p4584_p4 = scmp.ne.s32.totalorder %s3427_s8, %s4583_s9  ;;  %p4589_p6 = scmp.lt.s32.totalorder %s4583_s9, %s4583_s9 }
 0x47c   :  { %3128 = vmatmul.mubr.f32.gmra.mrb[18].mxu0 %v7495_v50 }
 0x47d   :  { %4380 = vmatpush3.bf16.msra.mxu0 %v4379_v58  ;;  %3294 = vmatprep.mubr.f32.mxu0 %v6404_v22  ;;  %p4590_p7 = por %p4589_p6, %p4588_p5 }
 0x47e   :  { %4382 = vmatprep.subr.bf16.mxu0 %v4381_v28 }
 0x47f   :  { %p4591_p8 = pnand %p4590_p7, %p4584_p4 }
 0x481   :  { %4384 = vmatpush3.bf16.msra.mxu0 %v4383_v24 }
 0x482   :  { %4386 = vmatprep.subr.bf16.mxu0 %v4385_v54 }
 0x485   :  { %4388 = vmatpush3.bf16.msra.mxu0 %v4387_v18 }
 0x486   :  { %4390 = vmatprep.subr.bf16.mxu0 %v4389_v34 }
 0x489   :  { %4392 = vmatpush3.bf16.msra.mxu0 %v4391_v32 }
 0x48a   :  { %4394 = vmatprep.subr.bf16.mxu0 %v4393_v5 }
 0x48d   :  { %4396 = vmatpush3.bf16.msra.mxu0 %v4395_v46 }
 0x48e   :  { %4398 = vmatprep.subr.bf16.mxu0 %v4397_v9 }
 0x491   :  { %4400 = vmatpush3.bf16.msra.mxu0 %v4399_v8 }
 0x492   :  { %4402 = vmatprep.subr.bf16.mxu0 %v4401_v30 }
 0x495   :  { %4404 = vmatpush3.bf16.msra.mxu0 %v4403_v60 }
 0x496   :  { %4406 = vmatprep.subr.bf16.mxu0 %v7467_v59 }
 0x498   :  { %3296 = vmatmul.mubr.f32.vlgmr.msra.gmra.mrb[20].mxu0 %v6402_v19 }
 0x499   :  { %3301 = vmatprep.mubr.f32.mxu0 %v6415_v40  ;;  %4408 = vmatpush3.bf16.msra.mxu0 %v7468_v26 }
 0x49a   :  { %4410 = vmatprep.subr.bf16.mxu0 %v7469_v4 }
 0x49c   :  { %3303 = vmatmul.mubr.f32.gmra.mrb[22].mxu0 %v6413_v43 }
 0x49d   :  { %4412 = vmatpush3.bf16.msra.mxu0 %v7470_v48  ;;  %3405 = vmatprep.mubr.f32.mxu0 %v6404_v22  ;;  %v7518_v22 = vld [vmem:[#allocation72_spill] sm:$0xff] }
 0x49e   :  { %4414 = vmatprep.subr.bf16.mxu0 %v7471_v2 }
 0x4a1   :  { %4416 = vmatpush3.bf16.msra.mxu0 %v7472_v7 }
 0x4a2   :  { %4418 = vmatprep.subr.bf16.mxu0 %v7473_v13 }
 0x4a5   :  { %4420 = vmatpush3.bf16.msra.mxu0 %v7474_v47 }
 0x4a6   :  { %4422 = vmatprep.subr.bf16.mxu0 %v7475_v12 }
 0x4a9   :  { %4424 = vmatpush3.bf16.msra.mxu0 %v7476_v53 }
 0x4aa   :  { %4426 = vmatprep.subr.bf16.mxu0 %v7477_v0 }
 0x4ad   :  { %4428 = vmatpush3.bf16.msra.mxu0 %v7478_v21 }
 0x4ae   :  { %4430 = vmatprep.subr.bf16.mxu0 %v7479_v45 }
 0x4b1   :  { %4432 = vmatpush3.bf16.msra.mxu0 %v7480_v35 }
 0x4b2   :  { %4434 = vmatprep.subr.bf16.mxu0 %v7518_v22 }
 0x4b5   :  { %4436 = vmatpush3.bf16.msra.mxu0 %v7484_v42 }
 0x4b8   :  { %3407 = vmatmul.mubr.f32.vlgmr.msra.gmra.mrb[24].mxu0 %v6402_v19 }
 0x4b9   :  { %3412 = vmatprep.mubr.f32.mxu0 %v6415_v40 }
 0x4bc   :  { %3414 = vmatmul.mubr.f32.gmra.mrb[26].mxu0 %v6413_v43 }
 0x4eb   :  { %v3473_v36 = vpop.f32.mrb[4].mxu0 }
 0x4ec   :  { %v3474_v15 = vpop.f32.mrb[5].mxu0 }
 0x4ed   :  { %v3475_v39 = vadd.f32 %v3474_v15, %v3473_v36 }
 0x4ef   :  { %v3476_v3 = vpop.f32.mrb[6].mxu0  ;;  %v2610_v4 = vadd.f32 %v3475_v39, %v3440_v31 }
 0x4f0   :  { %v3477_v10 = vpop.f32.mrb[7].mxu0 }
 0x4f1   :  { %v3478_v56 = vadd.f32 %v3477_v10, %v3476_v3 }
 0x4f3   :  { %v2625_v40 = vadd.f32 %v3478_v56, %v3440_v31 }
 0x50b   :  { %v3511_v59 = vpop.f32.mrb[8].mxu0 }
 0x50c   :  { %v3512_v26 = vpop.f32.mrb[9].mxu0 }
 0x50d   :  { %v3513_v48 = vadd.f32 %v3512_v26, %v3511_v59 }
 0x50f   :  { %v2857_v2 = vadd.f32 %v3513_v48, %v2610_v4  ;;  %v3514_v19 = vpop.f32.mrb[10].mxu0 }
 0x510   :  { %v3515_v7 = vpop.f32.mrb[11].mxu0 }
 0x511   :  { %v3516_v13 = vadd.f32 %v3515_v7, %v3514_v19 }
 0x513   :  { %v2864_v43 = vadd.f32 %v3516_v13, %v2625_v40 }
 0x52b   :  { %v3549_v47 = vpop.f32.mrb[12].mxu0 }
 0x52c   :  { %v3550_v12 = vpop.f32.mrb[13].mxu0 }
 0x52d   :  { %v3551_v53 = vadd.f32 %v3550_v12, %v3549_v47 }
 0x52f   :  { %v3002_v0 = vadd.f32 %v3551_v53, %v2857_v2  ;;  %v3552_v21 = vpop.f32.mrb[14].mxu0 }
 0x530   :  { %v3553_v45 = vpop.f32.mrb[15].mxu0 }
 0x531   :  { %v3554_v35 = vadd.f32 %v3553_v45, %v3552_v21 }
 0x533   :  { %v3011_v42 = vadd.f32 %v3554_v35, %v2864_v43 }
 0x54b   :  { %v3587_v58 = vpop.f32.mrb[16].mxu0 }
 0x54c   :  { %v3588_v55 = vpop.f32.mrb[17].mxu0 }
 0x54d   :  { %v3589_v33 = vadd.f32 %v3588_v55, %v3587_v58 }
 0x54f   :  { %v3119_v28 = vadd.f32 %v3589_v33, %v3002_v0  ;;  %v3590_v50 = vpop.f32.mrb[18].mxu0 }
 0x550   :  { %v3591_v51 = vpop.f32.mrb[19].mxu0 }
 0x551   :  { %v3592_v11 = vadd.f32 %v3591_v51, %v3590_v50 }
 0x553   :  { %v3130_v24 = vadd.f32 %v3592_v11, %v3011_v42 }
 0x56b   :  { %v3625_v17 = vpop.f32.mrb[20].mxu0 }
 0x56c   :  { %v3626_v16 = vpop.f32.mrb[21].mxu0 }
 0x56d   :  { %v3627_v54 = vadd.f32 %v3626_v16, %v3625_v17 }
 0x56f   :  { %v3298_v57 = vadd.f32 %v3627_v54, %v3119_v28  ;;  %v3628_v23 = vpop.f32.mrb[22].mxu0 }
 0x570   :  { %v3629_v18 = vpop.f32.mrb[23].mxu0 }
 0x571   :  { %v3630_v44 = vadd.f32 %v3629_v18, %v3628_v23 }
 0x573   :  { %v3305_v38 = vadd.f32 %v3630_v44, %v3130_v24 }
 0x58b   :  { %v3663_v34 = vpop.f32.mrb[24].mxu0 }
 0x58c   :  { %v3664_v20 = vpop.f32.mrb[25].mxu0 }
 0x58d   :  { %v3665_v52 = vadd.f32 %v3664_v20, %v3663_v34 }
 0x58f   :  { %v3409_v32 = vadd.f32 %v3665_v52, %v3298_v57  ;;  %v3666_v62 = vpop.f32.mrb[26].mxu0 }
 0x590   :  { %v3667_v14 = vpop.f32.mrb[27].mxu0 }
 0x591   :  { %3419 = vst [vmem:[#allocation10] sm:$0xff] %v3409_v32  ;;  %v3668_v5 = vadd.f32 %v3667_v14, %v3666_v62 }
 0x593   :  { %v3416_v37 = vadd.f32 %v3668_v5, %v3305_v38 }
 0x595   :  { %3420 = vst [vmem:[#allocation10 + $0x8] sm:$0xff] %v3416_v37 }
 0x596   :  { %4594 = shalt.err (!%p4591_p8)
}
 0x597   :  { %s4595_s14 = scalar_lea.hbm %s6642_s7, 256 }
 0x598   :  { %p4596_p9 = scmp.ne.s32.totalorder %s6642_s7, %s4595_s14  ;;  %p4599_p10 = scmp.lt.u32.totalorder %s4595_s14, %s6642_s7 }
 0x59a   :  { %p4601_p11 = pnand %p4599_p10, %p4596_p9 }
 0x59c   :  { %4604 = shalt.err (!%p4601_p11)
}
 0x59d   :  { %3432 = dma.vmem_to_hbm [thread:$0]  %s3427_s8, 256, %s6642_s7, [#allocation4], %s4617_s1, %s4617_s1, %s4618_s25  }
 0x59e   :  { %4611 = dma.done.wait [#allocation4], 256  }
 0x59f   :  { %4612 = vsyncadd [#allocation4], 4294967040 }
 0x5a0   :  { %3436 = vsyncpa [#allocation3], 1 }
 0x5a1   :  { %3437 = vsyncpa [#allocation6], 1 }
 0x5a2   :  { %3438 = vsyncpa [#allocation9], 1 }
 0x5a3   :  { %3439 = vsyncpa [#allocation4], 1 }

// kernel: tpu_custom_call.1
= control target key start
LH: loop header
LB: loop body
LE: loop exit
PB: predicated region body
PF: predicated region fallthrough
CT: control target
= control target key end

     0   :  { %12 = vsyncpa [#allocation3], 0  ;;  %s6635_s0 = inlined_call_operand.hbm [shape: f32[16,128], index: 0, kind: input, shape index: {}]   ;;  %s6636_s1 = inlined_call_operand.hbm [shape: f32[128,256], index: 1, kind: input, shape index: {}]   ;;  %s6637_s2 = inlined_call_operand.vmem [shape: f32[1,256], index: 2, kind: input, shape index: {}]   ;;  %s6638_s3 = inlined_call_operand.hbm [shape: f32[256,256], index: 3, kind: input, shape index: {}]   ;;  %s6639_s4 = inlined_call_operand.vmem [shape: f32[1,256], index: 4, kind: input, shape index: {}]   ;;  %s6640_s5 = inlined_call_operand.hbm [shape: f32[256,128], index: 5, kind: input, shape index: {}]   ;;  %s6641_s6 = inlined_call_operand.vmem [shape: f32[1,128], index: 6, kind: input, shape index: {}]   ;;  %s6642_s7 = inlined_call_operand.hbm [shape: f32[16,128], index: 7, kind: output, shape index: {}]  }
   0x1   :  { %13 = vsyncpa [#allocation6], 0 }
   0x2   :  { %14 = vsyncpa [#allocation9], 0 }
   0x3   :  { %15 = vsyncpa [#allocation4], 0  ;;  %s4613_s24 = smov [#allocation5]   ;;  %s4495_s28 = scalar_lea.hbm %s6636_s1, 4096 }
   0x4   :  { %s33_s25 = sshll.u32 %s4613_s24, 4  ;;  %p4496_p0 = scmp.ne.s32.totalorder %s6636_s1, %s4495_s28  ;;  %s34_s25 = int_to_ptr.vmem [resolvable:$true] %s33_s25 }
   0x5   :  { %p4499_p1 = scmp.lt.u32.totalorder %s4495_s28, %s6636_s1 }
   0x7   :  { %p4501_p2 = pnand %p4499_p1, %p4496_p0 }
   0x9   :  { %4504 = shalt.err (!%p4501_p2)
}
   0xa   :  { %s4505_s10 = scalar_lea.vmem %s34_s25, 4096  ;;  %p4510_p4 = scmp.lt.s32.totalorder %s34_s25, %s34_s25 }
   0xb   :  { %p4506_p3 = scmp.ne.s32.totalorder %s34_s25, %s4505_s10  ;;  %p4511_p5 = scmp.lt.s32.totalorder %s4505_s10, %s4505_s10 }
   0xd   :  { %p4512_p6 = por %p4511_p5, %p4510_p4 }
   0xf   :  { %p4513_p7 = pnand %p4512_p6, %p4506_p3 }
  0x11   :  { %4516 = shalt.err (!%p4513_p7)
}
  0x12   :  { %s4614_s11 = smov 256   ;;  %s4615_s12 = smov 16  }
  0x13   :  { %39 = dma.hbm_to_vmem [thread:$0]  %s6636_s1, 4096, %s34_s25, [#allocation6], %s4614_s11, %s4614_s11, %s4615_s12  }
  0x14   :  { %s4616_s15 = smov [#allocation2]   ;;  %s4517_s19 = scalar_lea.hbm %s6635_s0, 256 }
  0x15   :  { %s21_s16 = sshll.u32 %s4616_s15, 4  ;;  %p4518_p8 = scmp.ne.s32.totalorder %s6635_s0, %s4517_s19  ;;  %s22_s16 = int_to_ptr.vmem [resolvable:$true] %s21_s16 }
  0x16   :  { %p4521_p9 = scmp.lt.u32.totalorder %s4517_s19, %s6635_s0 }
  0x18   :  { %p4523_p10 = pnand %p4521_p9, %p4518_p8 }
  0x1a   :  { %4526 = shalt.err (!%p4523_p10)
}
  0x1b   :  { %s4527_s24 = scalar_lea.vmem %s22_s16, 256  ;;  %p4532_p12 = scmp.lt.s32.totalorder %s22_s16, %s22_s16 }
  0x1c   :  { %p4528_p11 = scmp.ne.s32.totalorder %s22_s16, %s4527_s24  ;;  %p4533_p13 = scmp.lt.s32.totalorder %s4527_s24, %s4527_s24 }
  0x1e   :  { %p4534_p0 = por %p4533_p13, %p4532_p12 }
  0x20   :  { %p4535_p1 = pnand %p4534_p0, %p4528_p11 }
  0x22   :  { %4538 = shalt.err (!%p4535_p1)
}
  0x23   :  { %s4617_s1 = smov 128   ;;  %s4618_s25 = smov 8  }
  0x24   :  { %27 = dma.hbm_to_vmem [thread:$0]  %s6635_s0, 256, %s22_s16, [#allocation3], %s4617_s1, %s4617_s1, %s4618_s25  }
  0x25   :  { %s4619_s28 = smov [#allocation7]   ;;  %s4620_s30 = smov [#allocation8]  }
  0x26   :  { %s47_s29 = sshll.u32 %s4619_s28, 4  ;;  %s61_s8 = sshll.u32 %s4620_s30, 4  ;;  %s48_s29 = int_to_ptr.vmem [resolvable:$true] %s47_s29  ;;  %s4693_s8 = int_to_ptr.vmem [resolvable:$true] %s61_s8 }
  0x27   :  { %s4539_s13 = scalar_lea.hbm %s6638_s3, 8192 }
  0x28   :  { %p4540_p2 = scmp.ne.s32.totalorder %s6638_s3, %s4539_s13  ;;  %p4543_p3 = scmp.lt.u32.totalorder %s4539_s13, %s6638_s3 }
  0x2a   :  { %p4545_p4 = pnand %p4543_p3, %p4540_p2 }
  0x2c   :  { %4548 = shalt.err (!%p4545_p4)
}
  0x2d   :  { %s4549_s0 = scalar_lea.vmem %s48_s29, 8192  ;;  %p4554_p6 = scmp.lt.s32.totalorder %s48_s29, %s48_s29 }
  0x2e   :  { %p4550_p5 = scmp.ne.s32.totalorder %s48_s29, %s4549_s0  ;;  %p4555_p7 = scmp.lt.s32.totalorder %s4549_s0, %s4549_s0 }
  0x30   :  { %p4556_p8 = por %p4555_p7, %p4554_p6 }
  0x32   :  { %p4557_p9 = pnand %p4556_p8, %p4550_p5 }
  0x34   :  { %4560 = shalt.err (!%p4557_p9)
}
  0x35   :  { %53 = dma.hbm_to_vmem [thread:$0]  %s6638_s3, 8192, %s48_s29, [#allocation6], %s4614_s11, %s4614_s11, %s4615_s12  }
  0x36   :  { %s4561_s22 = scalar_lea.hbm %s6640_s5, 4096 }
  0x37   :  { %p4562_p10 = scmp.ne.s32.totalorder %s6640_s5, %s4561_s22  ;;  %p4565_p11 = scmp.lt.u32.totalorder %s4561_s22, %s6640_s5 }
  0x39   :  { %p4567_p12 = pnand %p4565_p11, %p4562_p10 }
  0x3b   :  { %4570 = shalt.err (!%p4567_p12)
}
  0x3c   :  { %s4571_s28 = scalar_lea.vmem %s4693_s8, 4096  ;;  %p4576_p0 = scmp.lt.s32.totalorder %s4693_s8, %s4693_s8 }
  0x3d   :  { %p4572_p13 = scmp.ne.s32.totalorder %s4693_s8, %s4571_s28  ;;  %p4577_p1 = scmp.lt.s32.totalorder %s4571_s28, %s4571_s28 }
  0x3f   :  { %p4578_p2 = por %p4577_p1, %p4576_p0 }
  0x41   :  { %p4579_p3 = pnand %p4578_p2, %p4572_p13 }
  0x43   :  { %4582 = shalt.err (!%p4579_p3)
}
  0x44   :  { %67 = dma.hbm_to_vmem [thread:$0]  %s6640_s5, 4096, %s4693_s8, [#allocation9], %s4617_s1, %s4617_s1, %s4618_s25  }
  0x45   :  { %4605 = dma.done.wait [#allocation3], 256  }
  0x46   :  { %4606 = vsyncadd [#allocation3], 4294967040 }
  0x47   :  { %4607 = dma.done.wait [#allocation6], 12288  }
  0x48   :  { %4608 = vsyncadd [#allocation6], 4294955008 }
  0x49   :  { %4609 = dma.done.wait [#allocation9], 4096  }
  0x4a   :  { %4610 = vsyncadd [#allocation9], 4294963200  ;;  %v6645_v0 = vmov 0.0   ;;  %v85_v1 = vld [vmem:[#allocation5 + $0x8] sm:$0xff]  ;;  %v87_v2 = vld [vmem:[#allocation5 + $0x18] sm:$0xff] }
  0x4b   :  { %224 = vmatprep.mubr.f32.mxu0 %v6645_v0  ;;  %v84_v3 = vld [vmem:[#allocation5] sm:$0xff]  ;;  %v128_v4 = vand.u32 4294901760, %v85_v1  ;;  %v132_v5 = vand.u32 4294901760, %v87_v2  ;;  %v86_v6 = vld [vmem:[#allocation5 + $0x10] sm:$0xff]  ;;  %v89_v8 = vld [vmem:[#allocation5 + $0x28] sm:$0xff] }
  0x4c   :  { %v130_v7 = vand.u32 4294901760, %v84_v3  ;;  %v91_v9 = vld [vmem:[#allocation5 + $0x38] sm:$0xff]  ;;  %v134_v10 = vand.u32 4294901760, %v86_v6  ;;  %v136_v11 = vand.u32 4294901760, %v89_v8  ;;  %v88_v13 = vld [vmem:[#allocation5 + $0x20] sm:$0xff]  ;;  %v90_v14 = vld [vmem:[#allocation5 + $0x30] sm:$0xff] }
  0x4d   :  { %v140_v12 = vand.u32 4294901760, %v91_v9  ;;  %v93_v15 = vld [vmem:[#allocation5 + $0x48] sm:$0xff]  ;;  %v4731_v16 = vpack.c.bf16 %v132_v5, %v128_v4  ;;  %v95_v17 = vld [vmem:[#allocation5 + $0x58] sm:$0xff]  ;;  %v92_v18 = vld [vmem:[#allocation5 + $0x40] sm:$0xff]  ;;  %v138_v23 = vand.u32 4294901760, %v88_v13  ;;  %v142_v24 = vand.u32 4294901760, %v90_v14 }
  0x4e   :  { %v94_v19 = vld [vmem:[#allocation5 + $0x50] sm:$0xff]  ;;  %v4733_v20 = vpack.c.bf16 %v134_v10, %v130_v7  ;;  %v97_v22 = vld [vmem:[#allocation5 + $0x68] sm:$0xff]  ;;  %v144_v25 = vand.u32 4294901760, %v93_v15  ;;  %v148_v26 = vand.u32 4294901760, %v95_v17  ;;  %v146_v27 = vand.u32 4294901760, %v92_v18  ;;  %v99_v29 = vld [vmem:[#allocation5 + $0x78] sm:$0xff] }
  0x4f   :  { %6986 = vst [vmem:[#allocation15_spill] sm:$0xff] %v4731_v16  ;;  %v4735_v21 = vpack.c.bf16 %v140_v12, %v136_v11  ;;  %3670 = vmatprep.subr.bf16.mxu0 %v4731_v16  ;;  %v150_v28 = vand.u32 4294901760, %v94_v19  ;;  %v96_v30 = vld [vmem:[#allocation5 + $0x60] sm:$0xff]  ;;  %v4739_v31 = vsub.f32 %v85_v1, %v128_v4  ;;  %v4742_v32 = vpack.c.bf16 %v142_v24, %v138_v23  ;;  %v98_v34 = vld [vmem:[#allocation5 + $0x70] sm:$0xff]  ;;  %v101_v39 = vld [vmem:[#allocation5 + $0x88] sm:$0xff] }
  0x50   :  { %6987 = vst [vmem:[#allocation16_spill] sm:$0xff] %v4733_v20  ;;  %3672 = vmatpush1.bf16.msra.mxu0 %v4733_v20  ;;  %v152_v33 = vand.u32 4294901760, %v97_v22  ;;  %v4744_v35 = vsub.f32 %v87_v2, %v132_v5  ;;  %v4746_v36 = vsub.f32 %v84_v3, %v130_v7  ;;  %v4748_v37 = vsub.f32 %v86_v6, %v134_v10  ;;  %v103_v40 = vld [vmem:[#allocation5 + $0x98] sm:$0xff]  ;;  %v100_v45 = vld [vmem:[#allocation5 + $0x80] sm:$0xff]  ;;  %v102_v46 = vld [vmem:[#allocation5 + $0x90] sm:$0xff] }
  0x51   :  { %6988 = vst [vmem:[#allocation17_spill] sm:$0xff] %v4735_v21  ;;  %3674 = vmatprep.subr.bf16.mxu0 %v4735_v21  ;;  %6989 = vst [vmem:[#allocation18_spill] sm:$0xff] %v4742_v32  ;;  %v4750_v38 = vpack.c.bf16 %v148_v26, %v144_v25  ;;  %v4752_v41 = vsub.f32 %v89_v8, %v136_v11  ;;  %v4754_v42 = vsub.f32 %v91_v9, %v140_v12  ;;  %v105_v51 = vld [vmem:[#allocation5 + $0xa8] sm:$0xff]  ;;  %v107_v56 = vld [vmem:[#allocation5 + $0xb8] sm:$0xff] }
  0x52   :  { %v156_v43 = vand.u32 4294901760, %v99_v29  ;;  %v154_v44 = vand.u32 4294901760, %v96_v30  ;;  %v4757_v47 = vsub.f32 %v88_v13, %v138_v23  ;;  %v4759_v48 = vsub.f32 %v90_v14, %v142_v24  ;;  %v104_v57 = vld [vmem:[#allocation5 + $0xa0] sm:$0xff]  ;;  %v106_v58 = vld [vmem:[#allocation5 + $0xb0] sm:$0xff]  ;;  %v109_v63 = vld [vmem:[#allocation5 + $0xc8] sm:$0xff] }
  0x53   :  { %6990 = vst [vmem:[#allocation19_spill] sm:$0xff] %v4750_v38  ;;  %v4761_v49 = vpack.c.bf16 %v150_v28, %v146_v27  ;;  %v158_v50 = vand.u32 4294901760, %v98_v34  ;;  %v4764_v52 = vsub.f32 %v93_v15, %v144_v25  ;;  %v160_v54 = vand.u32 4294901760, %v101_v39  ;;  %v111_v1 = vld [vmem:[#allocation5 + $0xd8] sm:$0xff]  ;;  %v108_v10 = vld [vmem:[#allocation5 + $0xc0] sm:$0xff]  ;;  %v110_v11 = vld [vmem:[#allocation5 + $0xd0] sm:$0xff] }
  0x54   :  { %3676 = vmatpush1.bf16.msra.mxu0 %v4742_v32  ;;  %v4766_v53 = vpack.c.bf16 %v156_v43, %v152_v33  ;;  %v164_v55 = vand.u32 4294901760, %v103_v40  ;;  %v4768_v59 = vsub.f32 %v95_v17, %v148_v26  ;;  %v4770_v60 = vsub.f32 %v92_v18, %v146_v27  ;;  %v82_v27 = vld [vmem:[#allocation2] sm:$0xff]  ;;  %v83_v20 = vld [vmem:[#allocation2 + $0x8] sm:$0xff] }
  0x55   :  { %6991 = vst [vmem:[#allocation20_spill] sm:$0xff] %v4761_v49  ;;  %3678 = vmatprep.subr.bf16.mxu0 %v4750_v38  ;;  %v162_v61 = vand.u32 4294901760, %v100_v45  ;;  %v166_v62 = vand.u32 4294901760, %v102_v46  ;;  %v4772_v2 = vsub.f32 %v94_v19, %v150_v28  ;;  %v4774_v3 = vsub.f32 %v97_v22, %v152_v33 }
  0x56   :  { %6992 = vst [vmem:[#allocation21_spill] sm:$0xff] %v4766_v53  ;;  %v4776_v4 = vsub.f32 %v99_v29, %v156_v43  ;;  %v4778_v5 = vpack.c.bf16 %v158_v50, %v154_v44  ;;  %v168_v6 = vand.u32 4294901760, %v105_v51  ;;  %v172_v7 = vand.u32 4294901760, %v107_v56 }
  0x57   :  { %v170_v8 = vand.u32 4294901760, %v104_v57  ;;  %v174_v9 = vand.u32 4294901760, %v106_v58  ;;  %v4782_v12 = vsub.f32 %v96_v30, %v154_v44  ;;  %v4784_v13 = vpack.c.bf16 %v164_v55, %v160_v54  ;;  %v113_v44 = vld [vmem:[#allocation5 + $0xe8] sm:$0xff] }
  0x58   :  { %6993 = vst [vmem:[#allocation22_spill] sm:$0xff] %v4778_v5  ;;  %3680 = vmatpush1.bf16.msra.mxu0 %v4761_v49  ;;  %v176_v14 = vand.u32 4294901760, %v109_v63  ;;  %v180_v15 = vand.u32 4294901760, %v111_v1  ;;  %v4786_v17 = vsub.f32 %v98_v34, %v158_v50  ;;  %v4788_v18 = vsub.f32 %v101_v39, %v160_v54 }
  0x59   :  { %3682 = vmatprep.subr.bf16.mxu0 %v4766_v53  ;;  %6994 = vst [vmem:[#allocation23_spill] sm:$0xff] %v4784_v13  ;;  %v4790_v19 = vsub.f32 %v103_v40, %v164_v55  ;;  %v4792_v22 = vpack.c.bf16 %v166_v62, %v162_v61  ;;  %v4794_v23 = vsub.f32 %v100_v45, %v162_v61  ;;  %v178_v25 = vand.u32 4294901760, %v108_v10  ;;  %v115_v45 = vld [vmem:[#allocation5 + $0xf8] sm:$0xff] }
  0x5a   :  { %v4796_v24 = vsub.f32 %v102_v46, %v166_v62  ;;  %v182_v26 = vand.u32 4294901760, %v110_v11  ;;  %v4799_v28 = vpack.c.bf16 %v172_v7, %v168_v6  ;;  %v4801_v29 = vsub.f32 %v105_v51, %v168_v6  ;;  %v4816_v46 = vld [vmem:[#allocation5 + $0xe0] sm:$0xff]  ;;  %v4831_v62 = vld [vmem:[#allocation5 + $0xf0] sm:$0xff] }
  0x5b   :  { %6995 = vst [vmem:[#allocation24_spill] sm:$0xff] %v4792_v22  ;;  %v4803_v30 = vsub.f32 %v107_v56, %v172_v7  ;;  %v4805_v33 = vpack.c.bf16 %v174_v9, %v170_v8  ;;  %v4808_v34 = vsub.f32 %v104_v57, %v170_v8  ;;  %v4810_v39 = vsub.f32 %v106_v58, %v174_v9 }
  0x5c   :  { %3684 = vmatpush1.bf16.msra.mxu0 %v4778_v5  ;;  %6996 = vst [vmem:[#allocation25_spill] sm:$0xff] %v4799_v28  ;;  %v4812_v40 = vpack.c.bf16 %v180_v15, %v176_v14  ;;  %v4814_v43 = vsub.f32 %v109_v63, %v176_v14  ;;  %v6644_v50 = vand.u32 4294901760, %v4739_v31  ;;  %v6643_v51 = vand.u32 4294901760, %v4744_v35 }
  0x5d   :  { %6997 = vst [vmem:[#allocation26_spill] sm:$0xff] %v4805_v33  ;;  %3686 = vmatprep.subr.bf16.mxu0 %v4784_v13  ;;  %v4820_v54 = vand.u32 4294901760, %v82_v27  ;;  %v6647_v55 = vand.u32 4294901760, %v4746_v36  ;;  %v4823_v56 = vsub.f32 %v111_v1, %v180_v15  ;;  %v4825_v57 = vpack.c.bf16 %v182_v26, %v178_v25 }
  0x5e   :  { %6998 = vst [vmem:[#allocation27_spill] sm:$0xff] %v4812_v40  ;;  %v4827_v58 = vsub.f32 %v108_v10, %v178_v25  ;;  %v4829_v61 = vsub.f32 %v110_v11, %v182_v26  ;;  %v184_v63 = vand.u32 4294901760, %v113_v44  ;;  %v188_v6 = vand.u32 4294901760, %v115_v45 }
  0x5f   :  { %6999 = vst [vmem:[#allocation28_spill] sm:$0xff] %v4825_v57  ;;  %v250_v7 = vsub.f32 %v4739_v31, %v6644_v50  ;;  %v262_v1 = vsub.f32 %v4744_v35, %v6643_v51  ;;  %v4843_v9 = vsub.f32 %v82_v27, %v4820_v54  ;;  %v6648_v10 = vand.u32 4294901760, %v4748_v37 }
  0x60   :  { %7000 = vst [vmem:[#allocation29_spill] sm:$0xff] %v4829_v61  ;;  %3688 = vmatpush1.bf16.msra.mxu0 %v4792_v22  ;;  %v6649_v11 = vand.u32 4294901760, %v4752_v41  ;;  %v256_v15 = vsub.f32 %v4746_v36, %v6647_v55  ;;  %v6652_v25 = vand.u32 4294901760, %v4754_v42  ;;  %v6657_v26 = vand.u32 4294901760, %v4757_v47 }
  0x61   :  { %3690 = vmatprep.subr.bf16.mxu0 %v4799_v28  ;;  %7001 = vst [vmem:[#allocation30_spill] sm:$0xff] %v4843_v9  ;;  %v251_v51 = vand.u32 4294901760, %v250_v7  ;;  %v263_v50 = vand.u32 4294901760, %v262_v1  ;;  %v268_v27 = vsub.f32 %v4748_v37, %v6648_v10  ;;  %v6662_v1 = vand.u32 4294901760, %v4759_v48 }
  0x62   :  { %v274_v14 = vsub.f32 %v4752_v41, %v6649_v11  ;;  %v286_v55 = vsub.f32 %v4754_v42, %v6652_v25  ;;  %v280_v7 = vsub.f32 %v4757_v47, %v6657_v26  ;;  %v4869_v0 = vpack.c.bf16 %v188_v6, %v184_v63 }
  0x63   :  { %v4871_v10 = vsub.f32 %v113_v44, %v184_v63  ;;  %v4873_v8 = vsub.f32 %v115_v45, %v188_v6  ;;  %v7006_v25 = vand.u32 4294901760, %v4831_v62  ;;  %v257_v22 = vand.u32 4294901760, %v256_v15 }
  0x64   :  { %3692 = vmatpush1.bf16.msra.mxu0 %v4805_v33  ;;  %7002 = vst [vmem:[#allocation31_spill] sm:$0xff] %v4869_v0  ;;  %v7005_v33 = vand.u32 4294901760, %v4816_v46  ;;  %v292_v26 = vsub.f32 %v4759_v48, %v6662_v1  ;;  %v3701_v13 = vpack.c.bf16 %v263_v50, %v251_v51  ;;  %v7008_v44 = vand.u32 4294901760, %v4843_v9 }
  0x65   :  { %3694 = vmatprep.subr.bf16.mxu0 %v4812_v40  ;;  %7003 = vst [vmem:[#allocation32_spill] sm:$0xff] %v4871_v10  ;;  %7004 = vst [vmem:[#allocation33_spill] sm:$0xff] %v4873_v8  ;;  %v6665_v40 = vand.u32 4294901760, %v4768_v59  ;;  %v269_v63 = vand.u32 4294901760, %v268_v27  ;;  %v275_v11 = vand.u32 4294901760, %v274_v14  ;;  %v6670_v15 = vand.u32 4294901760, %v4772_v2 }
  0x66   :  { %v4880_v28 = vpack.c.bf16 %v7006_v25, %v7005_v33  ;;  %v228_v45 = vsub.f32 %v4843_v9, %v7008_v44  ;;  %v287_v33 = vand.u32 4294901760, %v286_v55  ;;  %v281_v25 = vand.u32 4294901760, %v280_v7 }
  0x67   :  { %v7009_v1 = vand.u32 4294901760, %v4764_v52  ;;  %v310_v51 = vsub.f32 %v4768_v59, %v6665_v40  ;;  %v6675_v27 = vand.u32 4294901760, %v4774_v3  ;;  %v6676_v44 = vand.u32 4294901760, %v4776_v4 }
  0x68   :  { %7007 = vst [vmem:[#allocation34_spill] sm:$0xff] %v4880_v28  ;;  %3696 = vmatpush1.bf16.msra.mxu0 %v4825_v57  ;;  %v293_v6 = vand.u32 4294901760, %v292_v26  ;;  %v7010_v55 = vand.u32 4294901760, %v4770_v60  ;;  %v316_v7 = vsub.f32 %v4772_v2, %v6670_v15  ;;  %v6690_v26 = vand.u32 4294901760, %v4786_v17 }
  0x69   :  { %3698 = vmatprep.subr.bf16.mxu0 %v4869_v0  ;;  %v298_v50 = vsub.f32 %v4764_v52, %v7009_v1  ;;  %v6683_v0 = vand.u32 4294901760, %v4782_v12  ;;  %v229_v1 = vand.u32 4294901760, %v228_v45  ;;  %v322_v40 = vsub.f32 %v4774_v3, %v6675_v27 }
  0x6a   :  { %v304_v14 = vsub.f32 %v4770_v60, %v7010_v55  ;;  %v334_v57 = vsub.f32 %v4776_v4, %v6676_v44  ;;  %v3703_v55 = vpack.c.bf16 %v269_v63, %v257_v22  ;;  %v3705_v5 = vpack.c.bf16 %v287_v33, %v275_v11 }
  0x6b   :  { %v328_v15 = vsub.f32 %v4782_v12, %v6683_v0  ;;  %v6688_v45 = vand.u32 4294901760, %v4788_v18  ;;  %v299_v53 = vand.u32 4294901760, %v298_v50  ;;  %v311_v49 = vand.u32 4294901760, %v310_v51 }
  0x6c   :  { %3700 = vmatpush1.bf16.msra.mxu0 %v4880_v28  ;;  %v340_v27 = vsub.f32 %v4786_v17, %v6690_v26  ;;  %v6686_v44 = vand.u32 4294901760, %v4790_v19  ;;  %v3707_v38 = vpack.c.bf16 %v293_v6, %v281_v25  ;;  %v305_v32 = vand.u32 4294901760, %v304_v14 }
  0x6d   :  { %3702 = vmatprep.subr.bf16.mxu0 %v3701_v13  ;;  %v317_v28 = vand.u32 4294901760, %v316_v7  ;;  %v6685_v22 = vand.u32 4294901760, %v4794_v23  ;;  %v323_v11 = vand.u32 4294901760, %v322_v40  ;;  %v335_v63 = vand.u32 4294901760, %v334_v57 }
  0x6e   :  { %v329_v33 = vand.u32 4294901760, %v328_v15  ;;  %v6684_v0 = vand.u32 4294901760, %v4796_v24  ;;  %v341_v13 = vand.u32 4294901760, %v340_v27  ;;  %v346_v50 = vsub.f32 %v4788_v18, %v6688_v45 }
  0x6f   :  { %230 = vmatmul.mubr.f32.vlgmr.msra.gmra.mrb[0].mxu0 %v229_v1  ;;  %v6687_v51 = vand.u32 4294901760, %v4801_v29  ;;  %v6689_v6 = vand.u32 4294901760, %v4803_v30  ;;  %v7011_v25 = vmov 0.0   ;;  %v3709_v14 = vpack.c.bf16 %v311_v49, %v299_v53 }
  0x70   :  { %3704 = vmatpush1.bf16.msra.mxu0 %v3703_v55  ;;  %235 = vmatprep.mubr.f32.mxu0 %v7011_v25  ;;  %v358_v40 = vsub.f32 %v4790_v19, %v6686_v44  ;;  %v352_v57 = vsub.f32 %v4794_v23, %v6685_v22  ;;  %v364_v15 = vsub.f32 %v4796_v24, %v6684_v0  ;;  %v7012_v27 = vand.u32 4294901760, %v4816_v46 }
  0x71   :  { %3706 = vmatprep.subr.bf16.mxu0 %v3705_v5  ;;  %v370_v49 = vsub.f32 %v4801_v29, %v6687_v51  ;;  %v382_v53 = vsub.f32 %v4803_v30, %v6689_v6  ;;  %v7013_v1 = vand.u32 4294901760, %v4831_v62  ;;  %v3711_v0 = vpack.c.bf16 %v317_v28, %v305_v32 }
  0x72   :  { %v4944_v7 = vsub.f32 %v4816_v46, %v7012_v27  ;;  %v6697_v22 = vand.u32 4294901760, %v4810_v39  ;;  %v6695_v46 = vand.u32 4294901760, %v4814_v43  ;;  %v3713_v27 = vpack.c.bf16 %v335_v63, %v323_v11 }
  0x73   :  { %v4956_v55 = vsub.f32 %v4831_v62, %v7013_v1  ;;  %v3715_v44 = vpack.c.bf16 %v341_v13, %v329_v33  ;;  %v347_v51 = vand.u32 4294901760, %v346_v50  ;;  %v6696_v45 = vand.u32 4294901760, %v4823_v56 }
  0x74   :  { %3708 = vmatpush1.bf16.msra.mxu0 %v3707_v38  ;;  %v359_v6 = vand.u32 4294901760, %v358_v40  ;;  %v353_v26 = vand.u32 4294901760, %v352_v57  ;;  %v365_v5 = vand.u32 4294901760, %v364_v15  ;;  %v6698_v21 = vand.u32 4294901760, %v4827_v58 }
  0x75   :  { %3710 = vmatprep.subr.bf16.mxu0 %v3709_v14  ;;  %v371_v62 = vand.u32 4294901760, %v370_v49  ;;  %v383_v1 = vand.u32 4294901760, %v382_v53  ;;  %v7014_v32 = vand.u32 4294901760, %v4808_v34  ;;  %v411_v38 = vand.u32 4294901760, %v4829_v61 }
  0x76   :  { %v388_v11 = vsub.f32 %v4810_v39, %v6697_v22  ;;  %v394_v63 = vsub.f32 %v4814_v43, %v6695_v46  ;;  %v417_v33 = vand.u32 4294901760, %v4871_v10  ;;  %v429_v13 = vand.u32 4294901760, %v4873_v8 }
  0x77   :  { %v376_v28 = vsub.f32 %v4808_v34, %v7014_v32  ;;  %v406_v50 = vsub.f32 %v4823_v56, %v6696_v45  ;;  %v400_v14 = vsub.f32 %v4827_v58, %v6698_v21  ;;  %v412_v40 = vsub.f32 %v4829_v61, %v411_v38 }
  0x78   :  { %3712 = vmatpush1.bf16.msra.mxu0 %v3711_v0  ;;  %v4981_v57 = vand.u32 4294901760, %v83_v20  ;;  %v3717_v15 = vpack.c.bf16 %v359_v6, %v347_v51  ;;  %v418_v49 = vsub.f32 %v4871_v10, %v417_v33  ;;  %v430_v53 = vsub.f32 %v4873_v8, %v429_v13 }
  0x79   :  { %3714 = vmatprep.subr.bf16.mxu0 %v3713_v27  ;;  %v423_v0 = vand.u32 4294901760, %v4944_v7  ;;  %v3719_v32 = vpack.c.bf16 %v365_v5, %v353_v26  ;;  %v435_v45 = vand.u32 4294901760, %v4956_v55  ;;  %v3721_v22 = vpack.c.bf16 %v383_v1, %v371_v62 }
  0x7a   :  { %v4987_v46 = vsub.f32 %v83_v20, %v4981_v57  ;;  %v377_v21 = vand.u32 4294901760, %v376_v28  ;;  %v389_v9 = vand.u32 4294901760, %v388_v11  ;;  %v395_v16 = vand.u32 4294901760, %v394_v63 }
  0x7b   :  { %v407_v61 = vand.u32 4294901760, %v406_v50  ;;  %v401_v27 = vand.u32 4294901760, %v400_v14  ;;  %v413_v51 = vand.u32 4294901760, %v412_v40  ;;  %v419_v8 = vand.u32 4294901760, %v418_v49 }
  0x7c   :  { %3716 = vmatpush1.bf16.msra.mxu0 %v3715_v44  ;;  %v6706_v6 = vand.u32 4294901760, %v4987_v46  ;;  %v431_v10 = vand.u32 4294901760, %v430_v53  ;;  %v424_v26 = vsub.f32 %v4944_v7, %v423_v0  ;;  %v436_v20 = vsub.f32 %v4956_v55, %v435_v45 }
  0x7d   :  { %3718 = vmatprep.subr.bf16.mxu0 %v3717_v15  ;;  %v3723_v62 = vpack.c.bf16 %v389_v9, %v377_v21  ;;  %v3725_v1 = vpack.c.bf16 %v407_v61, %v395_v16  ;;  %v3727_v28 = vpack.c.bf16 %v413_v51, %v401_v27  ;;  %v7015_v14 = vand.u32 4294901760, %v4739_v31 }
  0x7e   :  { %v239_v5 = vsub.f32 %v4987_v46, %v6706_v6  ;;  %v3729_v11 = vpack.c.bf16 %v431_v10, %v419_v8  ;;  %v425_v63 = vand.u32 4294901760, %v424_v26  ;;  %v437_v50 = vand.u32 4294901760, %v436_v20 }
  0x7f   :  { %v7016_v40 = vand.u32 4294901760, %v4744_v35  ;;  %v7017_v49 = vand.u32 4294901760, %v4746_v36  ;;  %v7018_v53 = vand.u32 4294901760, %v4748_v37  ;;  %v7019_v16 = vand.u32 4294901760, %v4752_v41 }
  0x80   :  { %3720 = vmatpush1.bf16.msra.mxu0 %v3719_v32  ;;  %v240_v44 = vand.u32 4294901760, %v239_v5  ;;  %v7020_v21 = vand.u32 4294901760, %v4754_v42  ;;  %v7021_v8 = vand.u32 4294901760, %v4757_v47  ;;  %v7022_v9 = vand.u32 4294901760, %v4759_v48 }
  0x81   :  { %3722 = vmatprep.subr.bf16.mxu0 %v3721_v22  ;;  %v5000_v15 = vpack.c.bf16 %v7016_v40, %v7015_v14  ;;  %v5006_v32 = vpack.c.bf16 %v7018_v53, %v7017_v49  ;;  %v7023_v22 = vand.u32 4294901760, %v4764_v52  ;;  %v7024_v27 = vand.u32 4294901760, %v4768_v59 }
  0x82   :  { %241 = vmatmul.mubr.f32.gmra.mrb[2].mxu0 %v240_v44  ;;  %v5012_v61 = vpack.c.bf16 %v7020_v21, %v7019_v16  ;;  %v5018_v10 = vpack.c.bf16 %v7022_v9, %v7021_v8  ;;  %v7025_v26 = vand.u32 4294901760, %v4770_v60  ;;  %v7026_v20 = vand.u32 4294901760, %v4772_v2 }
  0x83   :  { %471 = vmatprep.mubr.f32.mxu0 %v7011_v25  ;;  %v5025_v51 = vpack.c.bf16 %v7024_v27, %v7023_v22  ;;  %v7027_v44 = vand.u32 4294901760, %v4774_v3  ;;  %v7028_v14 = vand.u32 4294901760, %v4776_v4  ;;  %v7029_v49 = vand.u32 4294901760, %v4782_v12 }
  0x84   :  { %v5031_v5 = vpack.c.bf16 %v7026_v20, %v7025_v26  ;;  %v7030_v53 = vand.u32 4294901760, %v4786_v17  ;;  %3724 = vmatpush1.bf16.msra.mxu0 %v3723_v62  ;;  %v7031_v21 = vand.u32 4294901760, %v4788_v18  ;;  %v7032_v8 = vand.u32 4294901760, %v4790_v19 }
  0x85   :  { %v5037_v40 = vpack.c.bf16 %v7028_v14, %v7027_v44  ;;  %v7033_v22 = vand.u32 4294901760, %v4794_v23  ;;  %v7034_v27 = vand.u32 4294901760, %v4796_v24  ;;  %v7036_v20 = vand.u32 4294901760, %v4801_v29  ;;  %3726 = vmatprep.subr.bf16.mxu0 %v3725_v1 }
  0x86   :  { %v5043_v16 = vpack.c.bf16 %v7030_v53, %v7029_v49  ;;  %v5049_v9 = vpack.c.bf16 %v7032_v8, %v7031_v21  ;;  %v7037_v44 = vand.u32 4294901760, %v4803_v30  ;;  %v7038_v62 = vand.u32 4294901760, %v4808_v34 }
  0x87   :  { %v5055_v26 = vpack.c.bf16 %v7034_v27, %v7033_v22  ;;  %v7039_v49 = vand.u32 4294901760, %v4810_v39  ;;  %v7040_v21 = vand.u32 4294901760, %v4814_v43  ;;  %v7041_v8 = vand.u32 4294901760, %v4823_v56 }
  0x88   :  { %v5061_v14 = vpack.c.bf16 %v7037_v44, %v7036_v20  ;;  %v7042_v22 = vand.u32 4294901760, %v4827_v58  ;;  %v5081_v20 = vpack.c.bf16 %v435_v45, %v423_v0  ;;  %3728 = vmatpush1.bf16.msra.mxu0 %v3727_v28  ;;  %v3731_v44 = vpack.c.bf16 %v437_v50, %v425_v63  ;;  %v1040_v63 = vld [vmem:[#allocation7 + $0x20] sm:$0xff]  ;;  %v1042_v50 = vld [vmem:[#allocation7 + $0x30] sm:$0xff] }
  0x89   :  { %7035 = vst [vmem:[#allocation35_spill] sm:$0xff] %v5055_v26  ;;  %v5067_v53 = vpack.c.bf16 %v7039_v49, %v7038_v62  ;;  %v5073_v6 = vpack.c.bf16 %v7041_v8, %v7040_v21  ;;  %v5079_v26 = vpack.c.bf16 %v429_v13, %v417_v33  ;;  %3730 = vmatprep.subr.bf16.mxu0 %v3729_v11  ;;  %v1043_v33 = vld [vmem:[#allocation7 + $0x38] sm:$0xff]  ;;  %v1045_v21 = vld [vmem:[#allocation7 + $0x48] sm:$0xff] }
  0x8a   :  { %v5077_v27 = vpack.c.bf16 %v411_v38, %v7042_v22  ;;  %v3733_v1 = vpack.c.bf16 %v4744_v35, %v4739_v31  ;;  %v3735_v62 = vpack.c.bf16 %v4748_v37, %v4746_v36  ;;  %v3737_v49 = vpack.c.bf16 %v4754_v42, %v4752_v41  ;;  %v1041_v38 = vld [vmem:[#allocation7 + $0x28] sm:$0xff] }
  0x8b   :  { %v3739_v45 = vpack.c.bf16 %v4759_v48, %v4757_v47  ;;  %v3741_v31 = vpack.c.bf16 %v4768_v59, %v4764_v52  ;;  %v3743_v35 = vpack.c.bf16 %v4772_v2, %v4770_v60  ;;  %v3745_v36 = vpack.c.bf16 %v4776_v4, %v4774_v3  ;;  %v1037_v47 = vld [vmem:[#allocation7 + $0x8] sm:$0xff]  ;;  %v1039_v48 = vld [vmem:[#allocation7 + $0x18] sm:$0xff]  ;;  %v1036_v52 = vld [vmem:[#allocation7] sm:$0xff] }
  0x8c   :  { %3732 = vmatpush1.bf16.msra.mxu0 %v3731_v44  ;;  %v1112_v60 = vand.u32 4294901760, %v1037_v47  ;;  %v1116_v2 = vand.u32 4294901760, %v1039_v48  ;;  %v1038_v3 = vld [vmem:[#allocation7 + $0x10] sm:$0xff]  ;;  %v1114_v4 = vand.u32 4294901760, %v1036_v52  ;;  %v1120_v28 = vand.u32 4294901760, %v1041_v38  ;;  %v1049_v41 = vld [vmem:[#allocation7 + $0x68] sm:$0xff] }
  0x8d   :  { %3734 = vmatprep.subr.bf16.mxu0 %v3733_v1  ;;  %v1118_v0 = vand.u32 4294901760, %v1038_v3  ;;  %v1124_v11 = vand.u32 4294901760, %v1043_v33  ;;  %v1136_v37 = vand.u32 4294901760, %v1049_v41 }
  0x8e   :  { %v5111_v8 = vpack.c.bf16 %v1116_v2, %v1112_v60  ;;  %v5113_v22 = vsub.f32 %v1037_v47, %v1112_v60  ;;  %v5115_v44 = vsub.f32 %v1039_v48, %v1116_v2  ;;  %v5117_v1 = vsub.f32 %v1036_v52, %v1114_v4  ;;  %v1051_v2 = vld [vmem:[#allocation7 + $0x78] sm:$0xff] }
  0x8f   :  { %473 = vmatmul.mubr.f32.vlgmr.msra.gmra.mrb[0].mxu0 %v4820_v54  ;;  %v5121_v13 = vsub.f32 %v1038_v3, %v1118_v0  ;;  %v5123_v59 = vpack.c.bf16 %v1124_v11, %v1120_v28  ;;  %v5125_v42 = vsub.f32 %v1041_v38, %v1120_v28  ;;  %v5128_v47 = vsub.f32 %v1043_v33, %v1124_v11  ;;  %v1050_v38 = vld [vmem:[#allocation7 + $0x70] sm:$0xff] }
  0x90   :  { %3736 = vmatpush1.bf16.msra.mxu0 %v3735_v62  ;;  %478 = vmatprep.mubr.f32.mxu0 %v7011_v25  ;;  %7043 = vst [vmem:[#allocation36_spill] sm:$0xff] %v5111_v8  ;;  %7044 = vst [vmem:[#allocation37_spill] sm:$0xff] %v5115_v44  ;;  %v1047_v62 = vld [vmem:[#allocation7 + $0x58] sm:$0xff]  ;;  %v1122_v48 = vand.u32 4294901760, %v1040_v63  ;;  %v1126_v52 = vand.u32 4294901760, %v1042_v50  ;;  %v1128_v60 = vand.u32 4294901760, %v1045_v21 }
  0x91   :  { %3738 = vmatprep.subr.bf16.mxu0 %v3737_v49  ;;  %7045 = vst [vmem:[#allocation38_spill] sm:$0xff] %v5117_v1  ;;  %v1044_v49 = vld [vmem:[#allocation7 + $0x40] sm:$0xff]  ;;  %7047 = vst [vmem:[#allocation40_spill] sm:$0xff] %v5121_v13  ;;  %3862 = vmatprep.subr.bf16.mxu1 %v5111_v8  ;;  %v1053_v8 = vld [vmem:[#allocation7 + $0x88] sm:$0xff] }
  0x92   :  { %7048 = vst [vmem:[#allocation41_spill] sm:$0xff] %v5123_v59  ;;  %7049 = vst [vmem:[#allocation42_spill] sm:$0xff] %v5125_v42  ;;  %v1130_v3 = vand.u32 4294901760, %v1044_v49  ;;  %v1048_v13 = vld [vmem:[#allocation7 + $0x60] sm:$0xff]  ;;  %v5134_v28 = vsub.f32 %v1040_v63, %v1122_v48  ;;  %v5136_v33 = vsub.f32 %v1042_v50, %v1126_v52  ;;  %v5138_v11 = vsub.f32 %v1045_v21, %v1128_v60 }
  0x93   :  { %480 = vmatmul.mubr.f32.gmra.mrb[2].mxu0 %v4981_v57  ;;  %7050 = vst [vmem:[#allocation43_spill] sm:$0xff] %v5128_v47  ;;  %v5140_v47 = vld [vmem:[#allocation7 + $0x80] sm:$0xff]  ;;  %v7057_v63 = vpack.c.bf16 %v4786_v17, %v4782_v12  ;;  %v1140_v21 = vand.u32 4294901760, %v1051_v2 }
  0x94   :  { %3740 = vmatpush1.bf16.msra.mxu0 %v3739_v45  ;;  %614 = vmatprep.mubr.f32.mxu0 %v7011_v25  ;;  %v1046_v45 = vld [vmem:[#allocation7 + $0x50] sm:$0xff]  ;;  %7052 = vst [vmem:[#allocation45_spill] sm:$0xff] %v5138_v11  ;;  %v5148_v44 = vsub.f32 %v1044_v49, %v1130_v3  ;;  %v1144_v49 = vand.u32 4294901760, %v1053_v8 }
  0x95   :  { %3742 = vmatprep.subr.bf16.mxu0 %v3741_v31  ;;  %v5119_v31 = vpack.c.bf16 %v1118_v0, %v1114_v4  ;;  %v1132_v4 = vand.u32 4294901760, %v1047_v62  ;;  %v1134_v0 = vand.u32 4294901760, %v1046_v45  ;;  %v5163_v12 = vpack.c.bf16 %v1140_v21, %v1136_v37 }
  0x96   :  { %7056 = vst [vmem:[#allocation49_spill] sm:$0xff] %v5148_v44  ;;  %v5165_v17 = vsub.f32 %v1051_v2, %v1140_v21  ;;  %v7068_v2 = vld [vmem:[#allocation32_spill] sm:$0xff]  ;;  %v7069_v21 = vld [vmem:[#allocation33_spill] sm:$0xff] }
  0x97   :  { %7046 = vst [vmem:[#allocation39_spill] sm:$0xff] %v5119_v31  ;;  %3864 = vmatpush1.bf16.msra.mxu1 %v5119_v31  ;;  %v5142_v31 = vpack.c.bf16 %v1132_v4, %v1128_v60  ;;  %v5144_v42 = vsub.f32 %v1047_v62, %v1132_v4  ;;  %v5146_v1 = vpack.c.bf16 %v1134_v0, %v1130_v3  ;;  %v1142_v62 = vand.u32 4294901760, %v1050_v38 }
  0x98   :  { %3744 = vmatpush1.bf16.msra.mxu0 %v3743_v35  ;;  %3866 = vmatprep.subr.bf16.mxu1 %v5123_v59  ;;  %v5132_v35 = vpack.c.bf16 %v1126_v52, %v1122_v48  ;;  %v1054_v59 = vld [vmem:[#allocation7 + $0x90] sm:$0xff]  ;;  %v5153_v50 = vsub.f32 %v1046_v45, %v1134_v0  ;;  %v5155_v48 = vsub.f32 %v1049_v41, %v1136_v37  ;;  %v1138_v52 = vand.u32 4294901760, %v1048_v13  ;;  %v1057_v0 = vld [vmem:[#allocation7 + $0xa8] sm:$0xff] }
  0x99   :  { %3746 = vmatprep.subr.bf16.mxu0 %v3745_v36  ;;  %v1055_v36 = vld [vmem:[#allocation7 + $0x98] sm:$0xff]  ;;  %7053 = vst [vmem:[#allocation46_spill] sm:$0xff] %v5142_v31  ;;  %7054 = vst [vmem:[#allocation47_spill] sm:$0xff] %v5144_v42  ;;  %v7060_v60 = vpack.c.bf16 %v4790_v19, %v4788_v18  ;;  %v1146_v3 = vand.u32 4294901760, %v5140_v47  ;;  %v1150_v45 = vand.u32 4294901760, %v1054_v59  ;;  %v3757_v18 = vpack.c.bf16 %v4823_v56, %v4814_v43  ;;  %v7064_v19 = vld [vmem:[#allocation29_spill] sm:$0xff] }
  0x9a   :  { %7051 = vst [vmem:[#allocation44_spill] sm:$0xff] %v5132_v35  ;;  %7055 = vst [vmem:[#allocation48_spill] sm:$0xff] %v5146_v1  ;;  %v1148_v4 = vand.u32 4294901760, %v1055_v36  ;;  %v5167_v41 = vsub.f32 %v1048_v13, %v1138_v52  ;;  %v1058_v37 = vld [vmem:[#allocation7 + $0xb0] sm:$0xff]  ;;  %v7067_v13 = vpack.c.bf16 %v4796_v24, %v4794_v23  ;;  %v5199_v24 = vpack.c.bf16 %v1142_v62, %v1138_v52  ;;  %v5214_v23 = vld [vmem:[#allocation7 + $0xf8] sm:$0xff] }
  0x9b   :  { %7058 = vst [vmem:[#allocation50_spill] sm:$0xff] %v5153_v50  ;;  %7059 = vst [vmem:[#allocation51_spill] sm:$0xff] %v5155_v48  ;;  %3868 = vmatpush1.bf16.msra.mxu1 %v5132_v35  ;;  %v5173_v35 = vsub.f32 %v1050_v38, %v1142_v62  ;;  %v5175_v48 = vsub.f32 %v1053_v8, %v1144_v49  ;;  %v5177_v50 = vld [vmem:[#allocation7 + $0xc8] sm:$0xff]  ;;  %v5187_v43 = vsub.f32 %v5140_v47, %v1146_v3  ;;  %v5191_v8 = vld [vmem:[#allocation7 + $0xc0] sm:$0xff] }
  0x9c   :  { %3748 = vmatpush1.bf16.msra.mxu0 %v7057_v63  ;;  %3870 = vmatprep.subr.bf16.mxu1 %v5142_v31  ;;  %7061 = vst [vmem:[#allocation52_spill] sm:$0xff] %v5163_v12  ;;  %7062 = vst [vmem:[#allocation53_spill] sm:$0xff] %v5165_v17  ;;  %v1059_v63 = vld [vmem:[#allocation7 + $0xb8] sm:$0xff]  ;;  %v1056_v31 = vld [vmem:[#allocation7 + $0xa0] sm:$0xff]  ;;  %v5184_v17 = vsub.f32 %v1055_v36, %v1148_v4  ;;  %v5189_v56 = vsub.f32 %v1054_v59, %v1150_v45  ;;  %v1152_v36 = vand.u32 4294901760, %v1057_v0 }
  0x9d   :  { %3750 = vmatprep.subr.bf16.mxu0 %v7060_v60  ;;  %7063 = vst [vmem:[#allocation54_spill] sm:$0xff] %v5167_v41  ;;  %v3759_v60 = vpack.c.bf16 %v7064_v19, %v4827_v58  ;;  %7065 = vst [vmem:[#allocation29_spill] sm:$0xff] %v5173_v35  ;;  %v3761_v41 = vpack.c.bf16 %v7069_v21, %v7068_v2  ;;  %v1063_v58 = vld [vmem:[#allocation7 + $0xd8] sm:$0xff]  ;;  %v7073_v38 = vpack.c.bf16 %v4803_v30, %v4801_v29  ;;  %v5201_v47 = vld [vmem:[#allocation7 + $0xd0] sm:$0xff] }
  0x9e   :  { %7066 = vst [vmem:[#allocation55_spill] sm:$0xff] %v5175_v48  ;;  %7070 = vst [vmem:[#allocation32_spill] sm:$0xff] %v5184_v17  ;;  %v1156_v19 = vand.u32 4294901760, %v1059_v63  ;;  %v5204_v59 = vpack.c.bf16 %v1148_v4, %v1144_v49  ;;  %v1158_v2 = vand.u32 4294901760, %v1058_v37  ;;  %v1160_v29 = vand.u32 4294901760, %v5177_v50  ;;  %v5207_v30 = vld [vmem:[#allocation7 + $0xe8] sm:$0xff] }
  0x9f   :  { %7071 = vst [vmem:[#allocation33_spill] sm:$0xff] %v5187_v43  ;;  %7072 = vst [vmem:[#allocation56_spill] sm:$0xff] %v5189_v56  ;;  %3872 = vmatpush1.bf16.msra.mxu1 %v5146_v1  ;;  %v5209_v21 = vsub.f32 %v1057_v0, %v1152_v36  ;;  %v1164_v52 = vand.u32 4294901760, %v1063_v58  ;;  %v5216_v1 = vld [vmem:[#allocation7 + $0xe0] sm:$0xff]  ;;  %v7078_v49 = vpack.c.bf16 %v4810_v39, %v4808_v34  ;;  %v5231_v62 = vld [vmem:[#allocation7 + $0x108] sm:$0xff]  ;;  %v7084_v39 = vand.u32 4294901760, %v5191_v8 }
  0xa0   :  { %3752 = vmatpush1.bf16.msra.mxu0 %v7067_v13  ;;  %7074 = vst [vmem:[#allocation57_spill] sm:$0xff] %v5199_v24  ;;  %3874 = vmatprep.subr.bf16.mxu1 %v5163_v12  ;;  %7075 = vst [vmem:[#allocation58_spill] sm:$0xff] %v5204_v59  ;;  %v1154_v13 = vand.u32 4294901760, %v1056_v31  ;;  %v5223_v12 = vsub.f32 %v1058_v37, %v1158_v2  ;;  %v5226_v0 = vsub.f32 %v5177_v50, %v1160_v29  ;;  %v5244_v37 = vld [vmem:[#allocation7 + $0x118] sm:$0xff] }
  0xa1   :  { %3754 = vmatprep.subr.bf16.mxu0 %v7073_v38  ;;  %7076 = vst [vmem:[#allocation59_spill] sm:$0xff] %v5209_v21  ;;  %v5211_v38 = vsub.f32 %v1059_v63, %v1156_v19  ;;  %v1166_v63 = vand.u32 4294901760, %v5201_v47  ;;  %v5234_v21 = vpack.c.bf16 %v1150_v45, %v1146_v3  ;;  %v5236_v34 = vsub.f32 %v1063_v58, %v1164_v52 }
  0xa2   :  { %v5221_v4 = vsub.f32 %v1056_v31, %v1154_v13  ;;  %7080 = vst [vmem:[#allocation62_spill] sm:$0xff] %v5223_v12  ;;  %7081 = vst [vmem:[#allocation63_spill] sm:$0xff] %v5226_v0  ;;  %v5241_v31 = vsub.f32 %v5191_v8, %v7084_v39  ;;  %v1168_v50 = vand.u32 4294901760, %v5207_v30  ;;  %v1172_v45 = vand.u32 4294901760, %v5214_v23  ;;  %v7103_v12 = vld [vmem:[#allocation15_spill] sm:$0xff] }
  0xa3   :  { %7077 = vst [vmem:[#allocation60_spill] sm:$0xff] %v5211_v38  ;;  %v5229_v38 = vld [vmem:[#allocation7 + $0xf0] sm:$0xff]  ;;  %3876 = vmatpush1.bf16.msra.mxu1 %v5199_v24  ;;  %7082 = vst [vmem:[#allocation64_spill] sm:$0xff] %v5234_v21  ;;  %v5252_v3 = vsub.f32 %v5201_v47, %v1166_v63  ;;  %v6740_v58 = vand.u32 4294901760, %v5216_v1  ;;  %v5258_v39 = vpack.c.bf16 %v1158_v2, %v1154_v13  ;;  %v1180_v2 = vand.u32 4294901760, %v5244_v37 }
  0xa4   :  { %3756 = vmatpush1.bf16.msra.mxu0 %v7078_v49  ;;  %7079 = vst [vmem:[#allocation61_spill] sm:$0xff] %v5221_v4  ;;  %7083 = vst [vmem:[#allocation65_spill] sm:$0xff] %v5236_v34  ;;  %v5246_v49 = vld [vmem:[#allocation7 + $0x100] sm:$0xff]  ;;  %3878 = vmatprep.subr.bf16.mxu1 %v5204_v59  ;;  %v5256_v24 = vld [vmem:[#allocation7 + $0x110] sm:$0xff]  ;;  %v1174_v34 = vand.u32 4294901760, %v5229_v38  ;;  %v5270_v47 = vsub.f32 %v5214_v23, %v1172_v45  ;;  %v7104_v4 = vand.u32 4294901760, %v5191_v8 }
  0xa5   :  { %3758 = vmatprep.subr.bf16.mxu0 %v3757_v18  ;;  %7085 = vst [vmem:[#allocation66_spill] sm:$0xff] %v5241_v31  ;;  %v5249_v18 = vpack.c.bf16 %v1156_v19, %v1152_v36  ;;  %7087 = vst [vmem:[#allocation68_spill] sm:$0xff] %v5252_v3  ;;  %v5261_v31 = vsub.f32 %v5207_v30, %v1168_v50  ;;  %v5265_v36 = vld [vmem:[#allocation7 + $0x128] sm:$0xff]  ;;  %v5267_v19 = vld [vmem:[#allocation7 + $0x138] sm:$0xff]  ;;  %v5275_v13 = vsub.f32 %v5216_v1, %v6740_v58 }
  0xa6   :  { %7088 = vst [vmem:[#allocation69_spill] sm:$0xff] %v5258_v39  ;;  %7090 = vst [vmem:[#allocation71_spill] sm:$0xff] %v5270_v47  ;;  %v5281_v59 = vld [vmem:[#allocation7 + $0x130] sm:$0xff]  ;;  %v5287_v23 = vsub.f32 %v5229_v38, %v1174_v34  ;;  %v7094_v47 = vand.u32 4294901760, %v5231_v62  ;;  %v5295_v30 = vld [vmem:[#allocation7 + $0x148] sm:$0xff]  ;;  %v1184_v38 = vand.u32 4294901760, %v5265_v36  ;;  %v5327_v56 = vpack.c.bf16 %v1166_v63, %v7104_v4 }
  0xa7   :  { %7086 = vst [vmem:[#allocation67_spill] sm:$0xff] %v5249_v18  ;;  %7089 = vst [vmem:[#allocation70_spill] sm:$0xff] %v5261_v31  ;;  %v5279_v31 = vld [vmem:[#allocation7 + $0x120] sm:$0xff]  ;;  %3880 = vmatpush1.bf16.msra.mxu1 %v5234_v21  ;;  %v1188_v21 = vand.u32 4294901760, %v5267_v19  ;;  %v1192_v0 = vand.u32 4294901760, %v5295_v30  ;;  %v7110_v4 = vld [vmem:[#allocation30_spill] sm:$0xff] }
  0xa8   :  { %3760 = vmatpush1.bf16.msra.mxu0 %v3759_v60  ;;  %7091 = vst [vmem:[#allocation72_spill] sm:$0xff] %v5275_v13  ;;  %v5284_v60 = vpack.c.bf16 %v1164_v52, %v1160_v29  ;;  %7093 = vst [vmem:[#allocation74_spill] sm:$0xff] %v5287_v23  ;;  %v5292_v58 = vsub.f32 %v5231_v62, %v7094_v47  ;;  %v1182_v13 = vand.u32 4294901760, %v5256_v24  ;;  %3882 = vmatprep.subr.bf16.mxu1 %v5249_v18  ;;  %v1079_v47 = vld [vmem:[#allocation7 + $0x158] sm:$0xff]  ;;  %v1076_v3 = vld [vmem:[#allocation7 + $0x140] sm:$0xff] }
  0xa9   :  { %3762 = vmatprep.subr.bf16.mxu0 %v3761_v41  ;;  %v5299_v41 = vsub.f32 %v5244_v37, %v1180_v2  ;;  %v7097_v29 = vand.u32 4294901760, %v5246_v49  ;;  %v1186_v23 = vand.u32 4294901760, %v5279_v31  ;;  %v1190_v18 = vand.u32 4294901760, %v5281_v59  ;;  %v1078_v37 = vld [vmem:[#allocation7 + $0x150] sm:$0xff]  ;;  %7105 = vst [vmem:[#allocation15_spill] sm:$0xff] %v5327_v56 }
  0xaa   :  { %7092 = vst [vmem:[#allocation73_spill] sm:$0xff] %v5284_v60  ;;  %7095 = vst [vmem:[#allocation75_spill] sm:$0xff] %v5292_v58  ;;  %v5309_v58 = vsub.f32 %v5256_v24, %v1182_v13  ;;  %v1081_v24 = vld [vmem:[#allocation7 + $0x168] sm:$0xff]  ;;  %v1198_v8 = vand.u32 4294901760, %v1078_v37 }
  0xab   :  { %7096 = vst [vmem:[#allocation76_spill] sm:$0xff] %v5299_v41  ;;  %v5304_v52 = vsub.f32 %v5246_v49, %v7097_v29  ;;  %v7100_v41 = vpack.c.bf16 %v4956_v55, %v4944_v7  ;;  %v5317_v29 = vsub.f32 %v5265_v36, %v1184_v38  ;;  %3884 = vmatpush1.bf16.msra.mxu1 %v5258_v39  ;;  %v1196_v36 = vand.u32 4294901760, %v1079_v47 }
  0xac   :  { %7099 = vst [vmem:[#allocation78_spill] sm:$0xff] %v5309_v58  ;;  %v1083_v58 = vld [vmem:[#allocation7 + $0x178] sm:$0xff]  ;;  %v5330_v7 = vsub.f32 %v5279_v31, %v1186_v23  ;;  %v5333_v55 = vsub.f32 %v5281_v59, %v1190_v18  ;;  %3886 = vmatprep.subr.bf16.mxu1 %v5284_v60  ;;  %v1194_v39 = vand.u32 4294901760, %v1076_v3  ;;  %v1200_v31 = vand.u32 4294901760, %v1081_v24 }
  0xad   :  { %7098 = vst [vmem:[#allocation77_spill] sm:$0xff] %v5304_v52  ;;  %3764 = vmatpush1.bf16.msra.mxu0 %v7100_v41  ;;  %7101 = vst [vmem:[#allocation79_spill] sm:$0xff] %v5317_v29  ;;  %v5320_v52 = vsub.f32 %v5267_v19, %v1188_v21  ;;  %v1080_v19 = vld [vmem:[#allocation7 + $0x160] sm:$0xff]  ;;  %v1082_v41 = vld [vmem:[#allocation7 + $0x170] sm:$0xff]  ;;  %v5339_v29 = vsub.f32 %v5295_v30, %v1192_v0  ;;  %v5342_v63 = vsub.f32 %v1079_v47, %v1196_v36 }
  0xae   :  { %3766 = vmatprep.subr.bf16.mxu0 %v7103_v12  ;;  %7106 = vst [vmem:[#allocation81_spill] sm:$0xff] %v5330_v7  ;;  %7107 = vst [vmem:[#allocation82_spill] sm:$0xff] %v5333_v55  ;;  %v1204_v7 = vand.u32 4294901760, %v1083_v58  ;;  %v7112_v59 = vld [vmem:[#allocation16_spill] sm:$0xff]  ;;  %v5346_v55 = vsub.f32 %v1076_v3, %v1194_v39  ;;  %v5348_v60 = vsub.f32 %v1078_v37, %v1198_v8  ;;  %v7115_v30 = vld [vmem:[#allocation17_spill] sm:$0xff]  ;;  %v7118_v3 = vand.u32 4294901760, %v5231_v62 }
  0xaf   :  { %7102 = vst [vmem:[#allocation80_spill] sm:$0xff] %v5320_v52  ;;  %v5336_v52 = vpack.c.bf16 %v1172_v45, %v1168_v50  ;;  %7109 = vst [vmem:[#allocation84_spill] sm:$0xff] %v5339_v29  ;;  %v1202_v50 = vand.u32 4294901760, %v1080_v19  ;;  %v1206_v45 = vand.u32 4294901760, %v1082_v41  ;;  %3888 = vmatpush1.bf16.msra.mxu1 %v5327_v56  ;;  %v7116_v29 = vand.u32 4294901760, %v5216_v1  ;;  %v7120_v56 = vld [vmem:[#allocation18_spill] sm:$0xff] }
  0xb0   :  { %617 = vmatmul.mubr.f32.vlgmr.msra.gmra.mrb[0].mxu0 %v7110_v4  ;;  %7111 = vst [vmem:[#allocation30_spill] sm:$0xff] %v5342_v63  ;;  %7113 = vst [vmem:[#allocation16_spill] sm:$0xff] %v5346_v55  ;;  %v5356_v63 = vsub.f32 %v1081_v24, %v1200_v31  ;;  %v5358_v43 = vsub.f32 %v1083_v58, %v1204_v7  ;;  %v5363_v37 = vpack.c.bf16 %v1180_v2, %v7118_v3  ;;  %v7121_v1 = vld [vmem:[#allocation19_spill] sm:$0xff]  ;;  %v7125_v2 = vld [vmem:[#allocation20_spill] sm:$0xff] }
  0xb1   :  { %7108 = vst [vmem:[#allocation83_spill] sm:$0xff] %v5336_v52  ;;  %3768 = vmatpush1.bf16.msra.mxu0 %v7112_v59  ;;  %622 = vmatprep.mubr.f32.mxu0 %v7011_v25  ;;  %7114 = vst [vmem:[#allocation85_spill] sm:$0xff] %v5348_v60  ;;  %v5354_v47 = vpack.c.bf16 %v1174_v34, %v7116_v29  ;;  %v5365_v60 = vsub.f32 %v1080_v19, %v1202_v50  ;;  %v7122_v34 = vand.u32 4294901760, %v5246_v49  ;;  %v7126_v29 = vld [vmem:[#allocation21_spill] sm:$0xff]  ;;  %v7130_v49 = vld [vmem:[#allocation23_spill] sm:$0xff] }
  0xb2   :  { %3770 = vmatprep.subr.bf16.mxu0 %v7115_v30  ;;  %3890 = vmatprep.subr.bf16.mxu1 %v5336_v52  ;;  %7119 = vst [vmem:[#allocation86_spill] sm:$0xff] %v5363_v37  ;;  %v5367_v55 = vsub.f32 %v1082_v41, %v1206_v45  ;;  %v5379_v62 = vpack.c.bf16 %v1188_v21, %v1184_v38  ;;  %v7129_v41 = vld [vmem:[#allocation22_spill] sm:$0xff]  ;;  %v7133_v38 = vld [vmem:[#allocation24_spill] sm:$0xff]  ;;  %v1092_v3 = vld [vmem:[#allocation7 + $0x1c0] sm:$0xff] }
  0xb3   :  { %7117 = vst [vmem:[#allocation17_spill] sm:$0xff] %v5354_v47  ;;  %3892 = vmatpush1.bf16.msra.mxu1 %v5354_v47  ;;  %v5376_v58 = vpack.c.bf16 %v1182_v13, %v7122_v34  ;;  %v5384_v24 = vpack.c.bf16 %v1190_v18, %v1186_v23  ;;  %v5387_v19 = vpack.c.bf16 %v1196_v36, %v1192_v0  ;;  %v7134_v18 = vld [vmem:[#allocation25_spill] sm:$0xff]  ;;  %v7136_v23 = vld [vmem:[#allocation26_spill] sm:$0xff]  ;;  %v7137_v36 = vld [vmem:[#allocation27_spill] sm:$0xff]  ;;  %v1226_v34 = vand.u32 4294901760, %v1092_v3 }
  0xb4   :  { %625 = vmatmul.mubr.f32.gmra.mrb[2].mxu0 %v4987_v46  ;;  %3894 = vmatprep.subr.bf16.mxu1 %v5363_v37  ;;  %7124 = vst [vmem:[#allocation19_spill] sm:$0xff] %v5379_v62  ;;  %v5392_v21 = vpack.c.bf16 %v1198_v8, %v1194_v39  ;;  %v5395_v13 = vpack.c.bf16 %v1204_v7, %v1200_v31  ;;  %v7138_v39 = vld [vmem:[#allocation28_spill] sm:$0xff]  ;;  %v7139_v7 = vld [vmem:[#allocation31_spill] sm:$0xff]  ;;  %v7140_v8 = vld [vmem:[#allocation34_spill] sm:$0xff]  ;;  %v7141_v31 = vand.u32 4294901760, %v7110_v4 }
  0xb5   :  { %3772 = vmatpush1.bf16.msra.mxu0 %v7120_v56  ;;  %727 = vmatprep.mubr.f32.mxu0 %v7011_v25  ;;  %7123 = vst [vmem:[#allocation18_spill] sm:$0xff] %v5376_v58  ;;  %7127 = vst [vmem:[#allocation20_spill] sm:$0xff] %v5384_v24  ;;  %v5400_v0 = vpack.c.bf16 %v1206_v45, %v1202_v50  ;;  %v7142_v50 = vand.u32 4294901760, %v4987_v46  ;;  %v1085_v46 = vld [vmem:[#allocation7 + $0x188] sm:$0xff]  ;;  %v7183_v37 = vld [vmem:[#allocation33_spill] sm:$0xff] }
  0xb6   :  { %3774 = vmatprep.subr.bf16.mxu0 %v7121_v1  ;;  %7128 = vst [vmem:[#allocation21_spill] sm:$0xff] %v5387_v19  ;;  %7131 = vst [vmem:[#allocation22_spill] sm:$0xff] %v5392_v21  ;;  %v1093_v4 = vld [vmem:[#allocation7 + $0x1c8] sm:$0xff] }
  0xb7   :  { %3896 = vmatpush1.bf16.msra.mxu1 %v5376_v58  ;;  %7132 = vst [vmem:[#allocation23_spill] sm:$0xff] %v5395_v13  ;;  %7135 = vst [vmem:[#allocation24_spill] sm:$0xff] %v5400_v0  ;;  %v1224_v45 = vand.u32 4294901760, %v1093_v4  ;;  %v7181_v52 = vld [vmem:[#allocation54_spill] sm:$0xff] }
  0xb8   :  { %3898 = vmatprep.subr.bf16.mxu1 %v5379_v62 }
  0xb9   :  { %3776 = vmatpush1.bf16.msra.mxu0 %v7125_v2 }
  0xba   :  { %3778 = vmatprep.subr.bf16.mxu0 %v7126_v29 }
  0xbb   :  { %3900 = vmatpush1.bf16.msra.mxu1 %v5384_v24 }
  0xbc   :  { %3902 = vmatprep.subr.bf16.mxu1 %v5387_v19 }
  0xbd   :  { %3780 = vmatpush1.bf16.msra.mxu0 %v7129_v41 }
  0xbe   :  { %3782 = vmatprep.subr.bf16.mxu0 %v7130_v49 }
  0xbf   :  { %3904 = vmatpush1.bf16.msra.mxu1 %v5392_v21 }
  0xc0   :  { %3906 = vmatprep.subr.bf16.mxu1 %v5395_v13 }
  0xc1   :  { %3784 = vmatpush1.bf16.msra.mxu0 %v7133_v38 }
  0xc2   :  { %3786 = vmatprep.subr.bf16.mxu0 %v7134_v18 }
  0xc3   :  { %3908 = vmatpush1.bf16.msra.mxu1 %v5400_v0 }
  0xc5   :  { %3788 = vmatpush1.bf16.msra.mxu0 %v7136_v23 }
  0xc6   :  { %3790 = vmatprep.subr.bf16.mxu0 %v7137_v36 }
  0xc9   :  { %3792 = vmatpush1.bf16.msra.mxu0 %v7138_v39 }
  0xca   :  { %3794 = vmatprep.subr.bf16.mxu0 %v7139_v7 }
  0xcd   :  { %3796 = vmatpush1.bf16.msra.mxu0 %v7140_v8 }
  0xce   :  { %3798 = vmatprep.subr.bf16.mxu0 %v5000_v15  ;;  %v7143_v15 = vld [vmem:[#allocation35_spill] sm:$0xff] }
  0xd0   :  { %731 = vmatmul.mubr.f32.vlgmr.msra.gmra.mrb[0].mxu0 %v7141_v31  ;;  %v1096_v31 = vld [vmem:[#allocation7 + $0x1e0] sm:$0xff] }
  0xd1   :  { %3800 = vmatpush1.bf16.msra.mxu0 %v5006_v32  ;;  %736 = vmatprep.mubr.f32.mxu0 %v7011_v25  ;;  %v1208_v32 = vand.u32 4294901760, %v1085_v46 }
  0xd2   :  { %3802 = vmatprep.subr.bf16.mxu0 %v5012_v61 }
  0xd4   :  { %740 = vmatmul.mubr.f32.gmra.mrb[2].mxu0 %v7142_v50  ;;  %v1098_v50 = vld [vmem:[#allocation7 + $0x1f0] sm:$0xff] }
  0xd5   :  { %3804 = vmatpush1.bf16.msra.mxu0 %v5018_v10  ;;  %906 = vmatprep.mubr.f32.mxu0 %v7011_v25  ;;  %v1084_v10 = vld [vmem:[#allocation7 + $0x180] sm:$0xff] }
  0xd6   :  { %3806 = vmatprep.subr.bf16.mxu0 %v5025_v51  ;;  %v1086_v51 = vld [vmem:[#allocation7 + $0x190] sm:$0xff] }
  0xd9   :  { %3808 = vmatpush1.bf16.msra.mxu0 %v5031_v5  ;;  %v1210_v5 = vand.u32 4294901760, %v1084_v10 }
  0xda   :  { %3810 = vmatprep.subr.bf16.mxu0 %v5037_v40  ;;  %v1214_v40 = vand.u32 4294901760, %v1086_v51 }
  0xdd   :  { %3812 = vmatpush1.bf16.msra.mxu0 %v5043_v16 }
  0xde   :  { %3814 = vmatprep.subr.bf16.mxu0 %v5049_v9  ;;  %v5456_v9 = vpack.c.bf16 %v1214_v40, %v1210_v5 }
  0xe0   :  { %7145 = vst [vmem:[#allocation26_spill] sm:$0xff] %v5456_v9 }
  0xe1   :  { %3816 = vmatpush1.bf16.msra.mxu0 %v7143_v15  ;;  %v1234_v15 = vand.u32 4294901760, %v1096_v31 }
  0xe2   :  { %3818 = vmatprep.subr.bf16.mxu0 %v5061_v14  ;;  %v1091_v14 = vld [vmem:[#allocation7 + $0x1b8] sm:$0xff] }
  0xe5   :  { %3820 = vmatpush1.bf16.msra.mxu0 %v5067_v53  ;;  %v1088_v53 = vld [vmem:[#allocation7 + $0x1a0] sm:$0xff] }
  0xe6   :  { %3822 = vmatprep.subr.bf16.mxu0 %v5073_v6  ;;  %v1087_v6 = vld [vmem:[#allocation7 + $0x198] sm:$0xff] }
  0xe7   :  { %v1212_v61 = vand.u32 4294901760, %v1087_v6 }
  0xe9   :  { %3824 = vmatpush1.bf16.msra.mxu0 %v5077_v27  ;;  %v5454_v16 = vpack.c.bf16 %v1212_v61, %v1208_v32  ;;  %v1218_v27 = vand.u32 4294901760, %v1088_v53 }
  0xea   :  { %3826 = vmatprep.subr.bf16.mxu0 %v5079_v26  ;;  %v1089_v26 = vld [vmem:[#allocation7 + $0x1a8] sm:$0xff] }
  0xeb   :  { %7144 = vst [vmem:[#allocation25_spill] sm:$0xff] %v5454_v16  ;;  %3910 = vmatprep.subr.bf16.mxu1 %v5454_v16 }
  0xec   :  { %3912 = vmatpush1.bf16.msra.mxu1 %v5456_v9 }
  0xed   :  { %3828 = vmatpush1.bf16.msra.mxu0 %v5081_v20 }
  0xee   :  { %3830 = vmatprep.subr.bf16.mxu0 %v7103_v12 }
  0xf0   :  { %908 = vmatmul.mubr.f32.vlgmr.msra.gmra.mrb[0].mxu0 %v4820_v54 }
  0xf1   :  { %3832 = vmatpush1.bf16.msra.mxu0 %v7112_v59  ;;  %913 = vmatprep.mubr.f32.mxu0 %v7011_v25  ;;  %v1095_v59 = vld [vmem:[#allocation7 + $0x1d8] sm:$0xff] }
  0xf2   :  { %3834 = vmatprep.subr.bf16.mxu0 %v7115_v30  ;;  %v1228_v30 = vand.u32 4294901760, %v1095_v59 }
  0xf4   :  { %915 = vmatmul.mubr.f32.gmra.mrb[2].mxu0 %v4981_v57  ;;  %v5499_v9 = vsub.f32 %v1095_v59, %v1228_v30 }
  0xf5   :  { %3836 = vmatpush1.bf16.msra.mxu0 %v7120_v56  ;;  %1017 = vmatprep.mubr.f32.mxu0 %v7011_v25 }
  0xf6   :  { %3838 = vmatprep.subr.bf16.mxu0 %v7121_v1  ;;  %v1094_v1 = vld [vmem:[#allocation7 + $0x1d0] sm:$0xff]  ;;  %7154 = vst [vmem:[#allocation88_spill] sm:$0xff] %v5499_v9 }
  0xf9   :  { %3840 = vmatpush1.bf16.msra.mxu0 %v7125_v2  ;;  %v1230_v2 = vand.u32 4294901760, %v1094_v1 }
  0xfa   :  { %3842 = vmatprep.subr.bf16.mxu0 %v7126_v29  ;;  %v5466_v29 = vpack.c.bf16 %v1228_v30, %v1224_v45 }
  0xfc   :  { %7148 = vst [vmem:[#allocation31_spill] sm:$0xff] %v5466_v29 }
  0xfd   :  { %3844 = vmatpush1.bf16.msra.mxu0 %v7129_v41  ;;  %v5468_v41 = vsub.f32 %v1085_v46, %v1208_v32  ;;  %v1238_v46 = vand.u32 4294901760, %v1098_v50 }
  0xfe   :  { %3846 = vmatprep.subr.bf16.mxu0 %v7130_v49  ;;  %v5470_v49 = vsub.f32 %v1087_v6, %v1212_v61  ;;  %v6783_v6 = vand.u32 4294901760, %v5113_v22  ;;  %v7151_v61 = vld [vmem:[#allocation37_spill] sm:$0xff] }
 0x101   :  { %3848 = vmatpush1.bf16.msra.mxu0 %v7133_v38  ;;  %v5472_v38 = vpack.c.bf16 %v1230_v2, %v1226_v34 }
 0x102   :  { %3850 = vmatprep.subr.bf16.mxu0 %v7134_v18  ;;  %v1097_v18 = vld [vmem:[#allocation7 + $0x1e8] sm:$0xff] }
 0x103   :  { %7149 = vst [vmem:[#allocation34_spill] sm:$0xff] %v5472_v38 }
 0x105   :  { %3852 = vmatpush1.bf16.msra.mxu0 %v7136_v23  ;;  %v1099_v23 = vld [vmem:[#allocation7 + $0x1f8] sm:$0xff] }
 0x106   :  { %3854 = vmatprep.subr.bf16.mxu0 %v7137_v36  ;;  %v5474_v36 = vsub.f32 %v1084_v10, %v1210_v5  ;;  %v5488_v5 = vpack.c.bf16 %v1238_v46, %v1234_v15 }
 0x108   :  { %7152 = vst [vmem:[#allocation37_spill] sm:$0xff] %v5488_v5 }
 0x109   :  { %3856 = vmatpush1.bf16.msra.mxu0 %v7138_v39  ;;  %v5476_v39 = vsub.f32 %v1086_v51, %v1214_v40  ;;  %v1276_v40 = vsub.f32 %v5113_v22, %v6783_v6 }
 0x10a   :  { %3858 = vmatprep.subr.bf16.mxu0 %v7139_v7  ;;  %v1232_v7 = vand.u32 4294901760, %v1097_v18 }
 0x10d   :  { %3860 = vmatpush1.bf16.msra.mxu0 %v7140_v8  ;;  %v1236_v8 = vand.u32 4294901760, %v1099_v23 }
 0x10f   :  { %v5481_v32 = vpack.c.bf16 %v1236_v8, %v1232_v7 }
 0x110   :  { %1019 = vmatmul.mubr.f32.vlgmr.msra.gmra.mrb[0].mxu0 %v4820_v54  ;;  %v1216_v54 = vand.u32 4294901760, %v1089_v26 }
 0x111   :  { %1024 = vmatprep.mubr.f32.mxu0 %v7011_v25  ;;  %v1220_v25 = vand.u32 4294901760, %v1091_v14  ;;  %7150 = vst [vmem:[#allocation35_spill] sm:$0xff] %v5481_v32 }
 0x112   :  { %v5484_v10 = vsub.f32 %v1089_v26, %v1216_v54  ;;  %v5502_v26 = vsub.f32 %v1092_v3, %v1226_v34 }
 0x113   :  { %v5460_v12 = vpack.c.bf16 %v1220_v25, %v1216_v54  ;;  %v5486_v51 = vsub.f32 %v1091_v14, %v1220_v25  ;;  %v5504_v14 = vsub.f32 %v1094_v1, %v1230_v2  ;;  %v5506_v54 = vsub.f32 %v1097_v18, %v1232_v7  ;;  %v7160_v1 = vld [vmem:[#allocation38_spill] sm:$0xff]  ;;  %v7161_v2 = vld [vmem:[#allocation40_spill] sm:$0xff] }
 0x114   :  { %1026 = vmatmul.mubr.f32.gmra.mrb[2].mxu0 %v4981_v57  ;;  %v1090_v57 = vld [vmem:[#allocation7 + $0x1b0] sm:$0xff]  ;;  %v5508_v25 = vsub.f32 %v1099_v23, %v1236_v8  ;;  %v6784_v34 = vand.u32 4294901760, %v7160_v1  ;;  %v6785_v18 = vand.u32 4294901760, %v7161_v2 }
 0x115   :  { %v1222_v20 = vand.u32 4294901760, %v1090_v57  ;;  %7146 = vst [vmem:[#allocation27_spill] sm:$0xff] %v5460_v12  ;;  %3914 = vmatprep.subr.bf16.mxu1 %v5460_v12  ;;  %v5497_v12 = vsub.f32 %v1093_v4, %v1224_v45  ;;  %7155 = vst [vmem:[#allocation89_spill] sm:$0xff] %v5504_v14  ;;  %v118_v45 = vlaneseq  ;;  %v116_v23 = vld [vmem:[%s6637_s2] sm:$0x3] }
 0x116   :  { %7156 = vst [vmem:[#allocation90_spill] sm:$0xff] %v5508_v25 }
 0x117   :  { %v5462_v56 = vpack.c.bf16 %v1222_v20, %v1218_v27  ;;  %v5518_v30 = vshrl.u32 %v118_v45, 7 }
 0x119   :  { %7147 = vst [vmem:[#allocation28_spill] sm:$0xff] %v5462_v56  ;;  %3916 = vmatpush1.bf16.msra.mxu1 %v5462_v56  ;;  %v6782_v56 = vand.u32 4294901760, %v7151_v61  ;;  %7159 = vst [vmem:[#allocation93_spill] sm:$0xff] %v5518_v30  ;;  %v6781_v3 = vsub.s32 0, %v5518_v30  ;;  %v6788_v7 = vsub.s32 1, %v5518_v30 }
 0x11a   :  { %3918 = vmatprep.subr.bf16.mxu1 %v5466_v29  ;;  %v5493_v29 = vsub.f32 %v1088_v53, %v1218_v27  ;;  %v5511_v53 = vsub.f32 %v1096_v31, %v1234_v15  ;;  %v1277_v27 = vand.u32 4294901760, %v1276_v40  ;;  %v1282_v31 = vsub.f32 %v7160_v1, %v6784_v34  ;;  %v7162_v15 = vld [vmem:[#allocation42_spill] sm:$0xff] }
 0x11b   :  { %v121_v8 = vrot.slane %v116_v23, %v6781_v3  ;;  %v125_v40 = vrot.slane %v116_v23, %v6788_v7 }
 0x11c   :  { %7157 = vst [vmem:[#allocation91_spill] sm:$0xff] %v5511_v53  ;;  %v1283_v6 = vand.u32 4294901760, %v1282_v31  ;;  %v7164_v31 = vand.u32 4294901760, %v5136_v33 }
 0x11d   :  { %3920 = vmatpush1.bf16.msra.mxu1 %v5472_v38  ;;  %v5495_v38 = vsub.f32 %v1090_v57, %v1222_v20  ;;  %v5513_v57 = vsub.f32 %v1098_v50, %v1238_v46  ;;  %v1288_v20 = vsub.f32 %v7151_v61, %v6782_v56  ;;  %v1294_v50 = vsub.f32 %v7161_v2, %v6785_v18 }
 0x11e   :  { %3922 = vmatprep.subr.bf16.mxu1 %v5481_v32  ;;  %v6793_v46 = vand.u32 4294901760, %v7162_v15 }
 0x11f   :  { %7153 = vst [vmem:[#allocation87_spill] sm:$0xff] %v5495_v38  ;;  %7158 = vst [vmem:[#allocation92_spill] sm:$0xff] %v5513_v57  ;;  %v1289_v4 = vand.u32 4294901760, %v1288_v20  ;;  %v1295_v34 = vand.u32 4294901760, %v1294_v50  ;;  %v1318_v50 = vsub.f32 %v5136_v33, %v7164_v31 }
 0x120   :  { %v1300_v18 = vsub.f32 %v7162_v15, %v6793_v46 }
 0x121   :  { %3924 = vmatpush1.bf16.msra.mxu1 %v5488_v5  ;;  %v3925_v59 = vpack.c.bf16 %v1289_v4, %v1277_v27  ;;  %v7163_v27 = vld [vmem:[#allocation43_spill] sm:$0xff]  ;;  %v6803_v4 = vand.u32 4294901760, %v5134_v28 }
 0x122   :  { %v6798_v20 = vand.u32 4294901760, %v7163_v27  ;;  %v1301_v13 = vand.u32 4294901760, %v1300_v18  ;;  %v7171_v18 = vld [vmem:[#allocation50_spill] sm:$0xff] }
 0x123   :  { %3926 = vmatprep.subr.bf16.mxu1 %v3925_v59  ;;  %v1306_v45 = vsub.f32 %v5134_v28, %v6803_v4  ;;  %v7167_v4 = vand.u32 4294901760, %v5138_v11 }
 0x124   :  { %v1312_v23 = vsub.f32 %v7163_v27, %v6798_v20  ;;  %v3927_v20 = vpack.c.bf16 %v1295_v34, %v1283_v6  ;;  %v7170_v34 = vand.u32 4294901760, %v5144_v42 }
 0x125   :  { %v1307_v24 = vand.u32 4294901760, %v1306_v45 }
 0x126   :  { %v1313_v21 = vand.u32 4294901760, %v1312_v23  ;;  %v7173_v23 = vld [vmem:[#allocation51_spill] sm:$0xff] }
 0x127   :  { %v7180_v47 = vand.u32 4294901760, %v7173_v23 }
 0x1e3   :  { %v1020_v59 = vpop.f32.mrb[0].mxu0 }
 0x1e4   :  { %v4437_v3 = vadd.f32 %v1020_v59, %v121_v8  ;;  %v1022_v56 = vpop.f32.mrb[1].mxu0 }
 0x1e5   :  { %v4438_v5 = vadd.f32 %v1022_v56, %v125_v40 }
 0x1e6   :  { %v1032_v30 = vmax.f32 %v4437_v3, 0.0 }
 0x1e7   :  { %v1033_v59 = vmax.f32 %v4438_v5, 0.0  ;;  %v1027_v32 = vpop.f32.mrb[2].mxu0  ;;  %v1324_v5 = vsub.f32 %v5138_v11, %v7167_v4  ;;  %v7187_v11 = vld [vmem:[#allocation60_spill] sm:$0xff] }
 0x1e8   :  { %v5555_v56 = vand.u32 4294901760, %v1032_v30  ;;  %v4439_v16 = vadd.f32 %v1027_v32, %v121_v8  ;;  %v1029_v0 = vpop.f32.mrb[3].mxu0  ;;  %v7176_v8 = vand.u32 4294901760, %v5148_v44 }
 0x1e9   :  { %v5557_v7 = vand.u32 4294901760, %v1033_v59  ;;  %v4440_v3 = vadd.f32 %v1029_v0, %v125_v40  ;;  %v1336_v0 = vsub.f32 %v5144_v42, %v7170_v34  ;;  %v1325_v62 = vand.u32 4294901760, %v1324_v5 }
 0x1ea   :  { %7165 = vst [vmem:[#allocation38_spill] sm:$0xff] %v5555_v56  ;;  %v5563_v19 = vsub.f32 %v1032_v30, %v5555_v56  ;;  %v1034_v31 = vmax.f32 %v4439_v16, 0.0  ;;  %v1319_v30 = vand.u32 4294901760, %v1318_v50  ;;  %v1330_v58 = vsub.f32 %v5148_v44, %v7176_v8  ;;  %v7177_v50 = vld [vmem:[#allocation53_spill] sm:$0xff] }
 0x1eb   :  { %7166 = vst [vmem:[#allocation40_spill] sm:$0xff] %v5557_v7  ;;  %v5567_v32 = vsub.f32 %v1033_v59, %v5557_v7  ;;  %v1035_v6 = vmax.f32 %v4440_v3, 0.0  ;;  %v3929_v59 = vpack.c.bf16 %v1313_v21, %v1301_v13  ;;  %v1337_v13 = vand.u32 4294901760, %v1336_v0 }
 0x1ec   :  { %7168 = vst [vmem:[#allocation42_spill] sm:$0xff] %v5563_v19  ;;  %v5573_v40 = vand.u32 4294901760, %v1034_v31  ;;  %v6814_v4 = vand.u32 4294901760, %v5563_v19  ;;  %v7179_v5 = vand.u32 4294901760, %v7171_v18  ;;  %v1348_v8 = vsub.f32 %v7173_v23, %v7180_v47  ;;  %v7184_v23 = vld [vmem:[#allocation56_spill] sm:$0xff] }
 0x1ed   :  { %7169 = vst [vmem:[#allocation43_spill] sm:$0xff] %v5567_v32  ;;  %v5577_v45 = vand.u32 4294901760, %v1035_v6  ;;  %v6823_v46 = vand.u32 4294901760, %v5567_v32  ;;  %v7185_v42 = vand.u32 4294901760, %v7181_v52 }
 0x1ee   :  { %7172 = vst [vmem:[#allocation94_spill] sm:$0xff] %v5573_v40  ;;  %v5581_v3 = vsub.f32 %v1034_v31, %v5573_v40  ;;  %v1249_v34 = vsub.f32 %v5563_v19, %v6814_v4  ;;  %v1342_v31 = vsub.f32 %v7171_v18, %v7179_v5  ;;  %v1331_v18 = vand.u32 4294901760, %v1330_v58 }
 0x1ef   :  { %7174 = vst [vmem:[#allocation95_spill] sm:$0xff] %v5577_v45  ;;  %v5591_v16 = vsub.f32 %v1035_v6, %v5577_v45  ;;  %v1243_v21 = vsub.f32 %v5567_v32, %v6823_v46  ;;  %v7182_v40 = vand.u32 4294901760, %v7177_v50  ;;  %v1354_v58 = vsub.f32 %v7181_v52, %v7185_v42 }
 0x1f0   :  { %7175 = vst [vmem:[#allocation96_spill] sm:$0xff] %v5581_v3  ;;  %v6832_v4 = vand.u32 4294901760, %v5581_v3  ;;  %v1250_v32 = vand.u32 4294901760, %v1249_v34  ;;  %v1343_v6 = vand.u32 4294901760, %v1342_v31  ;;  %v3931_v34 = vpack.c.bf16 %v1319_v30, %v1307_v24 }
 0x1f1   :  { %7178 = vst [vmem:[#allocation97_spill] sm:$0xff] %v5591_v16  ;;  %v1244_v19 = vand.u32 4294901760, %v1243_v21  ;;  %v6838_v44 = vand.u32 4294901760, %v5591_v16  ;;  %v1360_v47 = vsub.f32 %v7177_v50, %v7182_v40  ;;  %v7188_v50 = vand.u32 4294901760, %v5173_v35 }
 0x1f2   :  { %v1265_v5 = vsub.f32 %v5581_v3, %v6832_v4  ;;  %v7186_v4 = vld [vmem:[#allocation59_spill] sm:$0xff]  ;;  %v7190_v24 = vand.u32 4294901760, %v5184_v17  ;;  %v3933_v30 = vpack.c.bf16 %v1337_v13, %v1325_v62  ;;  %v1349_v3 = vand.u32 4294901760, %v1348_v8  ;;  %v7195_v13 = vld [vmem:[#allocation61_spill] sm:$0xff]  ;;  %v7200_v8 = vld [vmem:[#allocation68_spill] sm:$0xff] }
 0x1f3   :  { %1245 = vmatprep.mubr.f32.mxu1 %v1244_v19  ;;  %v1259_v21 = vsub.f32 %v5591_v16, %v6838_v44  ;;  %v1366_v31 = vsub.f32 %v5173_v35, %v7188_v50  ;;  %v7189_v44 = vand.u32 4294901760, %v5175_v48  ;;  %v1361_v46 = vand.u32 4294901760, %v1360_v47 }
 0x1f4   :  { %1251 = vmatmul.mubr.f32.vlgmr.msra.gmra.mrb[0].mxu1 %v1250_v32  ;;  %v1384_v32 = vsub.f32 %v5184_v17, %v7190_v24  ;;  %v1266_v42 = vand.u32 4294901760, %v1265_v5  ;;  %v7192_v50 = vand.u32 4294901760, %v7184_v23  ;;  %v1355_v5 = vand.u32 4294901760, %v1354_v58 }
 0x1f5   :  { %3928 = vmatpush1.bf16.msra.mxu1 %v3927_v20  ;;  %v1260_v19 = vand.u32 4294901760, %v1259_v21  ;;  %v1372_v0 = vsub.f32 %v5175_v48, %v7189_v44  ;;  %v3935_v20 = vpack.c.bf16 %v1343_v6, %v1331_v18  ;;  %v7191_v21 = vand.u32 4294901760, %v7183_v37  ;;  %v7196_v18 = vld [vmem:[#allocation62_spill] sm:$0xff] }
 0x1f6   :  { %3930 = vmatprep.subr.bf16.mxu1 %v3929_v59  ;;  %v1390_v16 = vsub.f32 %v7184_v23, %v7192_v50  ;;  %v7193_v44 = vand.u32 4294901760, %v7186_v4  ;;  %v7194_v59 = vand.u32 4294901760, %v7187_v11  ;;  %v1367_v47 = vand.u32 4294901760, %v1366_v31  ;;  %v7197_v50 = vld [vmem:[#allocation63_spill] sm:$0xff] }
 0x1f7   :  { %1261 = vmatprep.mubr.f32.mxu1 %v1260_v19  ;;  %v1378_v40 = vsub.f32 %v7183_v37, %v7191_v21  ;;  %v1373_v19 = vand.u32 4294901760, %v1372_v0  ;;  %v1385_v21 = vand.u32 4294901760, %v1384_v32  ;;  %v6852_v23 = vand.u32 4294901760, %v7197_v50  ;;  %v7203_v32 = vld [vmem:[#allocation70_spill] sm:$0xff] }
 0x1f8   :  { %1267 = vmatmul.mubr.f32.gmra.mrb[2].mxu1 %v1266_v42  ;;  %v1396_v24 = vsub.f32 %v7186_v4, %v7193_v44  ;;  %v1408_v62 = vsub.f32 %v7187_v11, %v7194_v59  ;;  %v3937_v42 = vpack.c.bf16 %v1361_v46, %v1349_v3  ;;  %v7198_v44 = vld [vmem:[#allocation65_spill] sm:$0xff]  ;;  %v1391_v17 = vand.u32 4294901760, %v1390_v16  ;;  %v7199_v59 = vld [vmem:[#allocation66_spill] sm:$0xff] }
 0x1f9   :  { %3932 = vmatpush1.bf16.msra.mxu1 %v3931_v34  ;;  %1658 = vmatprep.mubr.f32.mxu1 %v5557_v7  ;;  %v6851_v4 = vand.u32 4294901760, %v7198_v44  ;;  %v1379_v37 = vand.u32 4294901760, %v1378_v40  ;;  %v6856_v11 = vand.u32 4294901760, %v7199_v59  ;;  %v6858_v48 = vand.u32 4294901760, %v7200_v8 }
 0x1fa   :  { %3934 = vmatprep.subr.bf16.mxu1 %v3933_v30  ;;  %v1397_v6 = vand.u32 4294901760, %v1396_v24  ;;  %v1409_v34 = vand.u32 4294901760, %v1408_v62  ;;  %v7201_v7 = vand.u32 4294901760, %v7195_v13  ;;  %v7202_v0 = vand.u32 4294901760, %v7196_v18  ;;  %v7204_v24 = vld [vmem:[#allocation71_spill] sm:$0xff] }
 0x1fb   :  { %v3939_v3 = vpack.c.bf16 %v1367_v47, %v1355_v5  ;;  %v3941_v31 = vpack.c.bf16 %v1385_v21, %v1373_v19  ;;  %v1420_v16 = vsub.f32 %v7197_v50, %v6852_v23  ;;  %v1432_v40 = vsub.f32 %v7198_v44, %v6851_v4  ;;  %v7206_v4 = vld [vmem:[#allocation74_spill] sm:$0xff]  ;;  %v7207_v30 = vld [vmem:[#allocation75_spill] sm:$0xff] }
 0x1fc   :  { %v1402_v58 = vsub.f32 %v7195_v13, %v7201_v7  ;;  %v1414_v46 = vsub.f32 %v7196_v18, %v7202_v0  ;;  %v1426_v62 = vsub.f32 %v7199_v59, %v6856_v11  ;;  %v3943_v5 = vpack.c.bf16 %v1391_v17, %v1379_v37  ;;  %v7208_v7 = vld [vmem:[#allocation76_spill] sm:$0xff]  ;;  %v7213_v0 = vld [vmem:[#allocation79_spill] sm:$0xff] }
 0x1fd   :  { %3936 = vmatpush1.bf16.msra.mxu1 %v3935_v20  ;;  %v1438_v20 = vsub.f32 %v7200_v8, %v6858_v48  ;;  %v3945_v47 = vpack.c.bf16 %v1409_v34, %v1397_v6  ;;  %v1421_v18 = vand.u32 4294901760, %v1420_v16  ;;  %v1433_v11 = vand.u32 4294901760, %v1432_v40  ;;  %v7226_v8 = vld [vmem:[#allocation16_spill] sm:$0xff] }
 0x1fe   :  { %3938 = vmatprep.subr.bf16.mxu1 %v3937_v42  ;;  %v1403_v19 = vand.u32 4294901760, %v1402_v58  ;;  %v1415_v21 = vand.u32 4294901760, %v1414_v46  ;;  %v7205_v42 = vld [vmem:[#allocation72_spill] sm:$0xff]  ;;  %v7209_v59 = vand.u32 4294901760, %v7203_v32  ;;  %v7210_v17 = vand.u32 4294901760, %v7204_v24  ;;  %v7211_v58 = vld [vmem:[#allocation77_spill] sm:$0xff] }
 0x1ff   :  { %v1427_v6 = vand.u32 4294901760, %v1426_v62  ;;  %v1439_v34 = vand.u32 4294901760, %v1438_v20  ;;  %v6863_v46 = vand.u32 4294901760, %v7211_v58  ;;  %v7215_v40 = vand.u32 4294901760, %v7205_v42 }
 0x200   :  { %v1444_v48 = vsub.f32 %v7203_v32, %v7209_v59  ;;  %v1456_v37 = vsub.f32 %v7204_v24, %v7210_v17  ;;  %v3947_v44 = vpack.c.bf16 %v1415_v21, %v1403_v19  ;;  %v7216_v32 = vand.u32 4294901760, %v7206_v4 }
 0x201   :  { %3940 = vmatpush1.bf16.msra.mxu1 %v3939_v3  ;;  %v7212_v3 = vld [vmem:[#allocation78_spill] sm:$0xff]  ;;  %v1450_v59 = vsub.f32 %v7205_v42, %v7215_v40  ;;  %v7217_v62 = vand.u32 4294901760, %v7207_v30  ;;  %v7218_v23 = vand.u32 4294901760, %v7208_v7  ;;  %v3949_v21 = vpack.c.bf16 %v1433_v11, %v1421_v18  ;;  %v7222_v11 = vld [vmem:[#allocation81_spill] sm:$0xff] }
 0x202   :  { %3942 = vmatprep.subr.bf16.mxu1 %v3941_v31  ;;  %v7214_v31 = vld [vmem:[#allocation80_spill] sm:$0xff]  ;;  %v1462_v17 = vsub.f32 %v7206_v4, %v7216_v32  ;;  %v1445_v16 = vand.u32 4294901760, %v1444_v48  ;;  %v3951_v50 = vpack.c.bf16 %v1439_v34, %v1427_v6  ;;  %v1474_v40 = vsub.f32 %v7211_v58, %v6863_v46  ;;  %v7223_v18 = vld [vmem:[#allocation82_spill] sm:$0xff] }
 0x203   :  { %v1468_v20 = vsub.f32 %v7207_v30, %v7217_v62  ;;  %v1480_v19 = vsub.f32 %v7208_v7, %v7218_v23  ;;  %v7219_v42 = vand.u32 4294901760, %v7212_v3  ;;  %v7220_v4 = vand.u32 4294901760, %v7213_v0  ;;  %v7225_v7 = vld [vmem:[#allocation30_spill] sm:$0xff] }
 0x204   :  { %v7221_v30 = vand.u32 4294901760, %v7214_v31  ;;  %v1463_v6 = vand.u32 4294901760, %v1462_v17  ;;  %v6874_v24 = vand.u32 4294901760, %v7225_v7  ;;  %v6875_v13 = vand.u32 4294901760, %v7226_v8 }
 0x205   :  { %3944 = vmatpush1.bf16.msra.mxu1 %v3943_v5  ;;  %v1457_v5 = vand.u32 4294901760, %v1456_v37  ;;  %v1486_v32 = vsub.f32 %v7212_v3, %v7219_v42  ;;  %v1492_v62 = vsub.f32 %v7213_v0, %v7220_v4  ;;  %v1451_v37 = vand.u32 4294901760, %v1450_v59  ;;  %v7224_v42 = vld [vmem:[#allocation84_spill] sm:$0xff] }
 0x206   :  { %3946 = vmatprep.subr.bf16.mxu1 %v3945_v47  ;;  %v1504_v23 = vsub.f32 %v7214_v31, %v7221_v30  ;;  %v6887_v47 = vand.u32 4294901760, %v7223_v18  ;;  %v1469_v34 = vand.u32 4294901760, %v1468_v20  ;;  %v1481_v46 = vand.u32 4294901760, %v1480_v19  ;;  %v7227_v30 = vld [vmem:[#allocation85_spill] sm:$0xff] }
 0x207   :  { %v3953_v58 = vpack.c.bf16 %v1457_v5, %v1445_v16  ;;  %v6886_v3 = vand.u32 4294901760, %v7224_v42  ;;  %v1475_v4 = vand.u32 4294901760, %v1474_v40  ;;  %v1487_v0 = vand.u32 4294901760, %v1486_v32 }
 0x208   :  { %v6876_v31 = vand.u32 4294901760, %v7227_v30  ;;  %v1493_v48 = vand.u32 4294901760, %v1492_v62  ;;  %v1505_v35 = vand.u32 4294901760, %v1504_v23  ;;  %v1510_v16 = vsub.f32 %v7223_v18, %v6887_v47 }
 0x209   :  { %3948 = vmatpush1.bf16.msra.mxu1 %v3947_v44  ;;  %v7228_v44 = vand.u32 4294901760, %v7222_v11  ;;  %v3955_v17 = vpack.c.bf16 %v1463_v6, %v1451_v37  ;;  %v3957_v20 = vpack.c.bf16 %v1481_v46, %v1469_v34  ;;  %v1516_v19 = vsub.f32 %v7224_v42, %v6886_v3 }
 0x20a   :  { %3950 = vmatprep.subr.bf16.mxu1 %v3949_v21  ;;  %v1528_v21 = vsub.f32 %v7225_v7, %v6874_v24  ;;  %v6885_v5 = vand.u32 4294901760, %v5356_v63  ;;  %v6877_v40 = vand.u32 4294901760, %v5358_v43  ;;  %v1522_v32 = vsub.f32 %v7226_v8, %v6875_v13 }
 0x20b   :  { %v1498_v59 = vsub.f32 %v7222_v11, %v7228_v44  ;;  %v3961_v46 = vpack.c.bf16 %v1505_v35, %v1493_v48  ;;  %v1511_v23 = vand.u32 4294901760, %v1510_v16  ;;  %v6878_v37 = vand.u32 4294901760, %v5365_v60 }
 0x20c   :  { %v6879_v6 = vand.u32 4294901760, %v5367_v55  ;;  %v6880_v34 = vand.u32 4294901760, %v5468_v41  ;;  %v6883_v44 = vand.u32 4294901760, %v5470_v49  ;;  %v1517_v24 = vand.u32 4294901760, %v1516_v19 }
 0x20d   :  { %3952 = vmatpush1.bf16.msra.mxu1 %v3951_v50  ;;  %v1534_v50 = vsub.f32 %v7227_v30, %v6876_v31  ;;  %v1499_v62 = vand.u32 4294901760, %v1498_v59  ;;  %v1529_v13 = vand.u32 4294901760, %v1528_v21  ;;  %v1540_v31 = vsub.f32 %v5356_v63, %v6885_v5 }
 0x20e   :  { %3954 = vmatprep.subr.bf16.mxu1 %v3953_v58  ;;  %v3959_v58 = vpack.c.bf16 %v1487_v0, %v1475_v4  ;;  %v1552_v35 = vsub.f32 %v5358_v43, %v6877_v40  ;;  %v1523_v0 = vand.u32 4294901760, %v1522_v32  ;;  %v6881_v4 = vand.u32 4294901760, %v5474_v36 }
 0x20f   :  { %v1535_v48 = vand.u32 4294901760, %v1534_v50  ;;  %v6882_v59 = vand.u32 4294901760, %v5476_v39  ;;  %v3963_v16 = vpack.c.bf16 %v1511_v23, %v1499_v62  ;;  %v1546_v19 = vsub.f32 %v5365_v60, %v6878_v37 }
 0x210   :  { %v1558_v21 = vsub.f32 %v5367_v55, %v6879_v6  ;;  %v1564_v32 = vsub.f32 %v5468_v41, %v6880_v34  ;;  %v1576_v50 = vsub.f32 %v5470_v49, %v6883_v44  ;;  %v3965_v62 = vpack.c.bf16 %v1529_v13, %v1517_v24 }
 0x211   :  { %3956 = vmatpush1.bf16.msra.mxu1 %v3955_v17  ;;  %v6884_v17 = vand.u32 4294901760, %v5484_v10  ;;  %v1541_v23 = vand.u32 4294901760, %v1540_v31  ;;  %v3967_v40 = vpack.c.bf16 %v1535_v48, %v1523_v0  ;;  %v1570_v37 = vsub.f32 %v5474_v36, %v6881_v4 }
 0x212   :  { %3958 = vmatprep.subr.bf16.mxu1 %v3957_v20  ;;  %v6888_v20 = vand.u32 4294901760, %v5486_v51  ;;  %v1582_v6 = vsub.f32 %v5476_v39, %v6882_v59  ;;  %v6898_v13 = vand.u32 4294901760, %v5493_v29  ;;  %v6897_v24 = vand.u32 4294901760, %v5495_v38 }
 0x213   :  { %v1588_v34 = vsub.f32 %v5484_v10, %v6884_v17  ;;  %v1547_v31 = vand.u32 4294901760, %v1546_v19  ;;  %v1565_v0 = vand.u32 4294901760, %v1564_v32  ;;  %v1577_v48 = vand.u32 4294901760, %v1576_v50 }
 0x214   :  { %v6896_v59 = vand.u32 4294901760, %v5497_v12  ;;  %v6889_v44 = vand.u32 4294901760, %v5499_v9  ;;  %v1571_v17 = vand.u32 4294901760, %v1570_v37  ;;  %v1583_v5 = vand.u32 4294901760, %v1582_v6 }
 0x215   :  { %3960 = vmatpush1.bf16.msra.mxu1 %v3959_v58  ;;  %v1553_v58 = vand.u32 4294901760, %v1552_v35  ;;  %v1559_v35 = vand.u32 4294901760, %v1558_v21  ;;  %v1589_v3 = vand.u32 4294901760, %v1588_v34  ;;  %v3973_v21 = vpack.c.bf16 %v1577_v48, %v1565_v0 }
 0x216   :  { %3962 = vmatprep.subr.bf16.mxu1 %v3961_v46  ;;  %v1600_v46 = vsub.f32 %v5486_v51, %v6888_v20  ;;  %v1594_v20 = vsub.f32 %v5493_v29, %v6898_v13  ;;  %v6895_v32 = vand.u32 4294901760, %v5502_v26  ;;  %v6891_v50 = vand.u32 4294901760, %v5504_v14  ;;  %v7249_v13 = vld [vmem:[#allocation68_spill] sm:$0xff] }
 0x217   :  { %v3969_v4 = vpack.c.bf16 %v1553_v58, %v1541_v23  ;;  %v3971_v19 = vpack.c.bf16 %v1559_v35, %v1547_v31  ;;  %v1612_v37 = vsub.f32 %v5497_v12, %v6896_v59  ;;  %v1624_v6 = vsub.f32 %v5499_v9, %v6889_v44  ;;  %v7247_v59 = vld [vmem:[#allocation65_spill] sm:$0xff] }
 0x218   :  { %v1601_v47 = vand.u32 4294901760, %v1600_v46  ;;  %v6890_v34 = vand.u32 4294901760, %v5506_v54  ;;  %v1595_v58 = vand.u32 4294901760, %v1594_v20  ;;  %v1630_v31 = vsub.f32 %v5504_v14, %v6891_v50 }
 0x219   :  { %3964 = vmatpush1.bf16.msra.mxu1 %v3963_v16  ;;  %v1606_v16 = vsub.f32 %v5495_v38, %v6897_v24  ;;  %v6894_v35 = vand.u32 4294901760, %v5511_v53  ;;  %v6893_v0 = vand.u32 4294901760, %v5513_v57  ;;  %v1613_v48 = vand.u32 4294901760, %v1612_v37 }
 0x21a   :  { %3966 = vmatprep.subr.bf16.mxu1 %v3965_v62  ;;  %v6892_v62 = vand.u32 4294901760, %v5508_v25  ;;  %v3977_v23 = vpack.c.bf16 %v1601_v47, %v1589_v3  ;;  %v1625_v44 = vand.u32 4294901760, %v1624_v6  ;;  %v1636_v3 = vsub.f32 %v5506_v54, %v6890_v34 }
 0x21b   :  { %v1607_v46 = vand.u32 4294901760, %v1606_v16  ;;  %v1631_v20 = vand.u32 4294901760, %v1630_v31  ;;  %v1642_v16 = vsub.f32 %v5511_v53, %v6894_v35  ;;  %v7231_v31 = vld [vmem:[#allocation94_spill] sm:$0xff] }
 0x21c   :  { %v1648_v47 = vsub.f32 %v5508_v25, %v6892_v62  ;;  %v1637_v37 = vand.u32 4294901760, %v1636_v3  ;;  %v7233_v3 = vld [vmem:[#allocation49_spill] sm:$0xff]  ;;  %v7245_v35 = vld [vmem:[#allocation62_spill] sm:$0xff] }
 0x21d   :  { %3968 = vmatpush1.bf16.msra.mxu1 %v3967_v40  ;;  %v3975_v40 = vpack.c.bf16 %v1583_v5, %v1571_v17  ;;  %v3979_v5 = vpack.c.bf16 %v1607_v46, %v1595_v58  ;;  %v1643_v50 = vand.u32 4294901760, %v1642_v16  ;;  %v3989_v46 = vpack.c.bf16 %v7151_v61, %v5113_v22 }
 0x21e   :  { %3970 = vmatprep.subr.bf16.mxu1 %v3969_v4  ;;  %v1618_v4 = vsub.f32 %v5502_v26, %v6895_v32  ;;  %v1649_v6 = vand.u32 4294901760, %v1648_v47  ;;  %v7234_v47 = vld [vmem:[#allocation50_spill] sm:$0xff] }
 0x220   :  { %v1619_v17 = vand.u32 4294901760, %v1618_v4  ;;  %v3991_v4 = vpack.c.bf16 %v7161_v2, %v7160_v1 }
 0x221   :  { %3972 = vmatpush1.bf16.msra.mxu1 %v3971_v19  ;;  %v1654_v19 = vsub.f32 %v5513_v57, %v6893_v0 }
 0x222   :  { %3974 = vmatprep.subr.bf16.mxu1 %v3973_v21  ;;  %v3981_v21 = vpack.c.bf16 %v1625_v44, %v1613_v48  ;;  %v3983_v34 = vpack.c.bf16 %v1631_v20, %v1619_v17  ;;  %v3993_v44 = vpack.c.bf16 %v7163_v27, %v7162_v15  ;;  %v7232_v48 = vld [vmem:[#allocation43_spill] sm:$0xff]  ;;  %v7236_v20 = vld [vmem:[#allocation53_spill] sm:$0xff] }
 0x223   :  { %v1655_v62 = vand.u32 4294901760, %v1654_v19  ;;  %v7235_v17 = vld [vmem:[#allocation51_spill] sm:$0xff]  ;;  %v7237_v19 = vld [vmem:[#allocation29_spill] sm:$0xff] }
 0x224   :  { %v4001_v16 = vpack.c.bf16 %v7236_v20, %v7235_v17 }
 0x225   :  { %3976 = vmatpush1.bf16.msra.mxu1 %v3975_v40  ;;  %v3985_v40 = vpack.c.bf16 %v1649_v6, %v1637_v37  ;;  %v3987_v58 = vpack.c.bf16 %v1655_v62, %v1643_v50  ;;  %v3995_v50 = vpack.c.bf16 %v5136_v33, %v5134_v28  ;;  %v7230_v62 = vld [vmem:[#allocation47_spill] sm:$0xff]  ;;  %v7239_v6 = vld [vmem:[#allocation32_spill] sm:$0xff] }
 0x226   :  { %3978 = vmatprep.subr.bf16.mxu1 %v3977_v23  ;;  %v7238_v37 = vld [vmem:[#allocation55_spill] sm:$0xff] }
 0x229   :  { %3980 = vmatpush1.bf16.msra.mxu1 %v3979_v5  ;;  %v3999_v5 = vpack.c.bf16 %v7234_v47, %v7233_v3 }
 0x22a   :  { %3982 = vmatprep.subr.bf16.mxu1 %v3981_v21  ;;  %v4003_v21 = vpack.c.bf16 %v7237_v19, %v7181_v52 }
 0x22d   :  { %3984 = vmatpush1.bf16.msra.mxu1 %v3983_v34  ;;  %v7229_v34 = vld [vmem:[#allocation45_spill] sm:$0xff] }
 0x22e   :  { %3986 = vmatprep.subr.bf16.mxu1 %v3985_v40  ;;  %v3997_v23 = vpack.c.bf16 %v7230_v62, %v7229_v34  ;;  %v4005_v40 = vpack.c.bf16 %v7239_v6, %v7238_v37 }
 0x231   :  { %3988 = vmatpush1.bf16.msra.mxu1 %v3987_v58  ;;  %v7240_v58 = vld [vmem:[#allocation33_spill] sm:$0xff] }
 0x232   :  { %3990 = vmatprep.subr.bf16.mxu1 %v3989_v46  ;;  %v7241_v46 = vld [vmem:[#allocation56_spill] sm:$0xff] }
 0x234   :  { %1660 = vmatmul.mubr.f32.vlgmr.msra.gmra.mrb[0].mxu1 %v5555_v56 }
 0x235   :  { %1666 = vmatprep.mubr.f32.mxu1 %v5577_v45  ;;  %3992 = vmatpush1.bf16.msra.mxu1 %v3991_v4  ;;  %v4007_v4 = vpack.c.bf16 %v7241_v46, %v7240_v58  ;;  %v7251_v45 = vld [vmem:[#allocation71_spill] sm:$0xff]  ;;  %v7253_v46 = vld [vmem:[#allocation74_spill] sm:$0xff] }
 0x236   :  { %3994 = vmatprep.subr.bf16.mxu1 %v3993_v44  ;;  %v7242_v44 = vld [vmem:[#allocation59_spill] sm:$0xff] }
 0x238   :  { %1668 = vmatmul.mubr.f32.gmra.mrb[2].mxu1 %v7231_v31 }
 0x239   :  { %3996 = vmatpush1.bf16.msra.mxu1 %v3995_v50  ;;  %1868 = vmatprep.mubr.f32.mxu1 %v7232_v48  ;;  %v7243_v50 = vld [vmem:[#allocation60_spill] sm:$0xff] }
 0x23a   :  { %3998 = vmatprep.subr.bf16.mxu1 %v3997_v23  ;;  %v4009_v0 = vpack.c.bf16 %v7243_v50, %v7242_v44  ;;  %v7244_v23 = vld [vmem:[#allocation61_spill] sm:$0xff]  ;;  %v7255_v44 = vld [vmem:[#allocation76_spill] sm:$0xff] }
 0x23b   :  { %v4011_v32 = vpack.c.bf16 %v7245_v35, %v7244_v23  ;;  %v7257_v23 = vld [vmem:[#allocation78_spill] sm:$0xff] }
 0x23d   :  { %4000 = vmatpush1.bf16.msra.mxu1 %v3999_v5  ;;  %v7246_v5 = vld [vmem:[#allocation63_spill] sm:$0xff] }
 0x23e   :  { %4002 = vmatprep.subr.bf16.mxu1 %v4001_v16  ;;  %v4013_v24 = vpack.c.bf16 %v7247_v59, %v7246_v5  ;;  %v7248_v16 = vld [vmem:[#allocation66_spill] sm:$0xff]  ;;  %v7259_v5 = vld [vmem:[#allocation80_spill] sm:$0xff] }
 0x23f   :  { %v4015_v31 = vpack.c.bf16 %v7249_v13, %v7248_v16 }
 0x241   :  { %4004 = vmatpush1.bf16.msra.mxu1 %v4003_v21  ;;  %v7250_v21 = vld [vmem:[#allocation70_spill] sm:$0xff] }
 0x242   :  { %4006 = vmatprep.subr.bf16.mxu1 %v4005_v40  ;;  %v4017_v56 = vpack.c.bf16 %v7251_v45, %v7250_v21  ;;  %v7252_v40 = vld [vmem:[#allocation72_spill] sm:$0xff] }
 0x243   :  { %v4019_v50 = vpack.c.bf16 %v7253_v46, %v7252_v40 }
 0x245   :  { %4008 = vmatpush1.bf16.msra.mxu1 %v4007_v4  ;;  %v7254_v4 = vld [vmem:[#allocation75_spill] sm:$0xff] }
 0x246   :  { %4010 = vmatprep.subr.bf16.mxu1 %v4009_v0  ;;  %v4021_v35 = vpack.c.bf16 %v7255_v44, %v7254_v4  ;;  %v7256_v0 = vld [vmem:[#allocation77_spill] sm:$0xff] }
 0x247   :  { %v4023_v59 = vpack.c.bf16 %v7257_v23, %v7256_v0 }
 0x249   :  { %4012 = vmatpush1.bf16.msra.mxu1 %v4011_v32  ;;  %v7258_v32 = vld [vmem:[#allocation79_spill] sm:$0xff] }
 0x24a   :  { %4014 = vmatprep.subr.bf16.mxu1 %v4013_v24  ;;  %v4025_v13 = vpack.c.bf16 %v7259_v5, %v7258_v32  ;;  %v4027_v24 = vpack.c.bf16 %v7223_v18, %v7222_v11 }
 0x24d   :  { %4016 = vmatpush1.bf16.msra.mxu1 %v4015_v31  ;;  %v4029_v31 = vpack.c.bf16 %v7225_v7, %v7224_v42 }
 0x24e   :  { %4018 = vmatprep.subr.bf16.mxu1 %v4017_v56  ;;  %v4031_v56 = vpack.c.bf16 %v7227_v30, %v7226_v8 }
 0x251   :  { %4020 = vmatpush1.bf16.msra.mxu1 %v4019_v50  ;;  %v4033_v50 = vpack.c.bf16 %v5358_v43, %v5356_v63 }
 0x252   :  { %4022 = vmatprep.subr.bf16.mxu1 %v4021_v35  ;;  %v4035_v35 = vpack.c.bf16 %v5367_v55, %v5365_v60 }
 0x255   :  { %4024 = vmatpush1.bf16.msra.mxu1 %v4023_v59  ;;  %v4037_v59 = vpack.c.bf16 %v5470_v49, %v5468_v41 }
 0x256   :  { %4026 = vmatprep.subr.bf16.mxu1 %v4025_v13  ;;  %v4039_v13 = vpack.c.bf16 %v5476_v39, %v5474_v36 }
 0x259   :  { %4028 = vmatpush1.bf16.msra.mxu1 %v4027_v24  ;;  %v4041_v24 = vpack.c.bf16 %v5486_v51, %v5484_v10 }
 0x25a   :  { %4030 = vmatprep.subr.bf16.mxu1 %v4029_v31  ;;  %v4043_v31 = vpack.c.bf16 %v5495_v38, %v5493_v29  ;;  %v7262_v38 = vld [vmem:[#allocation97_spill] sm:$0xff] }
 0x25d   :  { %4032 = vmatpush1.bf16.msra.mxu1 %v4031_v56  ;;  %v4045_v56 = vpack.c.bf16 %v5499_v9, %v5497_v12  ;;  %v7264_v9 = vld [vmem:[#allocation41_spill] sm:$0xff] }
 0x25e   :  { %4034 = vmatprep.subr.bf16.mxu1 %v4033_v50  ;;  %v4047_v50 = vpack.c.bf16 %v5504_v14, %v5502_v26  ;;  %v7266_v14 = vld [vmem:[#allocation44_spill] sm:$0xff] }
 0x261   :  { %4036 = vmatpush1.bf16.msra.mxu1 %v4035_v35  ;;  %v4049_v35 = vpack.c.bf16 %v5508_v25, %v5506_v54  ;;  %v7275_v25 = vld [vmem:[#allocation69_spill] sm:$0xff] }
 0x262   :  { %4038 = vmatprep.subr.bf16.mxu1 %v4037_v59  ;;  %v4051_v59 = vpack.c.bf16 %v5513_v57, %v5511_v53  ;;  %v7268_v57 = vld [vmem:[#allocation46_spill] sm:$0xff] }
 0x263   :  { %v7272_v53 = vld [vmem:[#allocation58_spill] sm:$0xff] }
 0x265   :  { %4040 = vmatpush1.bf16.msra.mxu1 %v4039_v13  ;;  %v7260_v13 = vld [vmem:[#allocation36_spill] sm:$0xff] }
 0x266   :  { %4042 = vmatprep.subr.bf16.mxu1 %v4041_v24  ;;  %v7261_v24 = vld [vmem:[#allocation42_spill] sm:$0xff] }
 0x269   :  { %4044 = vmatpush1.bf16.msra.mxu1 %v4043_v31  ;;  %v7263_v31 = vld [vmem:[#allocation39_spill] sm:$0xff] }
 0x26a   :  { %4046 = vmatprep.subr.bf16.mxu1 %v4045_v56  ;;  %v7265_v56 = vld [vmem:[#allocation96_spill] sm:$0xff] }
 0x26d   :  { %4048 = vmatpush1.bf16.msra.mxu1 %v4047_v50  ;;  %v7267_v50 = vand.u32 4294901760, %v7232_v48  ;;  %v7277_v48 = vld [vmem:[#allocation15_spill] sm:$0xff] }
 0x26e   :  { %4050 = vmatprep.subr.bf16.mxu1 %v4049_v35  ;;  %v7269_v35 = vld [vmem:[#allocation48_spill] sm:$0xff] }
 0x271   :  { %4052 = vmatpush1.bf16.msra.mxu1 %v4051_v59  ;;  %v7270_v59 = vld [vmem:[#allocation52_spill] sm:$0xff] }
 0x272   :  { %4054 = vmatprep.subr.bf16.mxu1 %v7260_v13  ;;  %v7271_v13 = vld [vmem:[#allocation57_spill] sm:$0xff] }
 0x274   :  { %1871 = vmatmul.mubr.f32.vlgmr.msra.gmra.mrb[0].mxu1 %v7261_v24 }
 0x275   :  { %1878 = vmatprep.mubr.f32.mxu1 %v7262_v38  ;;  %4056 = vmatpush1.bf16.msra.mxu1 %v7263_v31  ;;  %v7273_v31 = vld [vmem:[#allocation64_spill] sm:$0xff] }
 0x276   :  { %4058 = vmatprep.subr.bf16.mxu1 %v7264_v9  ;;  %v7274_v9 = vld [vmem:[#allocation67_spill] sm:$0xff] }
 0x278   :  { %1881 = vmatmul.mubr.f32.gmra.mrb[2].mxu1 %v7265_v56 }
 0x279   :  { %4060 = vmatpush1.bf16.msra.mxu1 %v7266_v14  ;;  %2018 = vmatprep.mubr.f32.mxu1 %v7267_v50  ;;  %v7276_v14 = vld [vmem:[#allocation73_spill] sm:$0xff]  ;;  %v7278_v50 = vld [vmem:[#allocation83_spill] sm:$0xff] }
 0x27a   :  { %4062 = vmatprep.subr.bf16.mxu1 %v7268_v57  ;;  %v7279_v57 = vld [vmem:[#allocation17_spill] sm:$0xff] }
 0x27d   :  { %4064 = vmatpush1.bf16.msra.mxu1 %v7269_v35  ;;  %v7280_v35 = vld [vmem:[#allocation86_spill] sm:$0xff] }
 0x27e   :  { %4066 = vmatprep.subr.bf16.mxu1 %v7270_v59  ;;  %v7281_v59 = vld [vmem:[#allocation18_spill] sm:$0xff] }
 0x281   :  { %4068 = vmatpush1.bf16.msra.mxu1 %v7271_v13  ;;  %v7282_v13 = vld [vmem:[#allocation19_spill] sm:$0xff] }
 0x282   :  { %4070 = vmatprep.subr.bf16.mxu1 %v7272_v53  ;;  %v7283_v53 = vld [vmem:[#allocation20_spill] sm:$0xff] }
 0x285   :  { %4072 = vmatpush1.bf16.msra.mxu1 %v7273_v31  ;;  %v7284_v31 = vld [vmem:[#allocation21_spill] sm:$0xff] }
 0x286   :  { %4074 = vmatprep.subr.bf16.mxu1 %v7274_v9  ;;  %v7285_v9 = vld [vmem:[#allocation22_spill] sm:$0xff] }
 0x289   :  { %4076 = vmatpush1.bf16.msra.mxu1 %v7275_v25  ;;  %v7286_v25 = vld [vmem:[#allocation23_spill] sm:$0xff] }
 0x28a   :  { %4078 = vmatprep.subr.bf16.mxu1 %v7276_v14  ;;  %v7287_v14 = vld [vmem:[#allocation24_spill] sm:$0xff] }
 0x28d   :  { %4080 = vmatpush1.bf16.msra.mxu1 %v7277_v48  ;;  %v7288_v48 = vld [vmem:[#allocation25_spill] sm:$0xff] }
 0x28e   :  { %4082 = vmatprep.subr.bf16.mxu1 %v7278_v50  ;;  %v7289_v50 = vld [vmem:[#allocation26_spill] sm:$0xff] }
 0x291   :  { %4084 = vmatpush1.bf16.msra.mxu1 %v7279_v57  ;;  %v7290_v57 = vld [vmem:[#allocation27_spill] sm:$0xff] }
 0x292   :  { %4086 = vmatprep.subr.bf16.mxu1 %v7280_v35  ;;  %v7291_v35 = vld [vmem:[#allocation28_spill] sm:$0xff] }
 0x295   :  { %4088 = vmatpush1.bf16.msra.mxu1 %v7281_v59  ;;  %v7292_v59 = vld [vmem:[#allocation31_spill] sm:$0xff] }
 0x296   :  { %4090 = vmatprep.subr.bf16.mxu1 %v7282_v13  ;;  %v7293_v13 = vld [vmem:[#allocation34_spill] sm:$0xff] }
 0x299   :  { %4092 = vmatpush1.bf16.msra.mxu1 %v7283_v53  ;;  %v7294_v53 = vld [vmem:[#allocation35_spill] sm:$0xff] }
 0x29a   :  { %4094 = vmatprep.subr.bf16.mxu1 %v7284_v31 }
 0x29d   :  { %4096 = vmatpush1.bf16.msra.mxu1 %v7285_v9  ;;  %v7295_v9 = vand.u32 4294901760, %v5113_v22  ;;  %v7303_v22 = vand.u32 4294901760, %v7262_v38  ;;  %v7310_v38 = vand.u32 4294901760, %v7234_v47  ;;  %v2463_v47 = vld [vmem:[#allocation8 + $0x8] sm:$0xff] }
 0x29e   :  { %4098 = vmatprep.subr.bf16.mxu1 %v7286_v25  ;;  %v7296_v25 = vand.u32 4294901760, %v7151_v61  ;;  %v7305_v61 = vand.u32 4294901760, %v5136_v33 }
 0x2a0   :  { %v4117_v31 = vpack.c.bf16 %v7296_v25, %v7295_v9  ;;  %v7304_v9 = vand.u32 4294901760, %v5134_v28  ;;  %v7312_v28 = vand.u32 4294901760, %v7236_v20  ;;  %v7316_v20 = vand.u32 4294901760, %v7238_v37  ;;  %v2467_v37 = vld [vmem:[#allocation8 + $0x28] sm:$0xff] }
 0x2a1   :  { %4100 = vmatpush1.bf16.msra.mxu1 %v7287_v14  ;;  %v7297_v14 = vld [vmem:[#allocation37_spill] sm:$0xff] }
 0x2a2   :  { %4102 = vmatprep.subr.bf16.mxu1 %v7288_v48  ;;  %v7298_v48 = vand.u32 4294901760, %v7160_v1  ;;  %v4123_v25 = vpack.c.bf16 %v7305_v61, %v7304_v9  ;;  %v7306_v1 = vand.u32 4294901760, %v7229_v34  ;;  %v7313_v34 = vld [vmem:[#allocation40_spill] sm:$0xff]  ;;  %v7317_v9 = vand.u32 4294901760, %v7239_v6 }
 0x2a4   :  { %v4133_v61 = vpack.c.bf16 %v7317_v9, %v7316_v20 }
 0x2a5   :  { %4104 = vmatpush1.bf16.msra.mxu1 %v7289_v50  ;;  %v7299_v50 = vand.u32 4294901760, %v7161_v2  ;;  %v7307_v2 = vand.u32 4294901760, %v7230_v62  ;;  %v7314_v62 = vand.u32 4294901760, %v7181_v52  ;;  %v2465_v52 = vld [vmem:[#allocation8 + $0x18] sm:$0xff] }
 0x2a6   :  { %4106 = vmatprep.subr.bf16.mxu1 %v7290_v57 }
 0x2a7   :  { %v4119_v57 = vpack.c.bf16 %v7299_v50, %v7298_v48 }
 0x2a9   :  { %4108 = vmatpush1.bf16.msra.mxu1 %v7291_v35  ;;  %v7300_v35 = vand.u32 4294901760, %v7162_v15  ;;  %v4125_v15 = vpack.c.bf16 %v7307_v2, %v7306_v1 }
 0x2aa   :  { %4110 = vmatprep.subr.bf16.mxu1 %v7292_v59  ;;  %v7301_v59 = vand.u32 4294901760, %v7163_v27  ;;  %v7308_v27 = vand.u32 4294901760, %v7265_v56  ;;  %v7315_v56 = vand.u32 4294901760, %v7237_v19 }
 0x2ad   :  { %4112 = vmatpush1.bf16.msra.mxu1 %v7293_v13  ;;  %v4121_v13 = vpack.c.bf16 %v7301_v59, %v7300_v35  ;;  %v2462_v35 = vld [vmem:[#allocation8] sm:$0xff]  ;;  %v4131_v59 = vpack.c.bf16 %v7315_v56, %v7314_v62 }
 0x2ae   :  { %4114 = vmatprep.subr.bf16.mxu1 %v7294_v53  ;;  %v7302_v53 = vand.u32 4294901760, %v7261_v24  ;;  %v2502_v50 = vand.u32 4294901760, %v2462_v35  ;;  %v2466_v62 = vld [vmem:[#allocation8 + $0x20] sm:$0xff] }
 0x2b1   :  { %4116 = vmatpush1.bf16.msra.mxu1 %v7297_v14  ;;  %v2484_v14 = vld [vmem:[#allocation8 + $0xb0] sm:$0xff] }
 0x2b2   :  { %4118 = vmatprep.subr.bf16.mxu1 %v4117_v31  ;;  %v2478_v31 = vld [vmem:[#allocation8 + $0x80] sm:$0xff] }
 0x2b4   :  { %2022 = vmatmul.mubr.f32.vlgmr.msra.gmra.mrb[0].mxu1 %v7302_v53  ;;  %v7309_v53 = vand.u32 4294901760, %v7233_v3  ;;  %v2550_v3 = vand.u32 4294901760, %v2478_v31 }
 0x2b5   :  { %2030 = vmatprep.mubr.f32.mxu1 %v7303_v22  ;;  %4120 = vmatpush1.bf16.msra.mxu1 %v4119_v57  ;;  %v7311_v57 = vand.u32 4294901760, %v7235_v17  ;;  %v2480_v22 = vld [vmem:[#allocation8 + $0x90] sm:$0xff]  ;;  %v2481_v17 = vld [vmem:[#allocation8 + $0x98] sm:$0xff] }
 0x2b6   :  { %4122 = vmatprep.subr.bf16.mxu1 %v4121_v13  ;;  %v4127_v24 = vpack.c.bf16 %v7310_v38, %v7309_v53  ;;  %v2479_v13 = vld [vmem:[#allocation8 + $0x88] sm:$0xff]  ;;  %v2556_v1 = vand.u32 4294901760, %v2480_v22  ;;  %v2559_v2 = vand.u32 4294901760, %v2481_v17  ;;  %v2482_v53 = vld [vmem:[#allocation8 + $0xa0] sm:$0xff]  ;;  %v5964_v38 = vsub.f32 %v2478_v31, %v2550_v3 }
 0x2b7   :  { %v4129_v33 = vpack.c.bf16 %v7312_v28, %v7311_v57  ;;  %v2553_v48 = vand.u32 4294901760, %v2479_v13  ;;  %v5968_v28 = vsub.f32 %v2462_v35, %v2502_v50  ;;  %v2511_v35 = vand.u32 4294901760, %v2465_v52 }
 0x2b8   :  { %2034 = vmatmul.mubr.f32.gmra.mrb[2].mxu1 %v7308_v27  ;;  %v2464_v27 = vld [vmem:[#allocation8 + $0x10] sm:$0xff]  ;;  %7319 = vst [vmem:[#allocation81_spill] sm:$0xff] %v5964_v38  ;;  %v5974_v20 = vpack.c.bf16 %v2559_v2, %v2556_v1  ;;  %v5976_v9 = vsub.f32 %v2480_v22, %v2556_v1  ;;  %v5979_v31 = vsub.f32 %v2481_v17, %v2559_v2  ;;  %v2469_v2 = vld [vmem:[#allocation8 + $0x38] sm:$0xff] }
 0x2b9   :  { %4124 = vmatpush1.bf16.msra.mxu1 %v4123_v25  ;;  %2297 = vmatprep.mubr.f32.mxu1 %v7313_v34  ;;  %v2505_v25 = vand.u32 4294901760, %v2463_v47  ;;  %v5962_v19 = vpack.c.bf16 %v2553_v48, %v2550_v3  ;;  %v5966_v57 = vsub.f32 %v2479_v13, %v2553_v48  ;;  %7321 = vst [vmem:[#allocation84_spill] sm:$0xff] %v5968_v28  ;;  %v2508_v13 = vand.u32 4294901760, %v2464_v27  ;;  %v2468_v28 = vld [vmem:[#allocation8 + $0x30] sm:$0xff] }
 0x2ba   :  { %4126 = vmatprep.subr.bf16.mxu1 %v4125_v15  ;;  %v2483_v15 = vld [vmem:[#allocation8 + $0xa8] sm:$0xff]  ;;  %7324 = vst [vmem:[#allocation85_spill] sm:$0xff] %v5974_v20  ;;  %7325 = vst [vmem:[#allocation45_spill] sm:$0xff] %v5976_v9  ;;  %v2562_v3 = vand.u32 4294901760, %v2482_v53  ;;  %v5987_v17 = vsub.f32 %v2465_v52, %v2511_v35 }
 0x2bb   :  { %7318 = vst [vmem:[#allocation54_spill] sm:$0xff] %v5962_v19  ;;  %7320 = vst [vmem:[#allocation82_spill] sm:$0xff] %v5966_v57  ;;  %v5970_v56 = vpack.c.bf16 %v2505_v25, %v2502_v50  ;;  %v5972_v6 = vsub.f32 %v2463_v47, %v2505_v25  ;;  %4246 = vmatprep.subr.bf16.mxu0 %v5962_v19  ;;  %v2565_v48 = vand.u32 4294901760, %v2483_v15  ;;  %v2514_v50 = vand.u32 4294901760, %v2466_v62  ;;  %v2485_v25 = vld [vmem:[#allocation8 + $0xb8] sm:$0xff] }
 0x2bc   :  { %7326 = vst [vmem:[#allocation47_spill] sm:$0xff] %v5979_v31  ;;  %v2517_v47 = vand.u32 4294901760, %v2467_v37  ;;  %v5983_v22 = vpack.c.bf16 %v2511_v35, %v2508_v13  ;;  %v5989_v1 = vsub.f32 %v2482_v53, %v2562_v3  ;;  %v2520_v53 = vand.u32 4294901760, %v2468_v28 }
 0x2bd   :  { %7322 = vst [vmem:[#allocation30_spill] sm:$0xff] %v5970_v56  ;;  %7323 = vst [vmem:[#allocation16_spill] sm:$0xff] %v5972_v6  ;;  %4128 = vmatpush1.bf16.msra.mxu1 %v4127_v24  ;;  %4248 = vmatpush3.bf16.msra.mxu0 %v5970_v56  ;;  %v2568_v6 = vand.u32 4294901760, %v2484_v14  ;;  %v5985_v24 = vsub.f32 %v2464_v27, %v2508_v13  ;;  %v7330_v56 = vld [vmem:[#allocation56_spill] sm:$0xff]  ;;  %v5995_v9 = vpack.c.bf16 %v2565_v48, %v2562_v3  ;;  %v7333_v13 = vld [vmem:[#allocation59_spill] sm:$0xff] }
 0x2be   :  { %4130 = vmatprep.subr.bf16.mxu1 %v4129_v33  ;;  %4250 = vmatprep.subr.bf16.mxu0 %v5974_v20  ;;  %7327 = vst [vmem:[#allocation43_spill] sm:$0xff] %v5983_v22  ;;  %7328 = vst [vmem:[#allocation49_spill] sm:$0xff] %v5989_v1  ;;  %v7329_v33 = vand.u32 4294901760, %v7240_v58  ;;  %v7331_v19 = vand.u32 4294901760, %v7330_v56  ;;  %v5997_v57 = vsub.f32 %v2483_v15, %v2565_v48  ;;  %v2571_v27 = vand.u32 4294901760, %v2485_v25  ;;  %v7335_v58 = vld [vmem:[#allocation60_spill] sm:$0xff] }
 0x2bf   :  { %7332 = vst [vmem:[#allocation50_spill] sm:$0xff] %v5995_v9  ;;  %v5999_v38 = vsub.f32 %v2466_v62, %v2514_v50  ;;  %v6001_v20 = vsub.f32 %v2467_v37, %v2517_v47  ;;  %v6003_v52 = vsub.f32 %v2484_v14, %v2568_v6  ;;  %v7334_v35 = vand.u32 4294901760, %v7333_v13  ;;  %v7341_v48 = vld [vmem:[#allocation62_spill] sm:$0xff]  ;;  %v7345_v13 = vld [vmem:[#allocation65_spill] sm:$0xff] }
 0x2c0   :  { %v4135_v31 = vpack.c.bf16 %v7331_v19, %v7329_v33  ;;  %v7336_v1 = vand.u32 4294901760, %v7335_v58  ;;  %v6010_v19 = vpack.c.bf16 %v2517_v47, %v2514_v50  ;;  %v2523_v15 = vand.u32 4294901760, %v2469_v2  ;;  %v7343_v50 = vld [vmem:[#allocation63_spill] sm:$0xff] }
 0x2c1   :  { %4132 = vmatpush1.bf16.msra.mxu1 %v4131_v59  ;;  %4252 = vmatpush3.bf16.msra.mxu0 %v5983_v22  ;;  %v6013_v59 = vpack.c.bf16 %v2571_v27, %v2568_v6  ;;  %v6015_v62 = vsub.f32 %v2485_v25, %v2571_v27  ;;  %v6017_v14 = vsub.f32 %v2468_v28, %v2520_v53  ;;  %v7344_v47 = vand.u32 4294901760, %v7343_v50 }
 0x2c2   :  { %4134 = vmatprep.subr.bf16.mxu1 %v4133_v61  ;;  %v4137_v56 = vpack.c.bf16 %v7336_v1, %v7334_v35  ;;  %7337 = vst [vmem:[#allocation51_spill] sm:$0xff] %v6010_v19  ;;  %4254 = vmatprep.subr.bf16.mxu0 %v5995_v9  ;;  %v6019_v37 = vsub.f32 %v2469_v2, %v2523_v15  ;;  %v7339_v61 = vld [vmem:[#allocation61_spill] sm:$0xff]  ;;  %v7342_v1 = vand.u32 4294901760, %v7341_v48  ;;  %v7346_v35 = vand.u32 4294901760, %v7345_v13 }
 0x2c3   :  { %7338 = vst [vmem:[#allocation53_spill] sm:$0xff] %v6013_v59  ;;  %v7340_v3 = vand.u32 4294901760, %v7339_v61  ;;  %v6030_v6 = vpack.c.bf16 %v2523_v15, %v2520_v53  ;;  %v7348_v28 = vand.u32 4294901760, %v7248_v16  ;;  %v7351_v27 = vand.u32 4294901760, %v7250_v21 }
 0x2c4   :  { %v4141_v58 = vpack.c.bf16 %v7346_v35, %v7344_v47  ;;  %v7353_v53 = vand.u32 4294901760, %v7252_v40  ;;  %v7354_v15 = vand.u32 4294901760, %v7253_v46  ;;  %v7355_v16 = vand.u32 4294901760, %v7254_v4 }
 0x2c5   :  { %4136 = vmatpush1.bf16.msra.mxu1 %v4135_v31  ;;  %v4139_v33 = vpack.c.bf16 %v7342_v1, %v7340_v3  ;;  %4256 = vmatpush3.bf16.msra.mxu0 %v6010_v19  ;;  %7347 = vst [vmem:[#allocation29_spill] sm:$0xff] %v6030_v6  ;;  %v7349_v31 = vld [vmem:[#allocation68_spill] sm:$0xff]  ;;  %v7356_v48 = vand.u32 4294901760, %v7255_v44  ;;  %v7357_v21 = vand.u32 4294901760, %v7256_v0  ;;  %v7359_v50 = vand.u32 4294901760, %v7258_v32 }
 0x2c6   :  { %4138 = vmatprep.subr.bf16.mxu1 %v4137_v56  ;;  %4258 = vmatprep.subr.bf16.mxu0 %v6013_v59  ;;  %v7350_v25 = vand.u32 4294901760, %v7349_v31  ;;  %v7352_v56 = vand.u32 4294901760, %v7251_v45  ;;  %v4147_v3 = vpack.c.bf16 %v7354_v15, %v7353_v53  ;;  %v7358_v45 = vand.u32 4294901760, %v7257_v23  ;;  %v7381_v53 = vld [vmem:[#allocation88_spill] sm:$0xff] }
 0x2c7   :  { %v4149_v1 = vpack.c.bf16 %v7356_v48, %v7355_v16  ;;  %v7360_v40 = vand.u32 4294901760, %v7259_v5  ;;  %v7361_v46 = vand.u32 4294901760, %v7222_v11  ;;  %v7362_v4 = vand.u32 4294901760, %v7223_v18  ;;  %v7387_v48 = vld [vmem:[#allocation90_spill] sm:$0xff] }
 0x2c8   :  { %v4143_v2 = vpack.c.bf16 %v7350_v25, %v7348_v28  ;;  %v4145_v61 = vpack.c.bf16 %v7352_v56, %v7351_v27  ;;  %v7363_v44 = vand.u32 4294901760, %v7224_v42  ;;  %v7364_v0 = vand.u32 4294901760, %v7225_v7  ;;  %v7378_v56 = vld [vmem:[#allocation87_spill] sm:$0xff] }
 0x2c9   :  { %4140 = vmatpush1.bf16.msra.mxu1 %v4139_v33  ;;  %4260 = vmatpush3.bf16.msra.mxu0 %v6030_v6  ;;  %v4151_v33 = vpack.c.bf16 %v7358_v45, %v7357_v21  ;;  %v4153_v47 = vpack.c.bf16 %v7360_v40, %v7359_v50  ;;  %v4155_v13 = vpack.c.bf16 %v7362_v4, %v7361_v46  ;;  %v7365_v23 = vand.u32 4294901760, %v7226_v8  ;;  %v7389_v21 = vld [vmem:[#allocation91_spill] sm:$0xff]  ;;  %v7393_v40 = vld [vmem:[#allocation36_spill] sm:$0xff]  ;;  %v7398_v4 = vld [vmem:[#allocation94_spill] sm:$0xff] }
 0x2ca   :  { %4142 = vmatprep.subr.bf16.mxu1 %v4141_v58  ;;  %v4157_v35 = vpack.c.bf16 %v7364_v0, %v7363_v44  ;;  %v7366_v32 = vand.u32 4294901760, %v7227_v30  ;;  %v7367_v5 = vand.u32 4294901760, %v5356_v63  ;;  %v7368_v11 = vand.u32 4294901760, %v5358_v43  ;;  %v7396_v46 = vld [vmem:[#allocation39_spill] sm:$0xff]  ;;  %v7400_v44 = vld [vmem:[#allocation46_spill] sm:$0xff]  ;;  %v7401_v0 = vld [vmem:[#allocation48_spill] sm:$0xff] }
 0x2cb   :  { %v7369_v18 = vand.u32 4294901760, %v5365_v60  ;;  %v7370_v42 = vand.u32 4294901760, %v5367_v55  ;;  %v7371_v7 = vand.u32 4294901760, %v5468_v41  ;;  %v7372_v8 = vand.u32 4294901760, %v5470_v49 }
 0x2cc   :  { %v4159_v58 = vpack.c.bf16 %v7366_v32, %v7365_v23  ;;  %v4161_v28 = vpack.c.bf16 %v7368_v11, %v7367_v5  ;;  %v7373_v30 = vand.u32 4294901760, %v5474_v36  ;;  %v7374_v63 = vand.u32 4294901760, %v5476_v39  ;;  %v7403_v23 = vld [vmem:[#allocation57_spill] sm:$0xff]  ;;  %v7404_v32 = vld [vmem:[#allocation58_spill] sm:$0xff]  ;;  %v7406_v5 = vld [vmem:[#allocation67_spill] sm:$0xff] }
 0x2cd   :  { %4144 = vmatpush1.bf16.msra.mxu1 %v4143_v2  ;;  %v4163_v31 = vpack.c.bf16 %v7370_v42, %v7369_v18  ;;  %v4165_v25 = vpack.c.bf16 %v7372_v8, %v7371_v7  ;;  %v7375_v43 = vand.u32 4294901760, %v5484_v10  ;;  %v7376_v60 = vand.u32 4294901760, %v5486_v51  ;;  %v7407_v11 = vld [vmem:[#allocation69_spill] sm:$0xff]  ;;  %v7409_v18 = vld [vmem:[#allocation15_spill] sm:$0xff]  ;;  %v7413_v7 = vld [vmem:[#allocation18_spill] sm:$0xff] }
 0x2ce   :  { %4146 = vmatprep.subr.bf16.mxu1 %v4145_v61  ;;  %v4167_v2 = vpack.c.bf16 %v7374_v63, %v7373_v30  ;;  %v7377_v55 = vand.u32 4294901760, %v5493_v29  ;;  %v7379_v41 = vand.u32 4294901760, %v7378_v56  ;;  %v7380_v49 = vand.u32 4294901760, %v5497_v12  ;;  %v7411_v42 = vld [vmem:[#allocation17_spill] sm:$0xff]  ;;  %v7414_v8 = vld [vmem:[#allocation19_spill] sm:$0xff]  ;;  %v7417_v63 = vld [vmem:[#allocation22_spill] sm:$0xff] }
 0x2cf   :  { %v4169_v27 = vpack.c.bf16 %v7376_v60, %v7375_v43  ;;  %v7382_v36 = vand.u32 4294901760, %v7381_v53  ;;  %v7383_v39 = vand.u32 4294901760, %v5502_v26  ;;  %v7386_v51 = vand.u32 4294901760, %v5506_v54  ;;  %v7394_v26 = vld [vmem:[#allocation38_spill] sm:$0xff]  ;;  %v7397_v54 = vld [vmem:[#allocation41_spill] sm:$0xff]  ;;  %v7419_v43 = vld [vmem:[#allocation24_spill] sm:$0xff] }
 0x2d0   :  { %v4171_v61 = vpack.c.bf16 %v7379_v41, %v7377_v55  ;;  %v7388_v29 = vand.u32 4294901760, %v7387_v48  ;;  %v7390_v45 = vand.u32 4294901760, %v7389_v21  ;;  %v7416_v30 = vld [vmem:[#allocation21_spill] sm:$0xff]  ;;  %v7422_v55 = vld [vmem:[#allocation27_spill] sm:$0xff]  ;;  %v7423_v56 = vld [vmem:[#allocation28_spill] sm:$0xff] }
 0x2d1   :  { %4148 = vmatpush1.bf16.msra.mxu1 %v4147_v3  ;;  %v4173_v15 = vpack.c.bf16 %v7382_v36, %v7380_v49  ;;  %v7384_v3 = vld [vmem:[#allocation89_spill] sm:$0xff]  ;;  %v7424_v41 = vld [vmem:[#allocation31_spill] sm:$0xff] }
 0x2d2   :  { %4150 = vmatprep.subr.bf16.mxu1 %v4149_v1  ;;  %v7385_v10 = vand.u32 4294901760, %v7384_v3  ;;  %v4177_v1 = vpack.c.bf16 %v7388_v29, %v7386_v51  ;;  %v7420_v60 = vld [vmem:[#allocation25_spill] sm:$0xff]  ;;  %v7426_v49 = vld [vmem:[#allocation35_spill] sm:$0xff] }
 0x2d3   :  { %v7427_v53 = vld [vmem:[#allocation37_spill] sm:$0xff]  ;;  %v2488_v21 = vld [vmem:[#allocation8 + $0xd0] sm:$0xff] }
 0x2d4   :  { %v4175_v16 = vpack.c.bf16 %v7385_v10, %v7383_v39  ;;  %v2486_v36 = vld [vmem:[#allocation8 + $0xc0] sm:$0xff] }
 0x2d5   :  { %4152 = vmatpush1.bf16.msra.mxu1 %v4151_v33  ;;  %v7391_v33 = vld [vmem:[#allocation92_spill] sm:$0xff]  ;;  %v2574_v39 = vand.u32 4294901760, %v2486_v36  ;;  %v2470_v10 = vld [vmem:[#allocation8 + $0x40] sm:$0xff] }
 0x2d6   :  { %4154 = vmatprep.subr.bf16.mxu1 %v4153_v47  ;;  %v7392_v12 = vand.u32 4294901760, %v7391_v33  ;;  %v7395_v47 = vld [vmem:[#allocation95_spill] sm:$0xff]  ;;  %v2526_v51 = vand.u32 4294901760, %v2470_v10  ;;  %v2580_v33 = vand.u32 4294901760, %v2488_v21 }
 0x2d8   :  { %v4179_v50 = vpack.c.bf16 %v7392_v12, %v7390_v45  ;;  %v2489_v45 = vld [vmem:[#allocation8 + $0xd8] sm:$0xff] }
 0x2d9   :  { %4156 = vmatpush1.bf16.msra.mxu1 %v4155_v13  ;;  %v7399_v13 = vld [vmem:[#allocation44_spill] sm:$0xff]  ;;  %v2583_v12 = vand.u32 4294901760, %v2489_v45 }
 0x2da   :  { %4158 = vmatprep.subr.bf16.mxu1 %v4157_v35  ;;  %v7402_v35 = vld [vmem:[#allocation52_spill] sm:$0xff] }
 0x2dd   :  { %4160 = vmatpush1.bf16.msra.mxu1 %v4159_v58  ;;  %v7405_v58 = vld [vmem:[#allocation64_spill] sm:$0xff] }
 0x2de   :  { %4162 = vmatprep.subr.bf16.mxu1 %v4161_v28  ;;  %v7408_v28 = vld [vmem:[#allocation73_spill] sm:$0xff] }
 0x2e1   :  { %4164 = vmatpush1.bf16.msra.mxu1 %v4163_v31  ;;  %v7412_v31 = vld [vmem:[#allocation86_spill] sm:$0xff] }
 0x2e2   :  { %4166 = vmatprep.subr.bf16.mxu1 %v4165_v25  ;;  %v7415_v25 = vld [vmem:[#allocation20_spill] sm:$0xff] }
 0x2e5   :  { %4168 = vmatpush1.bf16.msra.mxu1 %v4167_v2  ;;  %v7418_v2 = vld [vmem:[#allocation23_spill] sm:$0xff] }
 0x2e6   :  { %4170 = vmatprep.subr.bf16.mxu1 %v4169_v27  ;;  %v7421_v27 = vld [vmem:[#allocation26_spill] sm:$0xff] }
 0x2e9   :  { %4172 = vmatpush1.bf16.msra.mxu1 %v4171_v61  ;;  %v7425_v61 = vld [vmem:[#allocation34_spill] sm:$0xff] }
 0x2ea   :  { %4174 = vmatprep.subr.bf16.mxu1 %v4173_v15  ;;  %v2487_v15 = vld [vmem:[#allocation8 + $0xc8] sm:$0xff] }
 0x2eb   :  { %v2577_v3 = vand.u32 4294901760, %v2487_v15 }
 0x2ed   :  { %4176 = vmatpush1.bf16.msra.mxu1 %v4175_v16  ;;  %v2471_v16 = vld [vmem:[#allocation8 + $0x48] sm:$0xff]  ;;  %v6149_v29 = vpack.c.bf16 %v2577_v3, %v2574_v39 }
 0x2ee   :  { %4178 = vmatprep.subr.bf16.mxu1 %v4177_v1  ;;  %v2529_v48 = vand.u32 4294901760, %v2471_v16 }
 0x2ef   :  { %7428 = vst [vmem:[#allocation55_spill] sm:$0xff] %v6149_v29  ;;  %4262 = vmatprep.subr.bf16.mxu0 %v6149_v29  ;;  %v6192_v29 = vsub.f32 %v2470_v10, %v2526_v51 }
 0x2f0   :  { %v6151_v1 = vpack.c.bf16 %v2529_v48, %v2526_v51 }
 0x2f1   :  { %4180 = vmatpush1.bf16.msra.mxu1 %v4179_v50  ;;  %v2472_v50 = vld [vmem:[#allocation8 + $0x50] sm:$0xff] }
 0x2f2   :  { %4182 = vmatprep.subr.bf16.mxu1 %v7393_v40  ;;  %7429 = vst [vmem:[#allocation32_spill] sm:$0xff] %v6151_v1  ;;  %v2473_v40 = vld [vmem:[#allocation8 + $0x58] sm:$0xff]  ;;  %4264 = vmatpush3.bf16.msra.mxu0 %v6151_v1  ;;  %v6188_v1 = vsub.f32 %v2486_v36, %v2574_v39 }
 0x2f4   :  { %2299 = vmatmul.mubr.f32.vlgmr.msra.gmra.mrb[0].mxu1 %v7394_v26 }
 0x2f5   :  { %2305 = vmatprep.mubr.f32.mxu1 %v7395_v47  ;;  %4184 = vmatpush1.bf16.msra.mxu1 %v7396_v46  ;;  %v6155_v46 = vpack.c.bf16 %v2583_v12, %v2580_v33 }
 0x2f6   :  { %4186 = vmatprep.subr.bf16.mxu1 %v7397_v54 }
 0x2f7   :  { %7430 = vst [vmem:[#allocation33_spill] sm:$0xff] %v6155_v46  ;;  %4266 = vmatprep.subr.bf16.mxu0 %v6155_v46 }
 0x2f8   :  { %2307 = vmatmul.mubr.f32.gmra.mrb[2].mxu1 %v7398_v4 }
 0x2f9   :  { %4188 = vmatpush1.bf16.msra.mxu1 %v7399_v13  ;;  %2442 = vmatprep.mubr.f32.mxu1 %v7313_v34  ;;  %v7410_v34 = vld [vmem:[#allocation83_spill] sm:$0xff]  ;;  %v2491_v13 = vld [vmem:[#allocation8 + $0xe8] sm:$0xff] }
 0x2fa   :  { %4190 = vmatprep.subr.bf16.mxu1 %v7400_v44 }
 0x2fd   :  { %4192 = vmatpush1.bf16.msra.mxu1 %v7401_v0  ;;  %v2589_v0 = vand.u32 4294901760, %v2491_v13 }
 0x2fe   :  { %4194 = vmatprep.subr.bf16.mxu1 %v7402_v35  ;;  %v2474_v35 = vld [vmem:[#allocation8 + $0x60] sm:$0xff] }
 0x2ff   :  { %v6207_v36 = vsub.f32 %v2491_v13, %v2589_v0 }
 0x301   :  { %4196 = vmatpush1.bf16.msra.mxu1 %v7403_v23  ;;  %v2475_v23 = vld [vmem:[#allocation8 + $0x68] sm:$0xff] }
 0x302   :  { %4198 = vmatprep.subr.bf16.mxu1 %v7404_v32  ;;  %v2538_v32 = vand.u32 4294901760, %v2474_v35 }
 0x305   :  { %4200 = vmatpush1.bf16.msra.mxu1 %v7405_v58  ;;  %v2541_v58 = vand.u32 4294901760, %v2475_v23 }
 0x306   :  { %4202 = vmatprep.subr.bf16.mxu1 %v7406_v5 }
 0x307   :  { %v6211_v39 = vsub.f32 %v2475_v23, %v2541_v58 }
 0x309   :  { %4204 = vmatpush1.bf16.msra.mxu1 %v7407_v11  ;;  %v6163_v11 = vpack.c.bf16 %v2541_v58, %v2538_v32 }
 0x30a   :  { %4206 = vmatprep.subr.bf16.mxu1 %v7408_v28  ;;  %v2492_v28 = vld [vmem:[#allocation8 + $0xf0] sm:$0xff] }
 0x30b   :  { %7433 = vst [vmem:[#allocation71_spill] sm:$0xff] %v6163_v11 }
 0x30d   :  { %4208 = vmatpush1.bf16.msra.mxu1 %v7409_v18  ;;  %v2493_v18 = vld [vmem:[#allocation8 + $0xf8] sm:$0xff] }
 0x30e   :  { %4210 = vmatprep.subr.bf16.mxu1 %v7410_v34  ;;  %v2592_v34 = vand.u32 4294901760, %v2492_v28 }
 0x311   :  { %4212 = vmatpush1.bf16.msra.mxu1 %v7411_v42  ;;  %v2595_v42 = vand.u32 4294901760, %v2493_v18 }
 0x312   :  { %4214 = vmatprep.subr.bf16.mxu1 %v7412_v31  ;;  %v2476_v31 = vld [vmem:[#allocation8 + $0x70] sm:$0xff] }
 0x313   :  { %v6215_v10 = vsub.f32 %v2493_v18, %v2595_v42  ;;  %v6945_v18 = vand.u32 4294901760, %v6001_v20 }
 0x315   :  { %4216 = vmatpush1.bf16.msra.mxu1 %v7413_v7  ;;  %v2477_v7 = vld [vmem:[#allocation8 + $0x78] sm:$0xff] }
 0x316   :  { %4218 = vmatprep.subr.bf16.mxu1 %v7414_v8  ;;  %v7434_v8 = vld [vmem:[#allocation81_spill] sm:$0xff] }
 0x319   :  { %4220 = vmatpush1.bf16.msra.mxu1 %v7415_v25  ;;  %v6932_v25 = vand.u32 4294901760, %v7434_v8 }
 0x31a   :  { %4222 = vmatprep.subr.bf16.mxu1 %v7416_v30  ;;  %v7435_v30 = vld [vmem:[#allocation82_spill] sm:$0xff] }
 0x31d   :  { %4224 = vmatpush1.bf16.msra.mxu1 %v7417_v63  ;;  %v6935_v63 = vand.u32 4294901760, %v7435_v30 }
 0x31e   :  { %4226 = vmatprep.subr.bf16.mxu1 %v7418_v2  ;;  %v2544_v2 = vand.u32 4294901760, %v2476_v31 }
 0x321   :  { %4228 = vmatpush1.bf16.msra.mxu1 %v7419_v43  ;;  %v2547_v43 = vand.u32 4294901760, %v2477_v7 }
 0x322   :  { %4230 = vmatprep.subr.bf16.mxu1 %v7420_v60  ;;  %v7436_v60 = vld [vmem:[#allocation84_spill] sm:$0xff] }
 0x323   :  { %v6219_v51 = vsub.f32 %v2477_v7, %v2547_v43 }
 0x325   :  { %4232 = vmatpush1.bf16.msra.mxu1 %v7421_v27  ;;  %v6938_v27 = vand.u32 4294901760, %v7436_v60  ;;  %7442 = vst [vmem:[#allocation76_spill] sm:$0xff] %v6219_v51 }
 0x326   :  { %4234 = vmatprep.subr.bf16.mxu1 %v7422_v55  ;;  %v7437_v55 = vld [vmem:[#allocation16_spill] sm:$0xff] }
 0x329   :  { %4236 = vmatpush1.bf16.msra.mxu1 %v7423_v56  ;;  %v2632_v56 = vsub.f32 %v7436_v60, %v6938_v27 }
 0x32a   :  { %4238 = vmatprep.subr.bf16.mxu1 %v7424_v41  ;;  %v6171_v41 = vpack.c.bf16 %v2595_v42, %v2592_v34 }
 0x32c   :  { %7438 = vst [vmem:[#allocation72_spill] sm:$0xff] %v6171_v41 }
 0x32d   :  { %4240 = vmatpush1.bf16.msra.mxu1 %v7425_v61  ;;  %v2744_v61 = vsub.f32 %v7434_v8, %v6932_v25  ;;  %v6190_v25 = vsub.f32 %v2487_v15, %v2577_v3  ;;  %v6209_v15 = vsub.f32 %v2474_v35, %v2538_v32  ;;  %v6213_v3 = vsub.f32 %v2492_v28, %v2592_v34 }
 0x32e   :  { %4242 = vmatprep.subr.bf16.mxu1 %v7426_v49  ;;  %v2751_v49 = vsub.f32 %v7435_v30, %v6935_v63  ;;  %v6194_v63 = vsub.f32 %v2471_v16, %v2529_v48  ;;  %v6217_v16 = vsub.f32 %v2476_v31, %v2544_v2 }
 0x330   :  { %7441 = vst [vmem:[#allocation75_spill] sm:$0xff] %v6217_v16 }
 0x331   :  { %4244 = vmatpush1.bf16.msra.mxu1 %v7427_v53  ;;  %v6179_v53 = vpack.c.bf16 %v2547_v43, %v2544_v2 }
 0x333   :  { %7439 = vst [vmem:[#allocation74_spill] sm:$0xff] %v6179_v53 }
 0x334   :  { %2444 = vmatmul.mubr.f32.vlgmr.msra.gmra.mrb[0].mxu1 %v7394_v26  ;;  %v2532_v26 = vand.u32 4294901760, %v2472_v50 }
 0x335   :  { %2450 = vmatprep.mubr.f32.mxu1 %v7395_v47  ;;  %v2535_v47 = vand.u32 4294901760, %v2473_v40 }
 0x337   :  { %v6157_v54 = vpack.c.bf16 %v2535_v47, %v2532_v26  ;;  %v6203_v27 = vsub.f32 %v2473_v40, %v2535_v47  ;;  %v6955_v47 = vand.u32 4294901760, %v5987_v17 }
 0x338   :  { %2452 = vmatmul.mubr.f32.gmra.mrb[2].mxu1 %v7398_v4  ;;  %v2490_v4 = vld [vmem:[#allocation8 + $0xe0] sm:$0xff] }
 0x339   :  { %7431 = vst [vmem:[#allocation66_spill] sm:$0xff] %v6157_v54  ;;  %v2586_v44 = vand.u32 4294901760, %v2490_v4  ;;  %4268 = vmatpush3.bf16.msra.mxu0 %v6157_v54  ;;  %v7440_v54 = vand.u32 4294901760, %v7437_v55  ;;  %v2653_v32 = vsub.f32 %v5987_v17, %v6955_v47 }
 0x33b   :  { %v6161_v5 = vpack.c.bf16 %v2589_v0, %v2586_v44  ;;  %v2639_v46 = vsub.f32 %v7437_v55, %v7440_v54  ;;  %v6205_v6 = vsub.f32 %v2490_v4, %v2586_v44  ;;  %v7445_v54 = vld [vmem:[#allocation49_spill] sm:$0xff]  ;;  %v6947_v0 = vand.u32 4294901760, %v5997_v57 }
 0x33c   :  { %v6949_v4 = vand.u32 4294901760, %v7445_v54  ;;  %v2654_v31 = vand.u32 4294901760, %v2653_v32 }
 0x33d   :  { %7432 = vst [vmem:[#allocation70_spill] sm:$0xff] %v6161_v5  ;;  %4270 = vmatprep.subr.bf16.mxu0 %v6161_v5  ;;  %v2752_v5 = vand.u32 4294901760, %v2751_v49  ;;  %v6199_v49 = vsub.f32 %v2489_v45, %v2583_v12  ;;  %v2640_v45 = vand.u32 4294901760, %v2639_v46  ;;  %v6941_v46 = vand.u32 4294901760, %v5999_v38 }
 0x33e   :  { %4272 = vmatpush3.bf16.msra.mxu0 %v6163_v11  ;;  %v2745_v11 = vand.u32 4294901760, %v2744_v61  ;;  %v6197_v61 = vsub.f32 %v2488_v21, %v2580_v33  ;;  %v2633_v21 = vand.u32 4294901760, %v2632_v56  ;;  %v7443_v33 = vld [vmem:[#allocation45_spill] sm:$0xff]  ;;  %v2772_v58 = vsub.f32 %v7445_v54, %v6949_v4 }
 0x33f   :  { %4274 = vmatprep.subr.bf16.mxu0 %v6171_v41  ;;  %v6201_v41 = vsub.f32 %v2472_v50, %v2532_v26  ;;  %v6961_v12 = vand.u32 4294901760, %v7443_v33  ;;  %v7444_v50 = vld [vmem:[#allocation47_spill] sm:$0xff]  ;;  %v6957_v26 = vand.u32 4294901760, %v5985_v24  ;;  %v2660_v28 = vsub.f32 %v5999_v38, %v6941_v46 }
 0x340   :  { %v4277_v48 = vpack.c.bf16 %v2752_v5, %v2745_v11  ;;  %v6960_v40 = vand.u32 4294901760, %v7444_v50  ;;  %v6226_v13 = vpack.c.bf16 %v2640_v45, %v2633_v21  ;;  %v2779_v11 = vsub.f32 %v5997_v57, %v6947_v0 }
 0x341   :  { %v2758_v44 = vsub.f32 %v7443_v33, %v6961_v12  ;;  %v2646_v23 = vsub.f32 %v5985_v24, %v6957_v26  ;;  %v2773_v7 = vand.u32 4294901760, %v2772_v58  ;;  %v2661_v43 = vand.u32 4294901760, %v2660_v28 }
 0x342   :  { %4276 = vmatpush3.bf16.msra.mxu0 %v6179_v53  ;;  %v2765_v35 = vsub.f32 %v7444_v50, %v6960_v40  ;;  %v2780_v2 = vand.u32 4294901760, %v2779_v11  ;;  %v2667_v56 = vsub.f32 %v6001_v20, %v6945_v18  ;;  %v6944_v46 = vand.u32 4294901760, %v6017_v14 }
 0x343   :  { %4278 = vmatprep.subr.bf16.mxu0 %v4277_v48  ;;  %v2759_v5 = vand.u32 4294901760, %v2758_v44  ;;  %v2647_v42 = vand.u32 4294901760, %v2646_v23  ;;  %v6942_v48 = vand.u32 4294901760, %v6003_v52  ;;  %v6943_v44 = vand.u32 4294901760, %v6015_v62 }
 0x344   :  { %v2766_v34 = vand.u32 4294901760, %v2765_v35  ;;  %v6262_v35 = vpack.c.bf16 %v2780_v2, %v2773_v7  ;;  %v2668_v23 = vand.u32 4294901760, %v2667_v56  ;;  %v6946_v58 = vand.u32 4294901760, %v6019_v37 }
 0x345   :  { %v6258_v45 = vpack.c.bf16 %v2654_v31, %v2647_v42  ;;  %v2786_v32 = vsub.f32 %v6003_v52, %v6942_v48  ;;  %v2674_v11 = vsub.f32 %v6017_v14, %v6944_v46  ;;  %v6948_v28 = vand.u32 4294901760, %v6188_v1 }
 0x346   :  { %v6256_v21 = vpack.c.bf16 %v2766_v34, %v2759_v5  ;;  %v2793_v5 = vsub.f32 %v6015_v62, %v6943_v44  ;;  %v6951_v34 = vand.u32 4294901760, %v6190_v25  ;;  %v6276_v42 = vpack.c.bf16 %v2668_v23, %v2661_v43 }
 0x347   :  { %v2787_v31 = vand.u32 4294901760, %v2786_v32  ;;  %v2681_v7 = vsub.f32 %v6019_v37, %v6946_v58  ;;  %v6950_v2 = vand.u32 4294901760, %v6192_v29  ;;  %v2675_v48 = vand.u32 4294901760, %v2674_v11 }
 0x348   :  { %v2794_v56 = vand.u32 4294901760, %v2793_v5  ;;  %v2800_v44 = vsub.f32 %v6188_v1, %v6948_v28  ;;  %v2807_v46 = vsub.f32 %v6190_v25, %v6951_v34  ;;  %v6952_v23 = vand.u32 4294901760, %v6194_v63 }
 0x349   :  { %v2682_v18 = vand.u32 4294901760, %v2681_v7  ;;  %v2688_v43 = vsub.f32 %v6192_v29, %v6950_v2  ;;  %v6954_v32 = vand.u32 4294901760, %v6197_v61  ;;  %v6953_v0 = vand.u32 4294901760, %v6199_v49 }
 0x34a   :  { %v6293_v58 = vpack.c.bf16 %v2794_v56, %v2787_v31  ;;  %v2801_v5 = vand.u32 4294901760, %v2800_v44  ;;  %v2808_v11 = vand.u32 4294901760, %v2807_v46  ;;  %v2695_v7 = vsub.f32 %v6194_v63, %v6952_v23 }
 0x34b   :  { %v6296_v28 = vpack.c.bf16 %v2682_v18, %v2675_v48  ;;  %v2689_v4 = vand.u32 4294901760, %v2688_v43  ;;  %v2814_v2 = vsub.f32 %v6197_v61, %v6954_v32  ;;  %v2821_v44 = vsub.f32 %v6199_v49, %v6953_v0 }
 0x34c   :  { %v6304_v34 = vpack.c.bf16 %v2808_v11, %v2801_v5  ;;  %v6956_v46 = vand.u32 4294901760, %v6201_v41  ;;  %v6958_v18 = vand.u32 4294901760, %v6203_v27  ;;  %v2696_v48 = vand.u32 4294901760, %v2695_v7 }
 0x34d   :  { %v2815_v31 = vand.u32 4294901760, %v2814_v2  ;;  %v6959_v56 = vand.u32 4294901760, %v6205_v6  ;;  %v6962_v43 = vand.u32 4294901760, %v6207_v36  ;;  %v2822_v23 = vand.u32 4294901760, %v2821_v44 }
 0x34e   :  { %v2702_v5 = vsub.f32 %v6201_v41, %v6956_v46  ;;  %v2709_v11 = vsub.f32 %v6203_v27, %v6958_v18  ;;  %v6965_v0 = vand.u32 4294901760, %v6209_v15  ;;  %v6320_v32 = vpack.c.bf16 %v2696_v48, %v2689_v4 }
 0x34f   :  { %v2828_v2 = vsub.f32 %v6205_v6, %v6959_v56  ;;  %v2835_v7 = vsub.f32 %v6207_v36, %v6962_v43  ;;  %v6963_v44 = vand.u32 4294901760, %v6211_v39  ;;  %v6329_v47 = vpack.c.bf16 %v2822_v23, %v2815_v31 }
 0x350   :  { %v2703_v46 = vand.u32 4294901760, %v2702_v5  ;;  %v2710_v26 = vand.u32 4294901760, %v2709_v11  ;;  %v2716_v18 = vsub.f32 %v6209_v15, %v6965_v0  ;;  %v6964_v40 = vand.u32 4294901760, %v6213_v3 }
 0x351   :  { %v2829_v4 = vand.u32 4294901760, %v2828_v2  ;;  %v2836_v48 = vand.u32 4294901760, %v2835_v7  ;;  %v2723_v56 = vsub.f32 %v6211_v39, %v6963_v44  ;;  %v6968_v23 = vand.u32 4294901760, %v6215_v10 }
 0x352   :  { %v6338_v12 = vpack.c.bf16 %v2710_v26, %v2703_v46  ;;  %v2717_v43 = vand.u32 4294901760, %v2716_v18  ;;  %v6969_v31 = vand.u32 4294901760, %v6217_v16  ;;  %v2842_v2 = vsub.f32 %v6213_v3, %v6964_v40 }
 0x353   :  { %v6342_v5 = vpack.c.bf16 %v2836_v48, %v2829_v4  ;;  %v2724_v11 = vand.u32 4294901760, %v2723_v56  ;;  %v6970_v7 = vand.u32 4294901760, %v6219_v51  ;;  %v2849_v44 = vsub.f32 %v6215_v10, %v6968_v23 }
 0x354   :  { %v2730_v26 = vsub.f32 %v6217_v16, %v6969_v31  ;;  %v2843_v18 = vand.u32 4294901760, %v2842_v2 }
 0x355   :  { %v6354_v46 = vpack.c.bf16 %v2724_v11, %v2717_v43  ;;  %v2737_v56 = vsub.f32 %v6219_v51, %v6970_v7  ;;  %v2850_v4 = vand.u32 4294901760, %v2849_v44 }
 0x356   :  { %v2731_v48 = vand.u32 4294901760, %v2730_v26 }
 0x357   :  { %v2738_v40 = vand.u32 4294901760, %v2737_v56  ;;  %v6359_v0 = vpack.c.bf16 %v2850_v4, %v2843_v18  ;;  %v1100_v56 = vld [vmem:[%s6639_s4] sm:$0x3]  ;;  %v7446_v4 = vld [vmem:[#allocation93_spill] sm:$0xff] }
 0x358   :  { %v7447_v2 = vsub.s32 0, %v7446_v4 }
 0x359   :  { %v6361_v53 = vpack.c.bf16 %v2738_v40, %v2731_v48  ;;  %v7448_v48 = vsub.s32 1, %v7446_v4 }
 0x35a   :  { %v1105_v44 = vrot.slane %v1100_v56, %v7447_v2 }
 0x35b   :  { %v1109_v11 = vrot.slane %v1100_v56, %v7448_v48 }
 0x407   :  { %v2445_v7 = vpop.f32.mrb[0].mxu1 }
 0x408   :  { %v4441_v43 = vadd.f32 %v2445_v7, %v1105_v44  ;;  %v2447_v31 = vpop.f32.mrb[1].mxu1 }
 0x409   :  { %v4442_v40 = vadd.f32 %v2447_v31, %v1109_v11 }
 0x40a   :  { %v2458_v23 = vmax.f32 %v4441_v43, 0.0 }
 0x40b   :  { %v2459_v59 = vmax.f32 %v4442_v40, 0.0  ;;  %v2453_v26 = vpop.f32.mrb[2].mxu1 }
 0x40c   :  { %v6402_v19 = vand.u32 4294901760, %v2458_v23  ;;  %v4443_v18 = vadd.f32 %v2453_v26, %v1105_v44  ;;  %v2455_v9 = vpop.f32.mrb[3].mxu1 }
 0x40d   :  { %v6404_v22 = vand.u32 4294901760, %v2459_v59  ;;  %v4444_v16 = vadd.f32 %v2455_v9, %v1109_v11 }
 0x40e   :  { %v6407_v51 = vsub.f32 %v2458_v23, %v6402_v19  ;;  %v2460_v2 = vmax.f32 %v4443_v18, 0.0 }
 0x40f   :  { %v6410_v56 = vsub.f32 %v2459_v59, %v6404_v22  ;;  %v2461_v7 = vmax.f32 %v4444_v16, 0.0 }
 0x410   :  { %v6983_v31 = vand.u32 4294901760, %v6407_v51  ;;  %v6413_v43 = vand.u32 4294901760, %v2460_v2 }
 0x411   :  { %v6415_v40 = vand.u32 4294901760, %v2461_v7  ;;  %v2599_v44 = vand.u32 4294901760, %v6410_v56 }
 0x412   :  { %v2606_v9 = vsub.f32 %v6407_v51, %v6983_v31  ;;  %v6422_v23 = vsub.f32 %v2460_v2, %v6413_v43 }
 0x413   :  { %v6425_v11 = vsub.f32 %v2461_v7, %v6415_v40  ;;  %v2600_v59 = vsub.f32 %v6410_v56, %v2599_v44 }
 0x414   :  { %v6984_v16 = vand.u32 4294901760, %v6422_v23  ;;  %v2607_v4 = vand.u32 4294901760, %v2606_v9 }
 0x415   :  { %v2601_v26 = vand.u32 4294901760, %v2600_v59  ;;  %v6985_v18 = vand.u32 4294901760, %v6425_v11  ;;  %v7467_v59 = vld [vmem:[#allocation54_spill] sm:$0xff] }
 0x416   :  { %v2621_v48 = vsub.f32 %v6422_v23, %v6984_v16  ;;  %v7488_v16 = vand.u32 4294901760, %v7444_v50 }
 0x417   :  { %2602 = vmatprep.mubr.f32.mxu0 %v2601_v26  ;;  %v2615_v2 = vsub.f32 %v6425_v11, %v6985_v18  ;;  %v7468_v26 = vld [vmem:[#allocation30_spill] sm:$0xff] }
 0x418   :  { %2608 = vmatmul.mubr.f32.vlgmr.msra.gmra.mrb[4].mxu0 %v2607_v4  ;;  %v2622_v31 = vand.u32 4294901760, %v2621_v48  ;;  %v7469_v4 = vld [vmem:[#allocation85_spill] sm:$0xff]  ;;  %v7470_v48 = vld [vmem:[#allocation43_spill] sm:$0xff] }
 0x419   :  { %4280 = vmatpush3.bf16.msra.mxu0 %v6226_v13  ;;  %v2616_v7 = vand.u32 4294901760, %v2615_v2  ;;  %v7449_v13 = vpack.c.bf16 %v7435_v30, %v7434_v8  ;;  %v7471_v2 = vld [vmem:[#allocation50_spill] sm:$0xff] }
 0x41a   :  { %4282 = vmatprep.subr.bf16.mxu0 %v6256_v21  ;;  %v7454_v21 = vpack.c.bf16 %v6001_v20, %v5999_v38 }
 0x41b   :  { %2617 = vmatprep.mubr.f32.mxu0 %v2616_v7  ;;  %v7472_v7 = vld [vmem:[#allocation51_spill] sm:$0xff] }
 0x41c   :  { %2623 = vmatmul.mubr.f32.gmra.mrb[6].mxu0 %v2622_v31  ;;  %v7465_v31 = vld [vmem:[#allocation75_spill] sm:$0xff] }
 0x41d   :  { %4284 = vmatpush3.bf16.msra.mxu0 %v6258_v45  ;;  %2853 = vmatprep.mubr.f32.mxu0 %v6404_v22  ;;  %v7455_v45 = vpack.c.bf16 %v6015_v62, %v6003_v52 }
 0x41e   :  { %4286 = vmatprep.subr.bf16.mxu0 %v6262_v35  ;;  %v7456_v35 = vpack.c.bf16 %v6019_v37, %v6017_v14 }
 0x421   :  { %4288 = vmatpush3.bf16.msra.mxu0 %v6276_v42  ;;  %v7460_v42 = vpack.c.bf16 %v6203_v27, %v6201_v41 }
 0x422   :  { %4290 = vmatprep.subr.bf16.mxu0 %v6293_v58  ;;  %v7457_v58 = vpack.c.bf16 %v6190_v25, %v6188_v1 }
 0x425   :  { %4292 = vmatpush3.bf16.msra.mxu0 %v6296_v28  ;;  %v7458_v28 = vpack.c.bf16 %v6194_v63, %v6192_v29 }
 0x426   :  { %4294 = vmatprep.subr.bf16.mxu0 %v6304_v34  ;;  %v7459_v34 = vpack.c.bf16 %v6199_v49, %v6197_v61 }
 0x429   :  { %4296 = vmatpush3.bf16.msra.mxu0 %v6320_v32  ;;  %v7461_v32 = vpack.c.bf16 %v6207_v36, %v6205_v6 }
 0x42a   :  { %4298 = vmatprep.subr.bf16.mxu0 %v6329_v47  ;;  %v7450_v47 = vpack.c.bf16 %v7437_v55, %v7436_v60 }
 0x42d   :  { %4300 = vmatpush3.bf16.msra.mxu0 %v6338_v12  ;;  %v7451_v12 = vpack.c.bf16 %v7444_v50, %v7443_v33  ;;  %v7495_v50 = vand.u32 4294901760, %v6422_v23 }
 0x42e   :  { %4302 = vmatprep.subr.bf16.mxu0 %v6342_v5  ;;  %v7462_v5 = vpack.c.bf16 %v6211_v39, %v6209_v15 }
 0x431   :  { %4304 = vmatpush3.bf16.msra.mxu0 %v6354_v46  ;;  %v7463_v46 = vpack.c.bf16 %v6215_v10, %v6213_v3 }
 0x432   :  { %4306 = vmatprep.subr.bf16.mxu0 %v6359_v0  ;;  %v7453_v0 = vpack.c.bf16 %v5997_v57, %v7445_v54 }
 0x435   :  { %4308 = vmatpush3.bf16.msra.mxu0 %v6361_v53  ;;  %v7452_v53 = vpack.c.bf16 %v5987_v17, %v5985_v24 }
 0x436   :  { %4310 = vmatprep.subr.bf16.mxu0 %v7449_v13  ;;  %v7473_v13 = vld [vmem:[#allocation53_spill] sm:$0xff] }
 0x438   :  { %2855 = vmatmul.mubr.f32.vlgmr.msra.gmra.mrb[8].mxu0 %v6402_v19 }
 0x439   :  { %2860 = vmatprep.mubr.f32.mxu0 %v6415_v40  ;;  %4312 = vmatpush3.bf16.msra.mxu0 %v7450_v47  ;;  %v7474_v47 = vld [vmem:[#allocation29_spill] sm:$0xff] }
 0x43a   :  { %4314 = vmatprep.subr.bf16.mxu0 %v7451_v12  ;;  %v7475_v12 = vld [vmem:[#allocation55_spill] sm:$0xff] }
 0x43c   :  { %2862 = vmatmul.mubr.f32.gmra.mrb[10].mxu0 %v6413_v43 }
 0x43d   :  { %4316 = vmatpush3.bf16.msra.mxu0 %v7452_v53  ;;  %2997 = vmatprep.mubr.f32.mxu0 %v6410_v56  ;;  %v7464_v56 = vld [vmem:[#allocation76_spill] sm:$0xff] }
 0x43e   :  { %4318 = vmatprep.subr.bf16.mxu0 %v7453_v0  ;;  %v7466_v9 = vpack.c.bf16 %v7464_v56, %v7465_v31  ;;  %v7476_v53 = vld [vmem:[#allocation32_spill] sm:$0xff]  ;;  %v7477_v0 = vld [vmem:[#allocation33_spill] sm:$0xff] }
 0x441   :  { %4320 = vmatpush3.bf16.msra.mxu0 %v7454_v21  ;;  %v7478_v21 = vld [vmem:[#allocation66_spill] sm:$0xff] }
 0x442   :  { %4322 = vmatprep.subr.bf16.mxu0 %v7455_v45  ;;  %v7479_v45 = vld [vmem:[#allocation70_spill] sm:$0xff] }
 0x445   :  { %4324 = vmatpush3.bf16.msra.mxu0 %v7456_v35  ;;  %v7480_v35 = vld [vmem:[#allocation71_spill] sm:$0xff] }
 0x446   :  { %4326 = vmatprep.subr.bf16.mxu0 %v7457_v58  ;;  %v7482_v58 = vand.u32 4294901760, %v7434_v8  ;;  %v7490_v8 = vand.u32 4294901760, %v6425_v11 }
 0x449   :  { %4328 = vmatpush3.bf16.msra.mxu0 %v7458_v28  ;;  %v7483_v28 = vand.u32 4294901760, %v7435_v30  ;;  %v7491_v30 = vand.u32 4294901760, %v5985_v24 }
 0x44a   :  { %4330 = vmatprep.subr.bf16.mxu0 %v7459_v34 }
 0x44b   :  { %v4373_v34 = vpack.c.bf16 %v7483_v28, %v7482_v58 }
 0x44d   :  { %4332 = vmatpush3.bf16.msra.mxu0 %v7460_v42  ;;  %v7484_v42 = vld [vmem:[#allocation74_spill] sm:$0xff] }
 0x44e   :  { %4334 = vmatprep.subr.bf16.mxu0 %v7461_v32  ;;  %v7485_v32 = vand.u32 4294901760, %v7436_v60  ;;  %v7492_v60 = vand.u32 4294901760, %v5987_v17  ;;  %v7498_v17 = vand.u32 4294901760, %v6003_v52  ;;  %v7505_v52 = vand.u32 4294901760, %v6194_v63 }
 0x44f   :  { %v7512_v63 = vand.u32 4294901760, %v6209_v15 }
 0x450   :  { %v4379_v58 = vpack.c.bf16 %v7492_v60, %v7491_v30 }
 0x451   :  { %4336 = vmatpush3.bf16.msra.mxu0 %v7462_v5  ;;  %v7486_v5 = vand.u32 4294901760, %v7437_v55  ;;  %v7493_v55 = vand.u32 4294901760, %v7445_v54 }
 0x452   :  { %4338 = vmatprep.subr.bf16.mxu0 %v7463_v46 }
 0x453   :  { %v4375_v46 = vpack.c.bf16 %v7486_v5, %v7485_v32 }
 0x455   :  { %4340 = vmatpush3.bf16.msra.mxu0 %v7466_v9  ;;  %v7487_v9 = vand.u32 4294901760, %v7443_v33  ;;  %v7494_v33 = vand.u32 4294901760, %v5997_v57  ;;  %v7500_v57 = vand.u32 4294901760, %v6017_v14  ;;  %v7507_v14 = vand.u32 4294901760, %v6199_v49 }
 0x456   :  { %4342 = vmatprep.subr.bf16.mxu0 %v7467_v59  ;;  %v7514_v49 = vand.u32 4294901760, %v6213_v3 }
 0x457   :  { %v4377_v18 = vpack.c.bf16 %v7488_v16, %v7487_v9  ;;  %v4381_v28 = vpack.c.bf16 %v7494_v33, %v7493_v55  ;;  %v7499_v16 = vand.u32 4294901760, %v6015_v62  ;;  %v7506_v62 = vand.u32 4294901760, %v6197_v61 }
 0x458   :  { %3000 = vmatmul.mubr.f32.vlgmr.msra.gmra.mrb[12].mxu0 %v6407_v51  ;;  %v7513_v61 = vand.u32 4294901760, %v6211_v39 }
 0x459   :  { %3006 = vmatprep.mubr.f32.mxu0 %v6425_v11  ;;  %4344 = vmatpush3.bf16.msra.mxu0 %v7468_v26  ;;  %v7497_v11 = vand.u32 4294901760, %v6001_v20  ;;  %v4385_v54 = vpack.c.bf16 %v7499_v16, %v7498_v17  ;;  %v7504_v20 = vand.u32 4294901760, %v6192_v29  ;;  %v4393_v5 = vpack.c.bf16 %v7507_v14, %v7506_v62 }
 0x45a   :  { %4346 = vmatprep.subr.bf16.mxu0 %v7469_v4  ;;  %v7511_v29 = vand.u32 4294901760, %v6207_v36 }
 0x45b   :  { %v4391_v32 = vpack.c.bf16 %v7505_v52, %v7504_v20 }
 0x45c   :  { %3009 = vmatmul.mubr.f32.gmra.mrb[14].mxu0 %v6422_v23  ;;  %v7501_v23 = vand.u32 4294901760, %v6019_v37  ;;  %v7508_v37 = vand.u32 4294901760, %v6201_v41  ;;  %v7515_v41 = vand.u32 4294901760, %v6215_v10 }
 0x45d   :  { %4348 = vmatpush3.bf16.msra.mxu0 %v7470_v48  ;;  %3113 = vmatprep.mubr.f32.mxu0 %v2599_v44  ;;  %v7481_v44 = vld [vmem:[#allocation72_spill] sm:$0xff] }
 0x45e   :  { %4350 = vmatprep.subr.bf16.mxu0 %v7471_v2  ;;  %v4401_v30 = vpack.c.bf16 %v7515_v41, %v7514_v49 }
 0x461   :  { %4352 = vmatpush3.bf16.msra.mxu0 %v7472_v7 }
 0x462   :  { %4354 = vmatprep.subr.bf16.mxu0 %v7473_v13 }
 0x465   :  { %4356 = vmatpush3.bf16.msra.mxu0 %v7474_v47 }
 0x466   :  { %4358 = vmatprep.subr.bf16.mxu0 %v7475_v12 }
 0x469   :  { %4360 = vmatpush3.bf16.msra.mxu0 %v7476_v53 }
 0x46a   :  { %4362 = vmatprep.subr.bf16.mxu0 %v7477_v0 }
 0x46d   :  { %4364 = vmatpush3.bf16.msra.mxu0 %v7478_v21 }
 0x46e   :  { %4366 = vmatprep.subr.bf16.mxu0 %v7479_v45 }
 0x471   :  { %4368 = vmatpush3.bf16.msra.mxu0 %v7480_v35 }
 0x472   :  { %4370 = vmatprep.subr.bf16.mxu0 %v7481_v44  ;;  %v7489_v44 = vand.u32 4294901760, %v6407_v51  ;;  %v7496_v51 = vand.u32 4294901760, %v5999_v38  ;;  %v7503_v38 = vand.u32 4294901760, %v6190_v25  ;;  %v7510_v25 = vand.u32 4294901760, %v6205_v6 }
 0x473   :  { %v7517_v6 = vand.u32 4294901760, %v7464_v56 }
 0x474   :  { %v4383_v24 = vpack.c.bf16 %v7497_v11, %v7496_v51  ;;  %v4397_v9 = vpack.c.bf16 %v7511_v29, %v7510_v25 }
 0x475   :  { %4372 = vmatpush3.bf16.msra.mxu0 %v7484_v42 }
 0x476   :  { %4374 = vmatprep.subr.bf16.mxu0 %v4373_v34 }
 0x478   :  { %3117 = vmatmul.mubr.f32.vlgmr.msra.gmra.mrb[16].mxu0 %v7489_v44  ;;  %v7502_v44 = vand.u32 4294901760, %v6188_v1  ;;  %v7509_v1 = vand.u32 4294901760, %v6203_v27  ;;  %v7516_v27 = vand.u32 4294901760, %v7465_v31  ;;  %v3440_v31 = vld [vmem:[%s6641_s6] ss:$0 sm:$0xff]  ;;  %s4622_s6 = smov [#allocation10]  }
 0x479   :  { %3124 = vmatprep.mubr.f32.mxu0 %v7490_v8  ;;  %4376 = vmatpush3.bf16.msra.mxu0 %v4375_v46  ;;  %v4399_v8 = vpack.c.bf16 %v7513_v61, %v7512_v63  ;;  %s3426_s8 = sshll.u32 %s4622_s6, 4  ;;  %s3427_s8 = int_to_ptr.vmem [resolvable:$true] %s3426_s8 }
 0x47a   :  { %4378 = vmatprep.subr.bf16.mxu0 %v4377_v18  ;;  %v4387_v18 = vpack.c.bf16 %v7501_v23, %v7500_v57  ;;  %v4389_v34 = vpack.c.bf16 %v7503_v38, %v7502_v44  ;;  %v4395_v46 = vpack.c.bf16 %v7509_v1, %v7508_v37  ;;  %v4403_v60 = vpack.c.bf16 %v7517_v6, %v7516_v27  ;;  %s4583_s9 = scalar_lea.vmem %s3427_s8, 256  ;;  %p4588_p5 = scmp.lt.s32.totalorder %s3427_s8, %s3427_s8 }
 0x47b   :  { %p4584_p4 = scmp.ne.s32.totalorder %s3427_s8, %s4583_s9  ;;  %p4589_p6 = scmp.lt.s32.totalorder %s4583_s9, %s4583_s9 }
 0x47c   :  { %3128 = vmatmul.mubr.f32.gmra.mrb[18].mxu0 %v7495_v50 }
 0x47d   :  { %4380 = vmatpush3.bf16.msra.mxu0 %v4379_v58  ;;  %3294 = vmatprep.mubr.f32.mxu0 %v6404_v22  ;;  %p4590_p7 = por %p4589_p6, %p4588_p5 }
 0x47e   :  { %4382 = vmatprep.subr.bf16.mxu0 %v4381_v28 }
 0x47f   :  { %p4591_p8 = pnand %p4590_p7, %p4584_p4 }
 0x481   :  { %4384 = vmatpush3.bf16.msra.mxu0 %v4383_v24 }
 0x482   :  { %4386 = vmatprep.subr.bf16.mxu0 %v4385_v54 }
 0x485   :  { %4388 = vmatpush3.bf16.msra.mxu0 %v4387_v18 }
 0x486   :  { %4390 = vmatprep.subr.bf16.mxu0 %v4389_v34 }
 0x489   :  { %4392 = vmatpush3.bf16.msra.mxu0 %v4391_v32 }
 0x48a   :  { %4394 = vmatprep.subr.bf16.mxu0 %v4393_v5 }
 0x48d   :  { %4396 = vmatpush3.bf16.msra.mxu0 %v4395_v46 }
 0x48e   :  { %4398 = vmatprep.subr.bf16.mxu0 %v4397_v9 }
 0x491   :  { %4400 = vmatpush3.bf16.msra.mxu0 %v4399_v8 }
 0x492   :  { %4402 = vmatprep.subr.bf16.mxu0 %v4401_v30 }
 0x495   :  { %4404 = vmatpush3.bf16.msra.mxu0 %v4403_v60 }
 0x496   :  { %4406 = vmatprep.subr.bf16.mxu0 %v7467_v59 }
 0x498   :  { %3296 = vmatmul.mubr.f32.vlgmr.msra.gmra.mrb[20].mxu0 %v6402_v19 }
 0x499   :  { %3301 = vmatprep.mubr.f32.mxu0 %v6415_v40  ;;  %4408 = vmatpush3.bf16.msra.mxu0 %v7468_v26 }
 0x49a   :  { %4410 = vmatprep.subr.bf16.mxu0 %v7469_v4 }
 0x49c   :  { %3303 = vmatmul.mubr.f32.gmra.mrb[22].mxu0 %v6413_v43 }
 0x49d   :  { %4412 = vmatpush3.bf16.msra.mxu0 %v7470_v48  ;;  %3405 = vmatprep.mubr.f32.mxu0 %v6404_v22  ;;  %v7518_v22 = vld [vmem:[#allocation72_spill] sm:$0xff] }
 0x49e   :  { %4414 = vmatprep.subr.bf16.mxu0 %v7471_v2 }
 0x4a1   :  { %4416 = vmatpush3.bf16.msra.mxu0 %v7472_v7 }
 0x4a2   :  { %4418 = vmatprep.subr.bf16.mxu0 %v7473_v13 }
 0x4a5   :  { %4420 = vmatpush3.bf16.msra.mxu0 %v7474_v47 }
 0x4a6   :  { %4422 = vmatprep.subr.bf16.mxu0 %v7475_v12 }
 0x4a9   :  { %4424 = vmatpush3.bf16.msra.mxu0 %v7476_v53 }
 0x4aa   :  { %4426 = vmatprep.subr.bf16.mxu0 %v7477_v0 }
 0x4ad   :  { %4428 = vmatpush3.bf16.msra.mxu0 %v7478_v21 }
 0x4ae   :  { %4430 = vmatprep.subr.bf16.mxu0 %v7479_v45 }
 0x4b1   :  { %4432 = vmatpush3.bf16.msra.mxu0 %v7480_v35 }
 0x4b2   :  { %4434 = vmatprep.subr.bf16.mxu0 %v7518_v22 }
 0x4b5   :  { %4436 = vmatpush3.bf16.msra.mxu0 %v7484_v42 }
 0x4b8   :  { %3407 = vmatmul.mubr.f32.vlgmr.msra.gmra.mrb[24].mxu0 %v6402_v19 }
 0x4b9   :  { %3412 = vmatprep.mubr.f32.mxu0 %v6415_v40 }
 0x4bc   :  { %3414 = vmatmul.mubr.f32.gmra.mrb[26].mxu0 %v6413_v43 }
 0x4eb   :  { %v3473_v36 = vpop.f32.mrb[4].mxu0 }
 0x4ec   :  { %v3474_v15 = vpop.f32.mrb[5].mxu0 }
 0x4ed   :  { %v3475_v39 = vadd.f32 %v3474_v15, %v3473_v36 }
 0x4ef   :  { %v3476_v3 = vpop.f32.mrb[6].mxu0  ;;  %v2610_v4 = vadd.f32 %v3475_v39, %v3440_v31 }
 0x4f0   :  { %v3477_v10 = vpop.f32.mrb[7].mxu0 }
 0x4f1   :  { %v3478_v56 = vadd.f32 %v3477_v10, %v3476_v3 }
 0x4f3   :  { %v2625_v40 = vadd.f32 %v3478_v56, %v3440_v31 }
 0x50b   :  { %v3511_v59 = vpop.f32.mrb[8].mxu0 }
 0x50c   :  { %v3512_v26 = vpop.f32.mrb[9].mxu0 }
 0x50d   :  { %v3513_v48 = vadd.f32 %v3512_v26, %v3511_v59 }
 0x50f   :  { %v2857_v2 = vadd.f32 %v3513_v48, %v2610_v4  ;;  %v3514_v19 = vpop.f32.mrb[10].mxu0 }
 0x510   :  { %v3515_v7 = vpop.f32.mrb[11].mxu0 }
 0x511   :  { %v3516_v13 = vadd.f32 %v3515_v7, %v3514_v19 }
 0x513   :  { %v2864_v43 = vadd.f32 %v3516_v13, %v2625_v40 }
 0x52b   :  { %v3549_v47 = vpop.f32.mrb[12].mxu0 }
 0x52c   :  { %v3550_v12 = vpop.f32.mrb[13].mxu0 }
 0x52d   :  { %v3551_v53 = vadd.f32 %v3550_v12, %v3549_v47 }
 0x52f   :  { %v3002_v0 = vadd.f32 %v3551_v53, %v2857_v2  ;;  %v3552_v21 = vpop.f32.mrb[14].mxu0 }
 0x530   :  { %v3553_v45 = vpop.f32.mrb[15].mxu0 }
 0x531   :  { %v3554_v35 = vadd.f32 %v3553_v45, %v3552_v21 }
 0x533   :  { %v3011_v42 = vadd.f32 %v3554_v35, %v2864_v43 }
 0x54b   :  { %v3587_v58 = vpop.f32.mrb[16].mxu0 }
 0x54c   :  { %v3588_v55 = vpop.f32.mrb[17].mxu0 }
 0x54d   :  { %v3589_v33 = vadd.f32 %v3588_v55, %v3587_v58 }
 0x54f   :  { %v3119_v28 = vadd.f32 %v3589_v33, %v3002_v0  ;;  %v3590_v50 = vpop.f32.mrb[18].mxu0 }
 0x550   :  { %v3591_v51 = vpop.f32.mrb[19].mxu0 }
 0x551   :  { %v3592_v11 = vadd.f32 %v3591_v51, %v3590_v50 }
 0x553   :  { %v3130_v24 = vadd.f32 %v3592_v11, %v3011_v42 }
 0x56b   :  { %v3625_v17 = vpop.f32.mrb[20].mxu0 }
 0x56c   :  { %v3626_v16 = vpop.f32.mrb[21].mxu0 }
 0x56d   :  { %v3627_v54 = vadd.f32 %v3626_v16, %v3625_v17 }
 0x56f   :  { %v3298_v57 = vadd.f32 %v3627_v54, %v3119_v28  ;;  %v3628_v23 = vpop.f32.mrb[22].mxu0 }
 0x570   :  { %v3629_v18 = vpop.f32.mrb[23].mxu0 }
 0x571   :  { %v3630_v44 = vadd.f32 %v3629_v18, %v3628_v23 }
 0x573   :  { %v3305_v38 = vadd.f32 %v3630_v44, %v3130_v24 }
 0x58b   :  { %v3663_v34 = vpop.f32.mrb[24].mxu0 }
 0x58c   :  { %v3664_v20 = vpop.f32.mrb[25].mxu0 }
 0x58d   :  { %v3665_v52 = vadd.f32 %v3664_v20, %v3663_v34 }
 0x58f   :  { %v3409_v32 = vadd.f32 %v3665_v52, %v3298_v57  ;;  %v3666_v62 = vpop.f32.mrb[26].mxu0 }
 0x590   :  { %v3667_v14 = vpop.f32.mrb[27].mxu0 }
 0x591   :  { %3419 = vst [vmem:[#allocation10] sm:$0xff] %v3409_v32  ;;  %v3668_v5 = vadd.f32 %v3667_v14, %v3666_v62 }
 0x593   :  { %v3416_v37 = vadd.f32 %v3668_v5, %v3305_v38 }
 0x595   :  { %3420 = vst [vmem:[#allocation10 + $0x8] sm:$0xff] %v3416_v37 }
 0x596   :  { %4594 = shalt.err (!%p4591_p8)
}
 0x597   :  { %s4595_s14 = scalar_lea.hbm %s6642_s7, 256 }
 0x598   :  { %p4596_p9 = scmp.ne.s32.totalorder %s6642_s7, %s4595_s14  ;;  %p4599_p10 = scmp.lt.u32.totalorder %s4595_s14, %s6642_s7 }
 0x59a   :  { %p4601_p11 = pnand %p4599_p10, %p4596_p9 }
 0x59c   :  { %4604 = shalt.err (!%p4601_p11)
}
 0x59d   :  { %3432 = dma.vmem_to_hbm [thread:$0]  %s3427_s8, 256, %s6642_s7, [#allocation4], %s4617_s1, %s4617_s1, %s4618_s25  }
 0x59e   :  { %4611 = dma.done.wait [#allocation4], 256  }
 0x59f   :  { %4612 = vsyncadd [#allocation4], 4294967040 }
 0x5a0   :  { %3436 = vsyncpa [#allocation3], 1 }
 0x5a1   :  { %3437 = vsyncpa [#allocation6], 1 }
 0x5a2   :  { %3438 = vsyncpa [#allocation9], 1 }
 0x5a3   :  { %3439 = vsyncpa [#allocation4], 1 }

</bundles_post_ra>
